<compile_context>
chip_gen: v5e
topology: v5e:2x2
jax: 0.10.0
libtpu: 0.0.40
codegen_flags: <defaults>
</compile_context>

<pallas_src>
import functools

import numpy as np
import jax
import jax.numpy as jnp
from jax.experimental import pallas as pl
from jax.experimental.pallas import tpu as pltpu

POOL = 14            # F.avg_pool2d(kernel_size=(14,14), stride=(14,14))
RESIZE_HW = 224      # small stand-in for transforms.Resize((448,448)); 224 = 14*16
BATCH_REPEAT = 8     # repeat(x, 'c h w -> b c h w', b=8)
MEAN = (0.485, 0.456, 0.406)
STD = (0.229, 0.224, 0.225)
_HIGHEST = jax.lax.Precision.HIGHEST


def _bilinear_matrix(n_in, n_out):
    """(n_out, n_in) half-pixel bilinear interpolation matrix (rows sum to 1)."""
    # TODO(synk): torchvision/PIL Resize is antialiased bilinear; this plain bilinear
    #             (align_corners=False convention) is an acknowledged fidelity delta.
    src = (np.arange(n_out, dtype=np.float64) + 0.5) * (n_in / n_out) - 0.5
    src = np.clip(src, 0.0, n_in - 1)
    lo = np.floor(src).astype(np.int64)
    hi = np.minimum(lo + 1, n_in - 1)
    frac = src - lo
    mat = np.zeros((n_out, n_in), dtype=np.float32)
    mat[np.arange(n_out), lo] += (1.0 - frac).astype(np.float32)
    mat[np.arange(n_out), hi] += frac.astype(np.float32)
    return jnp.asarray(mat)


def _pick_row_tile(h_out):
    """Smallest multiple of 8*POOL (=112) dividing h_out -> most grid steps.

    TH % 112 == 0 keeps xn blocks sublane-aligned (TH % 8 == 0) and pooled blocks aligned
    too ((TH // 14) % 8 == 0).  At the real 448 this gives TH=112 and 4 grid steps
    (2 pipelined steps per TensorCore on v7x); the old 'largest tile' policy gave only 2."""
    base = 8 * POOL
    t = base
    while t <= h_out:
        if h_out % t == 0:
            return t
        t += base
    return h_out


def _resize_norm_pool_kernel(x_ref, rh_ref, rw_ref, pw_ref, ph_ref, xn_ref, xavg_ref,
                             *, scale, bias):
    """One grid step = one output row tile, all C channels.

    x_ref    : (C, H_in, W_in)  full input image (small; same block every step)
    rh_ref   : (TH, H_in)       row-interpolation matrix slice for this tile
    rw_ref   : (W_in, W_out)    column-interpolation matrix (pre-transposed)
    pw_ref   : (W_out, Wp)      column-pooling matrix (pre-transposed, entries 1/POOL)
    ph_ref   : (THp, TH)        row-pooling matrix for one tile (entries 1/POOL)
    xn_ref   : (C, TH, W_out)   normalized (resized) output tile
    xavg_ref : (C, THp, Wp)     14x14 avg-pooled output tile
    scale/bias: python float tuples (1/std, -mean/std), folded at trace time
    """
    C = x_ref.shape[0]
    rh = rh_ref[...]
    rw = rw_ref[...]
    pw = pw_ref[...]
    ph = ph_ref[...]
    for c in range(C):                                           # static unroll, C == 3
        # Separable bilinear resize: two MXU matmuls (rows first -> no redundant column work).
        rows = jnp.dot(rh, x_ref[c], preferred_element_type=jnp.float32, precision=_HIGHEST)
        xr = jnp.dot(rows, rw, preferred_element_type=jnp.float32, precision=_HIGHEST)
        # Normalize: single VPU FMA, constants folded at trace time.
        xn = xr * scale[c] + bias[c]
        xn_ref[c] = xn.astype(xn_ref.dtype)
        # 14x14 avg pool = column pool then row pool (MXU).  For f32 output, re-read from
        # xn_ref (bounds the live range of the big normalized slab); when narrowing to bf16,
        # keep the f32 value so pooling still accumulates in f32.
        pool_lhs = xn_ref[c] if xn_ref.dtype == jnp.float32 else xn
        tmp = jnp.dot(pool_lhs, pw, preferred_element_type=jnp.float32, precision=_HIGHEST)
        xavg_ref[c] = jnp.dot(ph, tmp, preferred_element_type=jnp.float32, precision=_HIGHEST)


def resize_normalize_pool(img, out_hw, mean, std, *, row_tile=None, out_dtype=jnp.float32):
    """img: (C, H_in, W_in) f32 in [0,1] (post-ToTensor).  Fused Resize + Normalize + AvgPool14.

    Returns (xn (C, out_hw, out_hw) out_dtype, x_avg (C, out_hw//14, out_hw//14) f32)."""
    C, H_in, W_in = img.shape
    H_out = W_out = int(out_hw)
    assert H_out % POOL == 0 and W_out % POOL == 0, "spatial dims must be multiples of 14"
    Hp, Wp = H_out // POOL, W_out // POOL

    TH = _pick_row_tile(H_out) if row_tile is None else row_tile
    assert H_out % TH == 0 and TH % POOL == 0 and TH % 8 == 0
    THp = TH // POOL
    n_tiles = H_out // TH

    # Fold Normalize constants: (x - mean) / std == x * (1/std) + (-mean/std).
    scale = tuple(float(1.0 / s) for s in std)
    bias = tuple(float(-m / s) for m, s in zip(mean, std))

    # Interpolation / pooling matrices (trace-time constants, built pre-transposed where needed).
    rh = _bilinear_matrix(H_in, H_out)                    # (H_out, H_in), sliced per row tile
    rw_t = _bilinear_matrix(W_in, W_out).T                # (W_in, W_out)
    cols = jnp.arange(W_out) // POOL
    pw_t = (cols[:, None] == jnp.arange(Wp)[None, :]).astype(jnp.float32) / POOL   # (W_out, Wp)
    rows = jnp.arange(TH) // POOL
    ph = (jnp.arange(THp)[:, None] == rows[None, :]).astype(jnp.float32) / POOL    # (THp, TH)

    kernel = functools.partial(_resize_norm_pool_kernel, scale=scale, bias=bias)

    grid_spec = pl.GridSpec(
        grid=(n_tiles,),
        in_specs=[
            pl.BlockSpec((C, H_in, W_in), lambda i: (0, 0, 0)),   # full input image, every step
            pl.BlockSpec((TH, H_in), lambda i: (i, 0)),           # row-interp slice for this tile
            pl.BlockSpec((W_in, W_out), lambda i: (0, 0)),        # column-interp, same every step
            pl.BlockSpec((W_out, Wp), lambda i: (0, 0)),          # pw^T, same every step
            pl.BlockSpec((THp, TH), lambda i: (0, 0)),            # ph, same every step
        ],
        out_specs=[
            # If a v5e profile still shows exposed DMA on this writeback, add
            # pipeline_mode=pl.Buffered(3) here (kept default for portability).
            pl.BlockSpec((C, TH, W_out), lambda i: (0, i, 0)),    # normalized row tile
            pl.BlockSpec((C, THp, Wp), lambda i: (0, i, 0)),      # pooled row tile (tiny; as-is)
        ],
    )

    xn, xavg = pl.pallas_call(
        kernel,
        grid_spec=grid_spec,
        out_shape=(
            jax.ShapeDtypeStruct((C, H_out, W_out), out_dtype),
            jax.ShapeDtypeStruct((C, Hp, Wp), jnp.float32),
        ),
        compiler_params=pltpu.CompilerParams(
            # Independent row tiles: shards across v7x's two TensorCores, pipelines everywhere.
            dimension_semantics=("parallel",),
        ),
    )(img.astype(jnp.float32), rh, rw_t, pw_t, ph)
    return xn, xavg


def model_tta_forward(img, cls_id=None, image_features=None):
    """img: (3, H_in, W_in) f32 in [0,1] (post-ToTensor convention).

    Returns the unbatched (normalized x, x_avg) handed to the backbone."""
    xn, xavg = resize_normalize_pool(img, RESIZE_HW, MEAN, STD)
    # repeat(x, 'c h w -> b c h w', b=8) is a pure broadcast: deliberately NOT materialized
    # here (would cost ~8x HBM writes/reads); the consumer should broadcast lazily.
    # TODO(synk): self.clip_teacher (CLIP ViT-L/14) and self.backbone.forward_wrapper(...)
    #             are external/undefined modules — loss, feat_out, orig_feat_out cannot be
    #             reproduced from the given source; cls_id / image_features are consumed there.
    return xn, xavg


if __name__ == "__main__":
    key = jax.random.PRNGKey(0)
    k_img, k_feat = jax.random.split(key)

    # Small deterministic inputs consistent with the module's forward signature.
    img = jax.random.uniform(k_img, (3, 64, 64), dtype=jnp.float32)            # RGB image in [0,1]
    cls_id = jnp.int32(3)
    image_features = jax.random.normal(k_feat, (1, 768), dtype=jnp.float32)    # CLIP ViT-L/14 dim

    xn, xavg = model_tta_forward(img, cls_id, image_features)
    xn = jax.block_until_ready(xn)
    xavg = jax.block_until_ready(xavg)

    # Reference: same separable bilinear matrices in plain JAX + Normalize + avg_pool2d(14,14).
    rh = _bilinear_matrix(64, RESIZE_HW)                      # (H_out, H_in)
    rw = _bilinear_matrix(64, RESIZE_HW)                      # (W_out, W_in)
    x_resized = jnp.einsum("ah,chw,bw->cab", rh, img, rw, precision=_HIGHEST)
    mean = jnp.asarray(MEAN, jnp.float32)[:, None, None]
    std = jnp.asarray(STD, jnp.float32)[:, None, None]
    xn_expected = (x_resized - mean) / std
    Hp, Wp = RESIZE_HW // POOL, RESIZE_HW // POOL
    xavg_expected = xn_expected.reshape(3, Hp, POOL, Wp, POOL).mean(axis=(2, 4))

    assert xn.shape == (3, RESIZE_HW, RESIZE_HW)
    assert xavg.shape == (3, Hp, Wp)
    assert jnp.allclose(xn, xn_expected, atol=1e-4, rtol=1e-4)
    assert jnp.allclose(xavg, xavg_expected, atol=1e-4, rtol=1e-4)

    # The b=8 repeat is a pure broadcast view; verify its semantics cheaply at demo size.
    x_b = jnp.broadcast_to(xn[None], (BATCH_REPEAT,) + xn.shape)
    x_avg_b = jnp.broadcast_to(xavg[None], (BATCH_REPEAT,) + xavg.shape)
    assert x_b.shape == (BATCH_REPEAT, 3, RESIZE_HW, RESIZE_HW)
    assert x_avg_b.shape == (BATCH_REPEAT, 3, Hp, Wp)
    assert jnp.allclose(x_b[5], xn_expected, atol=1e-4, rtol=1e-4)

    print("KERNEL_OK")
</pallas_src>

<mosaic_0001>
module attributes {stable_mosaic.version = 11 : i64} {
  func.func @_resize_norm_pool_kernel(%arg0: i32, %arg1: memref<3x64x64xf32, #tpu.memory_space<vmem>>, %arg2: memref<112x64xf32, #tpu.memory_space<vmem>>, %arg3: memref<64x224xf32, #tpu.memory_space<vmem>>, %arg4: memref<224x16xf32, #tpu.memory_space<vmem>>, %arg5: memref<8x112xf32, #tpu.memory_space<vmem>>, %arg6: memref<3x112x224xf32, #tpu.memory_space<vmem>>, %arg7: memref<3x8x16xf32, #tpu.memory_space<vmem>>) attributes {dimension_semantics = [#tpu.dimension_semantics<parallel>], iteration_bounds = array<i64: 2>, scalar_prefetch = 0 : i64, scratch_operands = 0 : i64, tpu.core_type = #tpu.core_type<tc>, window_params = [{pipeline_mode = #tpu.pipeline_mode<synchronous>, transform_indices = @transform_0, window_bounds = array<i64: 3, 64, 64>}, {transform_indices = @transform_1, window_bounds = array<i64: 112, 64>}, {pipeline_mode = #tpu.pipeline_mode<synchronous>, transform_indices = @transform_2, window_bounds = array<i64: 64, 224>}, {pipeline_mode = #tpu.pipeline_mode<synchronous>, transform_indices = @transform_3, window_bounds = array<i64: 224, 16>}, {pipeline_mode = #tpu.pipeline_mode<synchronous>, transform_indices = @transform_4, window_bounds = array<i64: 8, 112>}, {transform_indices = @transform_5, window_bounds = array<i64: 3, 112, 224>}, {transform_indices = @transform_6, window_bounds = array<i64: 3, 8, 16>}]} {
    %c0 = arith.constant 0 : index
    %c0_0 = arith.constant 0 : index
    %0 = vector.load %arg2[%c0, %c0_0] : memref<112x64xf32, #tpu.memory_space<vmem>>, vector<112x64xf32>
    %c0_1 = arith.constant 0 : index
    %c0_2 = arith.constant 0 : index
    %1 = vector.load %arg3[%c0_1, %c0_2] : memref<64x224xf32, #tpu.memory_space<vmem>>, vector<64x224xf32>
    %c0_3 = arith.constant 0 : index
    %c0_4 = arith.constant 0 : index
    %2 = vector.load %arg4[%c0_3, %c0_4] : memref<224x16xf32, #tpu.memory_space<vmem>>, vector<224x16xf32>
    %c0_5 = arith.constant 0 : index
    %c0_6 = arith.constant 0 : index
    %3 = vector.load %arg5[%c0_5, %c0_6] : memref<8x112xf32, #tpu.memory_space<vmem>>, vector<8x112xf32>
    %c0_7 = arith.constant 0 : index
    %c0_8 = arith.constant 0 : index
    %c0_9 = arith.constant 0 : index
    %4 = vector.load %arg1[%c0_7, %c0_8, %c0_9] : memref<3x64x64xf32, #tpu.memory_space<vmem>>, vector<1x64x64xf32>
    %5 = vector.shape_cast %4 : vector<1x64x64xf32> to vector<64x64xf32>
    %cst = arith.constant dense<0.000000e+00> : vector<112x64xf32>
    %6 = tpu.matmul %0, %5, %cst {dimension_numbers = #tpu.dot_dimension_numbers<[1], [0], [0], [1], [0, 0, 1, 1], [], []>, precision = #tpu.contract_precision<fp32>} : vector<112x64xf32>, vector<64x64xf32>, vector<112x64xf32> -> vector<112x64xf32>
    %cst_10 = arith.constant dense<0.000000e+00> : vector<112x224xf32>
    %7 = tpu.matmul %6, %1, %cst_10 {dimension_numbers = #tpu.dot_dimension_numbers<[1], [0], [0], [1], [0, 0, 1, 1], [], []>, precision = #tpu.contract_precision<fp32>} : vector<112x64xf32>, vector<64x224xf32>, vector<112x224xf32> -> vector<112x224xf32>
    %cst_11 = arith.constant 4.36681223 : f32
    %8 = vector.broadcast %cst_11 : f32 to vector<112x224xf32>
    %9 = arith.mulf %7, %8 : vector<112x224xf32>
    %cst_12 = arith.constant -2.11790395 : f32
    %10 = vector.broadcast %cst_12 : f32 to vector<112x224xf32>
    %11 = arith.addf %9, %10 : vector<112x224xf32>
    %c0_13 = arith.constant 0 : index
    %c0_14 = arith.constant 0 : index
    %c0_15 = arith.constant 0 : index
    %12 = vector.load %arg6[%c0_13, %c0_14, %c0_15] : memref<3x112x224xf32, #tpu.memory_space<vmem>>, vector<1x112x224xf32>
    %13 = vector.shape_cast %12 : vector<1x112x224xf32> to vector<112x224xf32>
    %14 = vector.shape_cast %11 : vector<112x224xf32> to vector<1x112x224xf32>
    tpu.vector_store %arg6[%c0_13, %c0_14, %c0_15], %14 {strides = array<i32>} : memref<3x112x224xf32, #tpu.memory_space<vmem>>, vector<1x112x224xf32>,
    %c0_16 = arith.constant 0 : index
    %c0_17 = arith.constant 0 : index
    %c0_18 = arith.constant 0 : index
    %15 = vector.load %arg6[%c0_16, %c0_17, %c0_18] : memref<3x112x224xf32, #tpu.memory_space<vmem>>, vector<1x112x224xf32>
    %16 = vector.shape_cast %15 : vector<1x112x224xf32> to vector<112x224xf32>
    %cst_19 = arith.constant dense<0.000000e+00> : vector<112x16xf32>
    %17 = tpu.matmul %16, %2, %cst_19 {dimension_numbers = #tpu.dot_dimension_numbers<[1], [0], [0], [1], [0, 0, 1, 1], [], []>, precision = #tpu.contract_precision<fp32>} : vector<112x224xf32>, vector<224x16xf32>, vector<112x16xf32> -> vector<112x16xf32>
    %cst_20 = arith.constant dense<0.000000e+00> : vector<8x16xf32>
    %18 = tpu.matmul %3, %17, %cst_20 {dimension_numbers = #tpu.dot_dimension_numbers<[1], [0], [0], [1], [0, 0, 1, 1], [], []>, precision = #tpu.contract_precision<fp32>} : vector<8x112xf32>, vector<112x16xf32>, vector<8x16xf32> -> vector<8x16xf32>
    %c0_21 = arith.constant 0 : index
    %c0_22 = arith.constant 0 : index
    %c0_23 = arith.constant 0 : index
    %19 = vector.load %arg7[%c0_21, %c0_22, %c0_23] : memref<3x8x16xf32, #tpu.memory_space<vmem>>, vector<1x8x16xf32>
    %20 = vector.shape_cast %19 : vector<1x8x16xf32> to vector<8x16xf32>
    %21 = vector.shape_cast %18 : vector<8x16xf32> to vector<1x8x16xf32>
    tpu.vector_store %arg7[%c0_21, %c0_22, %c0_23], %21 {strides = array<i32>} : memref<3x8x16xf32, #tpu.memory_space<vmem>>, vector<1x8x16xf32>,
    %c1 = arith.constant 1 : index
    %c0_24 = arith.constant 0 : index
    %c0_25 = arith.constant 0 : index
    %22 = vector.load %arg1[%c1, %c0_24, %c0_25] : memref<3x64x64xf32, #tpu.memory_space<vmem>>, vector<1x64x64xf32>
    %23 = vector.shape_cast %22 : vector<1x64x64xf32> to vector<64x64xf32>
    %cst_26 = arith.constant dense<0.000000e+00> : vector<112x64xf32>
    %24 = tpu.matmul %0, %23, %cst_26 {dimension_numbers = #tpu.dot_dimension_numbers<[1], [0], [0], [1], [0, 0, 1, 1], [], []>, precision = #tpu.contract_precision<fp32>} : vector<112x64xf32>, vector<64x64xf32>, vector<112x64xf32> -> vector<112x64xf32>
    %cst_27 = arith.constant dense<0.000000e+00> : vector<112x224xf32>
    %25 = tpu.matmul %24, %1, %cst_27 {dimension_numbers = #tpu.dot_dimension_numbers<[1], [0], [0], [1], [0, 0, 1, 1], [], []>, precision = #tpu.contract_precision<fp32>} : vector<112x64xf32>, vector<64x224xf32>, vector<112x224xf32> -> vector<112x224xf32>
    %cst_28 = arith.constant 4.46428585 : f32
    %26 = vector.broadcast %cst_28 : f32 to vector<112x224xf32>
    %27 = arith.mulf %25, %26 : vector<112x224xf32>
    %cst_29 = arith.constant -2.03571439 : f32
    %28 = vector.broadcast %cst_29 : f32 to vector<112x224xf32>
    %29 = arith.addf %27, %28 : vector<112x224xf32>
    %c1_30 = arith.constant 1 : index
    %c0_31 = arith.constant 0 : index
    %c0_32 = arith.constant 0 : index
    %30 = vector.load %arg6[%c1_30, %c0_31, %c0_32] : memref<3x112x224xf32, #tpu.memory_space<vmem>>, vector<1x112x224xf32>
    %31 = vector.shape_cast %30 : vector<1x112x224xf32> to vector<112x224xf32>
    %32 = vector.shape_cast %29 : vector<112x224xf32> to vector<1x112x224xf32>
    tpu.vector_store %arg6[%c1_30, %c0_31, %c0_32], %32 {strides = array<i32>} : memref<3x112x224xf32, #tpu.memory_space<vmem>>, vector<1x112x224xf32>,
    %c1_33 = arith.constant 1 : index
    %c0_34 = arith.constant 0 : index
    %c0_35 = arith.constant 0 : index
    %33 = vector.load %arg6[%c1_33, %c0_34, %c0_35] : memref<3x112x224xf32, #tpu.memory_space<vmem>>, vector<1x112x224xf32>
    %34 = vector.shape_cast %33 : vector<1x112x224xf32> to vector<112x224xf32>
    %cst_36 = arith.constant dense<0.000000e+00> : vector<112x16xf32>
    %35 = tpu.matmul %34, %2, %cst_36 {dimension_numbers = #tpu.dot_dimension_numbers<[1], [0], [0], [1], [0, 0, 1, 1], [], []>, precision = #tpu.contract_precision<fp32>} : vector<112x224xf32>, vector<224x16xf32>, vector<112x16xf32> -> vector<112x16xf32>
    %cst_37 = arith.constant dense<0.000000e+00> : vector<8x16xf32>
    %36 = tpu.matmul %3, %35, %cst_37 {dimension_numbers = #tpu.dot_dimension_numbers<[1], [0], [0], [1], [0, 0, 1, 1], [], []>, precision = #tpu.contract_precision<fp32>} : vector<8x112xf32>, vector<112x16xf32>, vector<8x16xf32> -> vector<8x16xf32>
    %c1_38 = arith.constant 1 : index
    %c0_39 = arith.constant 0 : index
    %c0_40 = arith.constant 0 : index
    %37 = vector.load %arg7[%c1_38, %c0_39, %c0_40] : memref<3x8x16xf32, #tpu.memory_space<vmem>>, vector<1x8x16xf32>
    %38 = vector.shape_cast %37 : vector<1x8x16xf32> to vector<8x16xf32>
    %39 = vector.shape_cast %36 : vector<8x16xf32> to vector<1x8x16xf32>
    tpu.vector_store %arg7[%c1_38, %c0_39, %c0_40], %39 {strides = array<i32>} : memref<3x8x16xf32, #tpu.memory_space<vmem>>, vector<1x8x16xf32>,
    %c2 = arith.constant 2 : index
    %c0_41 = arith.constant 0 : index
    %c0_42 = arith.constant 0 : index
    %40 = vector.load %arg1[%c2, %c0_41, %c0_42] : memref<3x64x64xf32, #tpu.memory_space<vmem>>, vector<1x64x64xf32>
    %41 = vector.shape_cast %40 : vector<1x64x64xf32> to vector<64x64xf32>
    %cst_43 = arith.constant dense<0.000000e+00> : vector<112x64xf32>
    %42 = tpu.matmul %0, %41, %cst_43 {dimension_numbers = #tpu.dot_dimension_numbers<[1], [0], [0], [1], [0, 0, 1, 1], [], []>, precision = #tpu.contract_precision<fp32>} : vector<112x64xf32>, vector<64x64xf32>, vector<112x64xf32> -> vector<112x64xf32>
    %cst_44 = arith.constant dense<0.000000e+00> : vector<112x224xf32>
    %43 = tpu.matmul %42, %1, %cst_44 {dimension_numbers = #tpu.dot_dimension_numbers<[1], [0], [0], [1], [0, 0, 1, 1], [], []>, precision = #tpu.contract_precision<fp32>} : vector<112x64xf32>, vector<64x224xf32>, vector<112x224xf32> -> vector<112x224xf32>
    %cst_45 = arith.constant 4.44444466 : f32
    %44 = vector.broadcast %cst_45 : f32 to vector<112x224xf32>
    %45 = arith.mulf %43, %44 : vector<112x224xf32>
    %cst_46 = arith.constant -1.80444443 : f32
    %46 = vector.broadcast %cst_46 : f32 to vector<112x224xf32>
    %47 = arith.addf %45, %46 : vector<112x224xf32>
    %c2_47 = arith.constant 2 : index
    %c0_48 = arith.constant 0 : index
    %c0_49 = arith.constant 0 : index
    %48 = vector.load %arg6[%c2_47, %c0_48, %c0_49] : memref<3x112x224xf32, #tpu.memory_space<vmem>>, vector<1x112x224xf32>
    %49 = vector.shape_cast %48 : vector<1x112x224xf32> to vector<112x224xf32>
    %50 = vector.shape_cast %47 : vector<112x224xf32> to vector<1x112x224xf32>
    tpu.vector_store %arg6[%c2_47, %c0_48, %c0_49], %50 {strides = array<i32>} : memref<3x112x224xf32, #tpu.memory_space<vmem>>, vector<1x112x224xf32>,
    %c2_50 = arith.constant 2 : index
    %c0_51 = arith.constant 0 : index
    %c0_52 = arith.constant 0 : index
    %51 = vector.load %arg6[%c2_50, %c0_51, %c0_52] : memref<3x112x224xf32, #tpu.memory_space<vmem>>, vector<1x112x224xf32>
    %52 = vector.shape_cast %51 : vector<1x112x224xf32> to vector<112x224xf32>
    %cst_53 = arith.constant dense<0.000000e+00> : vector<112x16xf32>
    %53 = tpu.matmul %52, %2, %cst_53 {dimension_numbers = #tpu.dot_dimension_numbers<[1], [0], [0], [1], [0, 0, 1, 1], [], []>, precision = #tpu.contract_precision<fp32>} : vector<112x224xf32>, vector<224x16xf32>, vector<112x16xf32> -> vector<112x16xf32>
    %cst_54 = arith.constant dense<0.000000e+00> : vector<8x16xf32>
    %54 = tpu.matmul %3, %53, %cst_54 {dimension_numbers = #tpu.dot_dimension_numbers<[1], [0], [0], [1], [0, 0, 1, 1], [], []>, precision = #tpu.contract_precision<fp32>} : vector<8x112xf32>, vector<112x16xf32>, vector<8x16xf32> -> vector<8x16xf32>
    %c2_55 = arith.constant 2 : index
    %c0_56 = arith.constant 0 : index
    %c0_57 = arith.constant 0 : index
    %55 = vector.load %arg7[%c2_55, %c0_56, %c0_57] : memref<3x8x16xf32, #tpu.memory_space<vmem>>, vector<1x8x16xf32>
    %56 = vector.shape_cast %55 : vector<1x8x16xf32> to vector<8x16xf32>
    %57 = vector.shape_cast %54 : vector<8x16xf32> to vector<1x8x16xf32>
    tpu.vector_store %arg7[%c2_55, %c0_56, %c0_57], %57 {strides = array<i32>} : memref<3x8x16xf32, #tpu.memory_space<vmem>>, vector<1x8x16xf32>,
    return
  }
  func.func @transform_0(%arg0: i32) -> (i32, i32, i32) {
    %c0_i32 = arith.constant 0 : i32
    %c0_i32_0 = arith.constant 0 : i32
    %c0_i32_1 = arith.constant 0 : i32
    %c0_i32_2 = arith.constant 0 : i32
    return %c0_i32, %c0_i32_0, %c0_i32_1 : i32, i32, i32
  }
  func.func @transform_1(%arg0: i32) -> (i32, i32) {
    %c0_i32 = arith.constant 0 : i32
    %c0_i32_0 = arith.constant 0 : i32
    return %arg0, %c0_i32 : i32, i32
  }
  func.func @transform_2(%arg0: i32) -> (i32, i32) {
    %c0_i32 = arith.constant 0 : i32
    %c0_i32_0 = arith.constant 0 : i32
    %c0_i32_1 = arith.constant 0 : i32
    return %c0_i32, %c0_i32_0 : i32, i32
  }
  func.func @transform_3(%arg0: i32) -> (i32, i32) {
    %c0_i32 = arith.constant 0 : i32
    %c0_i32_0 = arith.constant 0 : i32
    %c0_i32_1 = arith.constant 0 : i32
    return %c0_i32, %c0_i32_0 : i32, i32
  }
  func.func @transform_4(%arg0: i32) -> (i32, i32) {
    %c0_i32 = arith.constant 0 : i32
    %c0_i32_0 = arith.constant 0 : i32
    %c0_i32_1 = arith.constant 0 : i32
    return %c0_i32, %c0_i32_0 : i32, i32
  }
  func.func @transform_5(%arg0: i32) -> (i32, i32, i32) {
    %c0_i32 = arith.constant 0 : i32
    %c0_i32_0 = arith.constant 0 : i32
    %c0_i32_1 = arith.constant 0 : i32
    return %c0_i32, %arg0, %c0_i32_0 : i32, i32, i32
  }
  func.func @transform_6(%arg0: i32) -> (i32, i32, i32) {
    %c0_i32 = arith.constant 0 : i32
    %c0_i32_0 = arith.constant 0 : i32
    %c0_i32_1 = arith.constant 0 : i32
    return %c0_i32, %arg0, %c0_i32_0 : i32, i32, i32
  }
}

</mosaic_0001>

<bundles_post_ra>
// kernel: tpu_custom_call.1
= control target key start
LH: loop header
LB: loop body
LE: loop exit
PB: predicated region body
PF: predicated region fallthrough
CT: control target
= control target key end

     0   :  { %s19265_s0 = inlined_call_operand.vmem [shape: f32[3,64,64], index: 0, kind: input, shape index: {}]   ;;  %s19266_s1 = inlined_call_operand.vmem [shape: f32[224,64], index: 1, kind: input, shape index: {}]   ;;  %s19267_s2 = inlined_call_operand.vmem [shape: f32[64,224], index: 2, kind: input, shape index: {}]   ;;  %s19268_s3 = inlined_call_operand.vmem [shape: f32[224,16], index: 3, kind: input, shape index: {}]   ;;  %s19269_s4 = inlined_call_operand.vmem [shape: f32[8,112], index: 4, kind: input, shape index: {}]   ;;  %s19270_s5 = inlined_call_operand.hbm [shape: f32[3,224,224], index: 5, kind: output, shape index: {0}]   ;;  %s19271_s6 = inlined_call_operand.hbm [shape: f32[3,16,16], index: 6, kind: output, shape index: {1}]  }
   0x1   :  { %19914 = sst [smem:[#allocation288_spill]] %s19265_s0 }
   0x2   :  { %12 = vsyncpa [#allocation3], 0 }
   0x3   :  { %14 = vsyncpa [#allocation3 + $0x1], 0 }
   0x4   :  { %15 = vsyncpa [#allocation5], 0 }
   0x5   :  { %17 = vsyncpa [#allocation5 + $0x1], 0  ;;  %s12480_s21 = smov 0   ;;  %s12482_s22 = smov 0  }
   0x6   :  { %s12484_s23 = smov 0   ;;  %s12486_s24 = smov 0  }
   0x7 LB: > { %s12501_s25 = sadd.s32 4294967295, %s12433_s24   ;;  %s12162_s26 = sadd.s32 4294967294, %s12433_s24   ;;  %s12433_s24 = sphi %s12486_s24, %s21020_s24   ;;  %s12429_s23 = sphi %s12484_s23, %s21019_s23   ;;  %s12425_s22 = sphi %s12482_s22, %s21018_s22   ;;  %s12421_s21 = sphi %s12480_s21, %s21017_s21  }
   0x8   : > { %s12505_s27 = sadd.s32 1, %s12433_s24   ;;  %s140_s28 = sadd.s32 1, %s12429_s23 }
   0x9   : > { %s137_s29 = ssub.s32 %s12433_s24, %s12505_s27  ;;  %p150_p0 = scmp.ne.s32.totalorder %s12429_s23, %s12425_s22 }
   0xa   : > { %p138_p1 = scmp.eq.s32.totalorder %s137_s29, 0  ;;  %p151_p2 = scmp.eq.s32.totalorder %s12501_s25, 1 }
   0xb   : > { %p156_p3 = scmp.ne.s32.totalorder %s12425_s22, %s12421_s21  ;;  %p157_p4 = scmp.eq.s32.totalorder %s12162_s26, 1 }
   0xc   : > { %s12516_s30 = scalar_select %p138_p1, %s12429_s23, %s140_s28  }
   0xd   : > { %p12518_p5 = por %p151_p2, %p150_p0  ;;  %p12522_p6 = por %p157_p4, %p156_p3 }
   0xe   : > { %p12165_p7 = scmp.ge.s32.totalorder %s12433_s24, 1  ;;  %p222_p8 = scmp.lt.s32.totalorder %s12433_s24, 3 }
  0x10   : > { %p223_p9 = pnand %p12165_p7, %p222_p8 }
  0x12   : > { %226 = sbr.rel (%p223_p9) target bundleno = 3706 (0xe7a), region = 40 }
  0x17   : > { %s19917_s0 = sld [smem:[#allocation288_spill]]  ;;  %s257_s15 = smul.u32 14, %s12501_s25  ;;  %vm331_vm0 = vcmask 523264   ;;  %vm2393_vm1 = vcmask 785408   ;;  %vm3927_vm2 = vcmask 916480   ;;  %vm4246_vm3 = vcmask 130048  }
  0x18   : > { %s13685_s17 = sand.u32 1, %s12425_s22  }
  0x19   : > { %p258_p10 = scmp.lt.s32.totalorder %s257_s15, 27  ;;  %s12305_s18 = smul.u32 672, %s13685_s17 }
  0x1a   : > { %s12007_s28 = scalar_lea.sflag [#allocation3], %s13685_s17 }
  0x1b   : > { %s21022_s15 = smov (!%p258_p10, %s257_s15), 27  ;;  %s13737_s19 = scalar_lea.vmem [#allocation2], %s12305_s18 }
  0x1c   : > { %s12166_s11 = sshll.u32 %s21022_s15, 3 }
  0x1d   : > { %v330_v0 = vld [vmem:[%s19917_s0 + $0x38] sm:$0xff]  ;;  %v329_v1 = vld [vmem:[%s19917_s0 + $0x30] sm:$0xff]  ;;  %v328_v2 = vld [vmem:[%s19917_s0 + $0x28] sm:$0xff]  ;;  %s12614_s14 = scalar_lea.vmem %s19266_s1, %s12166_s11 }
  0x1e   : > { %v12538_v3 = vand.u32 4294901760, %v330_v0  ;;  %v12540_v4 = vand.u32 4294901760, %v329_v1  ;;  %v12542_v5 = vand.u32 4294901760, %v328_v2  ;;  %v327_v6 = vld [vmem:[%s19917_s0 + $0x20] sm:$0xff]  ;;  %v326_v7 = vld [vmem:[%s19917_s0 + $0x18] sm:$0xff]  ;;  %v325_v8 = vld [vmem:[%s19917_s0 + $0x10] sm:$0xff] }
  0x1f   : > { %v12553_v9 = vand.u32 4294901760, %v327_v6  ;;  %v12555_v10 = vand.u32 4294901760, %v326_v7  ;;  %v12557_v11 = vand.u32 4294901760, %v325_v8  ;;  %v324_v12 = vld [vmem:[%s19917_s0 + $0x8] sm:$0xff]  ;;  %v323_v13 = vld [vmem:[%s19917_s0] sm:$0xff]  ;;  %v266_v40 = vld [vmem:[%s12614_s14 + $0x10] sm:$0xff] }
  0x20   : > { %383 = vmatpush.msra.mxu0 %v12538_v3  ;;  %v12567_v14 = vsub.f32 %v330_v0, %v12538_v3  ;;  %v12570_v15 = vsub.f32 %v329_v1, %v12540_v4  ;;  %736 = vmatpush.msra.mxu3 %v12538_v3  ;;  %v12574_v16 = vsub.f32 %v328_v2, %v12542_v5  ;;  %v12576_v17 = vand.u32 4294901760, %v324_v12  ;;  %v264_v31 = vld [vmem:[%s12614_s14] sm:$0xff]  ;;  %v265_v34 = vld [vmem:[%s12614_s14 + $0x8] sm:$0xff]  ;;  %v267_v61 = vld [vmem:[%s12614_s14 + $0x18] sm:$0xff] }
  0x21   : > { %v12579_v18 = vsub.f32 %v327_v6, %v12553_v9  ;;  %v12582_v19 = vsub.f32 %v326_v7, %v12555_v10  ;;  %v12585_v20 = vsub.f32 %v325_v8, %v12557_v11  ;;  %v12587_v21 = vand.u32 4294901760, %v323_v13 }
  0x22   : > { %385 = vmatpush.msra.mxu0 %v12540_v4  ;;  %634 = vmatpush.msra.mxu2 %v12567_v14  ;;  %v521_v22 = vand.u32 4294901760, %v12567_v14  ;;  %v527_v23 = vand.u32 4294901760, %v12570_v15  ;;  %v533_v24 = vand.u32 4294901760, %v12574_v16  ;;  %v12597_v26 = vsub.f32 %v324_v12, %v12576_v17  ;;  %v268_v12 = vld [vmem:[%s12614_s14 + $0x20] sm:$0xff] }
  0x23   : > { %738 = vmatpush.msra.mxu3 %v12540_v4  ;;  %v539_v25 = vand.u32 4294901760, %v12579_v18  ;;  %v545_v30 = vand.u32 4294901760, %v12582_v19  ;;  %v551_v32 = vand.u32 4294901760, %v12585_v20  ;;  %v12620_v33 = vsub.f32 %v323_v13, %v12587_v21 }
  0x24   : > { %387 = vmatpush.msra.mxu0 %v12542_v5  ;;  %637 = vmatpush.msra.mxu2 %v12570_v15  ;;  %v522_v27 = vsub.f32 %v12567_v14, %v521_v22  ;;  %v528_v28 = vsub.f32 %v12570_v15, %v527_v23  ;;  %v534_v29 = vsub.f32 %v12574_v16, %v533_v24  ;;  %v333_v38 = vsel %vm331_vm0, %v264_v31, 0 }
  0x25   : > { %740 = vmatpush.msra.mxu3 %v12542_v5  ;;  %v540_v37 = vsub.f32 %v12579_v18, %v539_v25  ;;  %v12630_v39 = vand.u32 4294901760, %v333_v38  ;;  %v546_v42 = vsub.f32 %v12582_v19, %v545_v30  ;;  %v557_v43 = vand.u32 4294901760, %v12597_v26 }
  0x26   : > { %389 = vmatpush.msra.mxu0 %v12553_v9  ;;  %v523_v35 = vand.u32 4294901760, %v522_v27  ;;  %640 = vmatpush.msra.mxu2 %v12574_v16  ;;  %v529_v36 = vand.u32 4294901760, %v528_v28  ;;  %v535_v41 = vand.u32 4294901760, %v534_v29  ;;  %v336_v44 = vsel %vm331_vm0, %v265_v34, 0  ;;  %v271_v28 = vld [vmem:[%s12614_s14 + $0x38] sm:$0xff]  ;;  %v272_v34 = vld [vmem:[%s12614_s14 + $0x40] sm:$0xff] }
  0x27   : > { %742 = vmatpush.msra.mxu3 %v12553_v9  ;;  %19918 = vst [vmem:[#allocation10_spill] sm:$0xff] %v12630_v39  ;;  %v12642_v45 = vsub.f32 %v333_v38, %v12630_v39  ;;  %v12644_v46 = vand.u32 4294901760, %v336_v44  ;;  %v541_v47 = vand.u32 4294901760, %v540_v37  ;;  %v552_v48 = vsub.f32 %v12585_v20, %v551_v32 }
  0x28   : > { %524 = vmatpush.msra.mxu1 %v523_v35  ;;  %391 = vmatpush.msra.mxu0 %v12555_v10  ;;  %v563_v49 = vand.u32 4294901760, %v12620_v33  ;;  %v339_v50 = vsel %vm331_vm0, %v266_v40, 0  ;;  %v547_v53 = vand.u32 4294901760, %v546_v42  ;;  %v558_v54 = vsub.f32 %v12597_v26, %v557_v43  ;;  %v273_v42 = vld [vmem:[%s12614_s14 + $0x48] sm:$0xff] }
  0x29   : > { %643 = vmatpush.msra.mxu2 %v12579_v18  ;;  %744 = vmatpush.msra.mxu3 %v12555_v10  ;;  %19919 = vst [vmem:[#allocation11_spill] sm:$0xff] %v12642_v45  ;;  %v12655_v51 = vand.u32 4294901760, %v12642_v45  ;;  %v12658_v52 = vsub.f32 %v336_v44, %v12644_v46  ;;  %v12671_v57 = vand.u32 4294901760, %v339_v50  ;;  %v553_v58 = vand.u32 4294901760, %v552_v48  ;;  %v269_v18 = vld [vmem:[%s12614_s14 + $0x28] sm:$0xff] }
  0x2a   : > { %19920 = vst [vmem:[#allocation12_spill] sm:$0xff] %v12644_v46  ;;  %530 = vmatpush.msra.mxu1 %v529_v36  ;;  %393 = vmatpush.msra.mxu0 %v12557_v11  ;;  %v564_v59 = vsub.f32 %v12620_v33, %v563_v49  ;;  %v559_v62 = vand.u32 4294901760, %v558_v54  ;;  %v342_v2 = vsel %vm331_vm0, %v267_v61, 0  ;;  %v345_v15 = vsel %vm331_vm0, %v268_v12, 0 }
  0x2b   : > { %646 = vmatpush.msra.mxu2 %v12582_v19  ;;  %746 = vmatpush.msra.mxu3 %v12557_v11  ;;  %19921 = vst [vmem:[#allocation13_spill] sm:$0xff] %v12655_v51  ;;  %v401_v55 = vsub.f32 %v12642_v45, %v12655_v51  ;;  %v12669_v56 = vand.u32 4294901760, %v12658_v52  ;;  %v12688_v0 = vsub.f32 %v339_v50, %v12671_v57  ;;  %v12699_v8 = vand.u32 4294901760, %v342_v2 }
  0x2c   : > { %19922 = vst [vmem:[#allocation14_spill] sm:$0xff] %v12658_v52  ;;  %536 = vmatpush.msra.mxu1 %v535_v41  ;;  %395 = vmatpush.msra.mxu0 %v12576_v17  ;;  %v565_v1 = vand.u32 4294901760, %v564_v59  ;;  %v357_v37 = vsel %vm331_vm0, %v272_v34, 0 }
  0x2d   : > { %649 = vmatpush.msra.mxu2 %v12585_v20  ;;  %748 = vmatpush.msra.mxu3 %v12576_v17  ;;  %19923 = vst [vmem:[#allocation15_spill] sm:$0xff] %v12669_v56  ;;  %v12678_v60 = vand.u32 4294901760, %v401_v55  ;;  %v409_v63 = vsub.f32 %v12658_v52, %v12669_v56  ;;  %v12697_v7 = vand.u32 4294901760, %v12688_v0  ;;  %v12713_v14 = vsub.f32 %v342_v2, %v12699_v8 }
  0x2e   : > { %19924 = vst [vmem:[#allocation16_spill] sm:$0xff] %v12671_v57  ;;  %542 = vmatpush.msra.mxu1 %v541_v47  ;;  %397 = vmatpush.msra.mxu0 %v12587_v21  ;;  %v12811_v41 = vand.u32 4294901760, %v357_v37  ;;  %v360_v47 = vsel %vm331_vm0, %v273_v42, 0 }
  0x2f   : > { %652 = vmatpush.msra.mxu2 %v12597_v26  ;;  %19925 = vst [vmem:[#allocation17_spill] sm:$0xff] %v12678_v60  ;;  %750 = vmatpush.msra.mxu3 %v12587_v21  ;;  %v12694_v6 = vand.u32 4294901760, %v409_v63  ;;  %v417_v13 = vsub.f32 %v12688_v0, %v12697_v7  ;;  %v12725_v16 = vand.u32 4294901760, %v12713_v14  ;;  %v12829_v50 = vand.u32 4294901760, %v360_v47  ;;  %v275_v63 = vld [vmem:[%s12614_s14 + $0x58] sm:$0xff] }
  0x30   : > { %548 = vmatpush.msra.mxu1 %v547_v53  ;;  %754 = vmatmul.f32.vlgmr.msra.gmra.mxu3 %v12655_v51  ;;  %19926 = vst [vmem:[#allocation18_spill] sm:$0xff] %v12688_v0  ;;  %v12820_v44 = vsub.f32 %v357_v37, %v12811_v41  ;;  %v274_v53 = vld [vmem:[%s12614_s14 + $0x50] sm:$0xff]  ;;  %v366_v12 = vsel %vm331_vm0, %v275_v63, 0 }
  0x31   : > { %403 = vmatmul.f32.vlgmr.msra.gmra.mxu0 %v12678_v60  ;;  %655 = vmatpush.msra.mxu2 %v12620_v33  ;;  %19927 = vst [vmem:[#allocation19_spill] sm:$0xff] %v12694_v6  ;;  %v12838_v55 = vsub.f32 %v360_v47, %v12829_v50 }
  0x32   : > { %554 = vmatpush.msra.mxu1 %v553_v58  ;;  %658 = vmatmul.f32.vlgmr.msra.gmra.mxu2 %v12642_v45  ;;  %19928 = vst [vmem:[#allocation20_spill] sm:$0xff] %v12697_v7  ;;  %v363_v58 = vsel %vm331_vm0, %v274_v53, 0 }
  0x33   : > { %847 = vmatpush.msrb.mxu0 %v521_v22  ;;  %19929 = vst [vmem:[#allocation21_spill] sm:$0xff] %v12699_v8  ;;  %v12727_v22 = vand.u32 4294901760, %v345_v15  ;;  %v12845_v61 = vand.u32 4294901760, %v12838_v55 }
  0x34   : > { %560 = vmatpush.msra.mxu1 %v559_v62  ;;  %19930 = vst [vmem:[#allocation22_spill] sm:$0xff] %v12713_v14  ;;  %v12847_v62 = vand.u32 4294901760, %v363_v58 }
  0x35   : > { %851 = vmatpush.msrb.mxu0 %v527_v23  ;;  %19932 = vst [vmem:[#allocation24_spill] sm:$0xff] %v12725_v16  ;;  %v12741_v19 = vsub.f32 %v345_v15, %v12727_v22 }
  0x36   : > { %566 = vmatpush.msra.mxu1 %v565_v1  ;;  %19933 = vst [vmem:[#allocation25_spill] sm:$0xff] %v12727_v22  ;;  %v473_v1 = vsub.f32 %v12838_v55, %v12845_v61  ;;  %v12856_v2 = vsub.f32 %v363_v58, %v12847_v62 }
  0x37   : > { %568 = vmatmul.f32.vlgmr.msra.gmra.mxu1 %v12630_v39  ;;  %855 = vmatpush.msrb.mxu0 %v533_v24  ;;  %19934 = vst [vmem:[#allocation26_spill] sm:$0xff] %v12741_v19  ;;  %v12752_v23 = vand.u32 4294901760, %v12741_v19 }
  0x38   : > { %760 = vmatmul.f32.gmra.mxu3 %v12669_v56  ;;  %942 = vmatpush.msrb.mxu1 %v12538_v3  ;;  %v12722_v3 = vand.u32 4294901760, %v417_v13  ;;  %19949 = vst [vmem:[#allocation41_spill] sm:$0xff] %v12811_v41  ;;  %v12860_v13 = vand.u32 4294901760, %v473_v1  ;;  %v12863_v15 = vand.u32 4294901760, %v12856_v2 }
  0x39   : > { %411 = vmatmul.f32.gmra.mxu0 %v12694_v6  ;;  %19936 = vst [vmem:[#allocation28_spill] sm:$0xff] %v12752_v23 }
  0x3a   : > { %663 = vmatmul.f32.gmra.mxu2 %v12658_v52  ;;  %859 = vmatpush.msrb.mxu0 %v539_v25  ;;  %19931 = vst [vmem:[#allocation23_spill] sm:$0xff] %v12722_v3 }
  0x3b   : > { %944 = vmatpush.msrb.mxu1 %v12540_v4  ;;  %v425_v4 = vsub.f32 %v12713_v14, %v12725_v16  ;;  %19950 = vst [vmem:[#allocation42_spill] sm:$0xff] %v12820_v44 }
  0x3c   : > { %863 = vmatpush.msrb.mxu0 %v545_v30  ;;  %v354_v30 = vsel %vm331_vm0, %v271_v28, 0  ;;  %19953 = vst [vmem:[#allocation45_spill] sm:$0xff] %v12829_v50 }
  0x3d   : > { %946 = vmatpush.msrb.mxu1 %v12542_v5  ;;  %v348_v5 = vsel %vm331_vm0, %v269_v18, 0  ;;  %v12749_v20 = vand.u32 4294901760, %v425_v4  ;;  %v12793_v33 = vand.u32 4294901760, %v354_v30  ;;  %19954 = vst [vmem:[#allocation46_spill] sm:$0xff] %v12838_v55  ;;  %v12865_v18 = vand.u32 4294901760, %v366_v12  ;;  %v276_v4 = vld [vmem:[%s12614_s14 + $0x60] sm:$0xff] }
  0x3e   : > { %867 = vmatpush.msrb.mxu0 %v551_v32  ;;  %v12754_v24 = vand.u32 4294901760, %v348_v5  ;;  %19956 = vst [vmem:[#allocation48_spill] sm:$0xff] %v12845_v61 }
  0x3f   : > { %572 = vmatmul.f32.gmra.mxu1 %v12644_v46  ;;  %19935 = vst [vmem:[#allocation27_spill] sm:$0xff] %v12749_v20  ;;  %v12802_v36 = vsub.f32 %v354_v30, %v12793_v33  ;;  %v277_v30 = vld [vmem:[%s12614_s14 + $0x68] sm:$0xff] }
  0x40   : > { %766 = vmatmul.f32.gmra.mxu3 %v12697_v7  ;;  %871 = vmatpush.msrb.mxu0 %v557_v43  ;;  %19937 = vst [vmem:[#allocation29_spill] sm:$0xff] %v12754_v24  ;;  %v12765_v25 = vsub.f32 %v348_v5, %v12754_v24  ;;  %v481_v5 = vsub.f32 %v12856_v2, %v12863_v15  ;;  %v372_v37 = vsel %vm331_vm0, %v277_v30, 0 }
  0x41   : > { %419 = vmatmul.f32.gmra.mxu0 %v12722_v3  ;;  %948 = vmatpush.msrb.mxu1 %v12553_v9  ;;  %v270_v9 = vld [vmem:[%s12614_s14 + $0x30] sm:$0xff]  ;;  %19945 = vst [vmem:[#allocation37_spill] sm:$0xff] %v12793_v33  ;;  %v12809_v40 = vand.u32 4294901760, %v12802_v36  ;;  %v12901_v47 = vand.u32 4294901760, %v372_v37  ;;  %s12306_s14 = smul.u32 24, %s13685_s17 }
  0x42   : > { %668 = vmatmul.f32.gmra.mxu2 %v12688_v0  ;;  %875 = vmatpush.msrb.mxu0 %v563_v49  ;;  %19938 = vst [vmem:[#allocation30_spill] sm:$0xff] %v12765_v25  ;;  %v351_v26 = vsel %vm331_vm0, %v270_v9, 0  ;;  %v12773_v27 = vand.u32 4294901760, %v12765_v25  ;;  %v12827_v49 = vand.u32 4294901760, %v12820_v44  ;;  %v12874_v9 = vsub.f32 %v366_v12, %v12865_v18 }
  0x43   : > { %950 = vmatpush.msrb.mxu1 %v12555_v10  ;;  %v433_v10 = vsub.f32 %v12741_v19, %v12752_v23  ;;  %19946 = vst [vmem:[#allocation38_spill] sm:$0xff] %v12802_v36  ;;  %v457_v43 = vsub.f32 %v12802_v36, %v12809_v40  ;;  %s15701_s15 = scalar_lea.vmem [#allocation4], %s12306_s14 }
  0x44   : > { %19940 = vst [vmem:[#allocation32_spill] sm:$0xff] %v12773_v27  ;;  %v441_v29 = vsub.f32 %v12765_v25, %v12773_v27  ;;  %v465_v54 = vsub.f32 %v12820_v44, %v12827_v49  ;;  %v12881_v28 = vand.u32 4294901760, %v12874_v9 }
  0x45   : > { %952 = vmatpush.msrb.mxu1 %v12557_v11  ;;  %v12770_v11 = vand.u32 4294901760, %v433_v10  ;;  %19948 = vst [vmem:[#allocation40_spill] sm:$0xff] %v12809_v40  ;;  %v12824_v48 = vand.u32 4294901760, %v457_v43  ;;  %v369_v10 = vsel %vm331_vm0, %v276_v4, 0 }
  0x46   : > { %v12788_v31 = vand.u32 4294901760, %v441_v29  ;;  %19952 = vst [vmem:[#allocation44_spill] sm:$0xff] %v12827_v49  ;;  %v12842_v59 = vand.u32 4294901760, %v465_v54  ;;  %v12883_v29 = vand.u32 4294901760, %v369_v10  ;;  %v489_v34 = vsub.f32 %v12874_v9, %v12881_v28 }
  0x47   : > { %576 = vmatmul.f32.gmra.mxu1 %v12671_v57  ;;  %19939 = vst [vmem:[#allocation31_spill] sm:$0xff] %v12770_v11  ;;  %v12909_v54 = vsub.f32 %v372_v37, %v12901_v47 }
  0x48   : > { %772 = vmatmul.f32.gmra.mxu3 %v12725_v16  ;;  %954 = vmatpush.msrb.mxu1 %v12576_v17  ;;  %v12775_v17 = vand.u32 4294901760, %v351_v26  ;;  %19943 = vst [vmem:[#allocation35_spill] sm:$0xff] %v12788_v31  ;;  %v12896_v42 = vand.u32 4294901760, %v489_v34 }
  0x49   : > { %427 = vmatmul.f32.gmra.mxu0 %v12749_v20  ;;  %19951 = vst [vmem:[#allocation43_spill] sm:$0xff] %v12824_v48  ;;  %v12915_v63 = vand.u32 4294901760, %v12909_v54 }
  0x4a   : > { %673 = vmatmul.f32.gmra.mxu2 %v12713_v14  ;;  %956 = vmatpush.msrb.mxu1 %v12587_v21  ;;  %19941 = vst [vmem:[#allocation33_spill] sm:$0xff] %v12775_v17  ;;  %v12784_v21 = vsub.f32 %v351_v26, %v12775_v17  ;;  %v12878_v26 = vand.u32 4294901760, %v481_v5 }
  0x4b   : > { %19955 = vst [vmem:[#allocation47_spill] sm:$0xff] %v12842_v59  ;;  %v505_v1 = vsub.f32 %v12909_v54, %v12915_v63 }
  0x4c   : > { %19942 = vst [vmem:[#allocation34_spill] sm:$0xff] %v12784_v21  ;;  %v12791_v32 = vand.u32 4294901760, %v12784_v21 }
  0x4d   : > { %19957 = vst [vmem:[#allocation49_spill] sm:$0xff] %v12847_v62  ;;  %v12923_v12 = vand.u32 4294901760, %v505_v1 }
  0x4e   : > { %19944 = vst [vmem:[#allocation36_spill] sm:$0xff] %v12791_v32  ;;  %v449_v35 = vsub.f32 %v12784_v21, %v12791_v32 }
  0x4f   : > { %580 = vmatmul.f32.gmra.mxu1 %v12699_v8  ;;  %19958 = vst [vmem:[#allocation50_spill] sm:$0xff] %v12856_v2 }
  0x50   : > { %778 = vmatmul.f32.gmra.mxu3 %v12752_v23  ;;  %v12806_v38 = vand.u32 4294901760, %v449_v35  ;;  %19959 = vst [vmem:[#allocation51_spill] sm:$0xff] %v12860_v13  ;;  %v12892_v35 = vsub.f32 %v369_v10, %v12883_v29 }
  0x51   : > { %435 = vmatmul.f32.gmra.mxu0 %v12770_v11  ;;  %19960 = vst [vmem:[#allocation52_spill] sm:$0xff] %v12863_v15 }
  0x52   : > { %678 = vmatmul.f32.gmra.mxu2 %v12741_v19  ;;  %19947 = vst [vmem:[#allocation39_spill] sm:$0xff] %v12806_v38  ;;  %v12899_v43 = vand.u32 4294901760, %v12892_v35 }
  0x53   : > { %19961 = vst [vmem:[#allocation53_spill] sm:$0xff] %v12865_v18 }
  0x54   : > { %19962 = vst [vmem:[#allocation54_spill] sm:$0xff] %v12874_v9  ;;  %v497_v53 = vsub.f32 %v12892_v35, %v12899_v43 }
  0x55   : > { %19963 = vst [vmem:[#allocation55_spill] sm:$0xff] %v12878_v26 }
  0x56   : > { %19964 = vst [vmem:[#allocation56_spill] sm:$0xff] %v12881_v28  ;;  %v12912_v58 = vand.u32 4294901760, %v497_v53 }
  0x57   : > { %584 = vmatmul.f32.gmra.mxu1 %v12727_v22  ;;  %19965 = vst [vmem:[#allocation57_spill] sm:$0xff] %v12883_v29 }
  0x58   : > { %784 = vmatmul.f32.gmra.mxu3 %v12773_v27  ;;  %19966 = vst [vmem:[#allocation58_spill] sm:$0xff] %v12892_v35 }
  0x59   : > { %443 = vmatmul.f32.gmra.mxu0 %v12788_v31  ;;  %19967 = vst [vmem:[#allocation59_spill] sm:$0xff] %v12896_v42 }
  0x5a   : > { %683 = vmatmul.f32.gmra.mxu2 %v12765_v25  ;;  %19968 = vst [vmem:[#allocation60_spill] sm:$0xff] %v12899_v43 }
  0x5b   : > { %19969 = vst [vmem:[#allocation61_spill] sm:$0xff] %v12901_v47 }
  0x5c   : > { %19970 = vst [vmem:[#allocation62_spill] sm:$0xff] %v12909_v54 }
  0x5d   : > { %19971 = vst [vmem:[#allocation63_spill] sm:$0xff] %v12912_v58 }
  0x5e   : > { %19972 = vst [vmem:[#allocation64_spill] sm:$0xff] %v12915_v63 }
  0x5f   : > { %588 = vmatmul.f32.gmra.mxu1 %v12754_v24  ;;  %19973 = vst [vmem:[#allocation65_spill] sm:$0xff] %v12923_v12 }
  0x60   : > { %790 = vmatmul.f32.gmra.mxu3 %v12791_v32 }
  0x61   : > { %451 = vmatmul.f32.gmra.mxu0 %v12806_v38 }
  0x62   : > { %688 = vmatmul.f32.gmra.mxu2 %v12784_v21 }
  0x67   : > { %592 = vmatmul.f32.gmra.mxu1 %v12775_v17 }
  0x68   : > { %796 = vmatmul.f32.gmra.mxu3 %v12809_v40  ;;  %v282_v40 = vld [vmem:[%s19267_s2 + $0x20] sm:$0xff] }
  0x69   : > { %459 = vmatmul.f32.gmra.mxu0 %v12824_v48  ;;  %v13061_v11 = vand.u32 4294901760, %v282_v40 }
  0x6a   : > { %693 = vmatmul.f32.gmra.mxu2 %v12802_v36 }
  0x6b   : > { %19988 = vst [vmem:[#allocation80_spill] sm:$0xff] %v13061_v11  ;;  %v13081_v20 = vsub.f32 %v282_v40, %v13061_v11 }
  0x6d   : > { %19992 = vst [vmem:[#allocation84_spill] sm:$0xff] %v13081_v20  ;;  %v13101_v40 = vand.u32 4294901760, %v13081_v20 }
  0x6f   : > { %596 = vmatmul.f32.gmra.mxu1 %v12793_v33  ;;  %19995 = vst [vmem:[#allocation87_spill] sm:$0xff] %v13101_v40 }
  0x70   : > { %802 = vmatmul.f32.gmra.mxu3 %v12827_v49  ;;  %v284_v49 = vld [vmem:[%s19267_s2 + $0x30] sm:$0xff] }
  0x71   : > { %467 = vmatmul.f32.gmra.mxu0 %v12842_v59 }
  0x72   : > { %698 = vmatmul.f32.gmra.mxu2 %v12820_v44  ;;  %v13050_v44 = vand.u32 4294901760, %v284_v49 }
  0x74   : > { %19986 = vst [vmem:[#allocation78_spill] sm:$0xff] %v13050_v44  ;;  %v13070_v32 = vsub.f32 %v284_v49, %v13050_v44 }
  0x76   : > { %19990 = vst [vmem:[#allocation82_spill] sm:$0xff] %v13070_v32 }
  0x77   : > { %600 = vmatmul.f32.gmra.mxu1 %v12811_v41 }
  0x78   : > { %808 = vmatmul.f32.gmra.mxu3 %v12845_v61  ;;  %v286_v61 = vld [vmem:[%s19267_s2 + $0x40] sm:$0xff] }
  0x79   : > { %475 = vmatmul.f32.gmra.mxu0 %v12860_v13 }
  0x7a   : > { %703 = vmatmul.f32.gmra.mxu2 %v12838_v55  ;;  %v13031_v55 = vand.u32 4294901760, %v286_v61 }
  0x7c   : > { %19982 = vst [vmem:[#allocation74_spill] sm:$0xff] %v13031_v55  ;;  %v13047_v31 = vsub.f32 %v286_v61, %v13031_v55 }
  0x7e   : > { %19985 = vst [vmem:[#allocation77_spill] sm:$0xff] %v13047_v31  ;;  %v13067_v36 = vand.u32 4294901760, %v13047_v31 }
  0x7f   : > { %604 = vmatmul.f32.gmra.mxu1 %v12829_v50 }
  0x80   : > { %814 = vmatmul.f32.gmra.mxu3 %v12863_v15  ;;  %v288_v15 = vld [vmem:[%s19267_s2 + $0x50] sm:$0xff]  ;;  %19989 = vst [vmem:[#allocation81_spill] sm:$0xff] %v13067_v36 }
  0x81   : > { %483 = vmatmul.f32.gmra.mxu0 %v12878_v26 }
  0x82   : > { %708 = vmatmul.f32.gmra.mxu2 %v12856_v2 }
  0x87   : > { %608 = vmatmul.f32.gmra.mxu1 %v12847_v62 }
  0x88   : > { %820 = vmatmul.f32.gmra.mxu3 %v12881_v28  ;;  %v292_v28 = vld [vmem:[%s19267_s2 + $0x70] sm:$0xff] }
  0x89   : > { %491 = vmatmul.f32.gmra.mxu0 %v12896_v42 }
  0x8a   : > { %713 = vmatmul.f32.gmra.mxu2 %v12874_v9 }
  0x8f   : > { %612 = vmatmul.f32.gmra.mxu1 %v12865_v18 }
  0x90   : > { %826 = vmatmul.f32.gmra.mxu3 %v12899_v43 }
  0x91   : > { %499 = vmatmul.f32.gmra.mxu0 %v12912_v58 }
  0x92   : > { %718 = vmatmul.f32.gmra.mxu2 %v12892_v35 }
  0x97   : > { %616 = vmatmul.f32.gmra.mxu1 %v12883_v29 }
  0x98   : > { %832 = vmatmul.f32.gmra.mxu3 %v12915_v63 }
  0x99   : > { %507 = vmatmul.f32.gmra.mxu0 %v12923_v12 }
  0x9a   : > { %723 = vmatmul.f32.gmra.mxu2 %v12909_v54 }
  0x9f   : > { %620 = vmatmul.f32.gmra.mxu1 %v12901_v47 }
  0xa1   : > { %877 = vmatmul.f32.vlgmr.msrb.gmra.mxu0 %v12630_v39 }
  0xa7   : > { %958 = vmatmul.f32.vlgmr.msrb.gmra.mxu1 %v12630_v39 }
  0xa9   : > { %881 = vmatmul.f32.gmra.mxu0 %v12644_v46 }
  0xae   : > { %v12933_v4 = vpop.f32.mrf.mxu0 }
  0xaf   : > { %962 = vmatmul.f32.gmra.mxu1 %v12644_v46 }
  0xb1   : > { %885 = vmatmul.f32.gmra.mxu0 %v12671_v57 }
  0xb4   : > { %v12937_v5 = vpop.f32.mrf.mxu1 }
  0xb6   : > { %v12939_v10 = vpop.f32.mrf.mxu0 }
  0xb7   : > { %966 = vmatmul.f32.gmra.mxu1 %v12671_v57 }
  0xb9   : > { %889 = vmatmul.f32.gmra.mxu0 %v12699_v8 }
  0xbc   : > { %v12943_v30 = vpop.f32.mrf.mxu1 }
  0xbe   : > { %v12945_v34 = vpop.f32.mrf.mxu0 }
  0xbf   : > { %970 = vmatmul.f32.gmra.mxu1 %v12699_v8 }
  0xc1   : > { %893 = vmatmul.f32.gmra.mxu0 %v12727_v22 }
  0xc4   : > { %v12949_v37 = vpop.f32.mrf.mxu1 }
  0xc6   : > { %v12951_v53 = vpop.f32.mrf.mxu0 }
  0xc7   : > { %974 = vmatmul.f32.gmra.mxu1 %v12727_v22 }
  0xc9   : > { %897 = vmatmul.f32.gmra.mxu0 %v12754_v24 }
  0xcc   : > { %v12955_v1 = vpop.f32.mrf.mxu1 }
  0xce   : > { %v12957_v12 = vpop.f32.mrf.mxu0 }
  0xcf   : > { %978 = vmatmul.f32.gmra.mxu1 %v12754_v24 }
  0xd1   : > { %901 = vmatmul.f32.gmra.mxu0 %v12775_v17 }
  0xd4   : > { %v12961_v58 = vpop.f32.mrf.mxu1 }
  0xd6   : > { %v12963_v42 = vpop.f32.mrf.mxu0 }
  0xd7   : > { %982 = vmatmul.f32.gmra.mxu1 %v12775_v17 }
  0xd9   : > { %905 = vmatmul.f32.gmra.mxu0 %v12793_v33 }
  0xdc   : > { %v12967_v63 = vpop.f32.mrf.mxu1 }
  0xde   : > { %v12969_v26 = vpop.f32.mrf.mxu0 }
  0xdf   : > { %986 = vmatmul.f32.gmra.mxu1 %v12793_v33  ;;  %v12988_v33 = vand.u32 4294901760, %v292_v28 }
  0xe1   : > { %909 = vmatmul.f32.gmra.mxu0 %v12811_v41  ;;  %19974 = vst [vmem:[#allocation66_spill] sm:$0xff] %v12988_v33  ;;  %v12994_v59 = vsub.f32 %v292_v28, %v12988_v33  ;;  %1418 = vmatpush.msra.mxu1 %v12988_v33  ;;  %v13012_v28 = vand.u32 4294901760, %v288_v15 }
  0xe2   : > { %1065 = vmatpush.msrb.mxu2 %v12988_v33 }
  0xe3   : > { %19975 = vst [vmem:[#allocation67_spill] sm:$0xff] %v12994_v59  ;;  %v13006_v17 = vand.u32 4294901760, %v12994_v59  ;;  %1316 = vmatpush.msra.mxu0 %v12994_v59  ;;  %v13028_v38 = vsub.f32 %v288_v15, %v13012_v28 }
  0xe4   : > { %v12973_v54 = vpop.f32.mrf.mxu1  ;;  %19979 = vst [vmem:[#allocation71_spill] sm:$0xff] %v13012_v28 }
  0xe5   : > { %19977 = vst [vmem:[#allocation69_spill] sm:$0xff] %v13006_v17  ;;  %v13044_v22 = vand.u32 4294901760, %v13028_v38 }
  0xe6   : > { %v12975_v43 = vpop.f32.mrf.mxu0  ;;  %19981 = vst [vmem:[#allocation73_spill] sm:$0xff] %v13028_v38 }
  0xe7   : > { %990 = vmatmul.f32.gmra.mxu1 %v12811_v41  ;;  %v290_v41 = vld [vmem:[%s19267_s2 + $0x60] sm:$0xff]  ;;  %19984 = vst [vmem:[#allocation76_spill] sm:$0xff] %v13044_v22  ;;  %v1216_v8 = vsub.f32 %v13028_v38, %v13044_v22 }
  0xe8   : > { %v12996_v9 = vand.u32 4294901760, %v290_v41 }
  0xe9   : > { %913 = vmatmul.f32.gmra.mxu0 %v12829_v50  ;;  %v13078_v57 = vand.u32 4294901760, %v1216_v8  ;;  %v278_v8 = vld [vmem:[%s19267_s2] sm:$0xff] }
  0xea   : > { %19976 = vst [vmem:[#allocation68_spill] sm:$0xff] %v12996_v9  ;;  %v13009_v48 = vsub.f32 %v290_v41, %v12996_v9  ;;  %1420 = vmatpush.msra.mxu1 %v12996_v9  ;;  %1067 = vmatpush.msrb.mxu2 %v12996_v9  ;;  %v1204_v41 = vsub.f32 %v12994_v59, %v13006_v17  ;;  %v13106_v27 = vand.u32 4294901760, %v278_v8  ;;  %v659_v59 = vpop.f32.mrf.mxu2 }
  0xeb   : > { %19991 = vst [vmem:[#allocation83_spill] sm:$0xff] %v13078_v57 }
  0xec   : > { %v12979_v13 = vpop.f32.mrf.mxu1  ;;  %19978 = vst [vmem:[#allocation70_spill] sm:$0xff] %v13009_v48  ;;  %v13025_v24 = vand.u32 4294901760, %v13009_v48  ;;  %1319 = vmatpush.msra.mxu0 %v13009_v48  ;;  %1422 = vmatpush.msra.mxu1 %v13012_v28  ;;  %v13121_v25 = vsub.f32 %v278_v8, %v13106_v27  ;;  %v755_v8 = vpop.f32.mrf.mxu3 }
  0xed   : > { %1069 = vmatpush.msrb.mxu2 %v13012_v28  ;;  %19997 = vst [vmem:[#allocation89_spill] sm:$0xff] %v13106_v27 }
  0xee   : > { %v12981_v35 = vpop.f32.mrf.mxu0  ;;  %19980 = vst [vmem:[#allocation72_spill] sm:$0xff] %v13025_v24  ;;  %v1210_v15 = vsub.f32 %v13009_v48, %v13025_v24  ;;  %1322 = vmatpush.msra.mxu0 %v13028_v38  ;;  %1424 = vmatpush.msra.mxu1 %v13031_v55  ;;  %v1222_v38 = vsub.f32 %v13047_v31, %v13067_v36  ;;  %v13091_v48 = vand.u32 4294901760, %v13070_v32 }
  0xef   : > { %994 = vmatmul.f32.gmra.mxu1 %v12829_v50  ;;  %1071 = vmatpush.msrb.mxu2 %v13031_v55  ;;  %20000 = vst [vmem:[#allocation92_spill] sm:$0xff] %v13121_v25 }
  0xf0   : > { %1325 = vmatpush.msra.mxu0 %v13047_v31  ;;  %1426 = vmatpush.msra.mxu1 %v13050_v44  ;;  %19994 = vst [vmem:[#allocation86_spill] sm:$0xff] %v13091_v48  ;;  %v13108_v46 = vand.u32 4294901760, %v1222_v38  ;;  %v1228_v3 = vsub.f32 %v13070_v32, %v13091_v48 }
  0xf1   : > { %917 = vmatmul.f32.gmra.mxu0 %v12847_v62  ;;  %1073 = vmatpush.msrb.mxu2 %v13050_v44 }
  0xf2   : > { %1328 = vmatpush.msra.mxu0 %v13070_v32  ;;  %1428 = vmatpush.msra.mxu1 %v13061_v11  ;;  %19998 = vst [vmem:[#allocation90_spill] sm:$0xff] %v13108_v46  ;;  %v13125_v38 = vand.u32 4294901760, %v1228_v3 }
  0xf3   : > { %1075 = vmatpush.msrb.mxu2 %v13061_v11 }
  0xf4   : > { %v13000_v50 = vpop.f32.mrf.mxu1  ;;  %1331 = vmatpush.msra.mxu0 %v13081_v20  ;;  %20001 = vst [vmem:[#allocation93_spill] sm:$0xff] %v13125_v38 }
  0xf5   : > { %v602_v0 = vadd.f32 %v13000_v50, %v12981_v35 }
  0xf6   : > { %v13015_v2 = vpop.f32.mrf.mxu0 }
  0xf7   : > { %998 = vmatmul.f32.gmra.mxu1 %v12847_v62  ;;  %v13039_v62 = vand.u32 4294901760, %v1204_v41  ;;  %v13057_v41 = vand.u32 4294901760, %v1210_v15  ;;  %v280_v15 = vld [vmem:[%s19267_s2 + $0x10] sm:$0xff] }
  0xf8   : > { %v13083_v21 = vand.u32 4294901760, %v280_v15 }
  0xf9   : > { %921 = vmatmul.f32.gmra.mxu0 %v12865_v18  ;;  %19983 = vst [vmem:[#allocation75_spill] sm:$0xff] %v13039_v62  ;;  %1206 = vmatpush.msrb.mxu3 %v13039_v62  ;;  %v285_v62 = vld [vmem:[%s19267_s2 + $0x38] sm:$0xff] }
  0xfa   : > { %19987 = vst [vmem:[#allocation79_spill] sm:$0xff] %v13057_v41  ;;  %v13104_v31 = vsub.f32 %v280_v15, %v13083_v21  ;;  %1430 = vmatpush.msra.mxu1 %v13083_v21  ;;  %1077 = vmatpush.msrb.mxu2 %v13083_v21 }
  0xfb   : > { %1212 = vmatpush.msrb.mxu3 %v13057_v41  ;;  %19993 = vst [vmem:[#allocation85_spill] sm:$0xff] %v13083_v21 }
  0xfc   : > { %v13064_v61 = vpop.f32.mrf.mxu1  ;;  %19996 = vst [vmem:[#allocation88_spill] sm:$0xff] %v13104_v31  ;;  %v13118_v15 = vand.u32 4294901760, %v13104_v31  ;;  %1334 = vmatpush.msra.mxu0 %v13104_v31  ;;  %1432 = vmatpush.msra.mxu1 %v13106_v27 }
  0xfd   : > { %1218 = vmatpush.msrb.mxu3 %v13078_v57  ;;  %1079 = vmatpush.msrb.mxu2 %v13106_v27 }
  0xfe   : > { %v13086_v49 = vpop.f32.mrf.mxu0  ;;  %19999 = vst [vmem:[#allocation91_spill] sm:$0xff] %v13118_v15  ;;  %v1240_v23 = vsub.f32 %v13104_v31, %v13118_v15  ;;  %1337 = vmatpush.msra.mxu0 %v13121_v25 }
  0xff   : > { %1002 = vmatmul.f32.gmra.mxu1 %v12865_v18  ;;  %v1234_v18 = vsub.f32 %v13081_v20, %v13101_v40  ;;  %1224 = vmatpush.msrb.mxu3 %v13108_v46  ;;  %v13133_v20 = vand.u32 4294901760, %v13121_v25 }
 0x100   : > { %v13141_v3 = vand.u32 4294901760, %v1240_v23  ;;  %1529 = vmatpush.msra.mxu2 %v13006_v17  ;;  %v664_v23 = vpop.f32.mrf.mxu2 }
 0x101   : > { %925 = vmatmul.f32.gmra.mxu0 %v12883_v29  ;;  %v13128_v32 = vand.u32 4294901760, %v1234_v18  ;;  %20003 = vst [vmem:[#allocation95_spill] sm:$0xff] %v13133_v20  ;;  %1230 = vmatpush.msrb.mxu3 %v13125_v38  ;;  %v1246_v18 = vsub.f32 %v13121_v25, %v13133_v20  ;;  %v598_v38 = vadd.f32 %v12979_v13, %v12975_v43 }
 0x102   : > { %20004 = vst [vmem:[#allocation96_spill] sm:$0xff] %v13141_v3  ;;  %1533 = vmatpush.msra.mxu2 %v13025_v24 }
 0x103   : > { %20002 = vst [vmem:[#allocation94_spill] sm:$0xff] %v13128_v32  ;;  %1236 = vmatpush.msrb.mxu3 %v13128_v32  ;;  %v13151_v6 = vand.u32 4294901760, %v1246_v18  ;;  %v761_v18 = vpop.f32.mrf.mxu3 }
 0x104   : > { %v13137_v39 = vpop.f32.mrf.mxu1  ;;  %1537 = vmatpush.msra.mxu2 %v13044_v22 }
 0x105   : > { %20005 = vst [vmem:[#allocation97_spill] sm:$0xff] %v13151_v6  ;;  %1242 = vmatpush.msrb.mxu3 %v13141_v3 }
 0x106   : > { %v13146_v31 = vpop.f32.mrf.mxu0  ;;  %1541 = vmatpush.msra.mxu2 %v13067_v36 }
 0x107   : > { %1006 = vmatmul.f32.gmra.mxu1 %v12883_v29  ;;  %1248 = vmatpush.msrb.mxu3 %v13151_v6 }
 0x108   : > { %1545 = vmatpush.msra.mxu2 %v13091_v48  ;;  %v669_v36 = vpop.f32.mrf.mxu2 }
 0x109   : > { %929 = vmatmul.f32.gmra.mxu0 %v12901_v47  ;;  %1624 = vmatpush.msra.mxu3 %v12988_v33 }
 0x10a   : > { %1549 = vmatpush.msra.mxu2 %v13101_v40  ;;  %v570_v40 = vadd.f32 %v12937_v5, %v12933_v4 }
 0x10b   : > { %1626 = vmatpush.msra.mxu3 %v12996_v9 }
 0x10c   : > { %v13159_v25 = vpop.f32.mrf.mxu1  ;;  %1553 = vmatpush.msra.mxu2 %v13118_v15  ;;  %v660_v19 = vadd.f32 %v659_v59, %v570_v40  ;;  %v578_v59 = vadd.f32 %v12949_v37, %v12945_v34  ;;  %v582_v37 = vadd.f32 %v12955_v1, %v12951_v53 }
 0x10d   : > { %1628 = vmatpush.msra.mxu3 %v13012_v28  ;;  %v614_v45 = vadd.f32 %v13159_v25, %v13146_v31  ;;  %v281_v25 = vld [vmem:[%s19267_s2 + $0x18] sm:$0xff] }
 0x10e   : > { %v13163_v29 = vpop.f32.mrf.mxu0  ;;  %1557 = vmatpush.msra.mxu2 %v13133_v20  ;;  %v756_v16 = vadd.f32 %v755_v8, %v660_v19  ;;  %v574_v20 = vadd.f32 %v12943_v30, %v12939_v10 }
 0x10f   : > { %1010 = vmatmul.f32.gmra.mxu1 %v12901_v47  ;;  %1630 = vmatpush.msra.mxu3 %v13031_v55  ;;  %v767_v47 = vpop.f32.mrf.mxu3 }
 0x110   : > { %v674_v24 = vpop.f32.mrf.mxu2  ;;  %v665_v3 = vadd.f32 %v664_v23, %v574_v20 }
 0x111   : > { %1632 = vmatpush.msra.mxu3 %v13050_v44 }
 0x113   : > { %1634 = vmatpush.msra.mxu3 %v13061_v11 }
 0x114   : > { %v13172_v22 = vpop.f32.mrf.mxu1 }
 0x115   : > { %1636 = vmatpush.msra.mxu3 %v13083_v21 }
 0x116   : > { %v13176_v48 = vpop.f32.mrf.mxu0 }
 0x117   : > { %1638 = vmatpush.msra.mxu3 %v13106_v27  ;;  %v773_v60 = vpop.f32.mrf.mxu3  ;;  %v762_v27 = vadd.f32 %v761_v18, %v665_v3  ;;  %v675_v18 = vadd.f32 %v674_v24, %v582_v37 }
 0x118   : > { %v679_v4 = vpop.f32.mrf.mxu2 }
 0x11c   : > { %v13182_v15 = vpop.f32.mrf.mxu1 }
 0x11e   : > { %v878_v17 = vpop.f32.mrf.mxu0 }
 0x11f   : > { %v879_v6 = vadd.f32 %v878_v17, %v756_v16  ;;  %v779_v16 = vpop.f32.mrf.mxu3 }
 0x120   : > { %v684_v40 = vpop.f32.mrf.mxu2 }
 0x124   : > { %v959_v14 = vpop.f32.mrf.mxu1 }
 0x125   : > { %v960_v21 = vadd.f32 %v959_v14, %v879_v6  ;;  %v670_v14 = vadd.f32 %v669_v36, %v578_v59 }
 0x126   : > { %v882_v11 = vpop.f32.mrf.mxu0 }
 0x127   : > { %v1015_v7 = vsel %vm331_vm0, %v960_v21, 0  ;;  %v883_v10 = vadd.f32 %v882_v11, %v762_v27  ;;  %v768_v27 = vadd.f32 %v767_v47, %v670_v14  ;;  %v785_v59 = vpop.f32.mrf.mxu3 }
 0x128   : > { %v13187_v5 = vand.u32 4294901760, %v1015_v7 }
 0x12a   : > { %v13192_v19 = vsub.f32 %v1015_v7, %v13187_v5  ;;  %1250 = vmatmul.f32.vlgmr.msrb.gmra.mxu3 %v13187_v5 }
 0x12c   : > { %v963_v17 = vpop.f32.mrf.mxu1  ;;  %1340 = vmatmul.f32.vlgmr.msra.gmra.mxu0 %v13192_v19  ;;  %v13197_v6 = vand.u32 4294901760, %v13192_v19 }
 0x12d   : > { %v964_v20 = vadd.f32 %v963_v17, %v883_v10 }
 0x12e   : > { %v886_v21 = vpop.f32.mrf.mxu0  ;;  %1436 = vmatmul.f32.vlgmr.msra.gmra.mxu1 %v13197_v6  ;;  %v1083_v30 = vsub.f32 %v13192_v19, %v13197_v6 }
 0x12f   : > { %v1018_v7 = vsel %vm331_vm0, %v964_v20, 0  ;;  %v887_v8 = vadd.f32 %v886_v21, %v768_v27  ;;  %v774_v20 = vadd.f32 %v773_v60, %v675_v18  ;;  %v586_v21 = vadd.f32 %v12961_v58, %v12957_v12  ;;  %v791_v18 = vpop.f32.mrf.mxu3 }
 0x130   : > { %v13203_v34 = vand.u32 4294901760, %v1018_v7  ;;  %v13205_v11 = vand.u32 4294901760, %v1083_v30 }
 0x132   : > { %v13210_v36 = vsub.f32 %v1018_v7, %v13203_v34  ;;  %1085 = vmatmul.f32.vlgmr.msrb.gmra.mxu2 %v13205_v11  ;;  %1254 = vmatmul.f32.gmra.mxu3 %v13203_v34  ;;  %v689_v7 = vpop.f32.mrf.mxu2 }
 0x134   : > { %v967_v3 = vpop.f32.mrf.mxu1  ;;  %1345 = vmatmul.f32.gmra.mxu0 %v13210_v36  ;;  %v13216_v23 = vand.u32 4294901760, %v13210_v36 }
 0x135   : > { %v968_v47 = vadd.f32 %v967_v3, %v887_v8  ;;  %v680_v8 = vadd.f32 %v679_v4, %v586_v21 }
 0x136   : > { %v890_v10 = vpop.f32.mrf.mxu0  ;;  %1442 = vmatmul.f32.gmra.mxu1 %v13216_v23  ;;  %v1091_v53 = vsub.f32 %v13210_v36, %v13216_v23 }
 0x137   : > { %v1021_v1 = vsel %vm331_vm0, %v968_v47, 0  ;;  %v891_v30 = vadd.f32 %v890_v10, %v774_v20  ;;  %v797_v32 = vpop.f32.mrf.mxu3 }
 0x138   : > { %v13222_v17 = vand.u32 4294901760, %v1021_v1  ;;  %v13224_v14 = vand.u32 4294901760, %v1091_v53  ;;  %v780_v53 = vadd.f32 %v779_v16, %v680_v8 }
 0x13a   : > { %v13229_v24 = vsub.f32 %v1021_v1, %v13222_v17  ;;  %1093 = vmatmul.f32.gmra.mxu2 %v13224_v14  ;;  %1258 = vmatmul.f32.gmra.mxu3 %v13222_v17  ;;  %v590_v1 = vadd.f32 %v12967_v63, %v12963_v42  ;;  %v694_v16 = vpop.f32.mrf.mxu2 }
 0x13c   : > { %v971_v27 = vpop.f32.mrf.mxu1  ;;  %1350 = vmatmul.f32.gmra.mxu0 %v13229_v24  ;;  %v13235_v37 = vand.u32 4294901760, %v13229_v24 }
 0x13d   : > { %v972_v60 = vadd.f32 %v971_v27, %v891_v30  ;;  %v685_v27 = vadd.f32 %v684_v40, %v590_v1 }
 0x13e   : > { %v894_v3 = vpop.f32.mrf.mxu0  ;;  %1448 = vmatmul.f32.gmra.mxu1 %v13235_v37  ;;  %v1099_v58 = vsub.f32 %v13229_v24, %v13235_v37 }
 0x13f   : > { %v1024_v12 = vsel %vm331_vm0, %v972_v60, 0  ;;  %v895_v20 = vadd.f32 %v894_v3, %v780_v53  ;;  %v594_v53 = vadd.f32 %v12973_v54, %v12969_v26 }
 0x140   : > { %v13241_v47 = vand.u32 4294901760, %v1024_v12  ;;  %v13243_v10 = vand.u32 4294901760, %v1099_v58 }
 0x142   : > { %v13248_v4 = vsub.f32 %v1024_v12, %v13241_v47  ;;  %1101 = vmatmul.f32.gmra.mxu2 %v13243_v10  ;;  %1262 = vmatmul.f32.gmra.mxu3 %v13241_v47  ;;  %v786_v12 = vadd.f32 %v785_v59, %v685_v27 }
 0x144   : > { %20006 = vst [vmem:[#allocation98_spill] sm:$0xff] %v13248_v4  ;;  %v975_v21 = vpop.f32.mrf.mxu1  ;;  %1355 = vmatmul.f32.gmra.mxu0 %v13248_v4  ;;  %v13254_v30 = vand.u32 4294901760, %v13248_v4 }
 0x145   : > { %v976_v60 = vadd.f32 %v975_v21, %v895_v20 }
 0x146   : > { %20007 = vst [vmem:[#allocation99_spill] sm:$0xff] %v13254_v30  ;;  %v898_v8 = vpop.f32.mrf.mxu0  ;;  %1454 = vmatmul.f32.gmra.mxu1 %v13254_v30  ;;  %v1107_v42 = vsub.f32 %v13248_v4, %v13254_v30 }
 0x147   : > { %v1027_v63 = vsel %vm331_vm0, %v976_v60, 0  ;;  %v899_v1 = vadd.f32 %v898_v8, %v786_v12  ;;  %v690_v60 = vadd.f32 %v689_v7, %v594_v53 }
 0x148   : > { %v13260_v58 = vand.u32 4294901760, %v1027_v63  ;;  %v13262_v3 = vand.u32 4294901760, %v1107_v42  ;;  %v699_v42 = vpop.f32.mrf.mxu2 }
 0x149   : > { %v792_v12 = vadd.f32 %v791_v18, %v690_v60 }
 0x14a   : > { %v13267_v40 = vsub.f32 %v1027_v63, %v13260_v58  ;;  %1109 = vmatmul.f32.gmra.mxu2 %v13262_v3  ;;  %1266 = vmatmul.f32.gmra.mxu3 %v13260_v58 }
 0x14c   : > { %20008 = vst [vmem:[#allocation100_spill] sm:$0xff] %v13267_v40  ;;  %v979_v20 = vpop.f32.mrf.mxu1  ;;  %1360 = vmatmul.f32.gmra.mxu0 %v13267_v40  ;;  %v13273_v21 = vand.u32 4294901760, %v13267_v40 }
 0x14d   : > { %v980_v59 = vadd.f32 %v979_v20, %v899_v1  ;;  %v803_v1 = vpop.f32.mrf.mxu3 }
 0x14e   : > { %20009 = vst [vmem:[#allocation101_spill] sm:$0xff] %v13273_v21  ;;  %v902_v27 = vpop.f32.mrf.mxu0  ;;  %1460 = vmatmul.f32.gmra.mxu1 %v13273_v21  ;;  %v1115_v26 = vsub.f32 %v13267_v40, %v13273_v21 }
 0x14f   : > { %v1030_v54 = vsel %vm331_vm0, %v980_v59, 0  ;;  %v903_v53 = vadd.f32 %v902_v27, %v792_v12 }
 0x150   : > { %v13279_v63 = vand.u32 4294901760, %v1030_v54  ;;  %v13281_v8 = vand.u32 4294901760, %v1115_v26  ;;  %v695_v26 = vadd.f32 %v694_v16, %v598_v38  ;;  %v704_v44 = vpop.f32.mrf.mxu2 }
 0x152   : > { %v13286_v7 = vsub.f32 %v1030_v54, %v13279_v63  ;;  %1117 = vmatmul.f32.gmra.mxu2 %v13281_v8  ;;  %1270 = vmatmul.f32.gmra.mxu3 %v13279_v63  ;;  %v798_v12 = vadd.f32 %v797_v32, %v695_v26 }
 0x154   : > { %20010 = vst [vmem:[#allocation102_spill] sm:$0xff] %v13286_v7  ;;  %v983_v20 = vpop.f32.mrf.mxu1  ;;  %1365 = vmatmul.f32.gmra.mxu0 %v13286_v7  ;;  %v13292_v59 = vand.u32 4294901760, %v13286_v7 }
 0x155   : > { %v984_v18 = vadd.f32 %v983_v20, %v903_v53  ;;  %v809_v26 = vpop.f32.mrf.mxu3 }
 0x156   : > { %20011 = vst [vmem:[#allocation103_spill] sm:$0xff] %v13292_v59  ;;  %v906_v60 = vpop.f32.mrf.mxu0  ;;  %1466 = vmatmul.f32.gmra.mxu1 %v13292_v59  ;;  %v1123_v13 = vsub.f32 %v13286_v7, %v13292_v59 }
 0x157   : > { %v1033_v43 = vsel %vm331_vm0, %v984_v18, 0  ;;  %v907_v16 = vadd.f32 %v906_v60, %v798_v12  ;;  %v700_v18 = vadd.f32 %v699_v42, %v602_v0  ;;  %v606_v60 = vadd.f32 %v13064_v61, %v13015_v2  ;;  %v293_v61 = vld [vmem:[%s19267_s2 + $0x78] sm:$0xff] }
 0x158   : > { %v13298_v54 = vand.u32 4294901760, %v1033_v43  ;;  %v13300_v27 = vand.u32 4294901760, %v1123_v13 }
 0x159   : > { %v804_v46 = vadd.f32 %v803_v1, %v700_v18  ;;  %v13335_v18 = vand.u32 4294901760, %v293_v61 }
 0x15a   : > { %v13305_v38 = vsub.f32 %v1033_v43, %v13298_v54  ;;  %1125 = vmatmul.f32.gmra.mxu2 %v13300_v27  ;;  %1274 = vmatmul.f32.gmra.mxu3 %v13298_v54 }
 0x15b   : > { %20016 = vst [vmem:[#allocation108_spill] sm:$0xff] %v13335_v18  ;;  %1705 = vmatpush.msrb.mxu0 %v13335_v18  ;;  %2058 = vmatpush.msrb.mxu3 %v13335_v18 }
 0x15c   : > { %20012 = vst [vmem:[#allocation104_spill] sm:$0xff] %v13305_v38  ;;  %v987_v53 = vpop.f32.mrf.mxu1  ;;  %1370 = vmatmul.f32.gmra.mxu0 %v13305_v38  ;;  %v13311_v20 = vand.u32 4294901760, %v13305_v38 }
 0x15d   : > { %v988_v32 = vadd.f32 %v987_v53, %v907_v16  ;;  %v705_v16 = vadd.f32 %v704_v44, %v606_v60  ;;  %v709_v53 = vpop.f32.mrf.mxu2  ;;  %v291_v44 = vld [vmem:[%s19267_s2 + $0x68] sm:$0xff]  ;;  %v610_v60 = vadd.f32 %v13137_v39, %v13086_v49 }
 0x15e   : > { %20013 = vst [vmem:[#allocation105_spill] sm:$0xff] %v13311_v20  ;;  %v910_v13 = vpop.f32.mrf.mxu0  ;;  %1472 = vmatmul.f32.gmra.mxu1 %v13311_v20  ;;  %v1131_v50 = vsub.f32 %v13305_v38, %v13311_v20 }
 0x15f   : > { %v1036_v35 = vsel %vm331_vm0, %v988_v32, 0  ;;  %v911_v42 = vadd.f32 %v910_v13, %v804_v46 }
 0x160   : > { %v13319_v43 = vand.u32 4294901760, %v1036_v35  ;;  %v13321_v12 = vand.u32 4294901760, %v1131_v50  ;;  %v13345_v50 = vand.u32 4294901760, %v291_v44 }
 0x162   : > { %v13324_v0 = vsub.f32 %v1036_v35, %v13319_v43  ;;  %1133 = vmatmul.f32.gmra.mxu2 %v13321_v12  ;;  %1278 = vmatmul.f32.gmra.mxu3 %v13319_v43  ;;  %20017 = vst [vmem:[#allocation109_spill] sm:$0xff] %v13345_v50  ;;  %v810_v35 = vadd.f32 %v809_v26, %v705_v16  ;;  %v287_v16 = vld [vmem:[%s19267_s2 + $0x48] sm:$0xff] }
 0x163   : > { %1707 = vmatpush.msrb.mxu0 %v13345_v50  ;;  %v13367_v26 = vsub.f32 %v291_v44, %v13345_v50  ;;  %2060 = vmatpush.msrb.mxu3 %v13345_v50  ;;  %v13384_v52 = vand.u32 4294901760, %v287_v16 }
 0x164   : > { %20014 = vst [vmem:[#allocation106_spill] sm:$0xff] %v13324_v0  ;;  %v991_v55 = vpop.f32.mrf.mxu1  ;;  %1375 = vmatmul.f32.gmra.mxu0 %v13324_v0  ;;  %v13330_v2 = vand.u32 4294901760, %v13324_v0 }
 0x165   : > { %v992_v1 = vadd.f32 %v991_v55, %v911_v42  ;;  %v13348_v55 = vsub.f32 %v293_v61, %v13335_v18  ;;  %v815_v42 = vpop.f32.mrf.mxu3  ;;  %20021 = vst [vmem:[#allocation113_spill] sm:$0xff] %v13367_v26  ;;  %v13382_v44 = vand.u32 4294901760, %v13367_v26 }
 0x166   : > { %20015 = vst [vmem:[#allocation107_spill] sm:$0xff] %v13330_v2  ;;  %v914_v32 = vpop.f32.mrf.mxu0  ;;  %1478 = vmatmul.f32.gmra.mxu1 %v13330_v2  ;;  %v1139_v46 = vsub.f32 %v13324_v0, %v13330_v2 }
 0x167   : > { %v1039_v13 = vsel %vm331_vm0, %v992_v1, 0  ;;  %20018 = vst [vmem:[#allocation110_spill] sm:$0xff] %v13348_v55  ;;  %v289_v1 = vld [vmem:[%s19267_s2 + $0x58] sm:$0xff]  ;;  %v13362_v61 = vand.u32 4294901760, %v13348_v55  ;;  %v915_v49 = vadd.f32 %v914_v32, %v810_v35  ;;  %1956 = vmatpush.msrb.mxu2 %v13348_v55 }
 0x168   : > { %v13353_v56 = vand.u32 4294901760, %v1039_v13  ;;  %v13355_v57 = vand.u32 4294901760, %v1139_v46  ;;  %v13364_v41 = vand.u32 4294901760, %v289_v1  ;;  %20023 = vst [vmem:[#allocation115_spill] sm:$0xff] %v13382_v44 }
 0x169   : > { %20019 = vst [vmem:[#allocation111_spill] sm:$0xff] %v13362_v61  ;;  %v1844_v46 = vsub.f32 %v13348_v55, %v13362_v61  ;;  %1959 = vmatpush.msrb.mxu2 %v13367_v26 }
 0x16a   : > { %20020 = vst [vmem:[#allocation112_spill] sm:$0xff] %v13364_v41  ;;  %v13371_v39 = vsub.f32 %v1039_v13, %v13353_v56  ;;  %1141 = vmatmul.f32.gmra.mxu2 %v13355_v57  ;;  %1282 = vmatmul.f32.gmra.mxu3 %v13353_v56  ;;  %v13387_v32 = vsub.f32 %v289_v1, %v13364_v41 }
 0x16b   : > { %1709 = vmatpush.msrb.mxu0 %v13364_v41  ;;  %20024 = vst [vmem:[#allocation116_spill] sm:$0xff] %v13384_v52  ;;  %2062 = vmatpush.msrb.mxu3 %v13364_v41  ;;  %v710_v13 = vadd.f32 %v709_v53, %v610_v60  ;;  %v13398_v51 = vand.u32 4294901760, %v1844_v46  ;;  %v1850_v1 = vsub.f32 %v13367_v26, %v13382_v44  ;;  %v714_v60 = vpop.f32.mrf.mxu2 }
 0x16c   : > { %20022 = vst [vmem:[#allocation114_spill] sm:$0xff] %v13371_v39  ;;  %v995_v35 = vpop.f32.mrf.mxu1  ;;  %1380 = vmatmul.f32.gmra.mxu0 %v13371_v39  ;;  %v13392_v28 = vand.u32 4294901760, %v13371_v39  ;;  %v13404_v53 = vand.u32 4294901760, %v13387_v32  ;;  %v13413_v46 = vsub.f32 %v287_v16, %v13384_v52  ;;  %1962 = vmatpush.msrb.mxu2 %v13387_v32  ;;  %v715_v7 = vadd.f32 %v714_v60, %v614_v45 }
 0x16d   : > { %20025 = vst [vmem:[#allocation117_spill] sm:$0xff] %v13387_v32  ;;  %v996_v9 = vadd.f32 %v995_v35, %v915_v49  ;;  %1711 = vmatpush.msrb.mxu0 %v13384_v52  ;;  %2064 = vmatpush.msrb.mxu3 %v13384_v52  ;;  %v13410_v49 = vand.u32 4294901760, %v285_v62  ;;  %v283_v35 = vld [vmem:[%s19267_s2 + $0x28] sm:$0xff]  ;;  %v13423_v2 = vand.u32 4294901760, %v1850_v1  ;;  %v816_v31 = vadd.f32 %v815_v42, %v710_v13 }
 0x16e   : > { %20026 = vst [vmem:[#allocation118_spill] sm:$0xff] %v13392_v28  ;;  %v918_v33 = vpop.f32.mrf.mxu0  ;;  %1484 = vmatmul.f32.gmra.mxu1 %v13392_v28  ;;  %v1147_v55 = vsub.f32 %v13371_v39, %v13392_v28  ;;  %v1856_v39 = vsub.f32 %v13387_v32, %v13404_v53  ;;  %v13433_v26 = vand.u32 4294901760, %v13413_v46  ;;  %v13435_v38 = vand.u32 4294901760, %v283_v35  ;;  %1965 = vmatpush.msrb.mxu2 %v13413_v46 }
 0x16f   : > { %20027 = vst [vmem:[#allocation119_spill] sm:$0xff] %v13398_v51  ;;  %v1042_v0 = vsel %vm331_vm0, %v996_v9, 0  ;;  %1846 = vmatpush.msrb.mxu1 %v13398_v51  ;;  %1713 = vmatpush.msrb.mxu0 %v13410_v49  ;;  %v13447_v1 = vand.u32 4294901760, %v281_v25  ;;  %v821_v51 = vpop.f32.mrf.mxu3  ;;  %v919_v13 = vadd.f32 %v918_v33, %v816_v31 }
 0x170   : > { %20028 = vst [vmem:[#allocation120_spill] sm:$0xff] %v13404_v53  ;;  %v13427_v16 = vand.u32 4294901760, %v1042_v0  ;;  %v13429_v28 = vand.u32 4294901760, %v1147_v55  ;;  %2066 = vmatpush.msrb.mxu3 %v13410_v49  ;;  %v13442_v9 = vand.u32 4294901760, %v1856_v39  ;;  %v13445_v55 = vsub.f32 %v285_v62, %v13410_v49  ;;  %v279_v62 = vld [vmem:[%s19267_s2 + $0x8] sm:$0xff] }
 0x171   : > { %20029 = vst [vmem:[#allocation121_spill] sm:$0xff] %v13410_v49  ;;  %1852 = vmatpush.msrb.mxu1 %v13423_v2  ;;  %v1862_v42 = vsub.f32 %v13413_v46, %v13433_v26  ;;  %v13458_v39 = vsub.f32 %v283_v35, %v13435_v38  ;;  %1715 = vmatpush.msrb.mxu0 %v13435_v38  ;;  %v13468_v32 = vand.u32 4294901760, %v279_v62 }
 0x172   : > { %20030 = vst [vmem:[#allocation122_spill] sm:$0xff] %v13413_v46  ;;  %v13451_v20 = vsub.f32 %v1042_v0, %v13427_v16  ;;  %1149 = vmatmul.f32.gmra.mxu2 %v13429_v28  ;;  %1286 = vmatmul.f32.gmra.mxu3 %v13427_v16  ;;  %v13466_v0 = vand.u32 4294901760, %v13445_v55 }
 0x173   : > { %20031 = vst [vmem:[#allocation123_spill] sm:$0xff] %v13423_v2  ;;  %1858 = vmatpush.msrb.mxu1 %v13442_v9  ;;  %v13471_v2 = vsub.f32 %v281_v25, %v13447_v1  ;;  %v13477_v33 = vand.u32 4294901760, %v1862_v42  ;;  %v13480_v31 = vand.u32 4294901760, %v13458_v39  ;;  %2068 = vmatpush.msrb.mxu3 %v13435_v38  ;;  %v13490_v60 = vsub.f32 %v279_v62, %v13468_v32  ;;  %v719_v46 = vpop.f32.mrf.mxu2 }
 0x174   : > { %20032 = vst [vmem:[#allocation124_spill] sm:$0xff] %v13433_v26  ;;  %v999_v35 = vpop.f32.mrf.mxu1  ;;  %1385 = vmatmul.f32.gmra.mxu0 %v13451_v20  ;;  %v13475_v59 = vand.u32 4294901760, %v13451_v20  ;;  %v1868_v40 = vsub.f32 %v13445_v55, %v13466_v0  ;;  %1968 = vmatpush.msrb.mxu2 %v13445_v55 }
 0x175   : > { %20033 = vst [vmem:[#allocation125_spill] sm:$0xff] %v13435_v38  ;;  %1717 = vmatpush.msrb.mxu0 %v13447_v1  ;;  %v13487_v45 = vand.u32 4294901760, %v13471_v2  ;;  %2070 = vmatpush.msrb.mxu3 %v13447_v1  ;;  %v13513_v30 = vand.u32 4294901760, %v13490_v60 }
 0x176   : > { %20034 = vst [vmem:[#allocation126_spill] sm:$0xff] %v13442_v9  ;;  %v1000_v9 = vadd.f32 %v999_v35, %v919_v13  ;;  %v922_v25 = vpop.f32.mrf.mxu0  ;;  %1490 = vmatmul.f32.gmra.mxu1 %v13475_v59  ;;  %v1155_v42 = vsub.f32 %v13451_v20, %v13475_v59  ;;  %v1874_v13 = vsub.f32 %v13458_v39, %v13480_v31  ;;  %v13501_v21 = vand.u32 4294901760, %v1868_v40 }
 0x177   : > { %20035 = vst [vmem:[#allocation127_spill] sm:$0xff] %v13445_v55  ;;  %1864 = vmatpush.msrb.mxu1 %v13477_v33  ;;  %1719 = vmatpush.msrb.mxu0 %v13468_v32  ;;  %v1880_v62 = vsub.f32 %v13471_v2, %v13487_v45  ;;  %v822_v40 = vadd.f32 %v821_v51, %v715_v7 }
 0x178   : > { %20036 = vst [vmem:[#allocation128_spill] sm:$0xff] %v13447_v1  ;;  %v1045_v35 = vsel %vm331_vm0, %v1000_v9, 0  ;;  %2072 = vmatpush.msrb.mxu3 %v13468_v32  ;;  %v618_v9 = vadd.f32 %v13172_v22, %v13163_v29  ;;  %v827_v22 = vpop.f32.mrf.mxu3  ;;  %1971 = vmatpush.msrb.mxu2 %v13458_v39 }
 0x179   : > { %20037 = vst [vmem:[#allocation129_spill] sm:$0xff] %v13451_v20  ;;  %v13506_v4 = vand.u32 4294901760, %v1045_v35  ;;  %v13508_v20 = vand.u32 4294901760, %v1155_v42  ;;  %2169 = vmatpush.msra.mxu0 %v13362_v61  ;;  %1870 = vmatpush.msrb.mxu1 %v13501_v21  ;;  %v923_v51 = vadd.f32 %v922_v25, %v822_v40 }
 0x17a   : > { %20038 = vst [vmem:[#allocation130_spill] sm:$0xff] %v13458_v39  ;;  %1974 = vmatpush.msrb.mxu2 %v13471_v2 }
 0x17b   : > { %20039 = vst [vmem:[#allocation131_spill] sm:$0xff] %v13466_v0  ;;  %v13524_v42 = vsub.f32 %v1045_v35, %v13506_v4  ;;  %1157 = vmatmul.f32.gmra.mxu2 %v13508_v20  ;;  %1290 = vmatmul.f32.gmra.mxu3 %v13506_v4 }
 0x17c   : > { %20040 = vst [vmem:[#allocation132_spill] sm:$0xff] %v13468_v32  ;;  %2173 = vmatpush.msra.mxu0 %v13382_v44  ;;  %v1003_v29 = vpop.f32.mrf.mxu1  ;;  %1977 = vmatpush.msrb.mxu2 %v13490_v60 }
 0x17d   : > { %20041 = vst [vmem:[#allocation133_spill] sm:$0xff] %v13471_v2  ;;  %1390 = vmatmul.f32.gmra.mxu0 %v13524_v42  ;;  %v13534_v7 = vand.u32 4294901760, %v13524_v42  ;;  %v1004_v55 = vadd.f32 %v1003_v29, %v923_v51  ;;  %v622_v51 = vadd.f32 %v13182_v15, %v13176_v48  ;;  %v724_v29 = vpop.f32.mrf.mxu2 }
 0x17e   : > { %20042 = vst [vmem:[#allocation134_spill] sm:$0xff] %v13475_v59  ;;  %v13510_v59 = vand.u32 4294901760, %v1874_v13  ;;  %v1886_v13 = vsub.f32 %v13490_v60, %v13513_v30  ;;  %2177 = vmatpush.msra.mxu0 %v13404_v53  ;;  %v926_v25 = vpop.f32.mrf.mxu0 }
 0x17f   : > { %20043 = vst [vmem:[#allocation135_spill] sm:$0xff] %v13477_v33  ;;  %v13520_v33 = vand.u32 4294901760, %v1880_v62  ;;  %v720_v62 = vadd.f32 %v719_v46, %v618_v9  ;;  %1496 = vmatmul.f32.gmra.mxu1 %v13534_v7  ;;  %v1163_v40 = vsub.f32 %v13524_v42, %v13534_v7  ;;  %v1048_v44 = vsel %vm331_vm0, %v1004_v55, 0 }
 0x180   : > { %20044 = vst [vmem:[#allocation136_spill] sm:$0xff] %v13480_v31  ;;  %1876 = vmatpush.msrb.mxu1 %v13510_v59  ;;  %v13536_v35 = vand.u32 4294901760, %v1886_v13  ;;  %2181 = vmatpush.msra.mxu0 %v13433_v26  ;;  %v13548_v46 = vand.u32 4294901760, %v1048_v44  ;;  %v725_v15 = vadd.f32 %v724_v29, %v622_v51 }
 0x181   : > { %20045 = vst [vmem:[#allocation137_spill] sm:$0xff] %v13487_v45  ;;  %v13550_v9 = vand.u32 4294901760, %v1163_v40  ;;  %v828_v13 = vadd.f32 %v827_v22, %v720_v62 }
 0x182   : > { %20046 = vst [vmem:[#allocation138_spill] sm:$0xff] %v13490_v60  ;;  %1882 = vmatpush.msrb.mxu1 %v13520_v33  ;;  %2185 = vmatpush.msra.mxu0 %v13466_v0  ;;  %v13558_v55 = vsub.f32 %v1048_v44, %v13548_v46  ;;  %v833_v44 = vpop.f32.mrf.mxu3 }
 0x183   : > { %20047 = vst [vmem:[#allocation139_spill] sm:$0xff] %v13501_v21  ;;  %1165 = vmatmul.f32.gmra.mxu2 %v13550_v9  ;;  %1294 = vmatmul.f32.gmra.mxu3 %v13548_v46  ;;  %v927_v40 = vadd.f32 %v926_v25, %v828_v13  ;;  %v834_v29 = vadd.f32 %v833_v44, %v725_v15 }
 0x184   : > { %20048 = vst [vmem:[#allocation140_spill] sm:$0xff] %v13510_v59  ;;  %1888 = vmatpush.msrb.mxu1 %v13536_v35  ;;  %2189 = vmatpush.msra.mxu0 %v13480_v31  ;;  %v1007_v60 = vpop.f32.mrf.mxu1  ;;  %v13566_v48 = vand.u32 4294901760, %v13558_v55 }
 0x185   : > { %20049 = vst [vmem:[#allocation141_spill] sm:$0xff] %v13513_v30  ;;  %1395 = vmatmul.f32.gmra.mxu0 %v13558_v55  ;;  %v1008_v22 = vadd.f32 %v1007_v60, %v927_v40 }
 0x186   : > { %20050 = vst [vmem:[#allocation142_spill] sm:$0xff] %v13520_v33  ;;  %2264 = vmatpush.msra.mxu1 %v13335_v18  ;;  %2193 = vmatpush.msra.mxu0 %v13487_v45  ;;  %v1171_v62 = vsub.f32 %v13558_v55, %v13566_v48  ;;  %v930_v51 = vpop.f32.mrf.mxu0 }
 0x187   : > { %20051 = vst [vmem:[#allocation143_spill] sm:$0xff] %v13536_v35  ;;  %1502 = vmatmul.f32.gmra.mxu1 %v13566_v48  ;;  %v1051_v25 = vsel %vm331_vm0, %v1008_v22, 0  ;;  %v931_v22 = vadd.f32 %v930_v51, %v834_v29 }
 0x188   : > { %2266 = vmatpush.msra.mxu1 %v13345_v50  ;;  %2197 = vmatpush.msra.mxu0 %v13513_v30  ;;  %v13576_v13 = vand.u32 4294901760, %v1051_v25  ;;  %v13578_v60 = vand.u32 4294901760, %v1171_v62 }
 0x18a   : > { %2268 = vmatpush.msra.mxu1 %v13364_v41  ;;  %v13582_v40 = vsub.f32 %v1051_v25, %v13576_v13 }
 0x18b   : > { %1173 = vmatmul.f32.gmra.mxu2 %v13578_v60  ;;  %1298 = vmatmul.f32.gmra.mxu3 %v13576_v13 }
 0x18c   : > { %2270 = vmatpush.msra.mxu1 %v13384_v52  ;;  %v1011_v2 = vpop.f32.mrf.mxu1  ;;  %v13589_v39 = vand.u32 4294901760, %v13582_v40 }
 0x18d   : > { %1400 = vmatmul.f32.gmra.mxu0 %v13582_v40  ;;  %v1012_v62 = vadd.f32 %v1011_v2, %v931_v22 }
 0x18e   : > { %2272 = vmatpush.msra.mxu1 %v13410_v49  ;;  %v1179_v15 = vsub.f32 %v13582_v40, %v13589_v39 }
 0x18f   : > { %1508 = vmatmul.f32.gmra.mxu1 %v13589_v39  ;;  %v1054_v44 = vsel %vm331_vm0, %v1012_v62, 0 }
 0x190   : > { %2274 = vmatpush.msra.mxu1 %v13435_v38  ;;  %v13597_v25 = vand.u32 4294901760, %v1054_v44  ;;  %v13599_v51 = vand.u32 4294901760, %v1179_v15 }
 0x192   : > { %2276 = vmatpush.msra.mxu1 %v13447_v1  ;;  %v13602_v29 = vsub.f32 %v1054_v44, %v13597_v25  ;;  %v20083_v1 = vld [vmem:[#allocation105_spill] sm:$0xff] }
 0x193   : > { %1181 = vmatmul.f32.gmra.mxu2 %v13599_v51  ;;  %1302 = vmatmul.f32.gmra.mxu3 %v13597_v25 }
 0x194   : > { %2278 = vmatpush.msra.mxu1 %v13468_v32  ;;  %20052 = vst [vmem:[#allocation144_spill] sm:$0xff] %v13602_v29  ;;  %v13608_v2 = vand.u32 4294901760, %v13602_v29 }
 0x195   : > { %1405 = vmatmul.f32.gmra.mxu0 %v13602_v29 }
 0x196   : > { %v1187_v22 = vsub.f32 %v13602_v29, %v13608_v2 }
 0x197   : > { %1514 = vmatmul.f32.gmra.mxu1 %v13608_v2 }
 0x198   : > { %v13613_v62 = vand.u32 4294901760, %v1187_v22 }
 0x19b   : > { %1189 = vmatmul.f32.gmra.mxu2 %v13613_v62  ;;  %1640 = vmatmul.f32.vlgmr.msra.gmra.mxu3 %v13187_v5 }
 0x19d   : > { %1725 = vmatmul.f32.vlgmr.msrb.gmra.mxu0 %v13205_v11 }
 0x19f   : > { %1890 = vmatmul.f32.vlgmr.msrb.gmra.mxu1 %v13187_v5 }
 0x1a3   : > { %1559 = vmatmul.f32.vlgmr.msra.gmra.mxu2 %v13187_v5  ;;  %1644 = vmatmul.f32.gmra.mxu3 %v13203_v34 }
 0x1a5   : > { %1733 = vmatmul.f32.gmra.mxu0 %v13224_v14 }
 0x1a7   : > { %1894 = vmatmul.f32.gmra.mxu1 %v13203_v34 }
 0x1a9   : > { %v1341_v15 = vpop.f32.mrf.mxu0 }
 0x1ab   : > { %1563 = vmatmul.f32.gmra.mxu2 %v13203_v34  ;;  %1648 = vmatmul.f32.gmra.mxu3 %v13222_v17  ;;  %v1437_v44 = vpop.f32.mrf.mxu1 }
 0x1ad   : > { %1741 = vmatmul.f32.gmra.mxu0 %v13243_v10  ;;  %v1251_v22 = vpop.f32.mrf.mxu3 }
 0x1af   : > { %1898 = vmatmul.f32.gmra.mxu1 %v13222_v17 }
 0x1b1   : > { %v1346_v11 = vpop.f32.mrf.mxu0 }
 0x1b3   : > { %1567 = vmatmul.f32.gmra.mxu2 %v13222_v17  ;;  %1652 = vmatmul.f32.gmra.mxu3 %v13241_v47  ;;  %v1443_v30 = vpop.f32.mrf.mxu1 }
 0x1b5   : > { %1749 = vmatmul.f32.gmra.mxu0 %v13262_v3  ;;  %v1086_v14 = vpop.f32.mrf.mxu2  ;;  %v1255_v45 = vpop.f32.mrf.mxu3 }
 0x1b6   : > { %v1252_v31 = vadd.f32 %v1251_v22, %v1086_v14 }
 0x1b7   : > { %1902 = vmatmul.f32.gmra.mxu1 %v13241_v47 }
 0x1b8   : > { %v1342_v0 = vadd.f32 %v1341_v15, %v1252_v31 }
 0x1b9   : > { %v1351_v26 = vpop.f32.mrf.mxu0 }
 0x1ba   : > { %v13633_v10 = vadd.f32 %v1437_v44, %v1342_v0 }
 0x1bb   : > { %1571 = vmatmul.f32.gmra.mxu2 %v13241_v47  ;;  %1656 = vmatmul.f32.gmra.mxu3 %v13260_v58  ;;  %v1449_v53 = vpop.f32.mrf.mxu1 }
 0x1bd   : > { %1757 = vmatmul.f32.gmra.mxu0 %v13281_v8  ;;  %v1094_v61 = vpop.f32.mrf.mxu2  ;;  %v1259_v35 = vpop.f32.mrf.mxu3 }
 0x1be   : > { %v1256_v33 = vadd.f32 %v1255_v45, %v1094_v61 }
 0x1bf   : > { %1906 = vmatmul.f32.gmra.mxu1 %v13260_v58 }
 0x1c0   : > { %v1347_v3 = vadd.f32 %v1346_v11, %v1256_v33 }
 0x1c1   : > { %v1356_v22 = vpop.f32.mrf.mxu0 }
 0x1c2   : > { %v13639_v31 = vadd.f32 %v1443_v30, %v1347_v3 }
 0x1c3   : > { %1575 = vmatmul.f32.gmra.mxu2 %v13260_v58  ;;  %1660 = vmatmul.f32.gmra.mxu3 %v13279_v63  ;;  %v1455_v15 = vpop.f32.mrf.mxu1 }
 0x1c5   : > { %1765 = vmatmul.f32.gmra.mxu0 %v13300_v27  ;;  %v1102_v0 = vpop.f32.mrf.mxu2  ;;  %v1263_v44 = vpop.f32.mrf.mxu3 }
 0x1c6   : > { %v1260_v14 = vadd.f32 %v1259_v35, %v1102_v0 }
 0x1c7   : > { %1910 = vmatmul.f32.gmra.mxu1 %v13279_v63 }
 0x1c8   : > { %v1352_v8 = vadd.f32 %v1351_v26, %v1260_v14 }
 0x1c9   : > { %v1361_v61 = vpop.f32.mrf.mxu0 }
 0x1ca   : > { %v13645_v33 = vadd.f32 %v1449_v53, %v1352_v8 }
 0x1cb   : > { %1579 = vmatmul.f32.gmra.mxu2 %v13279_v63  ;;  %1664 = vmatmul.f32.gmra.mxu3 %v13298_v54  ;;  %v1461_v45 = vpop.f32.mrf.mxu1 }
 0x1cd   : > { %1773 = vmatmul.f32.gmra.mxu0 %v13321_v12  ;;  %v1110_v30 = vpop.f32.mrf.mxu2  ;;  %v1267_v11 = vpop.f32.mrf.mxu3 }
 0x1ce   : > { %v1264_v3 = vadd.f32 %v1263_v44, %v1110_v30 }
 0x1cf   : > { %1914 = vmatmul.f32.gmra.mxu1 %v13298_v54 }
 0x1d0   : > { %v1357_v27 = vadd.f32 %v1356_v22, %v1264_v3 }
 0x1d1   : > { %v1366_v35 = vpop.f32.mrf.mxu0 }
 0x1d2   : > { %v13651_v26 = vadd.f32 %v1455_v15, %v1357_v27 }
 0x1d3   : > { %1583 = vmatmul.f32.gmra.mxu2 %v13298_v54  ;;  %1668 = vmatmul.f32.gmra.mxu3 %v13319_v43  ;;  %v1467_v0 = vpop.f32.mrf.mxu1 }
 0x1d5   : > { %1781 = vmatmul.f32.gmra.mxu0 %v13355_v57  ;;  %v1118_v53 = vpop.f32.mrf.mxu2  ;;  %v1271_v14 = vpop.f32.mrf.mxu3 }
 0x1d6   : > { %v1268_v8 = vadd.f32 %v1267_v11, %v1118_v53 }
 0x1d7   : > { %1918 = vmatmul.f32.gmra.mxu1 %v13319_v43 }
 0x1d8   : > { %v1362_v12 = vadd.f32 %v1361_v61, %v1268_v8 }
 0x1d9   : > { %v1371_v44 = vpop.f32.mrf.mxu0 }
 0x1da   : > { %v13657_v22 = vadd.f32 %v1461_v45, %v1362_v12 }
 0x1db   : > { %1587 = vmatmul.f32.gmra.mxu2 %v13319_v43  ;;  %1672 = vmatmul.f32.gmra.mxu3 %v13353_v56  ;;  %v1473_v30 = vpop.f32.mrf.mxu1 }
 0x1dd   : > { %1789 = vmatmul.f32.gmra.mxu0 %v13429_v28  ;;  %v1126_v15 = vpop.f32.mrf.mxu2  ;;  %v1275_v3 = vpop.f32.mrf.mxu3 }
 0x1de   : > { %v1272_v27 = vadd.f32 %v1271_v14, %v1126_v15 }
 0x1df   : > { %1922 = vmatmul.f32.gmra.mxu1 %v13353_v56 }
 0x1e0   : > { %v1367_v57 = vadd.f32 %v1366_v35, %v1272_v27 }
 0x1e1   : > { %v1376_v11 = vpop.f32.mrf.mxu0 }
 0x1e2   : > { %v13663_v61 = vadd.f32 %v1467_v0, %v1367_v57 }
 0x1e3   : > { %1591 = vmatmul.f32.gmra.mxu2 %v13353_v56  ;;  %1676 = vmatmul.f32.gmra.mxu3 %v13427_v16  ;;  %v1479_v53 = vpop.f32.mrf.mxu1 }
 0x1e5   : > { %1797 = vmatmul.f32.gmra.mxu0 %v13508_v20  ;;  %v1134_v45 = vpop.f32.mrf.mxu2  ;;  %v1279_v8 = vpop.f32.mrf.mxu3 }
 0x1e6   : > { %v1276_v12 = vadd.f32 %v1275_v3, %v1134_v45 }
 0x1e7   : > { %1926 = vmatmul.f32.gmra.mxu1 %v13427_v16 }
 0x1e8   : > { %v1372_v28 = vadd.f32 %v1371_v44, %v1276_v12 }
 0x1e9   : > { %v1381_v14 = vpop.f32.mrf.mxu0 }
 0x1ea   : > { %v13669_v35 = vadd.f32 %v1473_v30, %v1372_v28 }
 0x1eb   : > { %1595 = vmatmul.f32.gmra.mxu2 %v13427_v16  ;;  %1680 = vmatmul.f32.gmra.mxu3 %v13506_v4  ;;  %v1485_v15 = vpop.f32.mrf.mxu1 }
 0x1ed   : > { %1805 = vmatmul.f32.gmra.mxu0 %v13550_v9  ;;  %v1142_v0 = vpop.f32.mrf.mxu2  ;;  %v1283_v27 = vpop.f32.mrf.mxu3 }
 0x1ee   : > { %v1280_v57 = vadd.f32 %v1279_v8, %v1142_v0 }
 0x1ef   : > { %1930 = vmatmul.f32.gmra.mxu1 %v13506_v4 }
 0x1f0   : > { %v1377_v20 = vadd.f32 %v1376_v11, %v1280_v57 }
 0x1f1   : > { %v1386_v3 = vpop.f32.mrf.mxu0 }
 0x1f2   : > { %v13675_v44 = vadd.f32 %v1479_v53, %v1377_v20 }
 0x1f3   : > { %1599 = vmatmul.f32.gmra.mxu2 %v13506_v4  ;;  %1684 = vmatmul.f32.gmra.mxu3 %v13548_v46  ;;  %v1491_v45 = vpop.f32.mrf.mxu1 }
 0x1f5   : > { %1813 = vmatmul.f32.gmra.mxu0 %v13578_v60  ;;  %v1150_v30 = vpop.f32.mrf.mxu2  ;;  %v1287_v12 = vpop.f32.mrf.mxu3 }
 0x1f6   : > { %v1284_v9 = vadd.f32 %v1283_v27, %v1150_v30 }
 0x1f7   : > { %1934 = vmatmul.f32.gmra.mxu1 %v13548_v46 }
 0x1f8   : > { %v1382_v8 = vadd.f32 %v1381_v14, %v1284_v9 }
 0x1fa   : > { %v1391_v28 = vpop.f32.mrf.mxu0  ;;  %v13681_v11 = vadd.f32 %v1485_v15, %v1382_v8 }
 0x1fb   : > { %1603 = vmatmul.f32.gmra.mxu2 %v13548_v46  ;;  %1688 = vmatmul.f32.gmra.mxu3 %v13576_v13 }
 0x1fc   : > { %v1497_v0 = vpop.f32.mrf.mxu1 }
 0x1fd   : > { %1821 = vmatmul.f32.gmra.mxu0 %v13599_v51 }
 0x1fe   : > { %v1158_v53 = vpop.f32.mrf.mxu2  ;;  %v1291_v57 = vpop.f32.mrf.mxu3 }
 0x1ff   : > { %v1288_v60 = vadd.f32 %v1287_v12, %v1158_v53  ;;  %1938 = vmatmul.f32.gmra.mxu1 %v13576_v13 }
 0x201   : > { %v1387_v27 = vadd.f32 %v1386_v3, %v1288_v60 }
 0x202   : > { %v1396_v20 = vpop.f32.mrf.mxu0 }
 0x203   : > { %1607 = vmatmul.f32.gmra.mxu2 %v13576_v13  ;;  %1692 = vmatmul.f32.gmra.mxu3 %v13597_v25  ;;  %v13690_v14 = vadd.f32 %v1491_v45, %v1387_v27 }
 0x204   : > { %v1503_v15 = vpop.f32.mrf.mxu1 }
 0x205   : > { %1829 = vmatmul.f32.gmra.mxu0 %v13613_v62 }
 0x206   : > { %v1166_v30 = vpop.f32.mrf.mxu2  ;;  %v1295_v51 = vpop.f32.mrf.mxu3 }
 0x207   : > { %v1292_v9 = vadd.f32 %v1291_v57, %v1166_v30  ;;  %1942 = vmatmul.f32.gmra.mxu1 %v13597_v25 }
 0x209   : > { %v1392_v8 = vadd.f32 %v1391_v28, %v1292_v9 }
 0x20a   : > { %v1401_v12 = vpop.f32.mrf.mxu0 }
 0x20b   : > { %1611 = vmatmul.f32.gmra.mxu2 %v13597_v25  ;;  %2076 = vmatmul.f32.vlgmr.msrb.gmra.mxu3 %v13197_v6  ;;  %v13696_v3 = vadd.f32 %v1497_v0, %v1392_v8 }
 0x20c   : > { %v1509_v53 = vpop.f32.mrf.mxu1 }
 0x20d   : > { %2199 = vmatmul.f32.vlgmr.msra.gmra.mxu0 %v13187_v5 }
 0x20e   : > { %v1174_v45 = vpop.f32.mrf.mxu2  ;;  %v1299_v60 = vpop.f32.mrf.mxu3 }
 0x20f   : > { %v1296_v27 = vadd.f32 %v1295_v51, %v1174_v45  ;;  %2280 = vmatmul.f32.vlgmr.msra.gmra.mxu1 %v13187_v5 }
 0x211   : > { %v1397_v62 = vadd.f32 %v1396_v20, %v1296_v27 }
 0x212   : > { %v1406_v57 = vpop.f32.mrf.mxu0 }
 0x213   : > { %1980 = vmatmul.f32.vlgmr.msrb.gmra.mxu2 %v13192_v19  ;;  %2082 = vmatmul.f32.gmra.mxu3 %v13216_v23  ;;  %v13702_v28 = vadd.f32 %v1503_v15, %v1397_v62 }
 0x214   : > { %v1515_v30 = vpop.f32.mrf.mxu1 }
 0x215   : > { %20053 = vst [vmem:[#allocation145_spill] sm:$0xff] %v13702_v28  ;;  %2203 = vmatmul.f32.gmra.mxu0 %v13203_v34 }
 0x216   : > { %v1182_v6 = vpop.f32.mrf.mxu2  ;;  %v1303_v0 = vpop.f32.mrf.mxu3 }
 0x217   : > { %v1300_v9 = vadd.f32 %v1299_v60, %v1182_v6  ;;  %2284 = vmatmul.f32.gmra.mxu1 %v13203_v34  ;;  %v20063_v6 = vld [vmem:[#allocation101_spill] sm:$0xff] }
 0x219   : > { %v1402_v8 = vadd.f32 %v1401_v12, %v1300_v9 }
 0x21a   : > { %v13706_v51 = vpop.f32.mrf.mxu0 }
 0x21b   : > { %20054 = vst [vmem:[#allocation146_spill] sm:$0xff] %v13706_v51  ;;  %1985 = vmatmul.f32.gmra.mxu2 %v13210_v36  ;;  %2088 = vmatmul.f32.gmra.mxu3 %v13235_v37  ;;  %v13710_v5 = vadd.f32 %v1509_v53, %v1402_v8  ;;  %v20058_v36 = vld [vmem:[#allocation99_spill] sm:$0xff]  ;;  %v20125_v51 = vld [vmem:[#allocation106_spill] sm:$0xff] }
 0x21c   : > { %v13712_v19 = vpop.f32.mrf.mxu1 }
 0x21d   : > { %20055 = vst [vmem:[#allocation147_spill] sm:$0xff] %v13710_v5  ;;  %2207 = vmatmul.f32.gmra.mxu0 %v13222_v17 }
 0x21e   : > { %20056 = vst [vmem:[#allocation148_spill] sm:$0xff] %v13712_v19  ;;  %v1190_v23 = vpop.f32.mrf.mxu2  ;;  %v1641_v20 = vpop.f32.mrf.mxu3 }
 0x21f   : > { %v1304_v15 = vadd.f32 %v1303_v0, %v1190_v23  ;;  %2288 = vmatmul.f32.gmra.mxu1 %v13222_v17  ;;  %v309_v23 = vld [vmem:[%s19268_s3 + $0x78] sm:$0xff] }
 0x221   : > { %v1407_v34 = vadd.f32 %v1406_v57, %v1304_v15  ;;  %v13748_v15 = vand.u32 4294901760, %v309_v23 }
 0x222   : > { %v13716_v12 = vpop.f32.mrf.mxu0 }
 0x223   : > { %20057 = vst [vmem:[#allocation149_spill] sm:$0xff] %v13716_v12  ;;  %1990 = vmatmul.f32.gmra.mxu2 %v13229_v24  ;;  %2094 = vmatmul.f32.gmra.mxu3 %v20058_v36  ;;  %v13720_v37 = vadd.f32 %v1515_v30, %v1407_v34  ;;  %v20062_v24 = vld [vmem:[#allocation98_spill] sm:$0xff]  ;;  %v20067_v36 = vld [vmem:[#allocation100_spill] sm:$0xff] }
 0x224   : > { %v13722_v53 = vpop.f32.mrf.mxu1  ;;  %20066 = vst [vmem:[#allocation152_spill] sm:$0xff] %v13748_v15  ;;  %2909 = vmatpush.msrb.mxu1 %v13748_v15  ;;  %2492 = vmatpush.msra.mxu2 %v13748_v15  ;;  %v298_v12 = vld [vmem:[%s19268_s3 + $0x20] sm:$0xff] }
 0x225   : > { %20059 = vst [vmem:[#allocation99_spill] sm:$0xff] %v13720_v37  ;;  %2211 = vmatmul.f32.gmra.mxu0 %v13241_v47  ;;  %v20126_v37 = vld [vmem:[#allocation118_spill] sm:$0xff] }
 0x226   : > { %20060 = vst [vmem:[#allocation150_spill] sm:$0xff] %v13722_v53  ;;  %v1560_v45 = vpop.f32.mrf.mxu2  ;;  %v1645_v60 = vpop.f32.mrf.mxu3 }
 0x227   : > { %v1561_v27 = vadd.f32 %v1560_v45, %v13633_v10  ;;  %2292 = vmatmul.f32.gmra.mxu1 %v13241_v47  ;;  %v20068_v45 = vld [vmem:[#allocation103_spill] sm:$0xff] }
 0x229   : > { %v1642_v17 = vadd.f32 %v1641_v20, %v1561_v27 }
 0x22a   : > { %v13728_v62 = vpop.f32.mrf.mxu0 }
 0x22b   : > { %20061 = vst [vmem:[#allocation151_spill] sm:$0xff] %v13728_v62  ;;  %v2336_v57 = vmul.f32 4.366812, %v1642_v17  ;;  %1995 = vmatmul.f32.gmra.mxu2 %v20062_v24  ;;  %2100 = vmatmul.f32.gmra.mxu3 %v20063_v6 }
 0x22c   : > { %v13732_v30 = vpop.f32.mrf.mxu1 }
 0x22d   : > { %20064 = vst [vmem:[#allocation98_spill] sm:$0xff] %v13732_v30  ;;  %v13734_v0 = vadd.f32 -2.117904, %v2336_v57  ;;  %2215 = vmatmul.f32.gmra.mxu0 %v13260_v58  ;;  %v307_v57 = vld [vmem:[%s19268_s3 + $0x68] sm:$0xff] }
 0x22e   : > { %v1564_v9 = vpop.f32.mrf.mxu2  ;;  %v1649_v8 = vpop.f32.mrf.mxu3 }
 0x22f   : > { %2392 = vst [vmem:[%s13737_s19] sm:$0xff] %v13734_v0  ;;  %v1565_v47 = vadd.f32 %v1564_v9, %v13639_v31  ;;  %2296 = vmatmul.f32.gmra.mxu1 %v13260_v58  ;;  %v308_v31 = vld [vmem:[%s19268_s3 + $0x70] sm:$0xff] }
 0x230   : > { %v13760_v27 = vand.u32 4294901760, %v308_v31 }
 0x231   : > { %v1646_v10 = vadd.f32 %v1645_v60, %v1565_v47  ;;  %v13758_v60 = vsub.f32 %v309_v23, %v13748_v15 }
 0x232   : > { %v13746_v20 = vpop.f32.mrf.mxu0  ;;  %20071 = vst [vmem:[#allocation153_spill] sm:$0xff] %v13760_v27  ;;  %v13776_v47 = vsub.f32 %v308_v31, %v13760_v27  ;;  %2911 = vmatpush.msrb.mxu1 %v13760_v27  ;;  %2494 = vmatpush.msra.mxu2 %v13760_v27 }
 0x233   : > { %20065 = vst [vmem:[#allocation101_spill] sm:$0xff] %v13746_v20  ;;  %v2338_v34 = vmul.f32 4.366812, %v1646_v10  ;;  %2000 = vmatmul.f32.gmra.mxu2 %v20067_v36  ;;  %2106 = vmatmul.f32.gmra.mxu3 %v20068_v45  ;;  %v13773_v9 = vand.u32 4294901760, %v13758_v60  ;;  %v13779_v10 = vand.u32 4294901760, %v307_v57  ;;  %v20104_v20 = vld [vmem:[#allocation107_spill] sm:$0xff] }
 0x234   : > { %v13755_v58 = vpop.f32.mrf.mxu1  ;;  %20070 = vst [vmem:[#allocation103_spill] sm:$0xff] %v13758_v60  ;;  %2791 = vmatpush.msrb.mxu0 %v13758_v60  ;;  %v13793_v45 = vand.u32 4294901760, %v13776_v47 }
 0x235   : > { %20069 = vst [vmem:[#allocation100_spill] sm:$0xff] %v13755_v58  ;;  %v13764_v17 = vadd.f32 -2.117904, %v2338_v34  ;;  %2219 = vmatmul.f32.gmra.mxu0 %v13279_v63  ;;  %v306_v34 = vld [vmem:[%s19268_s3 + $0x60] sm:$0xff]  ;;  %v2639_v36 = vsub.f32 %v13758_v60, %v13773_v9  ;;  %v13796_v31 = vsub.f32 %v307_v57, %v13779_v10  ;;  %2913 = vmatpush.msrb.mxu1 %v13779_v10 }
 0x236   : > { %v1568_v24 = vpop.f32.mrf.mxu2  ;;  %v13770_v6 = vpop.f32.mrf.mxu3  ;;  %20072 = vst [vmem:[#allocation154_spill] sm:$0xff] %v13773_v9  ;;  %2794 = vmatpush.msrb.mxu0 %v13776_v47  ;;  %2496 = vmatpush.msra.mxu2 %v13779_v10  ;;  %v2645_v57 = vsub.f32 %v13776_v47, %v13793_v45  ;;  %v20103_v58 = vld [vmem:[#allocation104_spill] sm:$0xff] }
 0x237   : > { %20073 = vst [vmem:[#allocation155_spill] sm:$0xff] %v13776_v47  ;;  %v1569_v23 = vadd.f32 %v1568_v24, %v13645_v33  ;;  %2300 = vmatmul.f32.gmra.mxu1 %v13279_v63  ;;  %v13799_v33 = vand.u32 4294901760, %v306_v34  ;;  %v305_v24 = vld [vmem:[%s19268_s3 + $0x58] sm:$0xff]  ;;  %v13808_v59 = vand.u32 4294901760, %v2639_v36  ;;  %v13813_v21 = vand.u32 4294901760, %v13796_v31  ;;  %v304_v47 = vld [vmem:[%s19268_s3 + $0x50] sm:$0xff] }
 0x238   : > { %20074 = vst [vmem:[#allocation156_spill] sm:$0xff] %v13779_v10  ;;  %2797 = vmatpush.msrb.mxu0 %v13796_v31  ;;  %v13822_v36 = vand.u32 4294901760, %v305_v24 }
 0x239   : > { %2395 = vst [vmem:[%s13737_s19 + $0x10] sm:$0xff] %v13764_v17  ;;  %v1650_v63 = vadd.f32 %v1649_v8, %v1569_v23  ;;  %v13816_v32 = vsub.f32 %v306_v34, %v13799_v33  ;;  %2915 = vmatpush.msrb.mxu1 %v13799_v33  ;;  %v20082_v23 = vld [vmem:[#allocation102_spill] sm:$0xff]  ;;  %2641 = vmatpush.msra.mxu3 %v13808_v59  ;;  %v13830_v34 = vand.u32 4294901760, %v2645_v57  ;;  %v303_v57 = vld [vmem:[%s19268_s3 + $0x48] sm:$0xff] }
 0x23a   : > { %20075 = vst [vmem:[#allocation157_spill] sm:$0xff] %v13793_v45  ;;  %v13806_v60 = vpop.f32.mrf.mxu0  ;;  %v2651_v49 = vsub.f32 %v13796_v31, %v13813_v21  ;;  %v13844_v52 = vsub.f32 %v305_v24, %v13822_v36  ;;  %v13860_v24 = vand.u32 4294901760, %v303_v57  ;;  %2498 = vmatpush.msra.mxu2 %v13799_v33 }
 0x23b   : > { %20076 = vst [vmem:[#allocation158_spill] sm:$0xff] %v13796_v31  ;;  %v2340_v8 = vmul.f32 4.366812, %v1650_v63  ;;  %2005 = vmatmul.f32.gmra.mxu2 %v20082_v23  ;;  %2112 = vmatmul.f32.gmra.mxu3 %v20083_v1  ;;  %v13835_v63 = vand.u32 4294901760, %v13816_v32  ;;  %v13838_v1 = vand.u32 4294901760, %v304_v47 }
 0x23c   : > { %20077 = vst [vmem:[#allocation159_spill] sm:$0xff] %v13799_v33  ;;  %v13827_v38 = vpop.f32.mrf.mxu1  ;;  %2800 = vmatpush.msrb.mxu0 %v13816_v32  ;;  %2917 = vmatpush.msrb.mxu1 %v13822_v36  ;;  %v13853_v41 = vand.u32 4294901760, %v2651_v49  ;;  %v302_v49 = vld [vmem:[%s19268_s3 + $0x40] sm:$0xff] }
 0x23d   : > { %20078 = vst [vmem:[#allocation160_spill] sm:$0xff] %v13806_v60  ;;  %v13840_v23 = vadd.f32 -2.117904, %v2340_v8  ;;  %2223 = vmatmul.f32.gmra.mxu0 %v13298_v54  ;;  %2647 = vmatpush.msra.mxu3 %v13830_v34  ;;  %v2657_v8 = vsub.f32 %v13816_v32, %v13835_v63  ;;  %v13858_v50 = vsub.f32 %v304_v47, %v13838_v1 }
 0x23e   : > { %20079 = vst [vmem:[#allocation161_spill] sm:$0xff] %v13808_v59  ;;  %v1572_v31 = vpop.f32.mrf.mxu2  ;;  %v13850_v59 = vpop.f32.mrf.mxu3  ;;  %2803 = vmatpush.msrb.mxu0 %v13844_v52  ;;  %2919 = vmatpush.msrb.mxu1 %v13838_v1 }
 0x23f   : > { %20080 = vst [vmem:[#allocation162_spill] sm:$0xff] %v13813_v21  ;;  %v1573_v18 = vadd.f32 %v1572_v31, %v13651_v26  ;;  %2304 = vmatmul.f32.gmra.mxu1 %v13298_v54  ;;  %2653 = vmatpush.msra.mxu3 %v13853_v41  ;;  %v13875_v47 = vand.u32 4294901760, %v2657_v8  ;;  %v13881_v26 = vsub.f32 %v303_v57, %v13860_v24  ;;  %v13883_v54 = vand.u32 4294901760, %v302_v49  ;;  %v301_v8 = vld [vmem:[%s19268_s3 + $0x38] sm:$0xff] }
 0x240   : > { %20081 = vst [vmem:[#allocation163_spill] sm:$0xff] %v13816_v32  ;;  %v13878_v32 = vand.u32 4294901760, %v13858_v50  ;;  %2806 = vmatpush.msrb.mxu0 %v13858_v50  ;;  %2500 = vmatpush.msra.mxu2 %v13822_v36 }
 0x241   : > { %20084 = vst [vmem:[#allocation102_spill] sm:$0xff] %v13822_v36  ;;  %v1654_v31 = vadd.f32 %v13770_v6, %v1573_v18  ;;  %2659 = vmatpush.msra.mxu3 %v13875_v47  ;;  %v13900_v18 = vand.u32 4294901760, %v13881_v26  ;;  %v13903_v6 = vsub.f32 %v302_v49, %v13883_v54  ;;  %2921 = vmatpush.msrb.mxu1 %v13860_v24 }
 0x242   : > { %20085 = vst [vmem:[#allocation105_spill] sm:$0xff] %v13827_v38  ;;  %v2669_v57 = vsub.f32 %v13858_v50, %v13878_v32  ;;  %2809 = vmatpush.msrb.mxu0 %v13881_v26  ;;  %2502 = vmatpush.msra.mxu2 %v13838_v1 }
 0x243   : > { %20086 = vst [vmem:[#allocation164_spill] sm:$0xff] %v13830_v34  ;;  %v13868_v34 = vand.u32 4294901760, %v13844_v52  ;;  %v2342_v60 = vmul.f32 4.366812, %v1654_v31  ;;  %2010 = vmatmul.f32.gmra.mxu2 %v20103_v58  ;;  %2118 = vmatmul.f32.gmra.mxu3 %v20104_v20  ;;  %v2675_v49 = vsub.f32 %v13881_v26, %v13900_v18  ;;  %v13922_v62 = vand.u32 4294901760, %v13903_v6  ;;  %v299_v31 = vld [vmem:[%s19268_s3 + $0x28] sm:$0xff] }
 0x244   : > { %20087 = vst [vmem:[#allocation165_spill] sm:$0xff] %v13835_v63  ;;  %v13917_v30 = vand.u32 4294901760, %v2669_v57  ;;  %2812 = vmatpush.msrb.mxu0 %v13903_v6  ;;  %2923 = vmatpush.msrb.mxu1 %v13883_v54 }
 0x245   : > { %20088 = vst [vmem:[#allocation166_spill] sm:$0xff] %v13838_v1  ;;  %v2663_v38 = vsub.f32 %v13844_v52, %v13868_v34  ;;  %v13929_v20 = vadd.f32 -2.117904, %v2342_v60  ;;  %2227 = vmatmul.f32.gmra.mxu0 %v13319_v43  ;;  %2504 = vmatpush.msra.mxu2 %v13860_v24 }
 0x246   : > { %20089 = vst [vmem:[#allocation167_spill] sm:$0xff] %v13840_v23  ;;  %v1576_v57 = vpop.f32.mrf.mxu2 }
 0x247   : > { %20090 = vst [vmem:[#allocation168_spill] sm:$0xff] %v13844_v52  ;;  %v13905_v52 = vand.u32 4294901760, %v301_v8  ;;  %v1577_v53 = vadd.f32 %v1576_v57, %v13657_v22  ;;  %2308 = vmatmul.f32.gmra.mxu1 %v13319_v43  ;;  %v13971_v22 = vand.u32 4294901760, %v298_v12  ;;  %2506 = vmatpush.msra.mxu2 %v13883_v54 }
 0x248   : > { %20091 = vst [vmem:[#allocation169_spill] sm:$0xff] %v13853_v41  ;;  %v13894_v41 = vpop.f32.mrf.mxu0 }
 0x249   : > { %20092 = vst [vmem:[#allocation170_spill] sm:$0xff] %v13858_v50  ;;  %v300_v50 = vld [vmem:[%s19268_s3 + $0x30] sm:$0xff]  ;;  %2925 = vmatpush.msrb.mxu1 %v13905_v52  ;;  %2508 = vmatpush.msra.mxu2 %v13905_v52 }
 0x24a   : > { %20093 = vst [vmem:[#allocation171_spill] sm:$0xff] %v13860_v24  ;;  %v13933_v58 = vand.u32 4294901760, %v300_v50 }
 0x24b   : > { %2397 = vst [vmem:[%s13737_s19 + $0x20] sm:$0xff] %v13840_v23  ;;  %2015 = vmatmul.f32.gmra.mxu2 %v20125_v51  ;;  %2124 = vmatmul.f32.gmra.mxu3 %v20126_v37 }
 0x24c   : > { %20094 = vst [vmem:[#allocation172_spill] sm:$0xff] %v13868_v34  ;;  %2927 = vmatpush.msrb.mxu1 %v13933_v58  ;;  %2510 = vmatpush.msra.mxu2 %v13933_v58 }
 0x24d   : > { %20095 = vst [vmem:[#allocation173_spill] sm:$0xff] %v13875_v47  ;;  %v13915_v47 = vpop.f32.mrf.mxu1  ;;  %2231 = vmatmul.f32.gmra.mxu0 %v13353_v56 }
 0x24e   : > { %20096 = vst [vmem:[#allocation174_spill] sm:$0xff] %v13878_v32  ;;  %v1580_v5 = vpop.f32.mrf.mxu2 }
 0x24f   : > { %20097 = vst [vmem:[#allocation175_spill] sm:$0xff] %v13881_v26  ;;  %v13938_v26 = vpop.f32.mrf.mxu3  ;;  %v1581_v28 = vadd.f32 %v1580_v5, %v13663_v61  ;;  %2312 = vmatmul.f32.gmra.mxu1 %v13353_v56 }
 0x250   : > { %20098 = vst [vmem:[#allocation176_spill] sm:$0xff] %v13883_v54 }
 0x251   : > { %20099 = vst [vmem:[#allocation177_spill] sm:$0xff] %v13894_v41  ;;  %v13910_v41 = vand.u32 4294901760, %v2663_v38  ;;  %v13926_v38 = vsub.f32 %v301_v8, %v13905_v52  ;;  %v2681_v8 = vsub.f32 %v13903_v6, %v13922_v62  ;;  %v1662_v5 = vadd.f32 %v13938_v26, %v1581_v28 }
 0x252   : > { %20100 = vst [vmem:[#allocation178_spill] sm:$0xff] %v13900_v18 }
 0x253   : > { %20101 = vst [vmem:[#allocation179_spill] sm:$0xff] %v13903_v6  ;;  %2665 = vmatpush.msra.mxu3 %v13910_v41  ;;  %v13945_v60 = vand.u32 4294901760, %v13926_v38  ;;  %v13962_v6 = vand.u32 4294901760, %v2681_v8  ;;  %2815 = vmatpush.msrb.mxu0 %v13926_v38  ;;  %v297_v8 = vld [vmem:[%s19268_s3 + $0x18] sm:$0xff]  ;;  %v2346_v26 = vmul.f32 4.366812, %v1662_v5 }
 0x254   : > { %20102 = vst [vmem:[#allocation180_spill] sm:$0xff] %v13905_v52 }
 0x255   : > { %20105 = vst [vmem:[#allocation104_spill] sm:$0xff] %v13910_v41  ;;  %v13949_v41 = vand.u32 4294901760, %v299_v31  ;;  %2671 = vmatpush.msra.mxu3 %v13917_v30  ;;  %v2687_v19 = vsub.f32 %v13926_v38, %v13945_v60  ;;  %v14090_v5 = vadd.f32 -2.117904, %v2346_v26  ;;  %2235 = vmatmul.f32.gmra.mxu0 %v13427_v16 }
 0x256   : > { %20106 = vst [vmem:[#allocation107_spill] sm:$0xff] %v13915_v47  ;;  %v13940_v47 = vand.u32 4294901760, %v2675_v49  ;;  %v13957_v49 = vsub.f32 %v300_v50, %v13933_v58  ;;  %v1658_v50 = vadd.f32 %v13850_v59, %v1577_v53  ;;  %v13992_v59 = vsub.f32 %v298_v12, %v13971_v22 }
 0x257   : > { %20107 = vst [vmem:[#allocation181_spill] sm:$0xff] %v13917_v30  ;;  %v13969_v43 = vsub.f32 %v299_v31, %v13949_v41  ;;  %v13984_v30 = vand.u32 4294901760, %v2687_v19  ;;  %v13994_v53 = vand.u32 4294901760, %v297_v8  ;;  %2929 = vmatpush.msrb.mxu1 %v13949_v41  ;;  %2512 = vmatpush.msra.mxu2 %v13949_v41 }
 0x258   : > { %20108 = vst [vmem:[#allocation182_spill] sm:$0xff] %v13922_v62  ;;  %2677 = vmatpush.msra.mxu3 %v13940_v47  ;;  %v13976_v57 = vand.u32 4294901760, %v13957_v49  ;;  %2818 = vmatpush.msrb.mxu0 %v13957_v49 }
 0x259   : > { %20109 = vst [vmem:[#allocation183_spill] sm:$0xff] %v13926_v38  ;;  %v13982_v38 = vpop.f32.mrf.mxu0  ;;  %v13987_v31 = vand.u32 4294901760, %v13969_v43  ;;  %v14013_v51 = vsub.f32 %v297_v8, %v13994_v53  ;;  %2931 = vmatpush.msrb.mxu1 %v13971_v22  ;;  %2514 = vmatpush.msra.mxu2 %v13971_v22 }
 0x25a   : > { %20110 = vst [vmem:[#allocation184_spill] sm:$0xff] %v13929_v20  ;;  %v2693_v19 = vsub.f32 %v13957_v49, %v13976_v57  ;;  %2683 = vmatpush.msra.mxu3 %v13962_v6  ;;  %2821 = vmatpush.msrb.mxu0 %v13969_v43 }
 0x25b   : > { %20111 = vst [vmem:[#allocation185_spill] sm:$0xff] %v13933_v58  ;;  %v2699_v12 = vsub.f32 %v13969_v43, %v13987_v31  ;;  %2933 = vmatpush.msrb.mxu1 %v13994_v53  ;;  %2516 = vmatpush.msra.mxu2 %v13994_v53 }
 0x25c   : > { %20112 = vst [vmem:[#allocation186_spill] sm:$0xff] %v13940_v47  ;;  %v2344_v47 = vmul.f32 4.366812, %v1658_v50  ;;  %v14009_v50 = vand.u32 4294901760, %v13992_v59  ;;  %2689 = vmatpush.msra.mxu3 %v13984_v30  ;;  %2824 = vmatpush.msrb.mxu0 %v13992_v59 }
 0x25d   : > { %20113 = vst [vmem:[#allocation187_spill] sm:$0xff] %v13945_v60  ;;  %v14027_v8 = vand.u32 4294901760, %v2699_v12  ;;  %2316 = vmatmul.f32.gmra.mxu1 %v13427_v16  ;;  %2239 = vmatmul.f32.gmra.mxu0 %v13506_v4 }
 0x25e   : > { %20114 = vst [vmem:[#allocation188_spill] sm:$0xff] %v13949_v41  ;;  %2827 = vmatpush.msrb.mxu0 %v14013_v51 }
 0x25f   : > { %2399 = vst [vmem:[%s13737_s19 + $0x30] sm:$0xff] %v13929_v20  ;;  %v14003_v20 = vpop.f32.mrf.mxu1 }
 0x260   : > { %20115 = vst [vmem:[#allocation189_spill] sm:$0xff] %v13957_v49  ;;  %v14017_v49 = vadd.f32 -2.117904, %v2344_v47  ;;  %v2705_v47 = vsub.f32 %v13992_v59, %v14009_v50 }
 0x261   : > { %20116 = vst [vmem:[#allocation190_spill] sm:$0xff] %v13962_v6  ;;  %v295_v6 = vld [vmem:[%s19268_s3 + $0x8] sm:$0xff] }
 0x262   : > { %20117 = vst [vmem:[#allocation191_spill] sm:$0xff] %v13969_v43  ;;  %v1665_v43 = vpop.f32.mrf.mxu3  ;;  %v14043_v12 = vand.u32 4294901760, %v295_v6  ;;  %v14049_v29 = vand.u32 4294901760, %v2705_v47  ;;  %v14065_v47 = vpop.f32.mrf.mxu0 }
 0x263   : > { %20118 = vst [vmem:[#allocation192_spill] sm:$0xff] %v13971_v22 }
 0x264   : > { %20119 = vst [vmem:[#allocation193_spill] sm:$0xff] %v13976_v57 }
 0x265   : > { %20120 = vst [vmem:[#allocation194_spill] sm:$0xff] %v13982_v38  ;;  %v296_v38 = vld [vmem:[%s19268_s3 + $0x10] sm:$0xff]  ;;  %2320 = vmatmul.f32.gmra.mxu1 %v13506_v4  ;;  %2243 = vmatmul.f32.gmra.mxu0 %v13548_v46 }
 0x266   : > { %20121 = vst [vmem:[#allocation195_spill] sm:$0xff] %v13984_v30  ;;  %v14015_v37 = vand.u32 4294901760, %v296_v38  ;;  %v294_v30 = vld [vmem:[%s19268_s3] sm:$0xff] }
 0x267   : > { %20122 = vst [vmem:[#allocation196_spill] sm:$0xff] %v13987_v31  ;;  %v14057_v56 = vand.u32 4294901760, %v294_v30 }
 0x268   : > { %20123 = vst [vmem:[#allocation197_spill] sm:$0xff] %v13992_v59  ;;  %v14036_v23 = vsub.f32 %v296_v38, %v14015_v37  ;;  %v14063_v59 = vsub.f32 %v295_v6, %v14043_v12  ;;  %2935 = vmatpush.msrb.mxu1 %v14015_v37  ;;  %2518 = vmatpush.msra.mxu2 %v14015_v37 }
 0x269   : > { %20124 = vst [vmem:[#allocation198_spill] sm:$0xff] %v13994_v53  ;;  %v14074_v28 = vsub.f32 %v294_v30, %v14057_v56 }
 0x26a   : > { %20127 = vst [vmem:[#allocation106_spill] sm:$0xff] %v14003_v20  ;;  %v14020_v20 = vand.u32 4294901760, %v2693_v19  ;;  %v14033_v19 = vand.u32 4294901760, %v14013_v51  ;;  %v14055_v61 = vand.u32 4294901760, %v14036_v23  ;;  %v14079_v6 = vand.u32 4294901760, %v14063_v59  ;;  %2830 = vmatpush.msrb.mxu0 %v14036_v23  ;;  %2937 = vmatpush.msrb.mxu1 %v14043_v12 }
 0x26b   : > { %20128 = vst [vmem:[#allocation118_spill] sm:$0xff] %v14009_v50  ;;  %v14088_v30 = vand.u32 4294901760, %v14074_v28  ;;  %2520 = vmatpush.msra.mxu2 %v14043_v12 }
 0x26c   : > { %20129 = vst [vmem:[#allocation199_spill] sm:$0xff] %v14013_v51  ;;  %2695 = vmatpush.msra.mxu3 %v14020_v20  ;;  %v2711_v38 = vsub.f32 %v14013_v51, %v14033_v19  ;;  %v20145_v51 = vld [vmem:[#allocation134_spill] sm:$0xff]  ;;  %2833 = vmatpush.msrb.mxu0 %v14063_v59 }
 0x26d   : > { %20130 = vst [vmem:[#allocation200_spill] sm:$0xff] %v14015_v37  ;;  %2130 = vmatmul.f32.gmra.mxu3 %v20145_v51  ;;  %v2723_v51 = vsub.f32 %v14063_v59, %v14079_v6  ;;  %2939 = vmatpush.msrb.mxu1 %v14057_v56 }
 0x26e   : > { %20131 = vst [vmem:[#allocation201_spill] sm:$0xff] %v14017_v49  ;;  %2701 = vmatpush.msra.mxu3 %v14027_v8  ;;  %2836 = vmatpush.msrb.mxu0 %v14074_v28 }
 0x26f   : > { %20132 = vst [vmem:[#allocation202_spill] sm:$0xff] %v14020_v20  ;;  %v14068_v20 = vand.u32 4294901760, %v2711_v38  ;;  %2522 = vmatpush.msra.mxu2 %v14057_v56  ;;  %2324 = vmatmul.f32.gmra.mxu1 %v13548_v46 }
 0x270   : > { %20133 = vst [vmem:[#allocation203_spill] sm:$0xff] %v14027_v8  ;;  %v14081_v8 = vpop.f32.mrf.mxu1  ;;  %2707 = vmatpush.msra.mxu3 %v14049_v29  ;;  %2247 = vmatmul.f32.gmra.mxu0 %v13576_v13 }
 0x271   : > { %20134 = vst [vmem:[#allocation204_spill] sm:$0xff] %v14033_v19  ;;  %v20144_v19 = vld [vmem:[#allocation114_spill] sm:$0xff]  ;;  %3028 = vmatpush.msrb.mxu2 %v13773_v9 }
 0x272   : > { %20135 = vst [vmem:[#allocation205_spill] sm:$0xff] %v14036_v23  ;;  %2020 = vmatmul.f32.gmra.mxu2 %v20144_v19  ;;  %v1584_v19 = vpop.f32.mrf.mxu2  ;;  %2713 = vmatpush.msra.mxu3 %v14068_v20 }
 0x273   : > { %2401 = vst [vmem:[%s13737_s19 + $0x40] sm:$0xff] %v14017_v49  ;;  %v2717_v49 = vsub.f32 %v14036_v23, %v14055_v61  ;;  %v1585_v26 = vadd.f32 %v1584_v19, %v13669_v35  ;;  %v20152_v35 = vld [vmem:[#allocation129_spill] sm:$0xff]  ;;  %3032 = vmatpush.msrb.mxu2 %v13793_v45 }
 0x274   : > { %20136 = vst [vmem:[#allocation206_spill] sm:$0xff] %v14043_v12 }
 0x275   : > { %20137 = vst [vmem:[#allocation207_spill] sm:$0xff] %v14049_v29  ;;  %v14084_v38 = vand.u32 4294901760, %v2717_v49  ;;  %v2729_v49 = vsub.f32 %v14074_v28, %v14088_v30  ;;  %v14104_v29 = vand.u32 4294901760, %v2723_v51  ;;  %v1666_v23 = vadd.f32 %v1665_v43, %v1585_v26  ;;  %2136 = vmatmul.f32.gmra.mxu3 %v13534_v7  ;;  %3036 = vmatpush.msrb.mxu2 %v13813_v21  ;;  %v20168_v21 = vld [vmem:[#allocation201_spill] sm:$0xff] }
 0x276   : > { %20138 = vst [vmem:[#allocation208_spill] sm:$0xff] %v14055_v61  ;;  %v14253_v45 = vand.u32 4294901760, %v20168_v21 }
 0x277   : > { %20139 = vst [vmem:[#allocation209_spill] sm:$0xff] %v14057_v56  ;;  %2719 = vmatpush.msra.mxu3 %v14084_v38  ;;  %v2348_v16 = vmul.f32 4.366812, %v1666_v23  ;;  %3040 = vmatpush.msrb.mxu2 %v13835_v63 }
 0x278   : > { %20140 = vst [vmem:[#allocation210_spill] sm:$0xff] %v14063_v59  ;;  %v14119_v51 = vpop.f32.mrf.mxu1  ;;  %2328 = vmatmul.f32.gmra.mxu1 %v13576_v13  ;;  %2251 = vmatmul.f32.gmra.mxu0 %v13597_v25 }
 0x279   : > { %20141 = vst [vmem:[#allocation211_spill] sm:$0xff] %v14065_v47  ;;  %v14108_v47 = vand.u32 4294901760, %v2729_v49  ;;  %2725 = vmatpush.msra.mxu3 %v14104_v29  ;;  %v14123_v43 = vadd.f32 -2.117904, %v2348_v16  ;;  %3044 = vmatpush.msrb.mxu2 %v13868_v34 }
 0x27a   : > { %20142 = vst [vmem:[#allocation212_spill] sm:$0xff] %v14068_v20  ;;  %v14113_v20 = vpop.f32.mrf.mxu0  ;;  %2025 = vmatmul.f32.gmra.mxu2 %v20152_v35  ;;  %v1588_v19 = vpop.f32.mrf.mxu2 }
 0x27b   : > { %20143 = vst [vmem:[#allocation213_spill] sm:$0xff] %v14074_v28  ;;  %2731 = vmatpush.msra.mxu3 %v14108_v47  ;;  %v1589_v7 = vadd.f32 %v1588_v19, %v13675_v44  ;;  %3048 = vmatpush.msrb.mxu2 %v13878_v32 }
 0x27c   : > { %20146 = vst [vmem:[#allocation114_spill] sm:$0xff] %v14079_v6 }
 0x27d   : > { %20147 = vst [vmem:[#allocation134_spill] sm:$0xff] %v14081_v8  ;;  %v1669_v8 = vpop.f32.mrf.mxu3  ;;  %3147 = vmatpush.msrb.mxu3 %v13748_v15  ;;  %3052 = vmatpush.msrb.mxu2 %v13900_v18  ;;  %v20165_v18 = vld [vmem:[#allocation184_spill] sm:$0xff] }
 0x27e   : > { %20148 = vst [vmem:[#allocation214_spill] sm:$0xff] %v14084_v38  ;;  %v1670_v23 = vadd.f32 %v1669_v8, %v1589_v7  ;;  %2142 = vmatmul.f32.gmra.mxu3 %v13566_v48  ;;  %v14242_v32 = vand.u32 4294901760, %v20165_v18 }
 0x27f   : > { %20149 = vst [vmem:[#allocation215_spill] sm:$0xff] %v14088_v30  ;;  %3149 = vmatpush.msrb.mxu3 %v13760_v27  ;;  %3056 = vmatpush.msrb.mxu2 %v13922_v62 }
 0x280   : > { %2403 = vst [vmem:[%s13737_s19 + $0x50] sm:$0xff] %v14090_v5  ;;  %v2350_v16 = vmul.f32 4.366812, %v1670_v23  ;;  %v14142_v4 = vpop.f32.mrf.mxu1  ;;  %2332 = vmatmul.f32.gmra.mxu1 %v13597_v25 }
 0x281   : > { %20150 = vst [vmem:[#allocation216_spill] sm:$0xff] %v14104_v29  ;;  %3151 = vmatpush.msrb.mxu3 %v13779_v10  ;;  %3060 = vmatpush.msrb.mxu2 %v13945_v60 }
 0x282   : > { %20151 = vst [vmem:[#allocation217_spill] sm:$0xff] %v14108_v47  ;;  %v14136_v26 = vpop.f32.mrf.mxu0  ;;  %2030 = vmatmul.f32.gmra.mxu2 %v13524_v42  ;;  %v14146_v44 = vadd.f32 -2.117904, %v2350_v16  ;;  %v1592_v8 = vpop.f32.mrf.mxu2  ;;  %v14179_v16 = vand.u32 4294901760, %v13734_v0 }
 0x283   : > { %2405 = vst [vmem:[%s13737_s19 + $0x60] sm:$0xff] %v14123_v43  ;;  %3153 = vmatpush.msrb.mxu3 %v13799_v33  ;;  %v1593_v42 = vadd.f32 %v1592_v8, %v13681_v11  ;;  %3064 = vmatpush.msrb.mxu2 %v13976_v57  ;;  %v20160_v57 = vld [vmem:[#allocation167_spill] sm:$0xff] }
 0x284   : > { %2407 = vst [vmem:[%s13737_s19 + $0x70] sm:$0xff] %v14146_v44  ;;  %v20211_v33 = vld [vmem:[#allocation107_spill] sm:$0xff] }
 0x285   : > { %v1673_v49 = vpop.f32.mrf.mxu3  ;;  %3155 = vmatpush.msrb.mxu3 %v13822_v36  ;;  %3068 = vmatpush.msrb.mxu2 %v13987_v31  ;;  %20169 = vst [vmem:[#allocation184_spill] sm:$0xff] %v14253_v45  ;;  %v314_v36 = vld [vmem:[%s19268_s3 + $0xa0] sm:$0xff] }
 0x286   : > { %v1674_v48 = vadd.f32 %v1673_v49, %v1593_v42  ;;  %2148 = vmatmul.f32.gmra.mxu3 %v13589_v39 }
 0x287   : > { %3157 = vmatpush.msrb.mxu3 %v13838_v1  ;;  %3072 = vmatpush.msrb.mxu2 %v14009_v50  ;;  %v315_v1 = vld [vmem:[%s19268_s3 + $0xa8] sm:$0xff] }
 0x288   : > { %v2352_v7 = vmul.f32 4.366812, %v1674_v48  ;;  %v14163_v11 = vpop.f32.mrf.mxu1 }
 0x289   : > { %3159 = vmatpush.msrb.mxu3 %v13860_v24 }
 0x28a   : > { %v14157_v19 = vpop.f32.mrf.mxu0  ;;  %2035 = vmatmul.f32.gmra.mxu2 %v13558_v55  ;;  %v14167_v46 = vadd.f32 -2.117904, %v2352_v7  ;;  %v1596_v49 = vpop.f32.mrf.mxu2 }
 0x28b   : > { %3161 = vmatpush.msrb.mxu3 %v13883_v54  ;;  %v1597_v39 = vadd.f32 %v1596_v49, %v13690_v14 }
 0x28c   : > { %2409 = vst [vmem:[%s13737_s19 + $0x80] sm:$0xff] %v14167_v46 }
 0x28d   : > { %v1677_v35 = vpop.f32.mrf.mxu3  ;;  %3163 = vmatpush.msrb.mxu3 %v13905_v52  ;;  %v317_v52 = vld [vmem:[%s19268_s3 + $0xb8] sm:$0xff] }
 0x28e   : > { %v1678_v55 = vadd.f32 %v1677_v35, %v1597_v39  ;;  %2154 = vmatmul.f32.gmra.mxu3 %v13608_v2  ;;  %v2524_v35 = vsub.f32 %v13734_v0, %v14179_v16  ;;  %v14205_v0 = vand.u32 4294901760, %v13764_v17 }
 0x28f   : > { %3165 = vmatpush.msrb.mxu3 %v13933_v58  ;;  %v316_v58 = vld [vmem:[%s19268_s3 + $0xb0] sm:$0xff] }
 0x290   : > { %v2354_v42 = vmul.f32 4.366812, %v1678_v55  ;;  %v14187_v13 = vpop.f32.mrf.mxu1  ;;  %v2525_v49 = vand.u32 4294901760, %v2524_v35  ;;  %20154 = vst [vmem:[#allocation218_spill] sm:$0xff] %v14205_v0  ;;  %v20156_v55 = vld [vmem:[#allocation204_spill] sm:$0xff]  ;;  %2839 = vmatmul.f32.vlgmr.msrb.gmra.mxu0 %v2524_v35 }
 0x291   : > { %3167 = vmatpush.msrb.mxu3 %v13949_v41  ;;  %20153 = vst [vmem:[#allocation129_spill] sm:$0xff] %v14187_v13  ;;  %3076 = vmatpush.msrb.mxu2 %v20156_v55 }
 0x292   : > { %v14181_v8 = vpop.f32.mrf.mxu0  ;;  %2040 = vmatmul.f32.gmra.mxu2 %v13582_v40  ;;  %v14191_v14 = vadd.f32 -2.117904, %v2354_v42  ;;  %v1600_v48 = vpop.f32.mrf.mxu2  ;;  %2943 = vmatmul.f32.vlgmr.msrb.gmra.mxu1 %v2525_v49 }
 0x293   : > { %3169 = vmatpush.msrb.mxu3 %v13971_v22  ;;  %v1601_v40 = vadd.f32 %v1600_v48, %v13696_v3  ;;  %v20157_v3 = vld [vmem:[#allocation144_spill] sm:$0xff]  ;;  %3080 = vmatpush.msrb.mxu2 %v14055_v61  ;;  %v2526_v48 = vsub.f32 %v2524_v35, %v2525_v49  ;;  %v14227_v35 = vand.u32 4294901760, %v20160_v57 }
 0x294   : > { %2411 = vst [vmem:[%s13737_s19 + $0x90] sm:$0xff] %v14191_v14 }
 0x295   : > { %v1681_v23 = vpop.f32.mrf.mxu3  ;;  %3171 = vmatpush.msrb.mxu3 %v13994_v53  ;;  %3084 = vmatpush.msrb.mxu2 %v14079_v6 }
 0x296   : > { %v1682_v2 = vadd.f32 %v1681_v23, %v1601_v40  ;;  %2733 = vmatmul.f32.vlgmr.msra.gmra.mxu3 %v14179_v16  ;;  %v2532_v40 = vsub.f32 %v13764_v17, %v14205_v0 }
 0x297   : > { %3173 = vmatpush.msrb.mxu3 %v14015_v37  ;;  %3088 = vmatpush.msrb.mxu2 %v14088_v30  ;;  %v14265_v37 = vand.u32 4294901760, %v14090_v5 }
 0x298   : > { %v2356_v42 = vmul.f32 4.366812, %v1682_v2  ;;  %v14213_v25 = vpop.f32.mrf.mxu1  ;;  %v20159_v2 = vld [vmem:[#allocation145_spill] sm:$0xff]  ;;  %v2533_v31 = vand.u32 4294901760, %v2532_v40  ;;  %2844 = vmatmul.f32.gmra.mxu0 %v2532_v40 }
 0x299   : > { %3175 = vmatpush.msrb.mxu3 %v14043_v12  ;;  %20158 = vst [vmem:[#allocation144_spill] sm:$0xff] %v14213_v25 }
 0x29a   : > { %v14207_v39 = vpop.f32.mrf.mxu0  ;;  %2045 = vmatmul.f32.gmra.mxu2 %v20157_v3  ;;  %v14217_v23 = vadd.f32 -2.117904, %v2356_v42  ;;  %v1604_v50 = vpop.f32.mrf.mxu2  ;;  %v2527_v42 = vand.u32 4294901760, %v2526_v48  ;;  %20161 = vst [vmem:[#allocation145_spill] sm:$0xff] %v14227_v35  ;;  %2949 = vmatmul.f32.gmra.mxu1 %v2533_v31 }
 0x29b   : > { %20155 = vst [vmem:[#allocation219_spill] sm:$0xff] %v14207_v39  ;;  %3177 = vmatpush.msrb.mxu3 %v14057_v56  ;;  %v1605_v3 = vadd.f32 %v1604_v50, %v20159_v2  ;;  %v2534_v50 = vsub.f32 %v2532_v40, %v2533_v31  ;;  %v20164_v2 = vld [vmem:[#allocation147_spill] sm:$0xff]  ;;  %v2548_v31 = vsub.f32 %v20165_v18, %v14242_v32  ;;  %v20171_v56 = vld [vmem:[#allocation148_spill] sm:$0xff] }
 0x29c   : > { %2413 = vst [vmem:[%s13737_s19 + $0xa0] sm:$0xff] %v14217_v23 }
 0x29d   : > { %v1685_v7 = vpop.f32.mrf.mxu3  ;;  %20166 = vst [vmem:[#allocation147_spill] sm:$0xff] %v14242_v32 }
 0x29e   : > { %v1686_v61 = vadd.f32 %v1685_v7, %v1605_v3  ;;  %2737 = vmatmul.f32.gmra.mxu3 %v14205_v0  ;;  %v2540_v7 = vsub.f32 %v20160_v57, %v14227_v35 }
 0x2a0   : > { %v2358_v17 = vmul.f32 4.366812, %v1686_v61  ;;  %v14232_v6 = vpop.f32.mrf.mxu1  ;;  %v2541_v30 = vand.u32 4294901760, %v2540_v7  ;;  %2849 = vmatmul.f32.gmra.mxu0 %v2540_v7 }
 0x2a1   : > { %20163 = vst [vmem:[#allocation220_spill] sm:$0xff] %v14232_v6  ;;  %v310_v6 = vld [vmem:[%s19268_s3 + $0x80] sm:$0xff] }
 0x2a2   : > { %v14229_v60 = vpop.f32.mrf.mxu0  ;;  %2528 = vmatmul.f32.vlgmr.msra.gmra.mxu2 %v2527_v42  ;;  %v14234_v62 = vadd.f32 -2.117904, %v2358_v17  ;;  %v1608_v49 = vpop.f32.mrf.mxu2  ;;  %v2535_v42 = vand.u32 4294901760, %v2534_v50  ;;  %v2542_v63 = vsub.f32 %v2540_v7, %v2541_v30  ;;  %v20167_v50 = vld [vmem:[#allocation99_spill] sm:$0xff]  ;;  %2955 = vmatmul.f32.gmra.mxu1 %v2541_v30  ;;  %v20170_v7 = vld [vmem:[#allocation146_spill] sm:$0xff] }
 0x2a3   : > { %20162 = vst [vmem:[#allocation167_spill] sm:$0xff] %v14229_v60  ;;  %v1609_v3 = vadd.f32 %v1608_v49, %v20164_v2  ;;  %v1892_v12 = vadd.f32 %v20171_v56, %v20170_v7  ;;  %v20173_v7 = vld [vmem:[#allocation149_spill] sm:$0xff] }
 0x2a4   : > { %2415 = vst [vmem:[%s13737_s19 + $0xb0] sm:$0xff] %v14234_v62 }
 0x2a5   : > { %v1689_v55 = vpop.f32.mrf.mxu3  ;;  %20172 = vst [vmem:[#allocation99_spill] sm:$0xff] %v14265_v37 }
 0x2a6   : > { %v1690_v61 = vadd.f32 %v1689_v55, %v1609_v3  ;;  %2741 = vmatmul.f32.gmra.mxu3 %v14227_v35 }
 0x2a8   : > { %v2360_v34 = vmul.f32 4.366812, %v1690_v61  ;;  %v2281_v57 = vpop.f32.mrf.mxu1  ;;  %v2543_v61 = vand.u32 4294901760, %v2542_v63  ;;  %2854 = vmatmul.f32.gmra.mxu0 %v2548_v31  ;;  %v2556_v63 = vsub.f32 %v20168_v21, %v14253_v45  ;;  %v20174_v21 = vld [vmem:[#allocation150_spill] sm:$0xff] }
 0x2a9   : > { %v1896_v59 = vadd.f32 %v20174_v21, %v20173_v7 }
 0x2aa   : > { %v2200_v17 = vpop.f32.mrf.mxu0  ;;  %2536 = vmatmul.f32.gmra.mxu2 %v2535_v42  ;;  %v14245_v40 = vadd.f32 -2.117904, %v2360_v34  ;;  %v1612_v49 = vpop.f32.mrf.mxu2  ;;  %v2549_v42 = vand.u32 4294901760, %v2548_v31 }
 0x2ab   : > { %v1613_v2 = vadd.f32 %v1612_v49, %v20167_v50 }
 0x2ac   : > { %2417 = vst [vmem:[%s13737_s19 + $0xc0] sm:$0xff] %v14245_v40  ;;  %v2550_v30 = vsub.f32 %v2548_v31, %v2549_v42  ;;  %2961 = vmatmul.f32.gmra.mxu1 %v2549_v42 }
 0x2ad   : > { %v1693_v48 = vpop.f32.mrf.mxu3 }
 0x2ae   : > { %v1694_v3 = vadd.f32 %v1693_v48, %v1613_v2  ;;  %2745 = vmatmul.f32.gmra.mxu3 %v14242_v32 }
 0x2b0   : > { %v2362_v9 = vmul.f32 4.366812, %v1694_v3  ;;  %v2285_v18 = vpop.f32.mrf.mxu1  ;;  %v2551_v3 = vand.u32 4294901760, %v2550_v30  ;;  %2859 = vmatmul.f32.gmra.mxu0 %v2556_v63 }
 0x2b2   : > { %v2204_v34 = vpop.f32.mrf.mxu0  ;;  %2544 = vmatmul.f32.gmra.mxu2 %v2543_v61  ;;  %v14258_v28 = vadd.f32 -2.117904, %v2362_v9  ;;  %v1981_v48 = vpop.f32.mrf.mxu2  ;;  %v2557_v61 = vand.u32 4294901760, %v2556_v63 }
 0x2b3   : > { %v1982_v50 = vadd.f32 %v1981_v48, %v1892_v12 }
 0x2b4   : > { %2419 = vst [vmem:[%s13737_s19 + $0xd0] sm:$0xff] %v14258_v28  ;;  %v2558_v12 = vsub.f32 %v2556_v63, %v2557_v61  ;;  %2967 = vmatmul.f32.gmra.mxu1 %v2557_v61  ;;  %v20177_v61 = vld [vmem:[#allocation98_spill] sm:$0xff] }
 0x2b5   : > { %v2077_v55 = vpop.f32.mrf.mxu3 }
 0x2b6   : > { %v2078_v2 = vadd.f32 %v2077_v55, %v1982_v50  ;;  %2749 = vmatmul.f32.gmra.mxu3 %v14253_v45  ;;  %v2564_v55 = vsub.f32 %v14090_v5, %v14265_v37  ;;  %v2559_v53 = vand.u32 4294901760, %v2558_v12  ;;  %v14285_v12 = vand.u32 4294901760, %v14146_v44  ;;  %v312_v45 = vld [vmem:[%s19268_s3 + $0x90] sm:$0xff] }
 0x2b8   : > { %v2201_v9 = vadd.f32 %v2200_v17, %v2078_v2  ;;  %v2289_v31 = vpop.f32.mrf.mxu1  ;;  %v14273_v17 = vand.u32 4294901760, %v14123_v43  ;;  %v2565_v7 = vand.u32 4294901760, %v2564_v55  ;;  %2864 = vmatmul.f32.gmra.mxu0 %v2564_v55  ;;  %20178 = vst [vmem:[#allocation146_spill] sm:$0xff] %v14285_v12 }
 0x2ba   : > { %v2208_v56 = vpop.f32.mrf.mxu0  ;;  %2552 = vmatmul.f32.gmra.mxu2 %v2551_v3  ;;  %v2282_v47 = vadd.f32 %v2281_v57, %v2201_v9  ;;  %v1986_v42 = vpop.f32.mrf.mxu2  ;;  %20175 = vst [vmem:[#allocation201_spill] sm:$0xff] %v14273_v17 }
 0x2bb   : > { %v1987_v50 = vadd.f32 %v1986_v42, %v1896_v59  ;;  %v2572_v59 = vsub.f32 %v14123_v43, %v14273_v17  ;;  %v14289_v43 = vsub.f32 %v14146_v44, %v14285_v12  ;;  %v14302_v44 = vand.u32 4294901760, %v14167_v46 }
 0x2bc   : > { %v2337_v48 = vmul.f32 4.366812, %v2282_v47  ;;  %v20176_v47 = vld [vmem:[#allocation151_spill] sm:$0xff]  ;;  %2973 = vmatmul.f32.gmra.mxu1 %v2565_v7 }
 0x2bd   : > { %v2083_v49 = vpop.f32.mrf.mxu3  ;;  %v1900_v9 = vadd.f32 %v20177_v61, %v20176_v47  ;;  %v20180_v61 = vld [vmem:[#allocation100_spill] sm:$0xff]  ;;  %20181 = vst [vmem:[#allocation148_spill] sm:$0xff] %v14302_v44 }
 0x2be   : > { %v2365_v2 = vadd.f32 -2.117904, %v2337_v48  ;;  %v2084_v3 = vadd.f32 %v2083_v49, %v1987_v50  ;;  %2753 = vmatmul.f32.gmra.mxu3 %v14265_v37  ;;  %v2566_v49 = vsub.f32 %v2564_v55, %v2565_v7  ;;  %v2573_v50 = vand.u32 4294901760, %v2572_v59  ;;  %v20179_v7 = vld [vmem:[#allocation101_spill] sm:$0xff] }
 0x2c0   : > { %2394 = vst.msk [vmem:[%s13737_s19 + $0x8] sm:$0xff] %vm2393_vm1, %v2365_v2  ;;  %v2205_v63 = vadd.f32 %v2204_v34, %v2084_v3  ;;  %v14278_v5 = vpop.f32.mrf.mxu1  ;;  %v2567_v29 = vand.u32 4294901760, %v2566_v49  ;;  %2869 = vmatmul.f32.gmra.mxu0 %v2572_v59 }
 0x2c2   : > { %v2212_v57 = vpop.f32.mrf.mxu0  ;;  %2560 = vmatmul.f32.gmra.mxu2 %v2559_v53  ;;  %v2286_v21 = vadd.f32 %v2285_v18, %v2205_v63  ;;  %v1991_v42 = vpop.f32.mrf.mxu2  ;;  %v2574_v63 = vsub.f32 %v2572_v59, %v2573_v50 }
 0x2c3   : > { %v1992_v48 = vadd.f32 %v1991_v42, %v1900_v9  ;;  %v1904_v9 = vadd.f32 %v20180_v61, %v20179_v7 }
 0x2c4   : > { %v2339_v53 = vmul.f32 4.366812, %v2286_v21  ;;  %v2581_v21 = vand.u32 4294901760, %v14289_v43  ;;  %2979 = vmatmul.f32.gmra.mxu1 %v2573_v50  ;;  %v2575_v59 = vand.u32 4294901760, %v2574_v63  ;;  %v14326_v50 = vsub.f32 %v14167_v46, %v14302_v44  ;;  %v319_v63 = vld [vmem:[%s19268_s3 + $0xc8] sm:$0xff] }
 0x2c5   : > { %v2089_v30 = vpop.f32.mrf.mxu3 }
 0x2c6   : > { %v2367_v2 = vadd.f32 -2.117904, %v2339_v53  ;;  %v2090_v3 = vadd.f32 %v2089_v30, %v1992_v48  ;;  %2757 = vmatmul.f32.gmra.mxu3 %v14273_v17  ;;  %v14322_v61 = vsub.f32 %v14289_v43, %v2581_v21 }
 0x2c8   : > { %2396 = vst.msk [vmem:[%s13737_s19 + $0x18] sm:$0xff] %vm2393_vm1, %v2367_v2  ;;  %v2209_v18 = vadd.f32 %v2208_v56, %v2090_v3  ;;  %v14296_v55 = vpop.f32.mrf.mxu1  ;;  %v321_v56 = vld [vmem:[%s19268_s3 + $0xd8] sm:$0xff]  ;;  %2874 = vmatmul.f32.gmra.mxu0 %v14289_v43  ;;  %v2583_v41 = vand.u32 4294901760, %v14322_v61  ;;  %v14383_v61 = vand.u32 4294901760, %v317_v52 }
 0x2c9   : > { %v14309_v42 = vand.u32 4294901760, %v321_v56 }
 0x2ca   : > { %v14291_v47 = vpop.f32.mrf.mxu0  ;;  %2568 = vmatmul.f32.gmra.mxu2 %v2567_v29  ;;  %v2290_v30 = vadd.f32 %v2289_v31, %v2209_v18  ;;  %v1996_v29 = vpop.f32.mrf.mxu2  ;;  %v320_v31 = vld [vmem:[%s19268_s3 + $0xd0] sm:$0xff]  ;;  %20195 = vst [vmem:[#allocation224_spill] sm:$0xff] %v14383_v61 }
 0x2cb   : > { %20182 = vst [vmem:[#allocation149_spill] sm:$0xff] %v14309_v42  ;;  %v1997_v48 = vadd.f32 %v1996_v29, %v1904_v9  ;;  %3240 = vmatpush.msra.mxu0 %v14309_v42  ;;  %v14315_v2 = vand.u32 4294901760, %v320_v31  ;;  %v14318_v3 = vsub.f32 %v321_v56, %v14309_v42  ;;  %3625 = vmatpush.msra.mxu3 %v14309_v42  ;;  %v14337_v56 = vand.u32 4294901760, %v319_v63  ;;  %v318_v29 = vld [vmem:[%s19268_s3 + $0xc0] sm:$0xff] }
 0x2cc   : > { %v2341_v53 = vmul.f32 4.366812, %v2290_v30  ;;  %v14357_v22 = vand.u32 4294901760, %v318_v29  ;;  %2985 = vmatmul.f32.gmra.mxu1 %v2581_v21  ;;  %v14402_v21 = vand.u32 4294901760, %v316_v58 }
 0x2cd   : > { %v2095_v34 = vpop.f32.mrf.mxu3  ;;  %20183 = vst [vmem:[#allocation150_spill] sm:$0xff] %v14315_v2  ;;  %3242 = vmatpush.msra.mxu0 %v14315_v2  ;;  %v14335_v30 = vand.u32 4294901760, %v14318_v3  ;;  %3627 = vmatpush.msra.mxu3 %v14315_v2 }
 0x2ce   : > { %20184 = vst [vmem:[#allocation151_spill] sm:$0xff] %v14318_v3  ;;  %v2369_v18 = vadd.f32 -2.117904, %v2341_v53  ;;  %v2096_v7 = vadd.f32 %v2095_v34, %v1997_v48  ;;  %v14340_v34 = vsub.f32 %v320_v31, %v14315_v2  ;;  %2761 = vmatmul.f32.gmra.mxu3 %v14285_v12  ;;  %3515 = vmatpush.msra.mxu2 %v14318_v3 }
 0x2cf   : > { %20185 = vst [vmem:[#allocation98_spill] sm:$0xff] %v14335_v30  ;;  %v3383_v48 = vsub.f32 %v14318_v3, %v14335_v30  ;;  %3244 = vmatpush.msra.mxu0 %v14337_v56  ;;  %3629 = vmatpush.msra.mxu3 %v14337_v56 }
 0x2d0   : > { %20186 = vst [vmem:[#allocation101_spill] sm:$0xff] %v14337_v56  ;;  %v2213_v46 = vadd.f32 %v2212_v57, %v2096_v7  ;;  %v14349_v53 = vpop.f32.mrf.mxu1  ;;  %v14355_v31 = vand.u32 4294901760, %v14340_v34  ;;  %v14360_v57 = vsub.f32 %v319_v63, %v14337_v56  ;;  %3518 = vmatpush.msra.mxu2 %v14340_v34  ;;  %2879 = vmatmul.f32.gmra.mxu0 %v14326_v50 }
 0x2d1   : > { %20187 = vst [vmem:[#allocation100_spill] sm:$0xff] %v14340_v34  ;;  %v14375_v24 = vand.u32 4294901760, %v3383_v48  ;;  %3246 = vmatpush.msra.mxu0 %v14357_v22  ;;  %3631 = vmatpush.msra.mxu3 %v14357_v22  ;;  %v14390_v48 = vsub.f32 %v318_v29, %v14357_v22  ;;  %v14405_v29 = vsub.f32 %v317_v52, %v14383_v61 }
 0x2d2   : > { %v14331_v9 = vpop.f32.mrf.mxu0  ;;  %2398 = vst.msk [vmem:[%s13737_s19 + $0x28] sm:$0xff] %vm2393_vm1, %v2369_v18  ;;  %2576 = vmatmul.f32.gmra.mxu2 %v2575_v59  ;;  %v20191_v59 = vld [vmem:[#allocation160_spill] sm:$0xff]  ;;  %v20192_v18 = vld [vmem:[#allocation105_spill] sm:$0xff]  ;;  %v2294_v38 = vadd.f32 %v14278_v5, %v2213_v46  ;;  %v2001_v63 = vpop.f32.mrf.mxu2  ;;  %v3389_v5 = vsub.f32 %v14340_v34, %v14355_v31  ;;  %v14381_v43 = vand.u32 4294901760, %v14360_v57  ;;  %v20201_v34 = vand.u32 4294901760, %v14326_v50 }
 0x2d3   : > { %20188 = vst [vmem:[#allocation221_spill] sm:$0xff] %v14355_v31  ;;  %v1908_v7 = vadd.f32 %v20192_v18, %v20191_v59  ;;  %v14387_v18 = vand.u32 4294901760, %v14191_v14  ;;  %3385 = vmatpush.msra.mxu1 %v14375_v24  ;;  %3248 = vmatpush.msra.mxu0 %v14383_v61 }
 0x2d4   : > { %20189 = vst [vmem:[#allocation222_spill] sm:$0xff] %v14357_v22  ;;  %v2343_v46 = vmul.f32 4.366812, %v2294_v38  ;;  %v14397_v3 = vand.u32 4294901760, %v3389_v5  ;;  %v3395_v38 = vsub.f32 %v14360_v57, %v14381_v43  ;;  %v14414_v5 = vand.u32 4294901760, %v14390_v48  ;;  %3633 = vmatpush.msra.mxu3 %v14383_v61  ;;  %3521 = vmatpush.msra.mxu2 %v14360_v57 }
 0x2d5   : > { %v14307_v49 = vpop.f32.mrf.mxu3  ;;  %20190 = vst [vmem:[#allocation223_spill] sm:$0xff] %v14360_v57  ;;  %v2002_v59 = vadd.f32 %v2001_v63, %v1908_v7  ;;  %3250 = vmatpush.msra.mxu0 %v14402_v21 }
 0x2d6   : > { %20193 = vst [vmem:[#allocation160_spill] sm:$0xff] %v14375_v24  ;;  %v2371_v7 = vadd.f32 -2.117904, %v2343_v46  ;;  %v14411_v24 = vsub.f32 %v14326_v50, %v20201_v34  ;;  %3391 = vmatpush.msra.mxu1 %v14397_v3  ;;  %v14428_v34 = vand.u32 4294901760, %v14405_v29  ;;  %v14430_v46 = vand.u32 4294901760, %v315_v1  ;;  %2765 = vmatmul.f32.gmra.mxu3 %v14302_v44  ;;  %v313_v44 = vld [vmem:[%s19268_s3 + $0x98] sm:$0xff] }
 0x2d7   : > { %20194 = vst [vmem:[#allocation105_spill] sm:$0xff] %v14381_v43  ;;  %v2102_v63 = vadd.f32 %v14307_v49, %v2002_v59  ;;  %v14424_v49 = vand.u32 4294901760, %v3395_v38  ;;  %v14433_v59 = vsub.f32 %v316_v58, %v14402_v21  ;;  %v14441_v38 = vsub.f32 %v14191_v14, %v14387_v18  ;;  %3635 = vmatpush.msra.mxu3 %v14402_v21 }
 0x2d8   : > { %20196 = vst [vmem:[#allocation225_spill] sm:$0xff] %v14387_v18  ;;  %v14448_v58 = vpop.f32.mrf.mxu1  ;;  %3252 = vmatpush.msra.mxu0 %v14430_v46  ;;  %v14457_v14 = vand.u32 4294901760, %v314_v36  ;;  %3524 = vmatpush.msra.mxu2 %v14390_v48 }
 0x2d9   : > { %20197 = vst [vmem:[#allocation226_spill] sm:$0xff] %v14390_v48  ;;  %v2217_v57 = vadd.f32 %v14291_v47, %v2102_v63  ;;  %3397 = vmatpush.msra.mxu1 %v14424_v49  ;;  %v14455_v47 = vand.u32 4294901760, %v14433_v59  ;;  %v20210_v63 = vld [vmem:[#allocation177_spill] sm:$0xff]  ;;  %3637 = vmatpush.msra.mxu3 %v14430_v46 }
 0x2da   : > { %20198 = vst [vmem:[#allocation227_spill] sm:$0xff] %v14397_v3  ;;  %v14421_v52 = vpop.f32.mrf.mxu0  ;;  %2584 = vmatmul.f32.gmra.mxu2 %v2583_v41  ;;  %v3401_v3 = vsub.f32 %v14390_v48, %v14414_v5  ;;  %v3407_v41 = vsub.f32 %v14405_v29, %v14428_v34  ;;  %v1912_v10 = vadd.f32 %v20211_v33, %v20210_v63  ;;  %v2006_v12 = vpop.f32.mrf.mxu2  ;;  %v20216_v63 = vand.u32 4294901760, %v14326_v50  ;;  %v311_v48 = vld [vmem:[%s19268_s3 + $0x88] sm:$0xff] }
 0x2db   : > { %20199 = vst [vmem:[#allocation228_spill] sm:$0xff] %v14402_v21  ;;  %v2298_v27 = vadd.f32 %v14296_v55, %v2217_v57  ;;  %v3413_v33 = vsub.f32 %v14433_v59, %v14455_v47  ;;  %3254 = vmatpush.msra.mxu0 %v14457_v14  ;;  %v14483_v55 = vand.u32 4294901760, %v313_v44  ;;  %v14490_v37 = vsub.f32 %v314_v36, %v14457_v14 }
 0x2dc   : > { %20200 = vst [vmem:[#allocation229_spill] sm:$0xff] %v14405_v29  ;;  %v14467_v15 = vand.u32 4294901760, %v3401_v3  ;;  %v14475_v17 = vand.u32 4294901760, %v3407_v41  ;;  %v2007_v57 = vadd.f32 %v2006_v12, %v1912_v10  ;;  %2991 = vmatmul.f32.gmra.mxu1 %v20216_v63  ;;  %v2597_v41 = vand.u32 4294901760, %v14441_v38  ;;  %3639 = vmatpush.msra.mxu3 %v14457_v14 }
 0x2dd   : > { %v14373_v54 = vpop.f32.mrf.mxu3  ;;  %20202 = vst [vmem:[#allocation230_spill] sm:$0xff] %v14414_v5  ;;  %v2345_v3 = vmul.f32 4.366812, %v2298_v27  ;;  %v14497_v32 = vand.u32 4294901760, %v3413_v33  ;;  %3256 = vmatpush.msra.mxu0 %v14483_v55  ;;  %v14502_v10 = vand.u32 4294901760, %v312_v45  ;;  %v14505_v36 = vsub.f32 %v313_v44, %v14483_v55  ;;  %3527 = vmatpush.msra.mxu2 %v14405_v29 }
 0x2de   : > { %20203 = vst [vmem:[#allocation231_spill] sm:$0xff] %v14424_v49  ;;  %v2591_v49 = vand.u32 4294901760, %v14411_v24  ;;  %3403 = vmatpush.msra.mxu1 %v14467_v15  ;;  %v2108_v50 = vadd.f32 %v14373_v54, %v2007_v57  ;;  %v14509_v63 = vand.u32 4294901760, %v14217_v23  ;;  %v14512_v33 = vand.u32 4294901760, %v14490_v37  ;;  %2769 = vmatmul.f32.gmra.mxu3 %v14387_v18  ;;  %v20230_v18 = vld [vmem:[#allocation106_spill] sm:$0xff] }
 0x2df   : > { %20204 = vst [vmem:[#allocation232_spill] sm:$0xff] %v14428_v34  ;;  %v2373_v12 = vadd.f32 -2.117904, %v2345_v3  ;;  %3258 = vmatpush.msra.mxu0 %v14502_v10  ;;  %v14526_v54 = vand.u32 4294901760, %v14505_v36  ;;  %v14528_v3 = vand.u32 4294901760, %v311_v48  ;;  %v14531_v57 = vsub.f32 %v312_v45, %v14502_v10  ;;  %3641 = vmatpush.msra.mxu3 %v14483_v55 }
 0x2e0   : > { %20205 = vst [vmem:[#allocation233_spill] sm:$0xff] %v14430_v46  ;;  %3409 = vmatpush.msra.mxu1 %v14475_v17  ;;  %v2221_v29 = vadd.f32 %v14331_v9, %v2108_v50  ;;  %v14543_v60 = vpop.f32.mrf.mxu1  ;;  %v20229_v50 = vld [vmem:[#allocation194_spill] sm:$0xff]  ;;  %2884 = vmatmul.f32.gmra.mxu0 %v14441_v38 }
 0x2e1   : > { %20206 = vst [vmem:[#allocation234_spill] sm:$0xff] %v14433_v59  ;;  %v3431_v45 = vsub.f32 %v14505_v36, %v14526_v54  ;;  %3260 = vmatpush.msra.mxu0 %v14528_v3  ;;  %v14550_v9 = vand.u32 4294901760, %v14531_v57  ;;  %v1916_v35 = vadd.f32 %v20230_v18, %v20229_v50  ;;  %3530 = vmatpush.msra.mxu2 %v14433_v59 }
 0x2e2   : > { %2400 = vst.msk [vmem:[%s13737_s19 + $0x38] sm:$0xff] %vm2393_vm1, %v2371_v7  ;;  %v14460_v7 = vsub.f32 %v315_v1, %v14430_v46  ;;  %2592 = vmatmul.f32.gmra.mxu2 %v2591_v49  ;;  %3415 = vmatpush.msra.mxu1 %v14497_v32  ;;  %v14552_v49 = vand.u32 4294901760, %v310_v6  ;;  %v2302_v25 = vadd.f32 %v14349_v53, %v2221_v29  ;;  %v2011_v0 = vpop.f32.mrf.mxu2 }
 0x2e3   : > { %20207 = vst [vmem:[#allocation235_spill] sm:$0xff] %v14455_v47  ;;  %v3437_v18 = vsub.f32 %v14531_v57, %v14550_v9  ;;  %3643 = vmatpush.msra.mxu3 %v14502_v10 }
 0x2e4   : > { %20208 = vst [vmem:[#allocation236_spill] sm:$0xff] %v14457_v14  ;;  %v14481_v24 = vand.u32 4294901760, %v14460_v7  ;;  %3262 = vmatpush.msra.mxu0 %v14552_v49  ;;  %v2347_v29 = vmul.f32 4.366812, %v2302_v25  ;;  %2997 = vmatmul.f32.gmra.mxu1 %v2597_v41 }
 0x2e5   : > { %20209 = vst [vmem:[#allocation237_spill] sm:$0xff] %v14460_v7  ;;  %v14473_v1 = vpop.f32.mrf.mxu3  ;;  %v14583_v50 = vand.u32 4294901760, %v3437_v18  ;;  %3533 = vmatpush.msra.mxu2 %v14460_v7  ;;  %3645 = vmatpush.msra.mxu3 %v14528_v3 }
 0x2e6   : > { %20212 = vst [vmem:[#allocation177_spill] sm:$0xff] %v14467_v15  ;;  %v3419_v27 = vsub.f32 %v14460_v7, %v14481_v24  ;;  %v14519_v15 = vpop.f32.mrf.mxu0  ;;  %3740 = vmatpush.msrb.mxu0 %v14335_v30  ;;  %2773 = vmatmul.f32.gmra.mxu3 %v14509_v63  ;;  %v20239_v7 = vld [vmem:[#allocation134_spill] sm:$0xff] }
 0x2e7   : > { %20213 = vst [vmem:[#allocation107_spill] sm:$0xff] %v14475_v17  ;;  %v3425_v17 = vsub.f32 %v14490_v37, %v14512_v33  ;;  %3536 = vmatpush.msra.mxu2 %v14490_v37  ;;  %3647 = vmatpush.msra.mxu3 %v14552_v49 }
 0x2e8   : > { %20214 = vst [vmem:[#allocation238_spill] sm:$0xff] %v14481_v24  ;;  %v14522_v44 = vand.u32 4294901760, %v3419_v27  ;;  %v2598_v27 = vsub.f32 %v14441_v38, %v2597_v41  ;;  %3744 = vmatpush.msrb.mxu0 %v14355_v31 }
 0x2e9   : > { %20215 = vst [vmem:[#allocation239_spill] sm:$0xff] %v14483_v55  ;;  %v14563_v39 = vand.u32 4294901760, %v3425_v17  ;;  %v14576_v17 = vsub.f32 %v310_v6, %v14552_v49  ;;  %3539 = vmatpush.msra.mxu2 %v14505_v36 }
 0x2ea   : > { %20217 = vst [vmem:[#allocation240_spill] sm:$0xff] %v14490_v37  ;;  %3421 = vmatpush.msra.mxu1 %v14522_v44  ;;  %v2599_v38 = vand.u32 4294901760, %v2598_v27  ;;  %3748 = vmatpush.msrb.mxu0 %v14381_v43  ;;  %v2016_v59 = vpop.f32.mrf.mxu2 }
 0x2eb   : > { %20218 = vst [vmem:[#allocation241_spill] sm:$0xff] %v14497_v32  ;;  %v2604_v32 = vsub.f32 %v14217_v23, %v14509_v63  ;;  %v2012_v23 = vadd.f32 %v2011_v0, %v1916_v35  ;;  %v2375_v0 = vadd.f32 -2.117904, %v2347_v29  ;;  %v14590_v35 = vand.u32 4294901760, %v14576_v17  ;;  %v14606_v29 = vpop.f32.mrf.mxu1  ;;  %3542 = vmatpush.msra.mxu2 %v14531_v57 }
 0x2ec   : > { %20219 = vst [vmem:[#allocation242_spill] sm:$0xff] %v14502_v10  ;;  %3427 = vmatpush.msra.mxu1 %v14563_v39  ;;  %2600 = vmatmul.f32.gmra.mxu2 %v2599_v38 }
 0x2ed   : > { %20220 = vst [vmem:[#allocation243_spill] sm:$0xff] %v14505_v36  ;;  %v2119_v13 = vpop.f32.mrf.mxu3  ;;  %v2114_v6 = vadd.f32 %v14473_v1, %v2012_v23  ;;  %v2605_v25 = vand.u32 4294901760, %v2604_v32  ;;  %v3449_v18 = vsub.f32 %v14576_v17, %v14590_v35  ;;  %2889 = vmatmul.f32.gmra.mxu0 %v2604_v32 }
 0x2ee   : > { %20221 = vst [vmem:[#allocation244_spill] sm:$0xff] %v14512_v33  ;;  %v14594_v41 = vpop.f32.mrf.mxu0  ;;  %3752 = vmatpush.msrb.mxu0 %v14414_v5 }
 0x2ef   : > { %20222 = vst [vmem:[#allocation245_spill] sm:$0xff] %v14522_v44  ;;  %v2225_v1 = vadd.f32 %v14421_v52, %v2114_v6  ;;  %v2606_v38 = vsub.f32 %v2604_v32, %v2605_v25  ;;  %v14615_v6 = vand.u32 4294901760, %v3449_v18  ;;  %3003 = vmatmul.f32.gmra.mxu1 %v2605_v25  ;;  %v14624_v18 = vand.u32 4294901760, %v14245_v40 }
 0x2f0   : > { %20223 = vst [vmem:[#allocation246_spill] sm:$0xff] %v14526_v54  ;;  %3756 = vmatpush.msrb.mxu0 %v14428_v34 }
 0x2f1   : > { %20224 = vst [vmem:[#allocation247_spill] sm:$0xff] %v14528_v3  ;;  %v2306_v52 = vadd.f32 %v14448_v58, %v2225_v1  ;;  %v2607_v1 = vand.u32 4294901760, %v2606_v38 }
 0x2f2   : > { %20225 = vst [vmem:[#allocation248_spill] sm:$0xff] %v14531_v57  ;;  %3760 = vmatpush.msrb.mxu0 %v14455_v47  ;;  %v20247_v57 = vld [vmem:[#allocation220_spill] sm:$0xff] }
 0x2f3   : > { %2402 = vst.msk [vmem:[%s13737_s19 + $0x48] sm:$0xff] %vm2393_vm1, %v2373_v12  ;;  %v14555_v12 = vsub.f32 %v311_v48, %v14528_v3  ;;  %v14567_v48 = vand.u32 4294901760, %v3431_v45  ;;  %v14580_v45 = vand.u32 4294901760, %v14234_v62 }
 0x2f4   : > { %20226 = vst [vmem:[#allocation249_spill] sm:$0xff] %v14550_v9  ;;  %2608 = vmatmul.f32.gmra.mxu2 %v2607_v1  ;;  %3764 = vmatpush.msrb.mxu0 %v14481_v24  ;;  %v14654_v1 = vand.u32 4294901760, %v14258_v28 }
 0x2f5   : > { %20227 = vst [vmem:[#allocation250_spill] sm:$0xff] %v14552_v49  ;;  %v14573_v53 = vand.u32 4294901760, %v14555_v12  ;;  %3433 = vmatpush.msra.mxu1 %v14567_v48  ;;  %v2612_v23 = vsub.f32 %v14234_v62, %v14580_v45  ;;  %v2125_v31 = vpop.f32.mrf.mxu3  ;;  %v2349_v62 = vmul.f32 4.366812, %v2306_v52  ;;  %2777 = vmatmul.f32.gmra.mxu3 %v14580_v45  ;;  %v2620_v52 = vsub.f32 %v14245_v40, %v14624_v18  ;;  %v2021_v38 = vpop.f32.mrf.mxu2 }
 0x2f6   : > { %20228 = vst [vmem:[#allocation251_spill] sm:$0xff] %v14555_v12  ;;  %3768 = vmatpush.msrb.mxu0 %v14512_v33  ;;  %3545 = vmatpush.msra.mxu2 %v14555_v12 }
 0x2f7   : > { %20231 = vst [vmem:[#allocation194_spill] sm:$0xff] %v14563_v39  ;;  %v3443_v44 = vsub.f32 %v14555_v12, %v14573_v53  ;;  %3439 = vmatpush.msra.mxu1 %v14583_v50  ;;  %v2377_v32 = vadd.f32 -2.117904, %v2349_v62  ;;  %2894 = vmatmul.f32.gmra.mxu0 %v2612_v23 }
 0x2f8   : > { %20232 = vst [vmem:[#allocation106_spill] sm:$0xff] %v14567_v48  ;;  %3772 = vmatpush.msrb.mxu0 %v14526_v54  ;;  %3548 = vmatpush.msra.mxu2 %v14576_v17 }
 0x2f9   : > { %20233 = vst [vmem:[#allocation252_spill] sm:$0xff] %v14573_v53  ;;  %v14597_v27 = vand.u32 4294901760, %v3443_v44  ;;  %v20238_v44 = vld [vmem:[#allocation211_spill] sm:$0xff] }
 0x2fa   : > { %20234 = vst [vmem:[#allocation253_spill] sm:$0xff] %v14576_v17  ;;  %3776 = vmatpush.msrb.mxu0 %v14550_v9  ;;  %v20244_v17 = vld [vmem:[#allocation144_spill] sm:$0xff] }
 0x2fb   : > { %20235 = vst [vmem:[#allocation254_spill] sm:$0xff] %v14583_v50  ;;  %3445 = vmatpush.msra.mxu1 %v14597_v27 }
 0x2fc   : > { %20236 = vst [vmem:[#allocation255_spill] sm:$0xff] %v14590_v35  ;;  %3780 = vmatpush.msrb.mxu0 %v14573_v53 }
 0x2fd   : > { %20237 = vst [vmem:[#allocation256_spill] sm:$0xff] %v14597_v27  ;;  %3451 = vmatpush.msra.mxu1 %v14615_v6  ;;  %v2131_v62 = vpop.f32.mrf.mxu3  ;;  %2781 = vmatmul.f32.gmra.mxu3 %v14624_v18 }
 0x2fe   : > { %2404 = vst.msk [vmem:[%s13737_s19 + $0x58] sm:$0xff] %vm2393_vm1, %v2375_v0  ;;  %v1920_v0 = vadd.f32 %v20239_v7, %v20238_v44  ;;  %v2613_v7 = vand.u32 4294901760, %v2612_v23  ;;  %v1924_v44 = vadd.f32 %v14119_v51, %v14113_v20  ;;  %3784 = vmatpush.msrb.mxu0 %v14590_v35 }
 0x2ff   : > { %20240 = vst [vmem:[#allocation211_spill] sm:$0xff] %v14615_v6  ;;  %3847 = vmatpush.msrb.mxu1 %v14309_v42  ;;  %2899 = vmatmul.f32.gmra.mxu0 %v2620_v52 }
 0x300   : > { %v2017_v43 = vadd.f32 %v2016_v59, %v1920_v0  ;;  %v14628_v59 = vpop.f32.mrf.mxu0  ;;  %2406 = vst.msk [vmem:[%s13737_s19 + $0x68] sm:$0xff] %vm2393_vm1, %v2377_v32  ;;  %3009 = vmatmul.f32.gmra.mxu1 %v2613_v7 }
 0x301   : > { %3849 = vmatpush.msrb.mxu1 %v14315_v2 }
 0x302   : > { %v2120_v58 = vadd.f32 %v2119_v13, %v2017_v43  ;;  %v14636_v13 = vpop.f32.mrf.mxu1  ;;  %v2614_v43 = vsub.f32 %v2612_v23, %v2613_v7  ;;  %v2621_v23 = vand.u32 4294901760, %v2620_v52 }
 0x303   : > { %3851 = vmatpush.msrb.mxu1 %v14337_v56 }
 0x304   : > { %v2229_v25 = vadd.f32 %v14519_v15, %v2120_v58  ;;  %v2422_v15 = vld [vmem:[%s13737_s19 + $0x8] sm:$0xff]  ;;  %v2022_v58 = vadd.f32 %v2021_v38, %v1924_v44  ;;  %v2615_v20 = vand.u32 4294901760, %v2614_v43  ;;  %v1928_v44 = vadd.f32 %v14142_v4, %v14136_v26  ;;  %v2424_v38 = vld [vmem:[%s13737_s19 + $0x18] sm:$0xff] }
 0x305   : > { %3853 = vmatpush.msrb.mxu1 %v14357_v22  ;;  %v2453_v4 = vsel %vm2393_vm1, %v2424_v38, 0  ;;  %2785 = vmatmul.f32.gmra.mxu3 %v14654_v1 }
 0x306   : > { %v2310_v0 = vadd.f32 %v14543_v60, %v2229_v25  ;;  %v2450_v60 = vsel %vm2393_vm1, %v2422_v15, 0  ;;  %v2126_v40 = vadd.f32 %v2125_v31, %v2022_v58  ;;  %2616 = vmatmul.f32.gmra.mxu2 %v2615_v20  ;;  %v2622_v15 = vsub.f32 %v2620_v52, %v2621_v23  ;;  %v2137_v58 = vpop.f32.mrf.mxu3 }
 0x307   : > { %3855 = vmatpush.msrb.mxu1 %v14383_v61  ;;  %v14663_v31 = vand.u32 4294901760, %v2450_v60 }
 0x308   : > { %v2351_v32 = vmul.f32 4.366812, %v2310_v0  ;;  %v2240_v25 = vpop.f32.mrf.mxu0  ;;  %v2233_v7 = vadd.f32 %v14594_v41, %v2126_v40  ;;  %v2628_v41 = vsub.f32 %v14258_v28, %v14654_v1  ;;  %3015 = vmatmul.f32.gmra.mxu1 %v2621_v23  ;;  %v2623_v52 = vand.u32 4294901760, %v2622_v15 }
 0x309   : > { %3857 = vmatpush.msrb.mxu1 %v14402_v21  ;;  %v14676_v26 = vsub.f32 %v2450_v60, %v14663_v31  ;;  %v14686_v23 = vand.u32 4294901760, %v2453_v4 }
 0x30a   : > { %v2379_v51 = vadd.f32 -2.117904, %v2351_v32  ;;  %v2321_v43 = vpop.f32.mrf.mxu1  ;;  %v2314_v0 = vadd.f32 %v14606_v29, %v2233_v7  ;;  %v2026_v32 = vpop.f32.mrf.mxu2  ;;  %v2629_v40 = vand.u32 4294901760, %v2628_v41  ;;  %2904 = vmatmul.f32.gmra.mxu0 %v2628_v41 }
 0x30b   : > { %3859 = vmatpush.msrb.mxu1 %v14430_v46  ;;  %v19711_v60 = vand.u32 4294901760, %v14676_v26 }
 0x30c   : > { %2408 = vst.msk [vmem:[%s13737_s19 + $0x78] sm:$0xff] %vm2393_vm1, %v2379_v51  ;;  %v2353_v20 = vmul.f32 4.366812, %v2314_v0  ;;  %v2027_v51 = vadd.f32 %v2026_v32, %v1928_v44  ;;  %v2630_v38 = vsub.f32 %v2628_v41, %v2629_v40  ;;  %v2426_v32 = vld [vmem:[%s13737_s19 + $0x28] sm:$0xff] }
 0x30d   : > { %3861 = vmatpush.msrb.mxu1 %v14457_v14  ;;  %3179 = vmatmul.f32.vlgmr.msrb.gmra.mxu3 %v14179_v16 }
 0x30e   : > { %v2381_v29 = vadd.f32 -2.117904, %v2353_v20  ;;  %v2132_v28 = vadd.f32 %v2131_v62, %v2027_v51  ;;  %2624 = vmatmul.f32.gmra.mxu2 %v2623_v52  ;;  %v1932_v62 = vadd.f32 %v14163_v11, %v14157_v19  ;;  %v2143_v20 = vpop.f32.mrf.mxu3  ;;  %v14698_v52 = vsub.f32 %v2453_v4, %v14686_v23 }
 0x30f   : > { %3863 = vmatpush.msrb.mxu1 %v14483_v55  ;;  %v2456_v19 = vsel %vm2393_vm1, %v2426_v32, 0  ;;  %v2631_v41 = vand.u32 4294901760, %v2630_v38  ;;  %v20241_v32 = vld [vmem:[#allocation129_spill] sm:$0xff] }
 0x310   : > { %v2244_v7 = vpop.f32.mrf.mxu0  ;;  %2410 = vst.msk [vmem:[%s13737_s19 + $0x88] sm:$0xff] %vm2393_vm1, %v2381_v29  ;;  %v2237_v44 = vadd.f32 %v14628_v59, %v2132_v28  ;;  %3021 = vmatmul.f32.gmra.mxu1 %v2629_v40  ;;  %v3266_v28 = vsub.f32 %v14676_v26, %v19711_v60  ;;  %v14706_v4 = vand.u32 4294901760, %v2456_v19  ;;  %v1936_v60 = vadd.f32 %v20241_v32, %v14181_v8 }
 0x311   : > { %3865 = vmatpush.msrb.mxu1 %v14502_v10 }
 0x312   : > { %v2325_v0 = vpop.f32.mrf.mxu1  ;;  %v2318_v15 = vadd.f32 %v14636_v13, %v2237_v44  ;;  %v2031_v59 = vpop.f32.mrf.mxu2  ;;  %v3267_v40 = vand.u32 4294901760, %v3266_v28 }
 0x313   : > { %3867 = vmatpush.msrb.mxu1 %v14528_v3  ;;  %v2032_v29 = vadd.f32 %v2031_v59, %v1932_v62 }
 0x314   : > { %v2355_v51 = vmul.f32 4.366812, %v2318_v15  ;;  %v19712_v15 = vand.u32 4294901760, %v14698_v52  ;;  %3268 = vmatmul.f32.vlgmr.msra.gmra.mxu0 %v3267_v40 }
 0x315   : > { %3869 = vmatpush.msrb.mxu1 %v14552_v49  ;;  %v2138_v13 = vadd.f32 %v2137_v58, %v2032_v29  ;;  %v2428_v58 = vld [vmem:[%s13737_s19 + $0x38] sm:$0xff] }
 0x316   : > { %v2383_v11 = vadd.f32 -2.117904, %v2355_v51  ;;  %2632 = vmatmul.f32.gmra.mxu2 %v2631_v41  ;;  %v2149_v29 = vpop.f32.mrf.mxu3  ;;  %v3274_v28 = vsub.f32 %v14698_v52, %v19712_v15  ;;  %v2459_v41 = vsel %vm2393_vm1, %v2428_v58, 0  ;;  %v20243_v15 = vld [vmem:[#allocation219_spill] sm:$0xff] }
 0x317   : > { %v2241_v62 = vadd.f32 %v2240_v25, %v2138_v13  ;;  %v14716_v13 = vsub.f32 %v2456_v19, %v14706_v4  ;;  %v1940_v58 = vadd.f32 %v20244_v17, %v20243_v15 }
 0x318   : > { %v2248_v44 = vpop.f32.mrf.mxu0  ;;  %2412 = vst.msk [vmem:[%s13737_s19 + $0x98] sm:$0xff] %vm2393_vm1, %v2383_v11  ;;  %3453 = vmatmul.f32.vlgmr.msra.gmra.mxu1 %v14663_v31  ;;  %v3275_v32 = vand.u32 4294901760, %v3274_v28 }
 0x319   : > { %v2322_v51 = vadd.f32 %v2321_v43, %v2241_v62 }
 0x31a   : > { %v2329_v59 = vpop.f32.mrf.mxu1  ;;  %v2036_v38 = vpop.f32.mrf.mxu2 }
 0x31b   : > { %v2357_v11 = vmul.f32 4.366812, %v2322_v51  ;;  %v2037_v25 = vadd.f32 %v2036_v38, %v1936_v60  ;;  %v20242_v60 = vld [vmem:[#allocation218_spill] sm:$0xff]  ;;  %v19717_v51 = vand.u32 4294901760, %v14716_v13  ;;  %v14724_v38 = vand.u32 4294901760, %v2459_v41 }
 0x31c   : > { %3183 = vmatmul.f32.gmra.mxu3 %v20242_v60  ;;  %3276 = vmatmul.f32.gmra.mxu0 %v3275_v32  ;;  %v20245_v32 = vld [vmem:[#allocation145_spill] sm:$0xff] }
 0x31d   : > { %v2385_v8 = vadd.f32 -2.117904, %v2357_v11  ;;  %v2144_v43 = vadd.f32 %v2143_v20, %v2037_v25  ;;  %v2430_v20 = vld [vmem:[%s13737_s19 + $0x48] sm:$0xff]  ;;  %v14734_v28 = vsub.f32 %v2459_v41, %v14724_v38 }
 0x31e   : > { %3090 = vmatmul.f32.vlgmr.msrb.gmra.mxu2 %v14179_v16  ;;  %v3282_v16 = vsub.f32 %v14716_v13, %v19717_v51  ;;  %v2462_v12 = vsel %vm2393_vm1, %v2430_v20, 0  ;;  %v20246_v51 = vld [vmem:[#allocation167_spill] sm:$0xff] }
 0x31f   : > { %2414 = vst.msk [vmem:[%s13737_s19 + $0xa8] sm:$0xff] %vm2393_vm1, %v2385_v8  ;;  %v2245_v40 = vadd.f32 %v2244_v7, %v2144_v43  ;;  %v2155_v8 = vpop.f32.mrf.mxu3  ;;  %v1944_v20 = vadd.f32 %v20247_v57, %v20246_v51 }
 0x320   : > { %v2252_v62 = vpop.f32.mrf.mxu0  ;;  %3457 = vmatmul.f32.gmra.mxu1 %v14686_v23 }
 0x321   : > { %v2326_v11 = vadd.f32 %v2325_v0, %v2245_v40 }
 0x322   : > { %v2333_v19 = vpop.f32.mrf.mxu1  ;;  %v2041_v25 = vpop.f32.mrf.mxu2 }
 0x323   : > { %v2359_v7 = vmul.f32 4.366812, %v2326_v11  ;;  %v2042_v43 = vadd.f32 %v2041_v25, %v1940_v58  ;;  %v3283_v58 = vand.u32 4294901760, %v3282_v16  ;;  %v19722_v11 = vand.u32 4294901760, %v14734_v28 }
 0x324   : > { %3187 = vmatmul.f32.gmra.mxu3 %v20245_v32  ;;  %v14742_v25 = vand.u32 4294901760, %v2462_v12 }
 0x325   : > { %v2387_v17 = vadd.f32 -2.117904, %v2359_v7  ;;  %v2150_v0 = vadd.f32 %v2149_v29, %v2042_v43  ;;  %3284 = vmatmul.f32.gmra.mxu0 %v3283_v58  ;;  %v2432_v29 = vld [vmem:[%s13737_s19 + $0x58] sm:$0xff] }
 0x326   : > { %3094 = vmatmul.f32.gmra.mxu2 %v20242_v60  ;;  %v3290_v60 = vsub.f32 %v14734_v28, %v19722_v11  ;;  %v14752_v16 = vsub.f32 %v2462_v12, %v14742_v25  ;;  %v2465_v35 = vsel %vm2393_vm1, %v2432_v29, 0  ;;  %v20248_v58 = vld [vmem:[#allocation147_spill] sm:$0xff]  ;;  %v2434_v29 = vld [vmem:[%s13737_s19 + $0x68] sm:$0xff] }
 0x327   : > { %2416 = vst.msk [vmem:[%s13737_s19 + $0xb8] sm:$0xff] %vm2393_vm1, %v2387_v17  ;;  %v2249_v40 = vadd.f32 %v2248_v44, %v2150_v0  ;;  %v2734_v17 = vpop.f32.mrf.mxu3 }
 0x328   : > { %v2840_v15 = vpop.f32.mrf.mxu0  ;;  %3461 = vmatmul.f32.gmra.mxu1 %v14706_v4 }
 0x329   : > { %v2330_v7 = vadd.f32 %v2329_v59, %v2249_v40 }
 0x32a   : > { %v2944_v41 = vpop.f32.mrf.mxu1  ;;  %v2046_v43 = vpop.f32.mrf.mxu2 }
 0x32b   : > { %v2361_v44 = vmul.f32 4.366812, %v2330_v7  ;;  %v2047_v0 = vadd.f32 %v2046_v43, %v1944_v20  ;;  %v3291_v20 = vand.u32 4294901760, %v3290_v60  ;;  %v19725_v7 = vand.u32 4294901760, %v14752_v16 }
 0x32c   : > { %3191 = vmatmul.f32.gmra.mxu3 %v20248_v58  ;;  %v14760_v43 = vand.u32 4294901760, %v2465_v35  ;;  %v2468_v60 = vsel %vm2393_vm1, %v2434_v29, 0 }
 0x32d   : > { %v2389_v57 = vadd.f32 -2.117904, %v2361_v44  ;;  %v2156_v59 = vadd.f32 %v2155_v8, %v2047_v0  ;;  %3292 = vmatmul.f32.gmra.mxu0 %v3291_v20  ;;  %v14776_v20 = vand.u32 4294901760, %v2468_v60 }
 0x32e   : > { %3098 = vmatmul.f32.gmra.mxu2 %v20245_v32  ;;  %v14768_v32 = vsub.f32 %v2465_v35, %v14760_v43 }
 0x32f   : > { %2418 = vst.msk [vmem:[%s13737_s19 + $0xc8] sm:$0xff] %vm2393_vm1, %v2389_v57  ;;  %v2253_v40 = vadd.f32 %v2252_v62, %v2156_v59  ;;  %v2738_v8 = vpop.f32.mrf.mxu3  ;;  %v3298_v62 = vsub.f32 %v14752_v16, %v19725_v7  ;;  %v2436_v7 = vld [vmem:[%s13737_s19 + $0x78] sm:$0xff] }
 0x330   : > { %v2845_v51 = vpop.f32.mrf.mxu0  ;;  %3465 = vmatmul.f32.gmra.mxu1 %v14724_v38 }
 0x331   : > { %v2334_v11 = vadd.f32 %v2333_v19, %v2253_v40  ;;  %v19730_v40 = vand.u32 4294901760, %v14768_v32 }
 0x332   : > { %v2950_v12 = vpop.f32.mrf.mxu1  ;;  %v2529_v44 = vpop.f32.mrf.mxu2 }
 0x333   : > { %v2363_v0 = vmul.f32 4.366812, %v2334_v11  ;;  %v2735_v36 = vadd.f32 %v2734_v17, %v2529_v44  ;;  %v20249_v11 = vld [vmem:[#allocation184_spill] sm:$0xff]  ;;  %v3299_v17 = vand.u32 4294901760, %v3298_v62  ;;  %v2471_v62 = vsel %vm2393_vm1, %v2436_v7, 0 }
 0x334   : > { %3195 = vmatmul.f32.gmra.mxu3 %v20249_v11 }
 0x335   : > { %v2391_v57 = vadd.f32 -2.117904, %v2363_v0  ;;  %v2841_v19 = vadd.f32 %v2840_v15, %v2735_v36  ;;  %3300 = vmatmul.f32.gmra.mxu0 %v3299_v17  ;;  %v3306_v15 = vsub.f32 %v14768_v32, %v19730_v40  ;;  %v2438_v40 = vld [vmem:[%s13737_s19 + $0x88] sm:$0xff] }
 0x336   : > { %3102 = vmatmul.f32.gmra.mxu2 %v20248_v58  ;;  %v14786_v58 = vsub.f32 %v2468_v60, %v14776_v20 }
 0x337   : > { %2420 = vst.msk [vmem:[%s13737_s19 + $0xd8] sm:$0xff] %vm2393_vm1, %v2391_v57  ;;  %v14778_v44 = vadd.f32 %v2944_v41, %v2841_v19  ;;  %v2742_v0 = vpop.f32.mrf.mxu3  ;;  %v20250_v19 = vld [vmem:[#allocation99_spill] sm:$0xff]  ;;  %v3307_v17 = vand.u32 4294901760, %v3306_v15 }
 0x338   : > { %v2850_v59 = vpop.f32.mrf.mxu0  ;;  %3469 = vmatmul.f32.gmra.mxu1 %v14742_v25 }
 0x33a   : > { %v2956_v35 = vpop.f32.mrf.mxu1  ;;  %v2537_v29 = vpop.f32.mrf.mxu2 }
 0x33b   : > { %v2739_v36 = vadd.f32 %v2738_v8, %v2537_v29  ;;  %v19737_v8 = vand.u32 4294901760, %v14786_v58  ;;  %v14792_v29 = vand.u32 4294901760, %v2471_v62 }
 0x33c   : > { %3199 = vmatmul.f32.gmra.mxu3 %v20250_v19 }
 0x33d   : > { %v2846_v41 = vadd.f32 %v2845_v51, %v2739_v36  ;;  %3308 = vmatmul.f32.gmra.mxu0 %v3307_v17  ;;  %v3314_v51 = vsub.f32 %v14786_v58, %v19737_v8  ;;  %v2474_v36 = vsel %vm2393_vm1, %v2438_v40, 0  ;;  %v2440_v8 = vld [vmem:[%s13737_s19 + $0x98] sm:$0xff] }
 0x33e   : > { %3106 = vmatmul.f32.gmra.mxu2 %v20249_v11  ;;  %v14802_v11 = vsub.f32 %v2471_v62, %v14792_v29 }
 0x33f   : > { %v14794_v53 = vadd.f32 %v2950_v12, %v2846_v41  ;;  %v2746_v9 = vpop.f32.mrf.mxu3  ;;  %v20251_v41 = vld [vmem:[#allocation201_spill] sm:$0xff]  ;;  %v3315_v17 = vand.u32 4294901760, %v3314_v51 }
 0x340   : > { %v2855_v57 = vpop.f32.mrf.mxu0  ;;  %3473 = vmatmul.f32.gmra.mxu1 %v14760_v43 }
 0x342   : > { %v2962_v37 = vpop.f32.mrf.mxu1  ;;  %v2545_v60 = vpop.f32.mrf.mxu2 }
 0x343   : > { %v2743_v7 = vadd.f32 %v2742_v0, %v2545_v60  ;;  %v19744_v0 = vand.u32 4294901760, %v14802_v11  ;;  %v14808_v60 = vand.u32 4294901760, %v2474_v36 }
 0x344   : > { %3203 = vmatmul.f32.gmra.mxu3 %v20251_v41 }
 0x345   : > { %v2851_v12 = vadd.f32 %v2850_v59, %v2743_v7  ;;  %3316 = vmatmul.f32.gmra.mxu0 %v3315_v17  ;;  %v3322_v59 = vsub.f32 %v14802_v11, %v19744_v0  ;;  %v2477_v7 = vsel %vm2393_vm1, %v2440_v8, 0  ;;  %v2442_v0 = vld [vmem:[%s13737_s19 + $0xa8] sm:$0xff] }
 0x346   : > { %3110 = vmatmul.f32.gmra.mxu2 %v20250_v19  ;;  %v14818_v19 = vsub.f32 %v2474_v36, %v14808_v60 }
 0x347   : > { %v14810_v54 = vadd.f32 %v2956_v35, %v2851_v12  ;;  %v2750_v24 = vpop.f32.mrf.mxu3  ;;  %v20252_v12 = vld [vmem:[#allocation146_spill] sm:$0xff]  ;;  %v3323_v17 = vand.u32 4294901760, %v3322_v59 }
 0x348   : > { %v2860_v15 = vpop.f32.mrf.mxu0  ;;  %3477 = vmatmul.f32.gmra.mxu1 %v14776_v20 }
 0x34a   : > { %v2968_v33 = vpop.f32.mrf.mxu1  ;;  %v2553_v62 = vpop.f32.mrf.mxu2 }
 0x34b   : > { %v2747_v40 = vadd.f32 %v2746_v9, %v2553_v62  ;;  %v19751_v9 = vand.u32 4294901760, %v14818_v19  ;;  %v14824_v62 = vand.u32 4294901760, %v2477_v7 }
 0x34c   : > { %3207 = vmatmul.f32.gmra.mxu3 %v20252_v12 }
 0x34d   : > { %v2856_v35 = vadd.f32 %v2855_v57, %v2747_v40  ;;  %3324 = vmatmul.f32.gmra.mxu0 %v3323_v17  ;;  %v3330_v57 = vsub.f32 %v14818_v19, %v19751_v9  ;;  %v2480_v40 = vsel %vm2393_vm1, %v2442_v0, 0  ;;  %v2444_v9 = vld [vmem:[%s13737_s19 + $0xb8] sm:$0xff] }
 0x34e   : > { %3114 = vmatmul.f32.gmra.mxu2 %v20251_v41  ;;  %v14834_v41 = vsub.f32 %v2477_v7, %v14824_v62 }
 0x34f   : > { %v14826_v47 = vadd.f32 %v2962_v37, %v2856_v35  ;;  %v2754_v5 = vpop.f32.mrf.mxu3  ;;  %v20253_v35 = vld [vmem:[#allocation148_spill] sm:$0xff]  ;;  %v3331_v17 = vand.u32 4294901760, %v3330_v57 }
 0x350   : > { %v2865_v51 = vpop.f32.mrf.mxu0  ;;  %3481 = vmatmul.f32.gmra.mxu1 %v14792_v29 }
 0x352   : > { %v2974_v34 = vpop.f32.mrf.mxu1  ;;  %v2561_v36 = vpop.f32.mrf.mxu2 }
 0x353   : > { %v2751_v8 = vadd.f32 %v2750_v24, %v2561_v36  ;;  %v19758_v24 = vand.u32 4294901760, %v14834_v41  ;;  %v14840_v36 = vand.u32 4294901760, %v2480_v40 }
 0x354   : > { %3211 = vmatmul.f32.gmra.mxu3 %v20253_v35 }
 0x355   : > { %v2861_v37 = vadd.f32 %v2860_v15, %v2751_v8  ;;  %3332 = vmatmul.f32.gmra.mxu0 %v3331_v17  ;;  %v3338_v15 = vsub.f32 %v14834_v41, %v19758_v24  ;;  %v2483_v8 = vsel %vm2393_vm1, %v2444_v9, 0  ;;  %v2446_v24 = vld [vmem:[%s13737_s19 + $0xc8] sm:$0xff] }
 0x356   : > { %3118 = vmatmul.f32.gmra.mxu2 %v20252_v12  ;;  %v14850_v12 = vsub.f32 %v2480_v40, %v14840_v36 }
 0x357   : > { %v14842_v30 = vadd.f32 %v2968_v33, %v2861_v37  ;;  %v2758_v27 = vpop.f32.mrf.mxu3  ;;  %v20254_v37 = vld [vmem:[#allocation225_spill] sm:$0xff]  ;;  %v3339_v17 = vand.u32 4294901760, %v3338_v15 }
 0x358   : > { %v2870_v59 = vpop.f32.mrf.mxu0  ;;  %3485 = vmatmul.f32.gmra.mxu1 %v14808_v60 }
 0x35a   : > { %v2980_v6 = vpop.f32.mrf.mxu1  ;;  %v2569_v7 = vpop.f32.mrf.mxu2 }
 0x35b   : > { %v2755_v0 = vadd.f32 %v2754_v5, %v2569_v7  ;;  %v19763_v5 = vand.u32 4294901760, %v14850_v12  ;;  %v14856_v7 = vand.u32 4294901760, %v2483_v8 }
 0x35c   : > { %3215 = vmatmul.f32.gmra.mxu3 %v20254_v37 }
 0x35d   : > { %v2866_v33 = vadd.f32 %v2865_v51, %v2755_v0  ;;  %3340 = vmatmul.f32.gmra.mxu0 %v3339_v17  ;;  %v3346_v51 = vsub.f32 %v14850_v12, %v19763_v5  ;;  %v2486_v0 = vsel %vm2393_vm1, %v2446_v24, 0  ;;  %v2448_v5 = vld [vmem:[%s13737_s19 + $0xd8] sm:$0xff] }
 0x35e   : > { %3122 = vmatmul.f32.gmra.mxu2 %v20253_v35  ;;  %v14866_v35 = vsub.f32 %v2483_v8, %v14856_v7  ;;  %v14872_v17 = vand.u32 4294901760, %v2486_v0 }
 0x35f   : > { %v14858_v49 = vadd.f32 %v2974_v34, %v2866_v33  ;;  %v2762_v3 = vpop.f32.mrf.mxu3  ;;  %v3347_v33 = vand.u32 4294901760, %v3346_v51 }
 0x360   : > { %v2875_v57 = vpop.f32.mrf.mxu0  ;;  %3489 = vmatmul.f32.gmra.mxu1 %v14824_v62  ;;  %v14882_v24 = vsub.f32 %v2486_v0, %v14872_v17 }
 0x362   : > { %v2986_v50 = vpop.f32.mrf.mxu1  ;;  %v2577_v40 = vpop.f32.mrf.mxu2 }
 0x363   : > { %v2759_v9 = vadd.f32 %v2758_v27, %v2577_v40  ;;  %v19768_v27 = vand.u32 4294901760, %v14866_v35 }
 0x364   : > { %3219 = vmatmul.f32.gmra.mxu3 %v14509_v63 }
 0x365   : > { %v2871_v34 = vadd.f32 %v2870_v59, %v2759_v9  ;;  %3348 = vmatmul.f32.gmra.mxu0 %v3347_v33  ;;  %v3354_v59 = vsub.f32 %v14866_v35, %v19768_v27 }
 0x366   : > { %3126 = vmatmul.f32.gmra.mxu2 %v20254_v37  ;;  %v2489_v37 = vsel %vm2393_vm1, %v2448_v5, 0 }
 0x367   : > { %v14874_v40 = vadd.f32 %v2980_v6, %v2871_v34  ;;  %v2766_v10 = vpop.f32.mrf.mxu3  ;;  %v3355_v51 = vand.u32 4294901760, %v3354_v59  ;;  %v14888_v34 = vand.u32 4294901760, %v2489_v37 }
 0x368   : > { %v2880_v15 = vpop.f32.mrf.mxu0  ;;  %3493 = vmatmul.f32.gmra.mxu1 %v14840_v36 }
 0x36a   : > { %v2992_v48 = vpop.f32.mrf.mxu1  ;;  %v2585_v8 = vpop.f32.mrf.mxu2 }
 0x36b   : > { %v2763_v39 = vadd.f32 %v2762_v3, %v2585_v8  ;;  %v19773_v3 = vand.u32 4294901760, %v14882_v24 }
 0x36c   : > { %3223 = vmatmul.f32.gmra.mxu3 %v14580_v45 }
 0x36d   : > { %v2876_v9 = vadd.f32 %v2875_v57, %v2763_v39  ;;  %3356 = vmatmul.f32.gmra.mxu0 %v3355_v51  ;;  %v3362_v39 = vsub.f32 %v14882_v24, %v19773_v3 }
 0x36e   : > { %3130 = vmatmul.f32.gmra.mxu2 %v14509_v63  ;;  %v14897_v63 = vsub.f32 %v2489_v37, %v14888_v34 }
 0x36f   : > { %v14890_v33 = vadd.f32 %v2986_v50, %v2876_v9  ;;  %v2770_v0 = vpop.f32.mrf.mxu3  ;;  %v3363_v50 = vand.u32 4294901760, %v3362_v39 }
 0x370   : > { %v2885_v6 = vpop.f32.mrf.mxu0  ;;  %3497 = vmatmul.f32.gmra.mxu1 %v14856_v7  ;;  %v3369_v59 = vand.u32 4294901760, %v14897_v63 }
 0x372   : > { %v2998_v8 = vpop.f32.mrf.mxu1  ;;  %v2593_v27 = vpop.f32.mrf.mxu2 }
 0x373   : > { %v2767_v55 = vadd.f32 %v2766_v10, %v2593_v27 }
 0x374   : > { %3227 = vmatmul.f32.gmra.mxu3 %v14624_v18 }
 0x375   : > { %v2881_v57 = vadd.f32 %v2880_v15, %v2767_v55  ;;  %3364 = vmatmul.f32.gmra.mxu0 %v3363_v50  ;;  %v3370_v55 = vsub.f32 %v14897_v63, %v3369_v59 }
 0x376   : > { %3134 = vmatmul.f32.gmra.mxu2 %v14580_v45 }
 0x377   : > { %v14902_v9 = vadd.f32 %v2992_v48, %v2881_v57  ;;  %v2774_v51 = vpop.f32.mrf.mxu3  ;;  %v3371_v37 = vand.u32 4294901760, %v3370_v55 }
 0x378   : > { %v2890_v5 = vpop.f32.mrf.mxu0  ;;  %3501 = vmatmul.f32.gmra.mxu1 %v14872_v17 }
 0x37a   : > { %v3004_v10 = vpop.f32.mrf.mxu1  ;;  %v2601_v27 = vpop.f32.mrf.mxu2 }
 0x37b   : > { %v2771_v14 = vadd.f32 %v2770_v0, %v2601_v27 }
 0x37c   : > { %3231 = vmatmul.f32.gmra.mxu3 %v14654_v1 }
 0x37d   : > { %v2886_v15 = vadd.f32 %v2885_v6, %v2771_v14  ;;  %3372 = vmatmul.f32.gmra.mxu0 %v3371_v37  ;;  %v20255_v14 = vand.u32 4294901760, %v14676_v26 }
 0x37e   : > { %3138 = vmatmul.f32.gmra.mxu2 %v14624_v18 }
 0x37f   : > { %v14910_v48 = vadd.f32 %v2998_v8, %v2886_v15  ;;  %v2778_v50 = vpop.f32.mrf.mxu3 }
 0x380   : > { %v2895_v45 = vpop.f32.mrf.mxu0  ;;  %3505 = vmatmul.f32.gmra.mxu1 %v14888_v34 }
 0x382   : > { %v3010_v39 = vpop.f32.mrf.mxu1  ;;  %v2609_v57 = vpop.f32.mrf.mxu2 }
 0x383   : > { %v2775_v0 = vadd.f32 %v2774_v51, %v2609_v57 }
 0x384   : > { %3651 = vmatmul.f32.vlgmr.msra.gmra.mxu3 %v20255_v14 }
 0x385   : > { %v2891_v27 = vadd.f32 %v2890_v5, %v2775_v0  ;;  %3786 = vmatmul.f32.vlgmr.msrb.gmra.mxu0 %v14663_v31  ;;  %v20256_v5 = vand.u32 4294901760, %v14698_v52 }
 0x386   : > { %3142 = vmatmul.f32.gmra.mxu2 %v14654_v1 }
 0x387   : > { %v14916_v18 = vadd.f32 %v3004_v10, %v2891_v27  ;;  %v2782_v55 = vpop.f32.mrf.mxu3 }
 0x388   : > { %v2900_v3 = vpop.f32.mrf.mxu0  ;;  %3871 = vmatmul.f32.vlgmr.msrb.gmra.mxu1 %v14663_v31  ;;  %v20257_v31 = vand.u32 4294901760, %v14716_v13 }
 0x38a   : > { %v3016_v6 = vpop.f32.mrf.mxu1  ;;  %v2617_v8 = vpop.f32.mrf.mxu2 }
 0x38b   : > { %v2779_v15 = vadd.f32 %v2778_v50, %v2617_v8 }
 0x38c   : > { %3657 = vmatmul.f32.gmra.mxu3 %v20256_v5 }
 0x38d   : > { %v2896_v51 = vadd.f32 %v2895_v45, %v2779_v15  ;;  %3790 = vmatmul.f32.gmra.mxu0 %v14686_v23 }
 0x38e   : > { %3551 = vmatmul.f32.vlgmr.msra.gmra.mxu2 %v14676_v26 }
 0x38f   : > { %v14923_v1 = vadd.f32 %v3010_v39, %v2896_v51  ;;  %v2786_v0 = vpop.f32.mrf.mxu3 }
 0x390   : > { %v2905_v37 = vpop.f32.mrf.mxu0  ;;  %3875 = vmatmul.f32.gmra.mxu1 %v14686_v23  ;;  %v20258_v23 = vand.u32 4294901760, %v14734_v28 }
 0x392   : > { %v3022_v57 = vpop.f32.mrf.mxu1  ;;  %v2625_v10 = vpop.f32.mrf.mxu2 }
 0x393   : > { %v2783_v27 = vadd.f32 %v2782_v55, %v2625_v10 }
 0x394   : > { %3663 = vmatmul.f32.gmra.mxu3 %v20257_v31 }
 0x395   : > { %v2901_v50 = vadd.f32 %v2900_v3, %v2783_v27  ;;  %3794 = vmatmul.f32.gmra.mxu0 %v14706_v4 }
 0x396   : > { %3556 = vmatmul.f32.gmra.mxu2 %v14698_v52 }
 0x397   : > { %v14930_v26 = vadd.f32 %v3016_v6, %v2901_v50  ;;  %v3180_v8 = vpop.f32.mrf.mxu3 }
 0x398   : > { %v3269_v14 = vpop.f32.mrf.mxu0  ;;  %3879 = vmatmul.f32.gmra.mxu1 %v14706_v4 }
 0x39a   : > { %v3454_v45 = vpop.f32.mrf.mxu1  ;;  %v2633_v39 = vpop.f32.mrf.mxu2 }
 0x39b   : > { %v2787_v15 = vadd.f32 %v2786_v0, %v2633_v39 }
 0x39c   : > { %3669 = vmatmul.f32.gmra.mxu3 %v20258_v23 }
 0x39d   : > { %v2906_v55 = vadd.f32 %v2905_v37, %v2787_v15  ;;  %3798 = vmatmul.f32.gmra.mxu0 %v14724_v38 }
 0x39e   : > { %3561 = vmatmul.f32.gmra.mxu2 %v14716_v13  ;;  %v20259_v13 = vand.u32 4294901760, %v14752_v16 }
 0x39f   : > { %v14937_v52 = vadd.f32 %v3022_v57, %v2906_v55  ;;  %v3184_v5 = vpop.f32.mrf.mxu3 }
 0x3a0   : > { %v3277_v51 = vpop.f32.mrf.mxu0  ;;  %3883 = vmatmul.f32.gmra.mxu1 %v14724_v38 }
 0x3a2   : > { %v3458_v3 = vpop.f32.mrf.mxu1  ;;  %v3091_v6 = vpop.f32.mrf.mxu2 }
 0x3a3   : > { %v3092_v10 = vadd.f32 %v3091_v6, %v14778_v44 }
 0x3a4   : > { %3675 = vmatmul.f32.gmra.mxu3 %v20259_v13 }
 0x3a5   : > { %v3181_v0 = vadd.f32 %v3180_v8, %v3092_v10  ;;  %3802 = vmatmul.f32.gmra.mxu0 %v14742_v25 }
 0x3a6   : > { %3566 = vmatmul.f32.gmra.mxu2 %v14734_v28  ;;  %v20261_v28 = vand.u32 4294901760, %v14768_v32 }
 0x3a7   : > { %v3270_v37 = vadd.f32 %v3269_v14, %v3181_v0  ;;  %v3188_v31 = vpop.f32.mrf.mxu3 }
 0x3a8   : > { %v3285_v4 = vpop.f32.mrf.mxu0  ;;  %3887 = vmatmul.f32.gmra.mxu1 %v14742_v25 }
 0x3a9   : > { %v14946_v57 = vadd.f32 %v3454_v45, %v3270_v37 }
 0x3aa   : > { %v3462_v27 = vpop.f32.mrf.mxu1  ;;  %v3095_v50 = vpop.f32.mrf.mxu2 }
 0x3ab   : > { %20260 = vst [vmem:[#allocation134_spill] sm:$0xff] %v14946_v57  ;;  %v3096_v39 = vadd.f32 %v3095_v50, %v14794_v53 }
 0x3ac   : > { %3681 = vmatmul.f32.gmra.mxu3 %v20261_v28 }
 0x3ad   : > { %v3185_v38 = vadd.f32 %v3184_v5, %v3096_v39  ;;  %3806 = vmatmul.f32.gmra.mxu0 %v14760_v43 }
 0x3ae   : > { %3571 = vmatmul.f32.gmra.mxu2 %v14752_v16  ;;  %v20263_v16 = vand.u32 4294901760, %v14786_v58 }
 0x3af   : > { %v3278_v8 = vadd.f32 %v3277_v51, %v3185_v38  ;;  %v3192_v55 = vpop.f32.mrf.mxu3 }
 0x3b0   : > { %v3293_v44 = vpop.f32.mrf.mxu0  ;;  %3891 = vmatmul.f32.gmra.mxu1 %v14760_v43 }
 0x3b1   : > { %v14954_v15 = vadd.f32 %v3458_v3, %v3278_v8 }
 0x3b2   : > { %v3466_v14 = vpop.f32.mrf.mxu1  ;;  %v3099_v45 = vpop.f32.mrf.mxu2 }
 0x3b3   : > { %20262 = vst [vmem:[#allocation129_spill] sm:$0xff] %v14954_v15  ;;  %v3100_v23 = vadd.f32 %v3099_v45, %v14810_v54 }
 0x3b4   : > { %3687 = vmatmul.f32.gmra.mxu3 %v20263_v16 }
 0x3b5   : > { %v3189_v53 = vadd.f32 %v3188_v31, %v3100_v23  ;;  %3810 = vmatmul.f32.gmra.mxu0 %v14776_v20 }
 0x3b6   : > { %3576 = vmatmul.f32.gmra.mxu2 %v14768_v32  ;;  %v20266_v32 = vand.u32 4294901760, %v14802_v11 }
 0x3b7   : > { %v3286_v51 = vadd.f32 %v3285_v4, %v3189_v53  ;;  %v14968_v10 = vpop.f32.mrf.mxu3 }
 0x3b8   : > { %v14958_v25 = vpop.f32.mrf.mxu0  ;;  %3895 = vmatmul.f32.gmra.mxu1 %v14776_v20 }
 0x3b9   : > { %v14966_v3 = vadd.f32 %v3462_v27, %v3286_v51 }
 0x3ba   : > { %v14963_v6 = vpop.f32.mrf.mxu1  ;;  %v3103_v5 = vpop.f32.mrf.mxu2 }
 0x3bb   : > { %20264 = vst [vmem:[#allocation218_spill] sm:$0xff] %v14963_v6  ;;  %v3104_v54 = vadd.f32 %v3103_v5, %v14826_v47 }
 0x3bc   : > { %20265 = vst [vmem:[#allocation219_spill] sm:$0xff] %v14966_v3  ;;  %3693 = vmatmul.f32.gmra.mxu3 %v20266_v32 }
 0x3bd   : > { %v3193_v43 = vadd.f32 %v3192_v55, %v3104_v54  ;;  %3814 = vmatmul.f32.gmra.mxu0 %v14792_v29 }
 0x3be   : > { %3581 = vmatmul.f32.gmra.mxu2 %v14786_v58  ;;  %v20268_v58 = vand.u32 4294901760, %v14818_v19 }
 0x3bf   : > { %v3294_v4 = vadd.f32 %v3293_v44, %v3193_v43  ;;  %v14984_v47 = vpop.f32.mrf.mxu3 }
 0x3c0   : > { %v14972_v0 = vpop.f32.mrf.mxu0  ;;  %3899 = vmatmul.f32.gmra.mxu1 %v14792_v29  ;;  %v20269_v29 = vand.u32 4294901760, %v14834_v41 }
 0x3c1   : > { %v14980_v37 = vadd.f32 %v3466_v14, %v3294_v4 }
 0x3c2   : > { %v14977_v13 = vpop.f32.mrf.mxu1  ;;  %v14982_v27 = vpop.f32.mrf.mxu2 }
 0x3c3   : > { %20267 = vst [vmem:[#allocation144_spill] sm:$0xff] %v14980_v37 }
 0x3c4   : > { %3699 = vmatmul.f32.gmra.mxu3 %v20268_v58 }
 0x3c5   : > { %3818 = vmatmul.f32.gmra.mxu0 %v14808_v60 }
 0x3c6   : > { %3586 = vmatmul.f32.gmra.mxu2 %v14802_v11 }
 0x3c7   : > { %v14997_v39 = vpop.f32.mrf.mxu3 }
 0x3c8   : > { %v14987_v20 = vpop.f32.mrf.mxu0  ;;  %3903 = vmatmul.f32.gmra.mxu1 %v14808_v60  ;;  %v20270_v60 = vand.u32 4294901760, %v14850_v12 }
 0x3ca   : > { %v14992_v50 = vpop.f32.mrf.mxu1  ;;  %v14995_v31 = vpop.f32.mrf.mxu2 }
 0x3cc   : > { %3705 = vmatmul.f32.gmra.mxu3 %v20269_v29 }
 0x3cd   : > { %3822 = vmatmul.f32.gmra.mxu0 %v14824_v62 }
 0x3ce   : > { %3591 = vmatmul.f32.gmra.mxu2 %v14818_v19 }
 0x3cf   : > { %v15010_v28 = vpop.f32.mrf.mxu3 }
 0x3d0   : > { %v15000_v38 = vpop.f32.mrf.mxu0  ;;  %3907 = vmatmul.f32.gmra.mxu1 %v14824_v62  ;;  %v20271_v62 = vand.u32 4294901760, %v14866_v35 }
 0x3d2   : > { %v15005_v11 = vpop.f32.mrf.mxu1  ;;  %v15008_v44 = vpop.f32.mrf.mxu2 }
 0x3d4   : > { %3711 = vmatmul.f32.gmra.mxu3 %v20270_v60 }
 0x3d5   : > { %3826 = vmatmul.f32.gmra.mxu0 %v14840_v36 }
 0x3d6   : > { %3596 = vmatmul.f32.gmra.mxu2 %v14834_v41 }
 0x3d7   : > { %v15023_v45 = vpop.f32.mrf.mxu3 }
 0x3d8   : > { %v15013_v8 = vpop.f32.mrf.mxu0  ;;  %3911 = vmatmul.f32.gmra.mxu1 %v14840_v36  ;;  %v20272_v36 = vand.u32 4294901760, %v14882_v24 }
 0x3da   : > { %v15018_v19 = vpop.f32.mrf.mxu1  ;;  %v15021_v14 = vpop.f32.mrf.mxu2 }
 0x3dc   : > { %3717 = vmatmul.f32.gmra.mxu3 %v20271_v62 }
 0x3dd   : > { %3830 = vmatmul.f32.gmra.mxu0 %v14856_v7 }
 0x3de   : > { %3601 = vmatmul.f32.gmra.mxu2 %v14850_v12 }
 0x3df   : > { %v15036_v53 = vpop.f32.mrf.mxu3 }
 0x3e0   : > { %v15026_v55 = vpop.f32.mrf.mxu0  ;;  %3915 = vmatmul.f32.gmra.mxu1 %v14856_v7 }
 0x3e2   : > { %v15031_v41 = vpop.f32.mrf.mxu1  ;;  %v15034_v23 = vpop.f32.mrf.mxu2 }
 0x3e4   : > { %3723 = vmatmul.f32.gmra.mxu3 %v20272_v36 }
 0x3e5   : > { %3834 = vmatmul.f32.gmra.mxu0 %v14872_v17 }
 0x3e6   : > { %3606 = vmatmul.f32.gmra.mxu2 %v14866_v35 }
 0x3e7   : > { %v15049_v5 = vpop.f32.mrf.mxu3 }
 0x3e8   : > { %v15039_v16 = vpop.f32.mrf.mxu0  ;;  %3919 = vmatmul.f32.gmra.mxu1 %v14872_v17 }
 0x3ea   : > { %v15044_v12 = vpop.f32.mrf.mxu1  ;;  %v15047_v51 = vpop.f32.mrf.mxu2 }
 0x3ec   : > { %3729 = vmatmul.f32.gmra.mxu3 %v3369_v59 }
 0x3ed   : > { %3838 = vmatmul.f32.gmra.mxu0 %v14888_v34 }
 0x3ee   : > { %3611 = vmatmul.f32.gmra.mxu2 %v14882_v24 }
 0x3ef   : > { %v3224_v43 = vpop.f32.mrf.mxu3 }
 0x3f0   : > { %v15052_v54 = vpop.f32.mrf.mxu0  ;;  %3923 = vmatmul.f32.gmra.mxu1 %v14888_v34 }
 0x3f2   : > { %v15057_v7 = vpop.f32.mrf.mxu1  ;;  %v3131_v35 = vpop.f32.mrf.mxu2 }
 0x3f6   : > { %3616 = vmatmul.f32.gmra.mxu2 %v14897_v63 }
 0x3f7   : > { %v3228_v58 = vpop.f32.mrf.mxu3 }
 0x3f8   : > { %v15061_v32 = vpop.f32.mrf.mxu0 }
 0x3fa   : > { %v15064_v17 = vpop.f32.mrf.mxu1  ;;  %v3135_v4 = vpop.f32.mrf.mxu2 }
 0x3ff   : > { %v15070_v60 = vpop.f32.mrf.mxu3 }
 0x400   : > { %v15066_v24 = vpop.f32.mrf.mxu0 }
 0x402   : > { %v15068_v29 = vpop.f32.mrf.mxu1  ;;  %v3139_v59 = vpop.f32.mrf.mxu2 }
 0x403   : > { %20273 = vst [vmem:[#allocation145_spill] sm:$0xff] %v15068_v29  ;;  %v3132_v29 = vadd.f32 %v3131_v35, %v14916_v18 }
 0x407   : > { %v15078_v46 = vpop.f32.mrf.mxu3 }
 0x408   : > { %v15072_v62 = vpop.f32.mrf.mxu0  ;;  %20276 = vst [vmem:[#allocation147_spill] sm:$0xff] %v15078_v46 }
 0x409   : > { %20274 = vst [vmem:[#allocation167_spill] sm:$0xff] %v15072_v62 }
 0x40a   : > { %v15074_v36 = vpop.f32.mrf.mxu1  ;;  %v15076_v34 = vpop.f32.mrf.mxu2 }
 0x40b   : > { %20275 = vst [vmem:[#allocation220_spill] sm:$0xff] %v15074_v36 }
 0x40f   : > { %v15086_v22 = vpop.f32.mrf.mxu3 }
 0x410   : > { %v15080_v63 = vpop.f32.mrf.mxu0  ;;  %20280 = vst [vmem:[#allocation146_spill] sm:$0xff] %v15086_v22 }
 0x411   : > { %20277 = vst [vmem:[#allocation184_spill] sm:$0xff] %v15080_v63 }
 0x412   : > { %v15082_v21 = vpop.f32.mrf.mxu1  ;;  %v15084_v61 = vpop.f32.mrf.mxu2 }
 0x413   : > { %20278 = vst [vmem:[#allocation99_spill] sm:$0xff] %v15082_v21 }
 0x414   : > { %20279 = vst [vmem:[#allocation201_spill] sm:$0xff] %v15084_v61 }
 0x417   : > { %v15094_v62 = vpop.f32.mrf.mxu3 }
 0x418   : > { %v15088_v56 = vpop.f32.mrf.mxu0  ;;  %20284 = vst [vmem:[#allocation258_spill] sm:$0xff] %v15094_v62 }
 0x419   : > { %20281 = vst [vmem:[#allocation148_spill] sm:$0xff] %v15088_v56 }
 0x41a   : > { %v15090_v2 = vpop.f32.mrf.mxu1  ;;  %v15092_v42 = vpop.f32.mrf.mxu2 }
 0x41b   : > { %20282 = vst [vmem:[#allocation225_spill] sm:$0xff] %v15090_v2 }
 0x41c   : > { %20283 = vst [vmem:[#allocation257_spill] sm:$0xff] %v15092_v42 }
 0x41f   : > { %v15102_v63 = vpop.f32.mrf.mxu3 }
 0x420   : > { %v15096_v36 = vpop.f32.mrf.mxu0  ;;  %20288 = vst [vmem:[#allocation262_spill] sm:$0xff] %v15102_v63 }
 0x421   : > { %20285 = vst [vmem:[#allocation259_spill] sm:$0xff] %v15096_v36 }
 0x422   : > { %v15098_v57 = vpop.f32.mrf.mxu1  ;;  %v15100_v46 = vpop.f32.mrf.mxu2 }
 0x423   : > { %20286 = vst [vmem:[#allocation260_spill] sm:$0xff] %v15098_v57 }
 0x424   : > { %20287 = vst [vmem:[#allocation261_spill] sm:$0xff] %v15100_v46 }
 0x427   : > { %v15110_v56 = vpop.f32.mrf.mxu3 }
 0x428   : > { %v15104_v21 = vpop.f32.mrf.mxu0  ;;  %20292 = vst [vmem:[#allocation266_spill] sm:$0xff] %v15110_v56 }
 0x429   : > { %20289 = vst [vmem:[#allocation263_spill] sm:$0xff] %v15104_v21 }
 0x42a   : > { %v15106_v61 = vpop.f32.mrf.mxu1  ;;  %v15108_v22 = vpop.f32.mrf.mxu2 }
 0x42b   : > { %20290 = vst [vmem:[#allocation264_spill] sm:$0xff] %v15106_v61 }
 0x42c   : > { %20291 = vst [vmem:[#allocation265_spill] sm:$0xff] %v15108_v22 }
 0x42f   : > { %v15118_v36 = vpop.f32.mrf.mxu3 }
 0x430   : > { %v15112_v2 = vpop.f32.mrf.mxu0  ;;  %20296 = vst [vmem:[#allocation270_spill] sm:$0xff] %v15118_v36 }
 0x431   : > { %20293 = vst [vmem:[#allocation267_spill] sm:$0xff] %v15112_v2 }
 0x432   : > { %v15114_v42 = vpop.f32.mrf.mxu1  ;;  %v15116_v62 = vpop.f32.mrf.mxu2 }
 0x433   : > { %20294 = vst [vmem:[#allocation268_spill] sm:$0xff] %v15114_v42 }
 0x434   : > { %20295 = vst [vmem:[#allocation269_spill] sm:$0xff] %v15116_v62 }
 0x437   : > { %v15126_v21 = vpop.f32.mrf.mxu3 }
 0x438   : > { %v15120_v57 = vpop.f32.mrf.mxu0  ;;  %20300 = vst [vmem:[#allocation274_spill] sm:$0xff] %v15126_v21 }
 0x439   : > { %20297 = vst [vmem:[#allocation271_spill] sm:$0xff] %v15120_v57 }
 0x43a   : > { %v15122_v15 = vpop.f32.mrf.mxu1  ;;  %v15124_v63 = vpop.f32.mrf.mxu2 }
 0x43b   : > { %20298 = vst [vmem:[#allocation272_spill] sm:$0xff] %v15122_v15 }
 0x43c   : > { %20299 = vst [vmem:[#allocation273_spill] sm:$0xff] %v15124_v63 }
 0x43f   : > { %v15132_v56 = vpop.f32.mrf.mxu3 }
 0x440   : > { %v15128_v61 = vpop.f32.mrf.mxu0  ;;  %20302 = vst [vmem:[#allocation276_spill] sm:$0xff] %v15132_v56 }
 0x441   : > { %20301 = vst [vmem:[#allocation275_spill] sm:$0xff] %v15128_v61 }
 0x442   : > { %v15130_v46 = vpop.f32.mrf.mxu2  ;;  %v15134_v2 = vpop.f32.mrf.mxu1 }
 0x443   : > { %20303 = vst [vmem:[#allocation277_spill] sm:$0xff] %v15134_v2  ;;  %v3136_v2 = vadd.f32 %v3135_v4, %v14923_v1 }
 0x447   : > { %v15138_v3 = vpop.f32.mrf.mxu3 }
 0x448   : > { %20304 = vst [vmem:[#allocation278_spill] sm:$0xff] %v15138_v3  ;;  %v15140_v36 = vpop.f32.mrf.mxu0  ;;  %v3140_v3 = vadd.f32 %v3139_v59, %v14930_v26 }
 0x449   : > { %20305 = vst [vmem:[#allocation279_spill] sm:$0xff] %v15140_v36  ;;  %v3225_v36 = vadd.f32 %v3224_v43, %v3136_v2 }
 0x44a   : > { %v15136_v42 = vpop.f32.mrf.mxu2  ;;  %v15142_v57 = vpop.f32.mrf.mxu1 }
 0x44b   : > { %20306 = vst [vmem:[#allocation280_spill] sm:$0xff] %v15142_v57  ;;  %v3128_v57 = vadd.f32 %v15047_v51, %v14910_v48  ;;  %v3358_v18 = vadd.f32 %v15052_v54, %v3225_v36  ;;  %v3116_v48 = vadd.f32 %v15008_v44, %v14874_v40 }
 0x44d   : > { %v3217_v4 = vadd.f32 %v15036_v53, %v3128_v57  ;;  %v3144_v57 = vadd.f32 %v15076_v34, %v14937_v52  ;;  %v3499_v53 = vadd.f32 %v15057_v7, %v3358_v18 }
 0x44f   : > { %v3706_v22 = vpop.f32.mrf.mxu3  ;;  %v20311_v59 = vld [vmem:[#allocation278_spill] sm:$0xff] }
 0x450   : > { %v15144_v37 = vpop.f32.mrf.mxu0 }
 0x451   : > { %20307 = vst [vmem:[#allocation281_spill] sm:$0xff] %v15144_v37  ;;  %v3221_v37 = vadd.f32 %v15049_v5, %v3132_v29 }
 0x452   : > { %v3592_v15 = vpop.f32.mrf.mxu2  ;;  %v15146_v21 = vpop.f32.mrf.mxu1 }
 0x453   : > { %20308 = vst [vmem:[#allocation282_spill] sm:$0xff] %v15146_v21  ;;  %v3124_v21 = vadd.f32 %v15034_v23, %v14902_v9  ;;  %v3350_v9 = vadd.f32 %v15039_v16, %v3221_v37  ;;  %v3112_v23 = vadd.f32 %v14995_v31, %v14858_v49  ;;  %v3205_v37 = vadd.f32 %v14997_v39, %v3116_v48 }
 0x455   : > { %v3213_v26 = vadd.f32 %v15023_v45, %v3124_v21  ;;  %v3108_v21 = vadd.f32 %v14982_v27, %v14842_v30  ;;  %v3495_v49 = vadd.f32 %v15044_v12, %v3350_v9  ;;  %v3233_v45 = vadd.f32 %v15070_v60, %v3144_v57 }
 0x456   : > { %v3318_v27 = vadd.f32 %v14987_v20, %v3205_v37  ;;  %v20322_v37 = vld [vmem:[#allocation144_spill] sm:$0xff] }
 0x457   : > { %v3712_v62 = vpop.f32.mrf.mxu3  ;;  %v3334_v44 = vadd.f32 %v15013_v8, %v3213_v26  ;;  %v3197_v30 = vadd.f32 %v14968_v10, %v3108_v21  ;;  %v20319_v26 = vld [vmem:[#allocation274_spill] sm:$0xff] }
 0x458   : > { %v15148_v63 = vpop.f32.mrf.mxu0  ;;  %v3479_v20 = vadd.f32 %v14992_v50, %v3318_v27  ;;  %v20315_v50 = vld [vmem:[#allocation273_spill] sm:$0xff]  ;;  %v20327_v27 = vld [vmem:[#allocation219_spill] sm:$0xff] }
 0x459   : > { %20309 = vst [vmem:[#allocation283_spill] sm:$0xff] %v15148_v63  ;;  %v3120_v63 = vadd.f32 %v15021_v14, %v14890_v33  ;;  %v3487_v12 = vadd.f32 %v15018_v19, %v3334_v44  ;;  %v3302_v10 = vadd.f32 %v14958_v25, %v3197_v30  ;;  %v20314_v25 = vld [vmem:[#allocation218_spill] sm:$0xff]  ;;  %v20317_v18 = vld [vmem:[#allocation281_spill] sm:$0xff] }
 0x45a   : > { %v3597_v61 = vpop.f32.mrf.mxu2  ;;  %v15151_v56 = vpop.f32.mrf.mxu1  ;;  %v20323_v44 = vld [vmem:[#allocation265_spill] sm:$0xff] }
 0x45b   : > { %20310 = vst [vmem:[#allocation284_spill] sm:$0xff] %v15151_v56  ;;  %v3229_v56 = vadd.f32 %v3228_v58, %v3140_v3  ;;  %v3209_v33 = vadd.f32 %v15010_v28, %v3120_v63  ;;  %v3342_v3 = vadd.f32 %v15026_v55, %v3217_v4  ;;  %v3201_v28 = vadd.f32 %v14984_v47, %v3112_v23 }
 0x45c   : > { %v3471_v63 = vadd.f32 %v20314_v25, %v3302_v10  ;;  %v20333_v10 = vld [vmem:[#allocation257_spill] sm:$0xff]  ;;  %v20340_v25 = vld [vmem:[#allocation263_spill] sm:$0xff] }
 0x45d   : > { %v3366_v40 = vadd.f32 %v15061_v32, %v3229_v56  ;;  %v3326_v52 = vadd.f32 %v15000_v38, %v3209_v33  ;;  %v3491_v55 = vadd.f32 %v15031_v41, %v3342_v3  ;;  %v3310_v38 = vadd.f32 %v14972_v0, %v3201_v28  ;;  %v20320_v33 = vld [vmem:[#allocation279_spill] sm:$0xff] }
 0x45e   : > { %v3593_v41 = vadd.f32 %v3592_v15, %v3487_v12  ;;  %v3374_v32 = vadd.f32 %v15066_v24, %v3233_v45  ;;  %v20313_v24 = vld [vmem:[#allocation145_spill] sm:$0xff]  ;;  %v20329_v12 = vld [vmem:[#allocation266_spill] sm:$0xff] }
 0x45f   : > { %v3718_v1 = vpop.f32.mrf.mxu3  ;;  %v3503_v56 = vadd.f32 %v15064_v17, %v3366_v40  ;;  %v3598_v5 = vadd.f32 %v3597_v61, %v3491_v55  ;;  %v3483_v7 = vadd.f32 %v15005_v11, %v3326_v52  ;;  %v3475_v0 = vadd.f32 %v14977_v13, %v3310_v38  ;;  %v20326_v55 = vld [vmem:[#allocation282_spill] sm:$0xff] }
 0x460   : > { %v3831_v2 = vpop.f32.mrf.mxu0  ;;  %v3583_v11 = vadd.f32 %v15130_v46, %v3479_v20  ;;  %v3701_v15 = vadd.f32 %v20311_v59, %v3593_v41  ;;  %v20312_v60 = vld [vmem:[#allocation283_spill] sm:$0xff]  ;;  %v3507_v34 = vadd.f32 %v20313_v24, %v3374_v32  ;;  %v20332_v32 = vld [vmem:[#allocation129_spill] sm:$0xff]  ;;  %v20339_v24 = vld [vmem:[#allocation258_spill] sm:$0xff] }
 0x461   : > { %v3588_v19 = vadd.f32 %v15136_v42, %v3483_v7  ;;  %v3707_v61 = vadd.f32 %v3706_v22, %v3598_v5  ;;  %v20316_v42 = vld [vmem:[#allocation276_spill] sm:$0xff]  ;;  %v3558_v20 = vadd.f32 %v20333_v10, %v20332_v32 }
 0x462   : > { %v3602_v6 = vpop.f32.mrf.mxu2  ;;  %v3916_v14 = vpop.f32.mrf.mxu1  ;;  %v3689_v9 = vadd.f32 %v20319_v26, %v3583_v11  ;;  %v3820_v57 = vadd.f32 %v20320_v33, %v3701_v15  ;;  %v20321_v3 = vld [vmem:[#allocation284_spill] sm:$0xff] }
 0x463   : > { %v3603_v16 = vadd.f32 %v3602_v6, %v3495_v49  ;;  %v3695_v22 = vadd.f32 %v20316_v42, %v3588_v19  ;;  %v3824_v48 = vadd.f32 %v20317_v18, %v3707_v61  ;;  %v3568_v49 = vadd.f32 %v20323_v44, %v20322_v37  ;;  %v20331_v7 = vld [vmem:[#allocation280_spill] sm:$0xff]  ;;  %v20335_v61 = vld [vmem:[#allocation267_spill] sm:$0xff] }
 0x464   : > { %v20347_v44 = vld [vmem:[#allocation264_spill] sm:$0xff] }
 0x465   : > { %v3713_v6 = vadd.f32 %v3712_v62, %v3603_v16  ;;  %v3909_v16 = vadd.f32 %v20326_v55, %v3824_v48  ;;  %v20342_v48 = vld [vmem:[#allocation146_spill] sm:$0xff]  ;;  %v20348_v55 = vld [vmem:[#allocation184_spill] sm:$0xff] }
 0x467   : > { %v3724_v39 = vpop.f32.mrf.mxu3  ;;  %v3828_v62 = vadd.f32 %v20312_v60, %v3713_v6  ;;  %v15234_v59 = vand.u32 4294901760, %v3909_v16  ;;  %v20337_v60 = vld [vmem:[#allocation134_spill] sm:$0xff] }
 0x468   : > { %v3835_v35 = vpop.f32.mrf.mxu0 }
 0x46a   : > { %v3607_v51 = vpop.f32.mrf.mxu2  ;;  %v3920_v17 = vpop.f32.mrf.mxu1 }
 0x46b   : > { %v3608_v31 = vadd.f32 %v3607_v51, %v3499_v53  ;;  %v20318_v51 = vld [vmem:[#allocation269_spill] sm:$0xff]  ;;  %v3913_v53 = vadd.f32 %v20321_v3, %v3828_v62  ;;  %v20345_v3 = vld [vmem:[#allocation147_spill] sm:$0xff] }
 0x46c   : > { %v3573_v46 = vadd.f32 %v20318_v51, %v3471_v63  ;;  %v20338_v62 = vld [vmem:[#allocation201_spill] sm:$0xff] }
 0x46d   : > { %v3719_v54 = vadd.f32 %v3718_v1, %v3608_v31  ;;  %v3578_v1 = vadd.f32 %v20315_v50, %v3475_v0  ;;  %v20324_v31 = vld [vmem:[#allocation270_spill] sm:$0xff]  ;;  %v15222_v6 = vand.u32 4294901760, %v3913_v53  ;;  %v20341_v50 = vld [vmem:[#allocation272_spill] sm:$0xff] }
 0x46e   : > { %v3677_v5 = vadd.f32 %v20329_v12, %v3573_v46  ;;  %v20344_v46 = vld [vmem:[#allocation268_spill] sm:$0xff] }
 0x46f   : > { %v3832_v58 = vadd.f32 %v3831_v2, %v3719_v54  ;;  %v3730_v23 = vpop.f32.mrf.mxu3  ;;  %v3683_v28 = vadd.f32 %v20324_v31, %v3578_v1  ;;  %v20330_v54 = vld [vmem:[#allocation271_spill] sm:$0xff]  ;;  %v15252_v18 = vsub.f32 %v3913_v53, %v15222_v6 }
 0x470   : > { %v3839_v52 = vpop.f32.mrf.mxu0  ;;  %v3804_v63 = vadd.f32 %v20340_v25, %v3677_v5 }
 0x471   : > { %v3917_v2 = vadd.f32 %v3916_v14, %v3832_v58  ;;  %v20325_v14 = vld [vmem:[#allocation275_spill] sm:$0xff]  ;;  %v3808_v58 = vadd.f32 %v20335_v61, %v3683_v28 }
 0x472   : > { %v3612_v8 = vpop.f32.mrf.mxu2  ;;  %v3816_v45 = vadd.f32 %v20325_v14, %v3695_v22  ;;  %v3924_v38 = vpop.f32.mrf.mxu1  ;;  %v3992_v14 = vand.u32 4294901760, %v15252_v18 }
 0x473   : > { %v3613_v47 = vadd.f32 %v3612_v8, %v3503_v56  ;;  %v15215_v30 = vand.u32 4294901760, %v3917_v2  ;;  %v3893_v26 = vadd.f32 %v20344_v46, %v3808_v58 }
 0x474   : > { %v3993_v10 = vsub.f32 %v15252_v18, %v3992_v14 }
 0x475   : > { %v3725_v43 = vadd.f32 %v3724_v39, %v3613_v47  ;;  %v20328_v39 = vld [vmem:[#allocation261_spill] sm:$0xff]  ;;  %v3812_v47 = vadd.f32 %v20330_v54, %v3689_v9  ;;  %v15237_v15 = vsub.f32 %v3917_v2, %v15215_v30  ;;  %v3659_v2 = vadd.f32 %v20342_v48, %v3558_v20 }
 0x476   : > { %v3563_v8 = vadd.f32 %v20328_v39, %v20327_v27  ;;  %v15283_v39 = vand.u32 4294901760, %v3893_v26  ;;  %v3994_v25 = vand.u32 4294901760, %v3993_v10 }
 0x477   : > { %v3836_v29 = vadd.f32 %v3835_v35, %v3725_v43  ;;  %v3905_v35 = vadd.f32 %v20331_v7, %v3820_v57  ;;  %v3897_v1 = vadd.f32 %v20341_v50, %v3812_v47  ;;  %v3986_v33 = vand.u32 4294901760, %v15237_v15  ;;  %v20350_v47 = vld [vmem:[#allocation167_spill] sm:$0xff]  ;;  %v20351_v7 = vld [vmem:[#allocation225_spill] sm:$0xff] }
 0x478   : > { %v15263_v57 = vsub.f32 %v3909_v16, %v15234_v59  ;;  %v3792_v16 = vadd.f32 %v20348_v55, %v3659_v2 }
 0x479   : > { %v3921_v36 = vadd.f32 %v3920_v17, %v3836_v29  ;;  %v20334_v17 = vld [vmem:[#allocation262_spill] sm:$0xff]  ;;  %v20336_v29 = vld [vmem:[#allocation277_spill] sm:$0xff]  ;;  %v15248_v42 = vand.u32 4294901760, %v3905_v35  ;;  %v15268_v31 = vand.u32 4294901760, %v3897_v1  ;;  %v3987_v12 = vsub.f32 %v15237_v15, %v3986_v33 }
 0x47a   : > { %v3617_v4 = vpop.f32.mrf.mxu2  ;;  %v3671_v19 = vadd.f32 %v20334_v17, %v3568_v49  ;;  %v3901_v0 = vadd.f32 %v20336_v29, %v3816_v45  ;;  %v3889_v49 = vadd.f32 %v20347_v44, %v3804_v63  ;;  %v3998_v5 = vand.u32 4294901760, %v15263_v57 }
 0x47b   : > { %v3618_v13 = vadd.f32 %v3617_v4, %v3507_v34  ;;  %v15208_v21 = vand.u32 4294901760, %v3921_v36  ;;  %v3665_v34 = vadd.f32 %v20339_v24, %v3563_v8  ;;  %v15279_v45 = vsub.f32 %v3905_v35, %v15248_v42 }
 0x47c   : > { %v15303_v17 = vsub.f32 %v3897_v1, %v15268_v31  ;;  %v3988_v29 = vand.u32 4294901760, %v3987_v12 }
 0x47d   : > { %v3731_v40 = vadd.f32 %v3730_v23, %v3618_v13  ;;  %v15225_v43 = vsub.f32 %v3921_v36, %v15208_v21  ;;  %v3553_v36 = vadd.f32 %v20338_v62, %v20337_v60  ;;  %v20343_v13 = vld [vmem:[#allocation259_spill] sm:$0xff]  ;;  %v15259_v23 = vand.u32 4294901760, %v3901_v0 }
 0x47e   : > { %v3800_v51 = vadd.f32 %v20343_v13, %v3671_v19  ;;  %v4004_v20 = vand.u32 4294901760, %v15279_v45  ;;  %v20352_v19 = vld [vmem:[#allocation99_spill] sm:$0xff]  ;;  %v15314_v62 = vsub.f32 %v3893_v26, %v15283_v39  ;;  %v4016_v50 = vand.u32 4294901760, %v15303_v17  ;;  %v322_v13 = vld [vmem:[%s19269_s4] sm:$0xff] }
 0x47f   : > { %v3840_v56 = vadd.f32 %v3839_v52, %v3731_v40  ;;  %v3980_v22 = vand.u32 4294901760, %v15225_v43  ;;  %v3653_v53 = vadd.f32 %v20345_v3, %v3553_v36  ;;  %v20346_v40 = vld [vmem:[#allocation148_spill] sm:$0xff]  ;;  %v15291_v54 = vsub.f32 %v3901_v0, %v15259_v23 }
 0x480   : > { %v3796_v37 = vadd.f32 %v20346_v40, %v3665_v34  ;;  %v3877_v61 = vadd.f32 %v20352_v19, %v3792_v16  ;;  %v3999_v0 = vsub.f32 %v15263_v57, %v3998_v5  ;;  %v20353_v36 = vld [vmem:[#allocation220_spill] sm:$0xff]  ;;  %v4005_v63 = vsub.f32 %v15279_v45, %v4004_v20 }
 0x481   : > { %v3925_v41 = vadd.f32 %v3924_v38, %v3840_v56  ;;  %v3981_v52 = vsub.f32 %v15225_v43, %v3980_v22  ;;  %v20349_v56 = vld [vmem:[#allocation260_spill] sm:$0xff]  ;;  %v3788_v38 = vadd.f32 %v20350_v47, %v3653_v53  ;;  %v4010_v60 = vand.u32 4294901760, %v15291_v54 }
 0x482   : > { %v3885_v27 = vadd.f32 %v20349_v56, %v3800_v51  ;;  %v3881_v35 = vadd.f32 %v20351_v7, %v3796_v37  ;;  %v15327_v48 = vand.u32 4294901760, %v3877_v61  ;;  %v4000_v51 = vand.u32 4294901760, %v3999_v0 }
 0x483   : > { %v15232_v11 = vand.u32 4294901760, %v3925_v41  ;;  %v3982_v32 = vand.u32 4294901760, %v3981_v52  ;;  %v3873_v24 = vadd.f32 %v20353_v36, %v3788_v38  ;;  %v4011_v46 = vsub.f32 %v15291_v54, %v4010_v60 }
 0x484   : > { %v15306_v58 = vand.u32 4294901760, %v3885_v27  ;;  %v15317_v34 = vand.u32 4294901760, %v3881_v35  ;;  %v4022_v26 = vand.u32 4294901760, %v15314_v62  ;;  %v3929_v3 = vsel %vm3927_vm2, %v322_v13, 0 }
 0x485   : > { %3934 = vmatpush.msrb.mxu2 %v15232_v11  ;;  %v15246_v4 = vsub.f32 %v3925_v41, %v15232_v11  ;;  %v15295_v41 = vand.u32 4294901760, %v3889_v49  ;;  %v15340_v53 = vand.u32 4294901760, %v3873_v24  ;;  %v15342_v40 = vand.u32 4294901760, %v3929_v3 }
 0x486   : > { %v15330_v2 = vsub.f32 %v3885_v27, %v15306_v58  ;;  %v4006_v37 = vand.u32 4294901760, %v4005_v63  ;;  %v4017_v44 = vsub.f32 %v15303_v17, %v4016_v50  ;;  %v4012_v55 = vand.u32 4294901760, %v4011_v46 }
 0x487   : > { %3936 = vmatpush.msrb.mxu2 %v15208_v21  ;;  %v3974_v9 = vand.u32 4294901760, %v15246_v4  ;;  %v15325_v1 = vsub.f32 %v3889_v49, %v15295_v41  ;;  %20354 = vst [vmem:[#allocation278_spill] sm:$0xff] %v15342_v40  ;;  %v15353_v52 = vsub.f32 %v3929_v3, %v15342_v40  ;;  %v4023_v16 = vsub.f32 %v15314_v62, %v4022_v26  ;;  %v12174_v3 = vld [vmem:[%s19917_s0 + $0x78] sm:$0xff] }
 0x488   : > { %v4034_v56 = vand.u32 4294901760, %v15330_v2  ;;  %v15361_v27 = vsub.f32 %v3877_v61, %v15327_v48  ;;  %v4018_v12 = vand.u32 4294901760, %v4017_v44  ;;  %v15372_v7 = vsub.f32 %v3873_v24, %v15340_v53  ;;  %v12173_v44 = vld [vmem:[%s19917_s0 + $0x70] sm:$0xff] }
 0x489   : > { %3938 = vmatpush.msrb.mxu2 %v15215_v30  ;;  %v3975_v28 = vsub.f32 %v15246_v4, %v3974_v9  ;;  %v4028_v49 = vand.u32 4294901760, %v15325_v1  ;;  %20355 = vst [vmem:[#allocation283_spill] sm:$0xff] %v15353_v52 }
 0x48a   : > { %v4035_v10 = vsub.f32 %v15330_v2, %v4034_v56  ;;  %v4046_v19 = vand.u32 4294901760, %v15361_v27  ;;  %v4052_v0 = vand.u32 4294901760, %v15372_v7 }
 0x48b   : > { %3940 = vmatpush.msrb.mxu2 %v15222_v6  ;;  %v3976_v8 = vand.u32 4294901760, %v3975_v28  ;;  %v15350_v28 = vsub.f32 %v3881_v35, %v15317_v34  ;;  %v4029_v47 = vsub.f32 %v15325_v1, %v4028_v49 }
 0x48c   : > { %v4036_v24 = vand.u32 4294901760, %v4035_v10  ;;  %v4053_v13 = vsub.f32 %v15372_v7, %v4052_v0 }
 0x48d   : > { %3942 = vmatpush.msrb.mxu2 %v15234_v59  ;;  %3977 = vmatpush.msrb.mxu3 %v3976_v8  ;;  %v15364_v8 = vand.u32 4294901760, %v15353_v52  ;;  %v4040_v38 = vand.u32 4294901760, %v15350_v28  ;;  %v4030_v61 = vand.u32 4294901760, %v4029_v47 }
 0x48e   : > { %v4054_v46 = vand.u32 4294901760, %v4053_v13 }
 0x48f   : > { %3944 = vmatpush.msrb.mxu2 %v15248_v42  ;;  %3983 = vmatpush.msrb.mxu3 %v3982_v32  ;;  %20356 = vst [vmem:[#allocation145_spill] sm:$0xff] %v15364_v8  ;;  %v3964_v35 = vsub.f32 %v15353_v52, %v15364_v8  ;;  %v4024_v32 = vand.u32 4294901760, %v4023_v16 }
 0x491   : > { %3946 = vmatpush.msrb.mxu2 %v15259_v23  ;;  %3989 = vmatpush.msrb.mxu3 %v3988_v29  ;;  %v4041_v29 = vsub.f32 %v15350_v28, %v4040_v38  ;;  %v15386_v36 = vand.u32 4294901760, %v3964_v35  ;;  %v12171_v35 = vld [vmem:[%s19917_s0 + $0x60] sm:$0xff] }
 0x492   : > { %v15451_v10 = vand.u32 4294901760, %v12171_v35 }
 0x493   : > { %3948 = vmatpush.msrb.mxu2 %v15268_v31  ;;  %3995 = vmatpush.msrb.mxu3 %v3994_v25  ;;  %20357 = vst [vmem:[#allocation218_spill] sm:$0xff] %v15386_v36  ;;  %v4047_v25 = vsub.f32 %v15361_v27, %v4046_v19  ;;  %v4042_v63 = vand.u32 4294901760, %v4041_v29 }
 0x494   : > { %v15476_v29 = vsub.f32 %v12171_v35, %v15451_v10  ;;  %v20378_v35 = vld [vmem:[#allocation22_spill] sm:$0xff] }
 0x495   : > { %3950 = vmatpush.msrb.mxu2 %v15283_v39  ;;  %4001 = vmatpush.msrb.mxu3 %v4000_v51  ;;  %v4048_v51 = vand.u32 4294901760, %v4047_v25 }
 0x497   : > { %3952 = vmatpush.msrb.mxu2 %v15295_v41  ;;  %4007 = vmatpush.msrb.mxu3 %v4006_v37  ;;  %v15420_v37 = vand.u32 4294901760, %v12174_v3 }
 0x499   : > { %3954 = vmatpush.msrb.mxu2 %v15306_v58  ;;  %4013 = vmatpush.msrb.mxu3 %v4012_v55  ;;  %v15427_v55 = vand.u32 4294901760, %v12173_v44  ;;  %v15430_v16 = vsub.f32 %v12174_v3, %v15420_v37  ;;  %v20376_v3 = vld [vmem:[#allocation96_spill] sm:$0xff] }
 0x49a   : > { %4619 = vmatpush.msra.mxu1 %v15420_v37 }
 0x49b   : > { %3956 = vmatpush.msrb.mxu2 %v15317_v34  ;;  %4019 = vmatpush.msrb.mxu3 %v4018_v12  ;;  %v12172_v12 = vld [vmem:[%s19917_s0 + $0x68] sm:$0xff] }
 0x49c   : > { %v15438_v47 = vand.u32 4294901760, %v12172_v12  ;;  %4517 = vmatpush.msra.mxu0 %v15430_v16  ;;  %4621 = vmatpush.msra.mxu1 %v15427_v55 }
 0x49d   : > { %3958 = vmatpush.msrb.mxu2 %v15327_v48  ;;  %4025 = vmatpush.msrb.mxu3 %v4024_v32  ;;  %v15446_v32 = vsub.f32 %v12173_v44, %v15427_v55  ;;  %v20377_v44 = vld [vmem:[#allocation85_spill] sm:$0xff] }
 0x49e   : > { %4623 = vmatpush.msra.mxu1 %v15438_v47 }
 0x49f   : > { %3960 = vmatpush.msrb.mxu2 %v15340_v53  ;;  %4031 = vmatpush.msrb.mxu3 %v4030_v61 }
 0x4a0   : > { %3966 = vmatmul.f32.vlgmr.msrb.gmra.mxu2 %v15386_v36  ;;  %4520 = vmatpush.msra.mxu0 %v15446_v32  ;;  %v20503_v36 = vld [vmem:[#allocation158_spill] sm:$0xff] }
 0x4a1   : > { %4065 = vmatpush.msra.mxu2 %v15246_v4  ;;  %4037 = vmatpush.msrb.mxu3 %v4036_v24  ;;  %v15456_v4 = vsub.f32 %v12172_v12, %v15438_v47 }
 0x4a2   : > { %4625 = vmatpush.msra.mxu1 %v15451_v10 }
 0x4a3   : > { %4068 = vmatpush.msra.mxu2 %v15225_v43  ;;  %4043 = vmatpush.msrb.mxu3 %v4042_v63  ;;  %v12169_v43 = vld [vmem:[%s19917_s0 + $0x50] sm:$0xff]  ;;  %v20374_v63 = vld [vmem:[#allocation20_spill] sm:$0xff] }
 0x4a4   : > { %4523 = vmatpush.msra.mxu0 %v15456_v4 }
 0x4a5   : > { %4071 = vmatpush.msra.mxu2 %v15237_v15  ;;  %4049 = vmatpush.msrb.mxu3 %v4048_v51  ;;  %v12168_v15 = vld [vmem:[%s19917_s0 + $0x48] sm:$0xff] }
 0x4a6   : > { %4526 = vmatpush.msra.mxu0 %v15476_v29 }
 0x4a7   : > { %4074 = vmatpush.msra.mxu2 %v15252_v18  ;;  %4055 = vmatpush.msrb.mxu3 %v4054_v46  ;;  %v12167_v18 = vld [vmem:[%s19917_s0 + $0x40] sm:$0xff] }
 0x4a8   : > { %4057 = vmatmul.f32.vlgmr.msrb.gmra.mxu3 %v15342_v40 }
 0x4a9   : > { %4077 = vmatpush.msra.mxu2 %v15263_v57  ;;  %4114 = vmatpush.msra.mxu3 %v15232_v11 }
 0x4ab   : > { %4080 = vmatpush.msra.mxu2 %v15279_v45  ;;  %4116 = vmatpush.msra.mxu3 %v15208_v21  ;;  %v20362_v45 = vld [vmem:[#allocation75_spill] sm:$0xff] }
 0x4ad   : > { %4083 = vmatpush.msra.mxu2 %v15291_v54  ;;  %4118 = vmatpush.msra.mxu3 %v15215_v30  ;;  %v20365_v54 = vld [vmem:[#allocation79_spill] sm:$0xff] }
 0x4af   : > { %4086 = vmatpush.msra.mxu2 %v15303_v17  ;;  %4120 = vmatpush.msra.mxu3 %v15222_v6  ;;  %v4416_v17 = vand.u32 4294901760, %v15456_v4 }
 0x4b1   : > { %4089 = vmatpush.msra.mxu2 %v15314_v62  ;;  %4122 = vmatpush.msra.mxu3 %v15234_v59  ;;  %v20368_v62 = vld [vmem:[#allocation74_spill] sm:$0xff] }
 0x4b3   : > { %4092 = vmatpush.msra.mxu2 %v15325_v1  ;;  %4124 = vmatpush.msra.mxu3 %v15248_v42  ;;  %v20369_v1 = vld [vmem:[#allocation90_spill] sm:$0xff] }
 0x4b5   : > { %4095 = vmatpush.msra.mxu2 %v15330_v2  ;;  %4126 = vmatpush.msra.mxu3 %v15259_v23  ;;  %v20370_v2 = vld [vmem:[#allocation78_spill] sm:$0xff] }
 0x4b7   : > { %4098 = vmatpush.msra.mxu2 %v15350_v28  ;;  %4128 = vmatpush.msra.mxu3 %v15268_v31  ;;  %v20371_v28 = vld [vmem:[#allocation18_spill] sm:$0xff] }
 0x4b9   : > { %4101 = vmatpush.msra.mxu2 %v15361_v27  ;;  %4130 = vmatpush.msra.mxu3 %v15283_v39 }
 0x4bb   : > { %4104 = vmatpush.msra.mxu2 %v15372_v7  ;;  %4132 = vmatpush.msra.mxu3 %v15295_v41 }
 0x4bc   : > { %4107 = vmatmul.f32.vlgmr.msra.gmra.mxu2 %v15353_v52  ;;  %v20502_v52 = vld [vmem:[#allocation173_spill] sm:$0xff] }
 0x4bd   : > { %4153 = vmatpush.msrb.mxu2 %v3974_v9  ;;  %4134 = vmatpush.msra.mxu3 %v15306_v58  ;;  %v12170_v9 = vld [vmem:[%s19917_s0 + $0x58] sm:$0xff] }
 0x4be   : > { %v15466_v61 = vand.u32 4294901760, %v12170_v9 }
 0x4bf   : > { %4157 = vmatpush.msrb.mxu2 %v3980_v22  ;;  %4136 = vmatpush.msra.mxu3 %v15317_v34  ;;  %v15473_v22 = vand.u32 4294901760, %v12169_v43 }
 0x4c0   : > { %v15488_v24 = vsub.f32 %v12170_v9, %v15466_v61  ;;  %4627 = vmatpush.msra.mxu1 %v15466_v61 }
 0x4c1   : > { %4161 = vmatpush.msrb.mxu2 %v3986_v33  ;;  %4138 = vmatpush.msra.mxu3 %v15327_v48  ;;  %v15485_v33 = vand.u32 4294901760, %v12168_v15  ;;  %v15501_v25 = vsub.f32 %v12169_v43, %v15473_v22  ;;  %v20380_v43 = vld [vmem:[#allocation17_spill] sm:$0xff] }
 0x4c2   : > { %4529 = vmatpush.msra.mxu0 %v15488_v24  ;;  %4629 = vmatpush.msra.mxu1 %v15473_v22 }
 0x4c3   : > { %4165 = vmatpush.msrb.mxu2 %v3992_v14  ;;  %4140 = vmatpush.msra.mxu3 %v15340_v53  ;;  %v15498_v14 = vand.u32 4294901760, %v12167_v18 }
 0x4c4   : > { %4144 = vmatmul.f32.vlgmr.msra.gmra.mxu3 %v15364_v8  ;;  %4532 = vmatpush.msra.mxu0 %v15501_v25  ;;  %v20500_v8 = vld [vmem:[#allocation155_spill] sm:$0xff] }
 0x4c5   : > { %4169 = vmatpush.msrb.mxu2 %v3998_v5  ;;  %4214 = vmatpush.msrb.mxu3 %v15232_v11  ;;  %v15508_v11 = vsub.f32 %v12168_v15, %v15485_v33  ;;  %v15516_v57 = vsub.f32 %v12167_v18, %v15498_v14  ;;  %v20364_v5 = vld [vmem:[#allocation14_spill] sm:$0xff]  ;;  %v20383_v18 = vld [vmem:[#allocation69_spill] sm:$0xff] }
 0x4c6   : > { %4631 = vmatpush.msra.mxu1 %v15485_v33 }
 0x4c7   : > { %4173 = vmatpush.msrb.mxu2 %v4004_v20  ;;  %4216 = vmatpush.msrb.mxu3 %v15208_v21  ;;  %v20358_v21 = vld [vmem:[#allocation11_spill] sm:$0xff]  ;;  %v4446_v46 = vand.u32 4294901760, %v15516_v57 }
 0x4c8   : > { %4535 = vmatpush.msra.mxu0 %v15508_v11  ;;  %4633 = vmatpush.msra.mxu1 %v15498_v14  ;;  %v20366_v20 = vld [vmem:[#allocation83_spill] sm:$0xff] }
 0x4c9   : > { %4177 = vmatpush.msrb.mxu2 %v4010_v60  ;;  %4218 = vmatpush.msrb.mxu3 %v15215_v30  ;;  %v20359_v30 = vld [vmem:[#allocation66_spill] sm:$0xff]  ;;  %v20367_v60 = vld [vmem:[#allocation15_spill] sm:$0xff]  ;;  %v4447_v9 = vsub.f32 %v15516_v57, %v4446_v46 }
 0x4ca   : > { %4538 = vmatpush.msra.mxu0 %v15516_v57  ;;  %5089 = vmatpush.msrb.mxu1 %v20362_v45  ;;  %v20385_v57 = vld [vmem:[#allocation26_spill] sm:$0xff] }
 0x4cb   : > { %4181 = vmatpush.msrb.mxu2 %v4016_v50  ;;  %4220 = vmatpush.msrb.mxu3 %v15222_v6  ;;  %v20360_v6 = vld [vmem:[#allocation13_spill] sm:$0xff]  ;;  %v4422_v50 = vand.u32 4294901760, %v15476_v29 }
 0x4cc   : > { %4541 = vmatmul.f32.vlgmr.msra.gmra.mxu0 %v20358_v21  ;;  %4637 = vmatmul.f32.vlgmr.msra.gmra.mxu1 %v20360_v6 }
 0x4cd   : > { %4185 = vmatpush.msrb.mxu2 %v4022_v26  ;;  %4222 = vmatpush.msrb.mxu3 %v15234_v59  ;;  %v20361_v59 = vld [vmem:[#allocation68_spill] sm:$0xff]  ;;  %v4417_v26 = vsub.f32 %v15456_v4, %v4416_v17  ;;  %v4423_v27 = vsub.f32 %v15476_v29, %v4422_v50  ;;  %v20381_v29 = vld [vmem:[#allocation89_spill] sm:$0xff] }
 0x4ce   : > { %4948 = vmatpush.msrb.mxu0 %v20359_v30  ;;  %5095 = vmatpush.msrb.mxu1 %v20365_v54 }
 0x4cf   : > { %4189 = vmatpush.msrb.mxu2 %v4028_v49  ;;  %4224 = vmatpush.msrb.mxu3 %v15248_v42  ;;  %v20363_v42 = vld [vmem:[#allocation71_spill] sm:$0xff]  ;;  %v4428_v49 = vand.u32 4294901760, %v15488_v24  ;;  %v4418_v7 = vand.u32 4294901760, %v4417_v26  ;;  %v4424_v13 = vand.u32 4294901760, %v4423_v27  ;;  %v20395_v26 = vld [vmem:[#allocation32_spill] sm:$0xff]  ;;  %v20400_v27 = vld [vmem:[#allocation34_spill] sm:$0xff] }
 0x4d0   : > { %4950 = vmatpush.msrb.mxu0 %v20361_v59  ;;  %5101 = vmatpush.msrb.mxu1 %v20366_v20 }
 0x4d1   : > { %4193 = vmatpush.msrb.mxu2 %v4034_v56  ;;  %4226 = vmatpush.msrb.mxu3 %v15259_v23  ;;  %v4404_v23 = vand.u32 4294901760, %v15430_v16 }
 0x4d2   : > { %4952 = vmatpush.msrb.mxu0 %v20363_v42  ;;  %5107 = vmatpush.msrb.mxu1 %v20369_v1 }
 0x4d3   : > { %4197 = vmatpush.msrb.mxu2 %v4040_v38  ;;  %4228 = vmatpush.msrb.mxu3 %v15268_v31  ;;  %v4410_v31 = vand.u32 4294901760, %v15446_v32  ;;  %v4434_v38 = vand.u32 4294901760, %v15501_v25 }
 0x4d4   : > { %4546 = vmatmul.f32.gmra.mxu0 %v20364_v5  ;;  %4643 = vmatmul.f32.gmra.mxu1 %v20367_v60 }
 0x4d5   : > { %4201 = vmatpush.msrb.mxu2 %v4046_v19  ;;  %4230 = vmatpush.msrb.mxu3 %v15283_v39  ;;  %v4405_v39 = vsub.f32 %v15430_v16, %v4404_v23  ;;  %v4429_v19 = vsub.f32 %v15488_v24, %v4428_v49  ;;  %v4435_v51 = vsub.f32 %v15501_v25, %v4434_v38  ;;  %v20382_v24 = vld [vmem:[#allocation24_spill] sm:$0xff]  ;;  %v4448_v25 = vand.u32 4294901760, %v4447_v9  ;;  %v20415_v9 = vld [vmem:[#allocation42_spill] sm:$0xff] }
 0x4d6   : > { %4954 = vmatpush.msrb.mxu0 %v20368_v62 }
 0x4d7   : > { %4205 = vmatpush.msrb.mxu2 %v4052_v0  ;;  %4232 = vmatpush.msrb.mxu3 %v15295_v41  ;;  %v4411_v41 = vsub.f32 %v15446_v32, %v4410_v31  ;;  %v4440_v0 = vand.u32 4294901760, %v15508_v11  ;;  %v4430_v16 = vand.u32 4294901760, %v4429_v19  ;;  %v20379_v32 = vld [vmem:[#allocation97_spill] sm:$0xff]  ;;  %v4436_v4 = vand.u32 4294901760, %v4435_v51  ;;  %v20405_v19 = vld [vmem:[#allocation36_spill] sm:$0xff]  ;;  %v20410_v51 = vld [vmem:[#allocation38_spill] sm:$0xff] }
 0x4d8   : > { %4207 = vmatmul.f32.vlgmr.msrb.gmra.mxu2 %v15342_v40  ;;  %4956 = vmatpush.msrb.mxu0 %v20370_v2 }
 0x4d9   : > { %4266 = vmatpush.msra.mxu2 %v15420_v37  ;;  %4234 = vmatpush.msrb.mxu3 %v15306_v58  ;;  %v4406_v58 = vand.u32 4294901760, %v4405_v39  ;;  %v4412_v56 = vand.u32 4294901760, %v4411_v41  ;;  %v4441_v12 = vsub.f32 %v15508_v11, %v4440_v0  ;;  %v20384_v11 = vld [vmem:[#allocation72_spill] sm:$0xff]  ;;  %v20387_v39 = vld [vmem:[#allocation10_spill] sm:$0xff] }
 0x4da   : > { %v20389_v41 = vld [vmem:[#allocation76_spill] sm:$0xff] }
 0x4db   : > { %4268 = vmatpush.msra.mxu2 %v15427_v55  ;;  %4236 = vmatpush.msrb.mxu3 %v15317_v34  ;;  %v20372_v34 = vld [vmem:[#allocation93_spill] sm:$0xff]  ;;  %v4442_v15 = vand.u32 4294901760, %v4441_v12 }
 0x4dc   : > { %4551 = vmatmul.f32.gmra.mxu0 %v20371_v28  ;;  %5113 = vmatpush.msrb.mxu1 %v20372_v34  ;;  %v20413_v12 = vld [vmem:[#allocation21_spill] sm:$0xff] }
 0x4dd   : > { %4270 = vmatpush.msra.mxu2 %v15438_v47  ;;  %4238 = vmatpush.msrb.mxu3 %v15327_v48  ;;  %v20373_v48 = vld [vmem:[#allocation94_spill] sm:$0xff] }
 0x4de   : > { %5119 = vmatpush.msrb.mxu1 %v20373_v48 }
 0x4df   : > { %4272 = vmatpush.msra.mxu2 %v15451_v10  ;;  %4240 = vmatpush.msrb.mxu3 %v15340_v53  ;;  %v20375_v53 = vld [vmem:[#allocation80_spill] sm:$0xff] }
 0x4e0   : > { %4242 = vmatmul.f32.vlgmr.msrb.gmra.mxu3 %v15342_v40  ;;  %4649 = vmatmul.f32.gmra.mxu1 %v20374_v63 }
 0x4e1   : > { %4274 = vmatpush.msra.mxu2 %v15466_v61  ;;  %4407 = vmatpush.msra.mxu3 %v4406_v58  ;;  %v20393_v58 = vld [vmem:[#allocation12_spill] sm:$0xff] }
 0x4e2   : > { %4958 = vmatpush.msrb.mxu0 %v20375_v53  ;;  %5125 = vmatpush.msrb.mxu1 %v20376_v3 }
 0x4e3   : > { %4276 = vmatpush.msra.mxu2 %v15473_v22  ;;  %4413 = vmatpush.msra.mxu3 %v4412_v56  ;;  %v20398_v56 = vld [vmem:[#allocation87_spill] sm:$0xff] }
 0x4e4   : > { %4960 = vmatpush.msrb.mxu0 %v20377_v44  ;;  %5131 = vmatpush.msrb.mxu1 %v20379_v32 }
 0x4e5   : > { %4278 = vmatpush.msra.mxu2 %v15485_v33  ;;  %4419 = vmatpush.msra.mxu3 %v4418_v7  ;;  %v20404_v7 = vld [vmem:[#allocation82_spill] sm:$0xff] }
 0x4e6   : > { %4556 = vmatmul.f32.gmra.mxu0 %v20378_v35  ;;  %5507 = vmatpush.msra.mxu1 %v20359_v30 }
 0x4e7   : > { %4280 = vmatpush.msra.mxu2 %v15498_v14  ;;  %4425 = vmatpush.msra.mxu3 %v4424_v13  ;;  %v20409_v13 = vld [vmem:[#allocation88_spill] sm:$0xff] }
 0x4e8   : > { %4286 = vmatmul.f32.vlgmr.msra.gmra.mxu2 %v20380_v43  ;;  %4962 = vmatpush.msrb.mxu0 %v20381_v29 }
 0x4e9   : > { %4431 = vmatpush.msra.mxu3 %v4430_v16  ;;  %4730 = vmatpush.msrb.mxu2 %v4404_v23  ;;  %v20386_v23 = vld [vmem:[#allocation19_spill] sm:$0xff] }
 0x4ea   : > { %4655 = vmatmul.f32.gmra.mxu1 %v20382_v24  ;;  %5412 = vmatpush.msra.mxu0 %v20383_v18  ;;  %v20412_v16 = vld [vmem:[#allocation31_spill] sm:$0xff]  ;;  %v20454_v18 = vld [vmem:[#allocation126_spill] sm:$0xff] }
 0x4eb   : > { %4437 = vmatpush.msra.mxu3 %v4436_v4  ;;  %4734 = vmatpush.msrb.mxu2 %v4410_v31  ;;  %v20388_v31 = vld [vmem:[#allocation28_spill] sm:$0xff] }
 0x4ec   : > { %5416 = vmatpush.msra.mxu0 %v20384_v11  ;;  %5509 = vmatpush.msra.mxu1 %v20361_v59  ;;  %v20414_v4 = vld [vmem:[#allocation40_spill] sm:$0xff]  ;;  %v20445_v11 = vld [vmem:[#allocation61_spill] sm:$0xff] }
 0x4ed   : > { %4443 = vmatpush.msra.mxu3 %v4442_v15  ;;  %4738 = vmatpush.msrb.mxu2 %v4416_v17  ;;  %v20390_v17 = vld [vmem:[#allocation81_spill] sm:$0xff]  ;;  %v20416_v15 = vld [vmem:[#allocation35_spill] sm:$0xff] }
 0x4ee   : > { %4561 = vmatmul.f32.gmra.mxu0 %v20385_v57  ;;  %5511 = vmatpush.msra.mxu1 %v20363_v42 }
 0x4ef   : > { %4449 = vmatpush.msra.mxu3 %v4448_v25  ;;  %4742 = vmatpush.msrb.mxu2 %v4422_v50  ;;  %v20391_v50 = vld [vmem:[#allocation30_spill] sm:$0xff]  ;;  %v20417_v25 = vld [vmem:[#allocation25_spill] sm:$0xff] }
 0x4f0   : > { %4294 = vmatmul.f32.gmra.mxu2 %v20386_v23  ;;  %4451 = vmatmul.f32.vlgmr.msra.gmra.mxu3 %v20387_v39 }
 0x4f1   : > { %4746 = vmatpush.msrb.mxu2 %v4428_v49  ;;  %4825 = vmatpush.msrb.mxu3 %v15420_v37  ;;  %v20392_v37 = vld [vmem:[#allocation23_spill] sm:$0xff]  ;;  %v20396_v49 = vld [vmem:[#allocation86_spill] sm:$0xff] }
 0x4f2   : > { %4661 = vmatmul.f32.gmra.mxu1 %v20388_v31  ;;  %5420 = vmatpush.msra.mxu0 %v20389_v41  ;;  %v20436_v41 = vld [vmem:[#allocation55_spill] sm:$0xff] }
 0x4f3   : > { %4750 = vmatpush.msrb.mxu2 %v4434_v38  ;;  %4827 = vmatpush.msrb.mxu3 %v15427_v55  ;;  %v20394_v55 = vld [vmem:[#allocation67_spill] sm:$0xff] }
 0x4f4   : > { %5424 = vmatpush.msra.mxu0 %v20390_v17  ;;  %5513 = vmatpush.msra.mxu1 %v20368_v62  ;;  %v20402_v38 = vld [vmem:[#allocation27_spill] sm:$0xff] }
 0x4f5   : > { %4754 = vmatpush.msrb.mxu2 %v4440_v0  ;;  %4829 = vmatpush.msrb.mxu3 %v15438_v47  ;;  %v20397_v47 = vld [vmem:[#allocation70_spill] sm:$0xff]  ;;  %v20407_v0 = vld [vmem:[#allocation84_spill] sm:$0xff]  ;;  %v20424_v17 = vld [vmem:[#allocation43_spill] sm:$0xff] }
 0x4f6   : > { %4566 = vmatmul.f32.gmra.mxu0 %v20391_v50  ;;  %5515 = vmatpush.msra.mxu1 %v20370_v2 }
 0x4f7   : > { %4758 = vmatpush.msrb.mxu2 %v4446_v46  ;;  %4831 = vmatpush.msrb.mxu3 %v15451_v10  ;;  %v20399_v10 = vld [vmem:[#allocation73_spill] sm:$0xff]  ;;  %v20411_v46 = vld [vmem:[#allocation92_spill] sm:$0xff] }
 0x4f8   : > { %4302 = vmatmul.f32.gmra.mxu2 %v20392_v37  ;;  %4455 = vmatmul.f32.gmra.mxu3 %v20393_v58 }
 0x4f9   : > { %4833 = vmatpush.msrb.mxu3 %v15466_v61  ;;  %5199 = vmatpush.msra.mxu2 %v20394_v55  ;;  %v20401_v61 = vld [vmem:[#allocation77_spill] sm:$0xff]  ;;  %v20455_v55 = vld [vmem:[#allocation128_spill] sm:$0xff] }
 0x4fa   : > { %4667 = vmatmul.f32.gmra.mxu1 %v20395_v26  ;;  %5428 = vmatpush.msra.mxu0 %v20396_v49  ;;  %v20423_v49 = vld [vmem:[#allocation50_spill] sm:$0xff]  ;;  %v20448_v26 = vld [vmem:[#allocation112_spill] sm:$0xff] }
 0x4fb   : > { %4835 = vmatpush.msrb.mxu3 %v15473_v22  ;;  %5202 = vmatpush.msra.mxu2 %v20397_v47  ;;  %v20403_v22 = vld [vmem:[#allocation16_spill] sm:$0xff]  ;;  %v20452_v47 = vld [vmem:[#allocation123_spill] sm:$0xff] }
 0x4fc   : > { %5432 = vmatpush.msra.mxu0 %v20398_v56  ;;  %5517 = vmatpush.msra.mxu1 %v20375_v53  ;;  %v20420_v56 = vld [vmem:[#allocation39_spill] sm:$0xff] }
 0x4fd   : > { %4837 = vmatpush.msrb.mxu3 %v15485_v33  ;;  %5205 = vmatpush.msra.mxu2 %v20399_v10  ;;  %v20406_v33 = vld [vmem:[#allocation91_spill] sm:$0xff] }
 0x4fe   : > { %4571 = vmatmul.f32.gmra.mxu0 %v20400_v27  ;;  %5519 = vmatpush.msra.mxu1 %v20377_v44  ;;  %v20443_v27 = vld [vmem:[#allocation65_spill] sm:$0xff] }
 0x4ff   : > { %4839 = vmatpush.msrb.mxu3 %v15498_v14  ;;  %5208 = vmatpush.msra.mxu2 %v20401_v61  ;;  %v20408_v14 = vld [vmem:[#allocation95_spill] sm:$0xff] }
 0x500   : > { %4310 = vmatmul.f32.gmra.mxu2 %v20402_v38  ;;  %4459 = vmatmul.f32.gmra.mxu3 %v20403_v22 }
 0x501   : > { %5301 = vmatpush.msra.mxu3 %v20359_v30  ;;  %5211 = vmatpush.msra.mxu2 %v20404_v7  ;;  %v20447_v7 = vld [vmem:[#allocation109_spill] sm:$0xff] }
 0x502   : > { %4673 = vmatmul.f32.gmra.mxu1 %v20405_v19  ;;  %5436 = vmatpush.msra.mxu0 %v20406_v33  ;;  %v20419_v33 = vld [vmem:[#allocation46_spill] sm:$0xff]  ;;  %v20426_v19 = vld [vmem:[#allocation52_spill] sm:$0xff] }
 0x503   : > { %5303 = vmatpush.msra.mxu3 %v20361_v59  ;;  %5214 = vmatpush.msra.mxu2 %v20407_v0 }
 0x504   : > { %5440 = vmatpush.msra.mxu0 %v20408_v14  ;;  %5521 = vmatpush.msra.mxu1 %v20381_v29  ;;  %v20418_v14 = vld [vmem:[#allocation44_spill] sm:$0xff] }
 0x505   : > { %5305 = vmatpush.msra.mxu3 %v20363_v42  ;;  %5217 = vmatpush.msra.mxu2 %v20409_v13  ;;  %v20440_v13 = vld [vmem:[#allocation49_spill] sm:$0xff] }
 0x506   : > { %4576 = vmatmul.f32.gmra.mxu0 %v20410_v51  ;;  %v20421_v51 = vld [vmem:[#allocation29_spill] sm:$0xff] }
 0x507   : > { %5307 = vmatpush.msra.mxu3 %v20368_v62  ;;  %5220 = vmatpush.msra.mxu2 %v20411_v46  ;;  %v20432_v46 = vld [vmem:[#allocation51_spill] sm:$0xff] }
 0x508   : > { %4318 = vmatmul.f32.gmra.mxu2 %v20412_v16  ;;  %4463 = vmatmul.f32.gmra.mxu3 %v20413_v12  ;;  %v20428_v16 = vld [vmem:[#allocation47_spill] sm:$0xff] }
 0x509   : > { %5309 = vmatpush.msra.mxu3 %v20370_v2 }
 0x50a   : > { %4679 = vmatmul.f32.gmra.mxu1 %v20414_v4  ;;  %v20422_v4 = vld [vmem:[#allocation48_spill] sm:$0xff] }
 0x50b   : > { %5311 = vmatpush.msra.mxu3 %v20375_v53 }
 0x50d   : > { %5313 = vmatpush.msra.mxu3 %v20377_v44 }
 0x50e   : > { %4581 = vmatmul.f32.gmra.mxu0 %v20415_v9  ;;  %v20425_v9 = vld [vmem:[#allocation33_spill] sm:$0xff] }
 0x50f   : > { %5315 = vmatpush.msra.mxu3 %v20381_v29 }
 0x510   : > { %4326 = vmatmul.f32.gmra.mxu2 %v20416_v15  ;;  %4467 = vmatmul.f32.gmra.mxu3 %v20417_v25  ;;  %v20427_v15 = vld [vmem:[#allocation54_spill] sm:$0xff] }
 0x512   : > { %4685 = vmatmul.f32.gmra.mxu1 %v20418_v14  ;;  %v20429_v14 = vld [vmem:[#allocation37_spill] sm:$0xff] }
 0x516   : > { %4586 = vmatmul.f32.gmra.mxu0 %v20419_v33  ;;  %v20430_v33 = vld [vmem:[#allocation56_spill] sm:$0xff] }
 0x518   : > { %4334 = vmatmul.f32.gmra.mxu2 %v20420_v56  ;;  %4471 = vmatmul.f32.gmra.mxu3 %v20421_v51  ;;  %v20431_v56 = vld [vmem:[#allocation58_spill] sm:$0xff] }
 0x51a   : > { %4691 = vmatmul.f32.gmra.mxu1 %v20422_v4  ;;  %v20433_v4 = vld [vmem:[#allocation41_spill] sm:$0xff] }
 0x51e   : > { %4591 = vmatmul.f32.gmra.mxu0 %v20423_v49  ;;  %v20434_v49 = vld [vmem:[#allocation60_spill] sm:$0xff] }
 0x520   : > { %4342 = vmatmul.f32.gmra.mxu2 %v20424_v17  ;;  %4475 = vmatmul.f32.gmra.mxu3 %v20425_v9  ;;  %v20435_v17 = vld [vmem:[#allocation62_spill] sm:$0xff] }
 0x522   : > { %4697 = vmatmul.f32.gmra.mxu1 %v20426_v19  ;;  %v20437_v19 = vld [vmem:[#allocation45_spill] sm:$0xff] }
 0x526   : > { %4596 = vmatmul.f32.gmra.mxu0 %v20427_v15  ;;  %v20438_v15 = vld [vmem:[#allocation64_spill] sm:$0xff] }
 0x528   : > { %4350 = vmatmul.f32.gmra.mxu2 %v20428_v16  ;;  %4479 = vmatmul.f32.gmra.mxu3 %v20429_v14  ;;  %v20439_v16 = vld [vmem:[#allocation59_spill] sm:$0xff] }
 0x52a   : > { %4703 = vmatmul.f32.gmra.mxu1 %v20430_v33  ;;  %v20441_v33 = vld [vmem:[#allocation63_spill] sm:$0xff] }
 0x52e   : > { %4601 = vmatmul.f32.gmra.mxu0 %v20431_v56  ;;  %v20442_v56 = vld [vmem:[#allocation53_spill] sm:$0xff] }
 0x530   : > { %4358 = vmatmul.f32.gmra.mxu2 %v20432_v46  ;;  %4483 = vmatmul.f32.gmra.mxu3 %v20433_v4  ;;  %v3967_v46 = vpop.f32.mrf.mxu2 }
 0x532   : > { %4709 = vmatmul.f32.gmra.mxu1 %v20434_v49  ;;  %v20444_v49 = vld [vmem:[#allocation57_spill] sm:$0xff] }
 0x536   : > { %4606 = vmatmul.f32.gmra.mxu0 %v20435_v17  ;;  %v4058_v17 = vpop.f32.mrf.mxu3 }
 0x537   : > { %v4059_v0 = vadd.f32 %v4058_v17, %v3967_v46  ;;  %v20450_v17 = vld [vmem:[#allocation119_spill] sm:$0xff]  ;;  %v20451_v46 = vld [vmem:[#allocation121_spill] sm:$0xff] }
 0x538   : > { %4366 = vmatmul.f32.gmra.mxu2 %v20436_v41  ;;  %4487 = vmatmul.f32.gmra.mxu3 %v20437_v19 }
 0x53a   : > { %4715 = vmatmul.f32.gmra.mxu1 %v20438_v15  ;;  %v20446_v15 = vld [vmem:[#allocation108_spill] sm:$0xff] }
 0x53f   : > { %v4108_v41 = vpop.f32.mrf.mxu2 }
 0x540   : > { %4374 = vmatmul.f32.gmra.mxu2 %v20439_v16  ;;  %4491 = vmatmul.f32.gmra.mxu3 %v20440_v13 }
 0x547   : > { %v4145_v16 = vpop.f32.mrf.mxu3 }
 0x548   : > { %4382 = vmatmul.f32.gmra.mxu2 %v20441_v33  ;;  %4495 = vmatmul.f32.gmra.mxu3 %v20442_v56  ;;  %v4109_v33 = vadd.f32 %v4108_v41, %v4059_v0  ;;  %v20453_v41 = vld [vmem:[#allocation125_spill] sm:$0xff] }
 0x549   : > { %v4638_v29 = vpop.f32.mrf.mxu1 }
 0x54a   : > { %v4146_v61 = vadd.f32 %v4145_v16, %v4109_v33  ;;  %v20456_v33 = vld [vmem:[#allocation135_spill] sm:$0xff]  ;;  %v20457_v16 = vld [vmem:[#allocation132_spill] sm:$0xff] }
 0x550   : > { %4390 = vmatmul.f32.gmra.mxu2 %v20443_v27  ;;  %4499 = vmatmul.f32.gmra.mxu3 %v20444_v49  ;;  %v20449_v27 = vld [vmem:[#allocation116_spill] sm:$0xff] }
 0x551   : > { %v4644_v24 = vpop.f32.mrf.mxu1 }
 0x558   : > { %4503 = vmatmul.f32.gmra.mxu3 %v20445_v11  ;;  %4760 = vmatmul.f32.vlgmr.msrb.gmra.mxu2 %v20387_v39 }
 0x559   : > { %5588 = vmatpush.msrb.mxu2 %v20446_v15 }
 0x55b   : > { %5590 = vmatpush.msrb.mxu2 %v20447_v7  ;;  %v4208_v38 = vpop.f32.mrf.mxu2 }
 0x55c   : > { %v4209_v10 = vadd.f32 %v4208_v38, %v4146_v61  ;;  %v20458_v61 = vld [vmem:[#allocation139_spill] sm:$0xff]  ;;  %v20460_v38 = vld [vmem:[#allocation142_spill] sm:$0xff] }
 0x55d   : > { %5592 = vmatpush.msrb.mxu2 %v20448_v26  ;;  %v4650_v32 = vpop.f32.mrf.mxu1 }
 0x55f   : > { %5594 = vmatpush.msrb.mxu2 %v20449_v27 }
 0x560   : > { %4764 = vmatmul.f32.gmra.mxu2 %v20393_v58  ;;  %4841 = vmatmul.f32.vlgmr.msrb.gmra.mxu3 %v20387_v39 }
 0x561   : > { %5729 = vmatpush.msrb.mxu3 %v20450_v17  ;;  %5596 = vmatpush.msrb.mxu2 %v20451_v46 }
 0x563   : > { %v4243_v50 = vpop.f32.mrf.mxu3  ;;  %5735 = vmatpush.msrb.mxu3 %v20452_v47  ;;  %5598 = vmatpush.msrb.mxu2 %v20453_v41 }
 0x564   : > { %v4244_v0 = vadd.f32 %v4243_v50, %v4209_v10  ;;  %v20459_v10 = vld [vmem:[#allocation140_spill] sm:$0xff] }
 0x565   : > { %5741 = vmatpush.msrb.mxu3 %v20454_v18  ;;  %5600 = vmatpush.msrb.mxu2 %v20455_v55  ;;  %v20461_v18 = vld [vmem:[#allocation143_spill] sm:$0xff] }
 0x566   : > { %4247 = vst.msk [vmem:[%s15701_s15] sm:$0xff] %vm4246_vm3, %v4244_v0 }
 0x567   : > { %5747 = vmatpush.msrb.mxu3 %v20456_v33  ;;  %5602 = vmatpush.msrb.mxu2 %v20457_v16  ;;  %v4656_v43 = vpop.f32.mrf.mxu1 }
 0x568   : > { %4768 = vmatmul.f32.gmra.mxu2 %v20403_v22  ;;  %4845 = vmatmul.f32.gmra.mxu3 %v20393_v58 }
 0x569   : > { %5753 = vmatpush.msrb.mxu3 %v20458_v61 }
 0x56b   : > { %v4287_v50 = vpop.f32.mrf.mxu2  ;;  %5759 = vmatpush.msrb.mxu3 %v20459_v10 }
 0x56d   : > { %5765 = vmatpush.msrb.mxu3 %v20460_v38 }
 0x56f   : > { %5771 = vmatpush.msrb.mxu3 %v20461_v18 }
 0x570   : > { %4772 = vmatmul.f32.gmra.mxu2 %v20413_v12  ;;  %4849 = vmatmul.f32.gmra.mxu3 %v20403_v22 }
 0x573   : > { %v4295_v0 = vpop.f32.mrf.mxu2  ;;  %v4452_v33 = vpop.f32.mrf.mxu3 }
 0x574   : > { %v4453_v47 = vadd.f32 %v4452_v33, %v4287_v50 }
 0x578   : > { %4776 = vmatmul.f32.gmra.mxu2 %v20417_v25  ;;  %4853 = vmatmul.f32.gmra.mxu3 %v20413_v12 }
 0x57b   : > { %v4303_v17 = vpop.f32.mrf.mxu2  ;;  %v4456_v61 = vpop.f32.mrf.mxu3 }
 0x57c   : > { %v4457_v31 = vadd.f32 %v4456_v61, %v4295_v0 }
 0x580   : > { %4780 = vmatmul.f32.gmra.mxu2 %v20421_v51  ;;  %4857 = vmatmul.f32.gmra.mxu3 %v20417_v25 }
 0x583   : > { %v4311_v38 = vpop.f32.mrf.mxu2  ;;  %v4460_v18 = vpop.f32.mrf.mxu3 }
 0x584   : > { %v15719_v10 = vadd.f32 %v4460_v18, %v4303_v17 }
 0x588   : > { %4784 = vmatmul.f32.gmra.mxu2 %v20425_v9  ;;  %4861 = vmatmul.f32.gmra.mxu3 %v20421_v51 }
 0x58b   : > { %v15723_v33 = vpop.f32.mrf.mxu2  ;;  %v4464_v50 = vpop.f32.mrf.mxu3 }
 0x58c   : > { %v15725_v37 = vadd.f32 %v4464_v50, %v4311_v38 }
 0x590   : > { %4788 = vmatmul.f32.gmra.mxu2 %v20429_v14  ;;  %4865 = vmatmul.f32.gmra.mxu3 %v20425_v9 }
 0x593   : > { %v15729_v61 = vpop.f32.mrf.mxu2  ;;  %v15731_v0 = vpop.f32.mrf.mxu3 }
 0x598   : > { %4792 = vmatmul.f32.gmra.mxu2 %v20433_v4  ;;  %4869 = vmatmul.f32.gmra.mxu3 %v20429_v14 }
 0x59b   : > { %v15735_v18 = vpop.f32.mrf.mxu2  ;;  %v15737_v17 = vpop.f32.mrf.mxu3 }
 0x5a0   : > { %4796 = vmatmul.f32.gmra.mxu2 %v20437_v19  ;;  %4873 = vmatmul.f32.gmra.mxu3 %v20433_v4 }
 0x5a3   : > { %v15741_v38 = vpop.f32.mrf.mxu2  ;;  %v15743_v50 = vpop.f32.mrf.mxu3 }
 0x5a8   : > { %4800 = vmatmul.f32.gmra.mxu2 %v20440_v13  ;;  %4877 = vmatmul.f32.gmra.mxu3 %v20437_v19  ;;  %v4542_v19 = vpop.f32.mrf.mxu0 }
 0x5a9   : > { %v4543_v2 = vadd.f32 %v4542_v19, %v4453_v47  ;;  %v15789_v47 = vpop.f32.mrf.mxu1 }
 0x5ab   : > { %v15747_v9 = vpop.f32.mrf.mxu2  ;;  %v15749_v51 = vpop.f32.mrf.mxu3  ;;  %v4639_v63 = vadd.f32 %v4638_v29, %v4543_v2 }
 0x5b0   : > { %4804 = vmatmul.f32.gmra.mxu2 %v20442_v56  ;;  %4881 = vmatmul.f32.gmra.mxu3 %v20440_v13  ;;  %v4547_v57 = vpop.f32.mrf.mxu0 }
 0x5b1   : > { %v4548_v34 = vadd.f32 %v4547_v57, %v4457_v31  ;;  %v20464_v31 = vld [vmem:[#allocation120_spill] sm:$0xff] }
 0x5b3   : > { %v15753_v14 = vpop.f32.mrf.mxu2  ;;  %v15755_v25 = vpop.f32.mrf.mxu3  ;;  %v4645_v60 = vadd.f32 %v4644_v24, %v4548_v34  ;;  %v20463_v24 = vld [vmem:[#allocation115_spill] sm:$0xff] }
 0x5b8   : > { %4808 = vmatmul.f32.gmra.mxu2 %v20444_v49  ;;  %4885 = vmatmul.f32.gmra.mxu3 %v20442_v56  ;;  %v4552_v23 = vpop.f32.mrf.mxu0 }
 0x5bb   : > { %v15759_v4 = vpop.f32.mrf.mxu2  ;;  %v15761_v12 = vpop.f32.mrf.mxu3 }
 0x5c0   : > { %4812 = vmatmul.f32.gmra.mxu2 %v20445_v11  ;;  %4889 = vmatmul.f32.gmra.mxu3 %v20444_v49  ;;  %v4557_v3 = vpop.f32.mrf.mxu0 }
 0x5c3   : > { %v15765_v22 = vpop.f32.mrf.mxu2  ;;  %v15767_v13 = vpop.f32.mrf.mxu3 }
 0x5c4   : > { %v4493_v54 = vadd.f32 %v15767_v13, %v15759_v4 }
 0x5c8   : > { %4893 = vmatmul.f32.gmra.mxu3 %v20445_v11  ;;  %v15780_v62 = vpop.f32.mrf.mxu0 }
 0x5cb   : > { %v15770_v44 = vpop.f32.mrf.mxu2  ;;  %v15772_v56 = vpop.f32.mrf.mxu3 }
 0x5d3   : > { %v15774_v53 = vpop.f32.mrf.mxu2  ;;  %v15776_v58 = vpop.f32.mrf.mxu3 }
 0x5d4   : > { %v4501_v6 = vadd.f32 %v15776_v58, %v15770_v44 }
 0x5db   : > { %v15778_v49 = vpop.f32.mrf.mxu3  ;;  %v4761_v35 = vpop.f32.mrf.mxu2 }
 0x5dc   : > { %v4762_v48 = vadd.f32 %v4761_v35, %v4639_v63 }
 0x5e3   : > { %v4765_v11 = vpop.f32.mrf.mxu2  ;;  %v4842_v39 = vpop.f32.mrf.mxu3 }
 0x5e4   : > { %v4843_v28 = vadd.f32 %v4842_v39, %v4762_v48  ;;  %v4766_v2 = vadd.f32 %v4765_v11, %v4645_v60  ;;  %v15810_v39 = vpop.f32.mrf.mxu0 }
 0x5e6   : > { %v4898_v1 = vsel %vm331_vm0, %v4843_v28, 0  ;;  %v4553_v28 = vadd.f32 %v4552_v23, %v15719_v10 }
 0x5e7   : > { %v15783_v42 = vand.u32 4294901760, %v4898_v1 }
 0x5e8   : > { %v4651_v23 = vadd.f32 %v4650_v32, %v4553_v28 }
 0x5e9   : > { %v15786_v59 = vsub.f32 %v4898_v1, %v15783_v42  ;;  %5133 = vmatmul.f32.vlgmr.msrb.gmra.mxu1 %v15783_v42  ;;  %v20462_v1 = vld [vmem:[#allocation111_spill] sm:$0xff] }
 0x5ea   : > { %5941 = vmatpush.msrb.mxu1 %v20446_v15 }
 0x5eb   : > { %v4769_v63 = vpop.f32.mrf.mxu2  ;;  %v4846_v35 = vpop.f32.mrf.mxu3  ;;  %5223 = vmatmul.f32.vlgmr.msra.gmra.mxu2 %v15786_v59  ;;  %v15794_v48 = vand.u32 4294901760, %v15786_v59 }
 0x5ec   : > { %v4847_v34 = vadd.f32 %v4846_v35, %v4766_v2  ;;  %5943 = vmatpush.msrb.mxu1 %v20447_v7  ;;  %6052 = vmatpush.msra.mxu2 %v20462_v1  ;;  %v4770_v10 = vadd.f32 %v4769_v63, %v4651_v23  ;;  %v20465_v2 = vld [vmem:[#allocation110_spill] sm:$0xff]  ;;  %v20467_v23 = vld [vmem:[#allocation113_spill] sm:$0xff] }
 0x5ed   : > { %5319 = vmatmul.f32.vlgmr.msra.gmra.mxu3 %v15794_v48  ;;  %v4966_v60 = vsub.f32 %v15786_v59, %v15794_v48 }
 0x5ee   : > { %v4901_v29 = vsel %vm331_vm0, %v4847_v34, 0  ;;  %5945 = vmatpush.msrb.mxu1 %v20448_v26  ;;  %6056 = vmatpush.msra.mxu2 %v20463_v24  ;;  %v4558_v34 = vadd.f32 %v4557_v3, %v15725_v37  ;;  %v20468_v24 = vld [vmem:[#allocation131_spill] sm:$0xff] }
 0x5ef   : > { %v15805_v11 = vand.u32 4294901760, %v4901_v29  ;;  %v15807_v57 = vand.u32 4294901760, %v4966_v60  ;;  %6147 = vmatpush.msra.mxu3 %v20446_v15  ;;  %v15827_v60 = vpop.f32.mrf.mxu1 }
 0x5f0   : > { %5947 = vmatpush.msrb.mxu1 %v20449_v27  ;;  %6060 = vmatpush.msra.mxu2 %v20464_v31  ;;  %v20466_v31 = vld [vmem:[#allocation124_spill] sm:$0xff] }
 0x5f1   : > { %v15815_v19 = vsub.f32 %v4901_v29, %v15805_v11  ;;  %4968 = vmatmul.f32.vlgmr.msrb.gmra.mxu0 %v15807_v57  ;;  %5137 = vmatmul.f32.gmra.mxu1 %v15805_v11 }
 0x5f2   : > { %6149 = vmatpush.msra.mxu3 %v20447_v7  ;;  %5839 = vmatpush.msrb.mxu0 %v20465_v2 }
 0x5f3   : > { %v4773_v35 = vpop.f32.mrf.mxu2  ;;  %v4850_v32 = vpop.f32.mrf.mxu3  ;;  %5228 = vmatmul.f32.gmra.mxu2 %v15815_v19  ;;  %v15823_v28 = vand.u32 4294901760, %v15815_v19  ;;  %5949 = vmatpush.msrb.mxu1 %v20451_v46 }
 0x5f4   : > { %v4851_v29 = vadd.f32 %v4850_v32, %v4770_v10  ;;  %6064 = vmatpush.msra.mxu2 %v20466_v31  ;;  %6151 = vmatpush.msra.mxu3 %v20448_v26  ;;  %v20469_v10 = vld [vmem:[#allocation117_spill] sm:$0xff]  ;;  %v4657_v32 = vadd.f32 %v4656_v43, %v4558_v34  ;;  %v4469_v31 = vadd.f32 %v15731_v0, %v15723_v33 }
 0x5f5   : > { %5325 = vmatmul.f32.gmra.mxu3 %v15823_v28  ;;  %v4974_v63 = vsub.f32 %v15815_v19, %v15823_v28  ;;  %5842 = vmatpush.msrb.mxu0 %v20467_v23  ;;  %v20470_v23 = vld [vmem:[#allocation136_spill] sm:$0xff] }
 0x5f6   : > { %v4904_v2 = vsel %vm331_vm0, %v4851_v29, 0  ;;  %5951 = vmatpush.msrb.mxu1 %v20453_v41  ;;  %6068 = vmatpush.msra.mxu2 %v20468_v24  ;;  %v4774_v24 = vadd.f32 %v4773_v35, %v4657_v32  ;;  %v4563_v0 = vadd.f32 %v15780_v62, %v4469_v31  ;;  %v20473_v32 = vld [vmem:[#allocation127_spill] sm:$0xff]  ;;  %v20475_v31 = vld [vmem:[#allocation130_spill] sm:$0xff] }
 0x5f7   : > { %v15838_v3 = vand.u32 4294901760, %v4904_v2  ;;  %v15840_v37 = vand.u32 4294901760, %v4974_v63  ;;  %6153 = vmatpush.msra.mxu3 %v20449_v27  ;;  %5845 = vmatpush.msrb.mxu0 %v20469_v10  ;;  %v4572_v63 = vpop.f32.mrf.mxu0  ;;  %v20471_v10 = vld [vmem:[#allocation122_spill] sm:$0xff]  ;;  %v4481_v27 = vadd.f32 %v15749_v51, %v15741_v38 }
 0x5f8   : > { %5953 = vmatpush.msrb.mxu1 %v20455_v55  ;;  %6072 = vmatpush.msra.mxu2 %v20470_v23  ;;  %v20472_v23 = vld [vmem:[#allocation137_spill] sm:$0xff] }
 0x5f9   : > { %v15849_v29 = vsub.f32 %v4904_v2, %v15838_v3  ;;  %4976 = vmatmul.f32.gmra.mxu0 %v15840_v37  ;;  %5141 = vmatmul.f32.gmra.mxu1 %v15838_v3 }
 0x5fa   : > { %6155 = vmatpush.msra.mxu3 %v20451_v46  ;;  %5848 = vmatpush.msrb.mxu0 %v20471_v10  ;;  %v4674_v10 = vpop.f32.mrf.mxu1  ;;  %v20474_v46 = vld [vmem:[#allocation141_spill] sm:$0xff] }
 0x5fb   : > { %v4777_v43 = vpop.f32.mrf.mxu2  ;;  %v4854_v34 = vpop.f32.mrf.mxu3  ;;  %5233 = vmatmul.f32.gmra.mxu2 %v15849_v29  ;;  %v15857_v33 = vand.u32 4294901760, %v15849_v29  ;;  %5955 = vmatpush.msrb.mxu1 %v20457_v16 }
 0x5fc   : > { %v4855_v2 = vadd.f32 %v4854_v34, %v4774_v24  ;;  %6076 = vmatpush.msra.mxu2 %v20472_v23  ;;  %6157 = vmatpush.msra.mxu3 %v20453_v41  ;;  %v4663_v34 = vadd.f32 %v15789_v47, %v4563_v0  ;;  %v4473_v23 = vadd.f32 %v15737_v17, %v15729_v61 }
 0x5fd   : > { %5331 = vmatmul.f32.gmra.mxu3 %v15857_v33  ;;  %v4982_v35 = vsub.f32 %v15849_v29, %v15857_v33  ;;  %5851 = vmatpush.msrb.mxu0 %v20473_v32 }
 0x5fe   : > { %v4907_v1 = vsel %vm331_vm0, %v4855_v2, 0  ;;  %6080 = vmatpush.msra.mxu2 %v20474_v46  ;;  %6159 = vmatpush.msra.mxu3 %v20455_v55  ;;  %v4778_v2 = vadd.f32 %v4777_v43, %v4663_v34  ;;  %v20476_v46 = vld [vmem:[#allocation133_spill] sm:$0xff]  ;;  %v4568_v61 = vadd.f32 %v15810_v39, %v4473_v23  ;;  %v4477_v39 = vadd.f32 %v15743_v50, %v15735_v18 }
 0x5ff   : > { %v15870_v62 = vand.u32 4294901760, %v4907_v1  ;;  %v15872_v24 = vand.u32 4294901760, %v4982_v35  ;;  %5854 = vmatpush.msrb.mxu0 %v20475_v31  ;;  %v4577_v17 = vpop.f32.mrf.mxu0 }
 0x600   : > { %6161 = vmatpush.msra.mxu3 %v20457_v16  ;;  %v4669_v16 = vadd.f32 %v15827_v60, %v4568_v61  ;;  %v4573_v60 = vadd.f32 %v4572_v63, %v4477_v39 }
 0x601   : > { %v15880_v32 = vsub.f32 %v4907_v1, %v15870_v62  ;;  %4984 = vmatmul.f32.gmra.mxu0 %v15872_v24  ;;  %5145 = vmatmul.f32.gmra.mxu1 %v15870_v62  ;;  %v20477_v1 = vld [vmem:[#allocation138_spill] sm:$0xff] }
 0x602   : > { %5857 = vmatpush.msrb.mxu0 %v20476_v46  ;;  %v4680_v23 = vpop.f32.mrf.mxu1 }
 0x603   : > { %v4781_v35 = vpop.f32.mrf.mxu2  ;;  %v4858_v55 = vpop.f32.mrf.mxu3  ;;  %5238 = vmatmul.f32.gmra.mxu2 %v15880_v32  ;;  %v15887_v47 = vand.u32 4294901760, %v15880_v32 }
 0x604   : > { %v4859_v0 = vadd.f32 %v4858_v55, %v4778_v2  ;;  %5860 = vmatpush.msrb.mxu0 %v20477_v1  ;;  %v4782_v2 = vadd.f32 %v4781_v35, %v4669_v16  ;;  %v4675_v35 = vadd.f32 %v4674_v10, %v4573_v60  ;;  %v4578_v10 = vadd.f32 %v4577_v17, %v4481_v27 }
 0x605   : > { %5337 = vmatmul.f32.gmra.mxu3 %v15887_v47  ;;  %v4990_v43 = vsub.f32 %v15880_v32, %v15887_v47 }
 0x606   : > { %v4910_v34 = vsel %vm331_vm0, %v4859_v0, 0 }
 0x607   : > { %v15895_v46 = vand.u32 4294901760, %v4910_v34  ;;  %v15897_v31 = vand.u32 4294901760, %v4990_v43  ;;  %v4582_v50 = vpop.f32.mrf.mxu0 }
 0x609   : > { %v15903_v55 = vsub.f32 %v4910_v34, %v15895_v46  ;;  %4992 = vmatmul.f32.gmra.mxu0 %v15897_v31  ;;  %5149 = vmatmul.f32.gmra.mxu1 %v15895_v46 }
 0x60a   : > { %v4686_v63 = vpop.f32.mrf.mxu1 }
 0x60b   : > { %v4785_v1 = vpop.f32.mrf.mxu2  ;;  %v4862_v0 = vpop.f32.mrf.mxu3  ;;  %5243 = vmatmul.f32.gmra.mxu2 %v15903_v55  ;;  %v15909_v43 = vand.u32 4294901760, %v15903_v55 }
 0x60c   : > { %v4863_v61 = vadd.f32 %v4862_v0, %v4782_v2  ;;  %v4786_v39 = vadd.f32 %v4785_v1, %v4675_v35  ;;  %v4681_v1 = vadd.f32 %v4680_v23, %v4578_v10  ;;  %v4485_v35 = vadd.f32 %v15755_v25, %v15747_v9 }
 0x60d   : > { %5343 = vmatmul.f32.gmra.mxu3 %v15909_v43  ;;  %v4998_v18 = vsub.f32 %v15903_v55, %v15909_v43 }
 0x60e   : > { %v4913_v34 = vsel %vm331_vm0, %v4863_v61, 0  ;;  %v4583_v23 = vadd.f32 %v4582_v50, %v4485_v35 }
 0x60f   : > { %v15915_v41 = vand.u32 4294901760, %v4913_v34  ;;  %v15917_v16 = vand.u32 4294901760, %v4998_v18  ;;  %v4587_v7 = vpop.f32.mrf.mxu0 }
 0x611   : > { %20478 = vst [vmem:[#allocation273_spill] sm:$0xff] %v15915_v41  ;;  %v15922_v26 = vsub.f32 %v4913_v34, %v15915_v41  ;;  %5000 = vmatmul.f32.gmra.mxu0 %v15917_v16  ;;  %5153 = vmatmul.f32.gmra.mxu1 %v15915_v41 }
 0x613   : > { %20479 = vst [vmem:[#allocation276_spill] sm:$0xff] %v15922_v26  ;;  %v4789_v2 = vpop.f32.mrf.mxu2  ;;  %v4866_v0 = vpop.f32.mrf.mxu3  ;;  %5248 = vmatmul.f32.gmra.mxu2 %v15922_v26  ;;  %v15928_v61 = vand.u32 4294901760, %v15922_v26 }
 0x614   : > { %v4867_v60 = vadd.f32 %v4866_v0, %v4786_v39  ;;  %v4790_v27 = vadd.f32 %v4789_v2, %v4681_v1  ;;  %v4489_v1 = vadd.f32 %v15761_v12, %v15753_v14 }
 0x615   : > { %5349 = vmatmul.f32.gmra.mxu3 %v15928_v61  ;;  %v5006_v51 = vsub.f32 %v15922_v26, %v15928_v61 }
 0x616   : > { %v4916_v38 = vsel %vm331_vm0, %v4867_v60, 0  ;;  %v4692_v60 = vpop.f32.mrf.mxu1 }
 0x617   : > { %v15934_v18 = vand.u32 4294901760, %v4916_v38  ;;  %v15936_v34 = vand.u32 4294901760, %v5006_v51  ;;  %v4592_v50 = vpop.f32.mrf.mxu0 }
 0x619   : > { %v15941_v15 = vsub.f32 %v4916_v38, %v15934_v18  ;;  %5008 = vmatmul.f32.gmra.mxu0 %v15936_v34  ;;  %5157 = vmatmul.f32.gmra.mxu1 %v15934_v18  ;;  %v4687_v38 = vadd.f32 %v4686_v63, %v4583_v23  ;;  %v4588_v63 = vadd.f32 %v4587_v7, %v4489_v1 }
 0x61b   : > { %20480 = vst [vmem:[#allocation281_spill] sm:$0xff] %v15941_v15  ;;  %v4793_v17 = vpop.f32.mrf.mxu2  ;;  %v4870_v39 = vpop.f32.mrf.mxu3  ;;  %5253 = vmatmul.f32.gmra.mxu2 %v15941_v15  ;;  %v15947_v0 = vand.u32 4294901760, %v15941_v15 }
 0x61c   : > { %v4871_v10 = vadd.f32 %v4870_v39, %v4790_v27  ;;  %v4794_v35 = vadd.f32 %v4793_v17, %v4687_v38  ;;  %v4693_v38 = vadd.f32 %v4692_v60, %v4588_v63 }
 0x61d   : > { %20481 = vst [vmem:[#allocation269_spill] sm:$0xff] %v15947_v0  ;;  %5355 = vmatmul.f32.gmra.mxu3 %v15947_v0  ;;  %v5014_v9 = vsub.f32 %v15941_v15, %v15947_v0 }
 0x61e   : > { %v4919_v25 = vsel %vm331_vm0, %v4871_v10, 0 }
 0x61f   : > { %v15953_v51 = vand.u32 4294901760, %v4919_v25  ;;  %v15955_v2 = vand.u32 4294901760, %v5014_v9  ;;  %v4698_v9 = vpop.f32.mrf.mxu1  ;;  %v4597_v63 = vpop.f32.mrf.mxu0 }
 0x621   : > { %v15960_v20 = vsub.f32 %v4919_v25, %v15953_v51  ;;  %5016 = vmatmul.f32.gmra.mxu0 %v15955_v2  ;;  %5161 = vmatmul.f32.gmra.mxu1 %v15953_v51 }
 0x623   : > { %20482 = vst [vmem:[#allocation274_spill] sm:$0xff] %v15960_v20  ;;  %v4797_v27 = vpop.f32.mrf.mxu2  ;;  %v4874_v39 = vpop.f32.mrf.mxu3  ;;  %5258 = vmatmul.f32.gmra.mxu2 %v15960_v20  ;;  %v15966_v10 = vand.u32 4294901760, %v15960_v20 }
 0x624   : > { %v4875_v23 = vadd.f32 %v4874_v39, %v4794_v35  ;;  %v4798_v7 = vadd.f32 %v4797_v27, %v4693_v38  ;;  %v4497_v38 = vadd.f32 %v15772_v56, %v15765_v22 }
 0x625   : > { %20483 = vst [vmem:[#allocation279_spill] sm:$0xff] %v15966_v10  ;;  %5361 = vmatmul.f32.gmra.mxu3 %v15966_v10  ;;  %v5022_v14 = vsub.f32 %v15960_v20, %v15966_v10  ;;  %v20540_v10 = vld [vmem:[#allocation200_spill] sm:$0xff] }
 0x626   : > { %v4922_v12 = vsel %vm331_vm0, %v4875_v23, 0  ;;  %v4593_v23 = vadd.f32 %v4592_v50, %v4493_v54 }
 0x627   : > { %v15972_v25 = vand.u32 4294901760, %v4922_v12  ;;  %v15974_v17 = vand.u32 4294901760, %v5022_v14  ;;  %v4704_v45 = vpop.f32.mrf.mxu1 }
 0x629   : > { %v15979_v5 = vsub.f32 %v4922_v12, %v15972_v25  ;;  %5024 = vmatmul.f32.gmra.mxu0 %v15974_v17  ;;  %5165 = vmatmul.f32.gmra.mxu1 %v15972_v25  ;;  %v4699_v12 = vadd.f32 %v4698_v9, %v4593_v23  ;;  %v4598_v9 = vadd.f32 %v4597_v63, %v4497_v38 }
 0x62b   : > { %20484 = vst [vmem:[#allocation284_spill] sm:$0xff] %v15979_v5  ;;  %v4801_v1 = vpop.f32.mrf.mxu2  ;;  %v4878_v35 = vpop.f32.mrf.mxu3  ;;  %5263 = vmatmul.f32.gmra.mxu2 %v15979_v5  ;;  %v15985_v39 = vand.u32 4294901760, %v15979_v5 }
 0x62c   : > { %v4879_v60 = vadd.f32 %v4878_v35, %v4798_v7  ;;  %v4802_v50 = vadd.f32 %v4801_v1, %v4699_v12  ;;  %v4705_v12 = vadd.f32 %v4704_v45, %v4598_v9 }
 0x62d   : > { %20485 = vst [vmem:[#allocation144_spill] sm:$0xff] %v15985_v39  ;;  %5367 = vmatmul.f32.gmra.mxu3 %v15985_v39  ;;  %v5030_v13 = vsub.f32 %v15979_v5, %v15985_v39  ;;  %v20531_v5 = vld [vmem:[#allocation188_spill] sm:$0xff]  ;;  %v20537_v39 = vld [vmem:[#allocation198_spill] sm:$0xff] }
 0x62e   : > { %v4925_v4 = vsel %vm331_vm0, %v4879_v60, 0 }
 0x62f   : > { %v15991_v14 = vand.u32 4294901760, %v4925_v4  ;;  %v15993_v27 = vand.u32 4294901760, %v5030_v13  ;;  %v4602_v13 = vpop.f32.mrf.mxu0  ;;  %v4710_v38 = vpop.f32.mrf.mxu1 }
 0x631   : > { %v15998_v54 = vsub.f32 %v4925_v4, %v15991_v14  ;;  %5032 = vmatmul.f32.gmra.mxu0 %v15993_v27  ;;  %5169 = vmatmul.f32.gmra.mxu1 %v15991_v14 }
 0x633   : > { %20486 = vst [vmem:[#allocation265_spill] sm:$0xff] %v15998_v54  ;;  %v4805_v7 = vpop.f32.mrf.mxu2  ;;  %v4882_v35 = vpop.f32.mrf.mxu3  ;;  %5268 = vmatmul.f32.gmra.mxu2 %v15998_v54  ;;  %v16004_v60 = vand.u32 4294901760, %v15998_v54 }
 0x634   : > { %v4883_v23 = vadd.f32 %v4882_v35, %v4802_v50  ;;  %v4806_v63 = vadd.f32 %v4805_v7, %v4705_v12  ;;  %v4505_v12 = vadd.f32 %v15778_v49, %v15774_v53 }
 0x635   : > { %20487 = vst [vmem:[#allocation270_spill] sm:$0xff] %v16004_v60  ;;  %5373 = vmatmul.f32.gmra.mxu3 %v16004_v60  ;;  %v5038_v56 = vsub.f32 %v15998_v54, %v16004_v60  ;;  %v20528_v54 = vld [vmem:[#allocation185_spill] sm:$0xff] }
 0x636   : > { %v4928_v22 = vsel %vm331_vm0, %v4883_v23, 0  ;;  %v4603_v23 = vadd.f32 %v4602_v13, %v4501_v6 }
 0x637   : > { %v16010_v4 = vand.u32 4294901760, %v4928_v22  ;;  %v16012_v1 = vand.u32 4294901760, %v5038_v56  ;;  %v4607_v21 = vpop.f32.mrf.mxu0 }
 0x639   : > { %v16017_v30 = vsub.f32 %v4928_v22, %v16010_v4  ;;  %5040 = vmatmul.f32.gmra.mxu0 %v16012_v1  ;;  %5173 = vmatmul.f32.gmra.mxu1 %v16010_v4  ;;  %v4711_v22 = vadd.f32 %v4710_v38, %v4603_v23  ;;  %v4716_v23 = vpop.f32.mrf.mxu1 }
 0x63b   : > { %20488 = vst [vmem:[#allocation275_spill] sm:$0xff] %v16017_v30  ;;  %v4886_v50 = vpop.f32.mrf.mxu3  ;;  %5273 = vmatmul.f32.gmra.mxu2 %v16017_v30  ;;  %v16023_v35 = vand.u32 4294901760, %v16017_v30  ;;  %v4809_v9 = vpop.f32.mrf.mxu2 }
 0x63c   : > { %v4887_v45 = vadd.f32 %v4886_v50, %v4806_v63  ;;  %v4810_v13 = vadd.f32 %v4809_v9, %v4711_v22 }
 0x63d   : > { %20489 = vst [vmem:[#allocation282_spill] sm:$0xff] %v16023_v35  ;;  %5379 = vmatmul.f32.gmra.mxu3 %v16023_v35  ;;  %v5046_v44 = vsub.f32 %v16017_v30, %v16023_v35  ;;  %v20522_v35 = vld [vmem:[#allocation176_spill] sm:$0xff] }
 0x63e   : > { %v4931_v58 = vsel %vm331_vm0, %v4887_v45, 0  ;;  %v4608_v45 = vadd.f32 %v4607_v21, %v4505_v12 }
 0x63f   : > { %v16029_v56 = vand.u32 4294901760, %v4931_v58  ;;  %v16031_v7 = vand.u32 4294901760, %v5046_v44 }
 0x640   : > { %v4717_v22 = vadd.f32 %v4716_v23, %v4608_v45 }
 0x641   : > { %v16036_v6 = vsub.f32 %v4931_v58, %v16029_v56  ;;  %5048 = vmatmul.f32.gmra.mxu0 %v16031_v7  ;;  %5177 = vmatmul.f32.gmra.mxu1 %v16029_v56 }
 0x643   : > { %20490 = vst [vmem:[#allocation219_spill] sm:$0xff] %v16036_v6  ;;  %v4890_v63 = vpop.f32.mrf.mxu3  ;;  %5278 = vmatmul.f32.gmra.mxu2 %v16036_v6  ;;  %v16042_v50 = vand.u32 4294901760, %v16036_v6  ;;  %v4813_v44 = vpop.f32.mrf.mxu2 }
 0x644   : > { %v4891_v38 = vadd.f32 %v4890_v63, %v4810_v13  ;;  %v4814_v21 = vadd.f32 %v4813_v44, %v4717_v22 }
 0x645   : > { %20491 = vst [vmem:[#allocation261_spill] sm:$0xff] %v16042_v50  ;;  %5385 = vmatmul.f32.gmra.mxu3 %v16042_v50  ;;  %v5054_v53 = vsub.f32 %v16036_v6, %v16042_v50  ;;  %v20519_v50 = vld [vmem:[#allocation171_spill] sm:$0xff] }
 0x646   : > { %v4934_v49 = vsel %vm331_vm0, %v4891_v38, 0 }
 0x647   : > { %v16048_v58 = vand.u32 4294901760, %v4934_v49  ;;  %v16050_v9 = vand.u32 4294901760, %v5054_v53 }
 0x649   : > { %v16053_v40 = vsub.f32 %v4934_v49, %v16048_v58  ;;  %5056 = vmatmul.f32.gmra.mxu0 %v16050_v9  ;;  %5181 = vmatmul.f32.gmra.mxu1 %v16048_v58 }
 0x64b   : > { %20492 = vst [vmem:[#allocation266_spill] sm:$0xff] %v16053_v40  ;;  %v4894_v12 = vpop.f32.mrf.mxu3  ;;  %5283 = vmatmul.f32.gmra.mxu2 %v16053_v40  ;;  %v16059_v13 = vand.u32 4294901760, %v16053_v40 }
 0x64c   : > { %v4895_v63 = vadd.f32 %v4894_v12, %v4814_v21  ;;  %v20496_v12 = vld [vmem:[#allocation161_spill] sm:$0xff] }
 0x64d   : > { %20493 = vst [vmem:[#allocation271_spill] sm:$0xff] %v16059_v13  ;;  %5391 = vmatmul.f32.gmra.mxu3 %v16059_v13  ;;  %v5062_v45 = vsub.f32 %v16053_v40, %v16059_v13  ;;  %v20518_v40 = vld [vmem:[#allocation179_spill] sm:$0xff] }
 0x64e   : > { %v4937_v38 = vsel %vm331_vm0, %v4895_v63, 0  ;;  %v20497_v63 = vld [vmem:[#allocation164_spill] sm:$0xff] }
 0x64f   : > { %v16065_v23 = vand.u32 4294901760, %v4937_v38  ;;  %v16067_v53 = vand.u32 4294901760, %v5062_v45  ;;  %v20498_v45 = vld [vmem:[#allocation103_spill] sm:$0xff] }
 0x651   : > { %v16070_v49 = vsub.f32 %v4937_v38, %v16065_v23  ;;  %5064 = vmatmul.f32.gmra.mxu0 %v16067_v53  ;;  %5185 = vmatmul.f32.gmra.mxu1 %v16065_v23  ;;  %v20499_v38 = vld [vmem:[#allocation169_spill] sm:$0xff] }
 0x653   : > { %20494 = vst [vmem:[#allocation280_spill] sm:$0xff] %v16070_v49  ;;  %5288 = vmatmul.f32.gmra.mxu2 %v16070_v49  ;;  %v16076_v44 = vand.u32 4294901760, %v16070_v49 }
 0x655   : > { %20495 = vst [vmem:[#allocation129_spill] sm:$0xff] %v16076_v44  ;;  %5397 = vmatmul.f32.gmra.mxu3 %v16076_v44  ;;  %v5070_v22 = vsub.f32 %v16070_v49, %v16076_v44  ;;  %v20516_v49 = vld [vmem:[#allocation166_spill] sm:$0xff]  ;;  %v20517_v44 = vld [vmem:[#allocation195_spill] sm:$0xff] }
 0x657   : > { %v16081_v21 = vand.u32 4294901760, %v5070_v22  ;;  %v20501_v22 = vld [vmem:[#allocation152_spill] sm:$0xff] }
 0x659   : > { %5072 = vmatmul.f32.gmra.mxu0 %v16081_v21  ;;  %5523 = vmatmul.f32.vlgmr.msra.gmra.mxu1 %v15783_v42 }
 0x65a   : > { %6524 = vmatpush.msra.mxu1 %v20496_v12  ;;  %v20510_v12 = vld [vmem:[#allocation159_spill] sm:$0xff] }
 0x65b   : > { %5608 = vmatmul.f32.vlgmr.msrb.gmra.mxu2 %v15807_v57  ;;  %v20504_v57 = vld [vmem:[#allocation153_spill] sm:$0xff] }
 0x65c   : > { %6530 = vmatpush.msra.mxu1 %v20497_v63  ;;  %6674 = vmatpush.msrb.mxu2 %v20498_v45  ;;  %v20505_v45 = vld [vmem:[#allocation104_spill] sm:$0xff] }
 0x65d   : > { %5773 = vmatmul.f32.vlgmr.msrb.gmra.mxu3 %v15783_v42  ;;  %v20509_v63 = vld [vmem:[#allocation168_spill] sm:$0xff] }
 0x65e   : > { %6536 = vmatpush.msra.mxu1 %v20499_v38  ;;  %6677 = vmatpush.msrb.mxu2 %v20500_v8  ;;  %v20506_v38 = vld [vmem:[#allocation163_spill] sm:$0xff]  ;;  %v20507_v8 = vld [vmem:[#allocation156_spill] sm:$0xff] }
 0x65f   : > { %6792 = vmatpush.msrb.mxu3 %v20501_v22 }
 0x660   : > { %6542 = vmatpush.msra.mxu1 %v20502_v52  ;;  %6680 = vmatpush.msrb.mxu2 %v20503_v36  ;;  %v20508_v52 = vld [vmem:[#allocation181_spill] sm:$0xff] }
 0x661   : > { %5442 = vmatmul.f32.vlgmr.msra.gmra.mxu0 %v15783_v42  ;;  %5527 = vmatmul.f32.gmra.mxu1 %v15805_v11 }
 0x662   : > { %6794 = vmatpush.msrb.mxu3 %v20504_v57  ;;  %6375 = vmatpush.msra.mxu0 %v20501_v22 }
 0x663   : > { %5616 = vmatmul.f32.gmra.mxu2 %v15840_v37  ;;  %6548 = vmatpush.msra.mxu1 %v20505_v45  ;;  %v20511_v37 = vld [vmem:[#allocation186_spill] sm:$0xff] }
 0x664   : > { %6683 = vmatpush.msrb.mxu2 %v20506_v38  ;;  %6796 = vmatpush.msrb.mxu3 %v20507_v8  ;;  %v20512_v45 = vld [vmem:[#allocation170_spill] sm:$0xff] }
 0x665   : > { %5777 = vmatmul.f32.gmra.mxu3 %v15805_v11  ;;  %6377 = vmatpush.msra.mxu0 %v20504_v57  ;;  %v20513_v38 = vld [vmem:[#allocation102_spill] sm:$0xff] }
 0x666   : > { %v5134_v36 = vpop.f32.mrf.mxu1  ;;  %6554 = vmatpush.msra.mxu1 %v20508_v52  ;;  %6686 = vmatpush.msrb.mxu2 %v20509_v63  ;;  %v20514_v52 = vld [vmem:[#allocation190_spill] sm:$0xff]  ;;  %v20515_v63 = vld [vmem:[#allocation175_spill] sm:$0xff] }
 0x667   : > { %6798 = vmatpush.msrb.mxu3 %v20510_v12  ;;  %6379 = vmatpush.msra.mxu0 %v20507_v8 }
 0x668   : > { %6560 = vmatpush.msra.mxu1 %v20511_v37  ;;  %6689 = vmatpush.msrb.mxu2 %v20512_v45 }
 0x669   : > { %5446 = vmatmul.f32.gmra.mxu0 %v15805_v11  ;;  %5531 = vmatmul.f32.gmra.mxu1 %v15838_v3 }
 0x66a   : > { %6800 = vmatpush.msrb.mxu3 %v20513_v38  ;;  %6381 = vmatpush.msra.mxu0 %v20510_v12 }
 0x66b   : > { %5624 = vmatmul.f32.gmra.mxu2 %v15872_v24  ;;  %6566 = vmatpush.msra.mxu1 %v20514_v52  ;;  %v20521_v52 = vld [vmem:[#allocation183_spill] sm:$0xff] }
 0x66c   : > { %6692 = vmatpush.msrb.mxu2 %v20515_v63  ;;  %6802 = vmatpush.msrb.mxu3 %v20516_v49  ;;  %v20520_v63 = vld [vmem:[#allocation202_spill] sm:$0xff] }
 0x66d   : > { %5781 = vmatmul.f32.gmra.mxu3 %v15838_v3  ;;  %6383 = vmatpush.msra.mxu0 %v20513_v38 }
 0x66e   : > { %v4969_v45 = vpop.f32.mrf.mxu0  ;;  %v5138_v37 = vpop.f32.mrf.mxu1  ;;  %6572 = vmatpush.msra.mxu1 %v20517_v44  ;;  %6695 = vmatpush.msrb.mxu2 %v20518_v40  ;;  %v20524_v40 = vld [vmem:[#allocation189_spill] sm:$0xff]  ;;  %v20527_v44 = vld [vmem:[#allocation191_spill] sm:$0xff] }
 0x66f   : > { %v5135_v13 = vadd.f32 %v5134_v36, %v4969_v45  ;;  %v5224_v6 = vpop.f32.mrf.mxu2  ;;  %6804 = vmatpush.msrb.mxu3 %v20519_v50  ;;  %6385 = vmatpush.msra.mxu0 %v20516_v49  ;;  %v20523_v45 = vld [vmem:[#allocation203_spill] sm:$0xff] }
 0x670   : > { %v5320_v24 = vpop.f32.mrf.mxu3  ;;  %6578 = vmatpush.msra.mxu1 %v20520_v63  ;;  %6698 = vmatpush.msrb.mxu2 %v20521_v52  ;;  %v20525_v63 = vld [vmem:[#allocation180_spill] sm:$0xff]  ;;  %v20526_v52 = vld [vmem:[#allocation207_spill] sm:$0xff] }
 0x671   : > { %v5225_v30 = vadd.f32 %v5224_v6, %v5135_v13  ;;  %5450 = vmatmul.f32.gmra.mxu0 %v15838_v3  ;;  %5535 = vmatmul.f32.gmra.mxu1 %v15870_v62 }
 0x672   : > { %6806 = vmatpush.msrb.mxu3 %v20522_v35  ;;  %6387 = vmatpush.msra.mxu0 %v20519_v50 }
 0x673   : > { %v16131_v36 = vadd.f32 %v5320_v24, %v5225_v30  ;;  %5632 = vmatmul.f32.gmra.mxu2 %v15897_v31  ;;  %6584 = vmatpush.msra.mxu1 %v20523_v45  ;;  %v20530_v45 = vld [vmem:[#allocation197_spill] sm:$0xff] }
 0x674   : > { %6701 = vmatpush.msrb.mxu2 %v20524_v40  ;;  %6808 = vmatpush.msrb.mxu3 %v20525_v63  ;;  %v20529_v40 = vld [vmem:[#allocation212_spill] sm:$0xff] }
 0x675   : > { %5785 = vmatmul.f32.gmra.mxu3 %v15870_v62  ;;  %6389 = vmatpush.msra.mxu0 %v20522_v35 }
 0x676   : > { %v4977_v6 = vpop.f32.mrf.mxu0  ;;  %v5142_v13 = vpop.f32.mrf.mxu1  ;;  %6590 = vmatpush.msra.mxu1 %v20526_v52  ;;  %6704 = vmatpush.msrb.mxu2 %v20527_v44  ;;  %v20533_v44 = vld [vmem:[#allocation199_spill] sm:$0xff]  ;;  %v20536_v52 = vld [vmem:[#allocation205_spill] sm:$0xff] }
 0x677   : > { %v5139_v30 = vadd.f32 %v5138_v37, %v4977_v6  ;;  %v5229_v24 = vpop.f32.mrf.mxu2  ;;  %6810 = vmatpush.msrb.mxu3 %v20528_v54  ;;  %6391 = vmatpush.msra.mxu0 %v20525_v63  ;;  %v20532_v6 = vld [vmem:[#allocation214_spill] sm:$0xff] }
 0x678   : > { %v5326_v31 = vpop.f32.mrf.mxu3  ;;  %6596 = vmatpush.msra.mxu1 %v20529_v40  ;;  %6707 = vmatpush.msrb.mxu2 %v20530_v45  ;;  %v20534_v40 = vld [vmem:[#allocation192_spill] sm:$0xff] }
 0x679   : > { %v5230_v60 = vadd.f32 %v5229_v24, %v5139_v30  ;;  %5454 = vmatmul.f32.gmra.mxu0 %v15870_v62  ;;  %5539 = vmatmul.f32.gmra.mxu1 %v15895_v46  ;;  %v20535_v45 = vld [vmem:[#allocation216_spill] sm:$0xff] }
 0x67a   : > { %6812 = vmatpush.msrb.mxu3 %v20531_v5  ;;  %6393 = vmatpush.msra.mxu0 %v20528_v54 }
 0x67b   : > { %v16149_v37 = vadd.f32 %v5326_v31, %v5230_v60  ;;  %5640 = vmatmul.f32.gmra.mxu2 %v15917_v16  ;;  %6602 = vmatpush.msra.mxu1 %v20532_v6  ;;  %v20539_v6 = vld [vmem:[#allocation210_spill] sm:$0xff] }
 0x67c   : > { %6710 = vmatpush.msrb.mxu2 %v20533_v44  ;;  %6814 = vmatpush.msrb.mxu3 %v20534_v40  ;;  %v20538_v44 = vld [vmem:[#allocation217_spill] sm:$0xff] }
 0x67d   : > { %5789 = vmatmul.f32.gmra.mxu3 %v15895_v46  ;;  %6395 = vmatpush.msra.mxu0 %v20531_v5 }
 0x67e   : > { %v4985_v30 = vpop.f32.mrf.mxu0  ;;  %v5146_v24 = vpop.f32.mrf.mxu1  ;;  %6608 = vmatpush.msra.mxu1 %v20535_v45  ;;  %6713 = vmatpush.msrb.mxu2 %v20536_v52  ;;  %v20542_v52 = vld [vmem:[#allocation206_spill] sm:$0xff] }
 0x67f   : > { %v5143_v60 = vadd.f32 %v5142_v13, %v4985_v30  ;;  %v5234_v31 = vpop.f32.mrf.mxu2  ;;  %6816 = vmatpush.msrb.mxu3 %v20537_v39  ;;  %6397 = vmatpush.msra.mxu0 %v20534_v40  ;;  %v20541_v30 = vld [vmem:[#allocation213_spill] sm:$0xff] }
 0x680   : > { %v5332_v16 = vpop.f32.mrf.mxu3  ;;  %6614 = vmatpush.msra.mxu1 %v20538_v44  ;;  %6716 = vmatpush.msrb.mxu2 %v20539_v6  ;;  %v20543_v6 = vld [vmem:[#allocation209_spill] sm:$0xff] }
 0x681   : > { %v5235_v20 = vadd.f32 %v5234_v31, %v5143_v60  ;;  %5458 = vmatmul.f32.gmra.mxu0 %v15895_v46  ;;  %5543 = vmatmul.f32.gmra.mxu1 %v15915_v41 }
 0x682   : > { %6818 = vmatpush.msrb.mxu3 %v20540_v10  ;;  %6399 = vmatpush.msra.mxu0 %v20537_v39 }
 0x683   : > { %v16167_v13 = vadd.f32 %v5332_v16, %v5235_v20  ;;  %5648 = vmatmul.f32.gmra.mxu2 %v15936_v34 }
 0x684   : > { %6719 = vmatpush.msrb.mxu2 %v20541_v30  ;;  %6820 = vmatpush.msrb.mxu3 %v20542_v52 }
 0x685   : > { %5793 = vmatmul.f32.gmra.mxu3 %v15915_v41  ;;  %6401 = vmatpush.msra.mxu0 %v20540_v10 }
 0x686   : > { %v4993_v60 = vpop.f32.mrf.mxu0  ;;  %v5150_v31 = vpop.f32.mrf.mxu1  ;;  %6822 = vmatpush.msrb.mxu3 %v20543_v6 }
 0x687   : > { %v5147_v44 = vadd.f32 %v5146_v24, %v4993_v60  ;;  %v5239_v45 = vpop.f32.mrf.mxu2  ;;  %6403 = vmatpush.msra.mxu0 %v20542_v52 }
 0x688   : > { %v5338_v20 = vpop.f32.mrf.mxu3 }
 0x689   : > { %v5240_v16 = vadd.f32 %v5239_v45, %v5147_v44  ;;  %5462 = vmatmul.f32.gmra.mxu0 %v15915_v41  ;;  %5547 = vmatmul.f32.gmra.mxu1 %v15934_v18 }
 0x68a   : > { %6405 = vmatpush.msra.mxu0 %v20543_v6 }
 0x68b   : > { %v16179_v34 = vadd.f32 %v5338_v20, %v5240_v16  ;;  %5656 = vmatmul.f32.gmra.mxu2 %v15955_v2 }
 0x68d   : > { %20544 = vst [vmem:[#allocation257_spill] sm:$0xff] %v16179_v34  ;;  %5797 = vmatmul.f32.gmra.mxu3 %v15934_v18 }
 0x68e   : > { %v5001_v30 = vpop.f32.mrf.mxu0  ;;  %v5154_v15 = vpop.f32.mrf.mxu1 }
 0x68f   : > { %v5151_v24 = vadd.f32 %v5150_v31, %v5001_v30  ;;  %v5244_v60 = vpop.f32.mrf.mxu2 }
 0x690   : > { %v5344_v0 = vpop.f32.mrf.mxu3 }
 0x691   : > { %v5245_v26 = vadd.f32 %v5244_v60, %v5151_v24  ;;  %5466 = vmatmul.f32.gmra.mxu0 %v15934_v18  ;;  %5551 = vmatmul.f32.gmra.mxu1 %v15953_v51 }
 0x693   : > { %v16185_v44 = vadd.f32 %v5344_v0, %v5245_v26  ;;  %5664 = vmatmul.f32.gmra.mxu2 %v15974_v17 }
 0x695   : > { %5801 = vmatmul.f32.gmra.mxu3 %v15953_v51 }
 0x696   : > { %v5009_v45 = vpop.f32.mrf.mxu0  ;;  %v5158_v2 = vpop.f32.mrf.mxu1 }
 0x697   : > { %v5155_v20 = vadd.f32 %v5154_v15, %v5009_v45  ;;  %v5249_v16 = vpop.f32.mrf.mxu2 }
 0x698   : > { %v5350_v34 = vpop.f32.mrf.mxu3 }
 0x699   : > { %v5250_v41 = vadd.f32 %v5249_v16, %v5155_v20  ;;  %5470 = vmatmul.f32.gmra.mxu0 %v15953_v51  ;;  %5555 = vmatmul.f32.gmra.mxu1 %v15972_v25 }
 0x69b   : > { %v16191_v30 = vadd.f32 %v5350_v34, %v5250_v41  ;;  %5672 = vmatmul.f32.gmra.mxu2 %v15993_v27 }
 0x69d   : > { %5805 = vmatmul.f32.gmra.mxu3 %v15972_v25 }
 0x69e   : > { %v5017_v26 = vpop.f32.mrf.mxu0  ;;  %v5162_v0 = vpop.f32.mrf.mxu1 }
 0x69f   : > { %v5159_v17 = vadd.f32 %v5158_v2, %v5017_v26  ;;  %v5254_v31 = vpop.f32.mrf.mxu2 }
 0x6a0   : > { %v5356_v24 = vpop.f32.mrf.mxu3 }
 0x6a1   : > { %v5255_v60 = vadd.f32 %v5254_v31, %v5159_v17  ;;  %5474 = vmatmul.f32.gmra.mxu0 %v15972_v25  ;;  %5559 = vmatmul.f32.gmra.mxu1 %v15991_v14 }
 0x6a3   : > { %v16197_v15 = vadd.f32 %v5356_v24, %v5255_v60  ;;  %5680 = vmatmul.f32.gmra.mxu2 %v16012_v1 }
 0x6a5   : > { %5809 = vmatmul.f32.gmra.mxu3 %v15991_v14 }
 0x6a6   : > { %v5025_v41 = vpop.f32.mrf.mxu0  ;;  %v5166_v27 = vpop.f32.mrf.mxu1 }
 0x6a7   : > { %v5163_v34 = vadd.f32 %v5162_v0, %v5025_v41  ;;  %v5259_v45 = vpop.f32.mrf.mxu2 }
 0x6a8   : > { %v5362_v20 = vpop.f32.mrf.mxu3 }
 0x6a9   : > { %v5260_v16 = vadd.f32 %v5259_v45, %v5163_v34  ;;  %5478 = vmatmul.f32.gmra.mxu0 %v15991_v14  ;;  %5563 = vmatmul.f32.gmra.mxu1 %v16010_v4 }
 0x6ab   : > { %v16203_v2 = vadd.f32 %v5362_v20, %v5260_v16  ;;  %5688 = vmatmul.f32.gmra.mxu2 %v16031_v7 }
 0x6ad   : > { %5813 = vmatmul.f32.gmra.mxu3 %v16010_v4 }
 0x6ae   : > { %v5033_v26 = vpop.f32.mrf.mxu0  ;;  %v5170_v1 = vpop.f32.mrf.mxu1 }
 0x6af   : > { %v5167_v17 = vadd.f32 %v5166_v27, %v5033_v26  ;;  %v5264_v31 = vpop.f32.mrf.mxu2 }
 0x6b0   : > { %v5368_v24 = vpop.f32.mrf.mxu3 }
 0x6b1   : > { %v5265_v60 = vadd.f32 %v5264_v31, %v5167_v17  ;;  %5482 = vmatmul.f32.gmra.mxu0 %v16010_v4  ;;  %5567 = vmatmul.f32.gmra.mxu1 %v16029_v56 }
 0x6b3   : > { %v16209_v0 = vadd.f32 %v5368_v24, %v5265_v60  ;;  %5696 = vmatmul.f32.gmra.mxu2 %v16050_v9 }
 0x6b5   : > { %5817 = vmatmul.f32.gmra.mxu3 %v16029_v56 }
 0x6b6   : > { %v5041_v41 = vpop.f32.mrf.mxu0  ;;  %v5174_v7 = vpop.f32.mrf.mxu1 }
 0x6b7   : > { %v5171_v34 = vadd.f32 %v5170_v1, %v5041_v41  ;;  %v5269_v45 = vpop.f32.mrf.mxu2 }
 0x6b8   : > { %v5374_v20 = vpop.f32.mrf.mxu3 }
 0x6b9   : > { %v5270_v16 = vadd.f32 %v5269_v45, %v5171_v34  ;;  %5486 = vmatmul.f32.gmra.mxu0 %v16029_v56  ;;  %5571 = vmatmul.f32.gmra.mxu1 %v16048_v58 }
 0x6bb   : > { %v16215_v27 = vadd.f32 %v5374_v20, %v5270_v16  ;;  %5704 = vmatmul.f32.gmra.mxu2 %v16067_v53 }
 0x6bd   : > { %5821 = vmatmul.f32.gmra.mxu3 %v16048_v58 }
 0x6be   : > { %v5049_v26 = vpop.f32.mrf.mxu0  ;;  %v5178_v9 = vpop.f32.mrf.mxu1 }
 0x6bf   : > { %v5175_v17 = vadd.f32 %v5174_v7, %v5049_v26  ;;  %v5274_v31 = vpop.f32.mrf.mxu2 }
 0x6c0   : > { %v5380_v24 = vpop.f32.mrf.mxu3 }
 0x6c1   : > { %v5275_v60 = vadd.f32 %v5274_v31, %v5175_v17  ;;  %5490 = vmatmul.f32.gmra.mxu0 %v16048_v58  ;;  %5575 = vmatmul.f32.gmra.mxu1 %v16065_v23  ;;  %v20546_v17 = vld [vmem:[#allocation150_spill] sm:$0xff] }
 0x6c3   : > { %v16221_v1 = vadd.f32 %v5380_v24, %v5275_v60  ;;  %5712 = vmatmul.f32.gmra.mxu2 %v16081_v21  ;;  %v20545_v21 = vld [vmem:[#allocation149_spill] sm:$0xff]  ;;  %v20547_v24 = vld [vmem:[#allocation160_spill] sm:$0xff] }
 0x6c5   : > { %5825 = vmatmul.f32.gmra.mxu3 %v16065_v23 }
 0x6c6   : > { %v5057_v41 = vpop.f32.mrf.mxu0  ;;  %v5182_v53 = vpop.f32.mrf.mxu1 }
 0x6c7   : > { %v5179_v34 = vadd.f32 %v5178_v9, %v5057_v41  ;;  %v5279_v45 = vpop.f32.mrf.mxu2  ;;  %v20548_v41 = vld [vmem:[#allocation101_spill] sm:$0xff] }
 0x6c8   : > { %v5386_v20 = vpop.f32.mrf.mxu3 }
 0x6c9   : > { %v5280_v16 = vadd.f32 %v5279_v45, %v5179_v34  ;;  %5494 = vmatmul.f32.gmra.mxu0 %v16065_v23  ;;  %5959 = vmatmul.f32.vlgmr.msrb.gmra.mxu1 %v15794_v48 }
 0x6ca   : > { %7030 = vmatpush.msrb.mxu1 %v20501_v22 }
 0x6cb   : > { %v16228_v7 = vadd.f32 %v5386_v20, %v5280_v16  ;;  %6082 = vmatmul.f32.vlgmr.msra.gmra.mxu2 %v15783_v42  ;;  %v20551_v20 = vld [vmem:[#allocation157_spill] sm:$0xff]  ;;  %v20552_v16 = vld [vmem:[#allocation222_spill] sm:$0xff] }
 0x6cc   : > { %7032 = vmatpush.msrb.mxu1 %v20504_v57  ;;  %7123 = vmatpush.msra.mxu2 %v20545_v21 }
 0x6cd   : > { %6163 = vmatmul.f32.vlgmr.msra.gmra.mxu3 %v15783_v42  ;;  %v20549_v42 = vld [vmem:[#allocation154_spill] sm:$0xff] }
 0x6ce   : > { %v5065_v26 = vpop.f32.mrf.mxu0  ;;  %v5186_v9 = vpop.f32.mrf.mxu1  ;;  %7034 = vmatpush.msrb.mxu1 %v20507_v8  ;;  %7125 = vmatpush.msra.mxu2 %v20546_v17 }
 0x6cf   : > { %v5183_v31 = vadd.f32 %v5182_v53, %v5065_v26  ;;  %v5284_v48 = vpop.f32.mrf.mxu2  ;;  %7268 = vmatpush.msra.mxu3 %v20547_v24  ;;  %v20550_v53 = vld [vmem:[#allocation227_spill] sm:$0xff]  ;;  %v20553_v26 = vld [vmem:[#allocation162_spill] sm:$0xff] }
 0x6d0   : > { %v5392_v60 = vpop.f32.mrf.mxu3  ;;  %7036 = vmatpush.msrb.mxu1 %v20510_v12  ;;  %7127 = vmatpush.msra.mxu2 %v20548_v41  ;;  %v20574_v24 = vld [vmem:[#allocation106_spill] sm:$0xff] }
 0x6d1   : > { %v5285_v34 = vadd.f32 %v5284_v48, %v5183_v31  ;;  %5863 = vmatmul.f32.vlgmr.msrb.gmra.mxu0 %v15786_v59  ;;  %5965 = vmatmul.f32.gmra.mxu1 %v15823_v28 }
 0x6d2   : > { %6911 = vmatpush.msrb.mxu0 %v20549_v42  ;;  %7038 = vmatpush.msrb.mxu1 %v20513_v38  ;;  %v20557_v42 = vld [vmem:[#allocation172_spill] sm:$0xff] }
 0x6d3   : > { %v16243_v45 = vadd.f32 %v5392_v60, %v5285_v34  ;;  %6086 = vmatmul.f32.gmra.mxu2 %v15805_v11  ;;  %7274 = vmatpush.msra.mxu3 %v20550_v53  ;;  %v20554_v60 = vld [vmem:[#allocation231_spill] sm:$0xff]  ;;  %v20555_v34 = vld [vmem:[#allocation224_spill] sm:$0xff] }
 0x6d4   : > { %6915 = vmatpush.msrb.mxu0 %v20551_v20  ;;  %7040 = vmatpush.msrb.mxu1 %v20516_v49  ;;  %v20556_v20 = vld [vmem:[#allocation165_spill] sm:$0xff] }
 0x6d5   : > { %6167 = vmatmul.f32.gmra.mxu3 %v15805_v11  ;;  %7129 = vmatpush.msra.mxu2 %v20552_v16 }
 0x6d6   : > { %v5073_v59 = vpop.f32.mrf.mxu0  ;;  %v5524_v28 = vpop.f32.mrf.mxu1  ;;  %6919 = vmatpush.msrb.mxu0 %v20553_v26  ;;  %7042 = vmatpush.msrb.mxu1 %v20519_v50 }
 0x6d7   : > { %v5187_v31 = vadd.f32 %v5186_v9, %v5073_v59  ;;  %v5289_v48 = vpop.f32.mrf.mxu2  ;;  %7280 = vmatpush.msra.mxu3 %v20554_v60  ;;  %7131 = vmatpush.msra.mxu2 %v20555_v34  ;;  %v20558_v59 = vld [vmem:[#allocation177_spill] sm:$0xff]  ;;  %v20559_v60 = vld [vmem:[#allocation174_spill] sm:$0xff] }
 0x6d8   : > { %v5398_v53 = vpop.f32.mrf.mxu3  ;;  %6923 = vmatpush.msrb.mxu0 %v20556_v20  ;;  %7044 = vmatpush.msrb.mxu1 %v20522_v35  ;;  %v20564_v20 = vld [vmem:[#allocation182_spill] sm:$0xff] }
 0x6d9   : > { %v5290_v11 = vadd.f32 %v5289_v48, %v5187_v31  ;;  %5868 = vmatmul.f32.gmra.mxu0 %v15815_v19  ;;  %5971 = vmatmul.f32.gmra.mxu1 %v15857_v33  ;;  %v20560_v31 = vld [vmem:[#allocation228_spill] sm:$0xff]  ;;  %v20561_v48 = vld [vmem:[#allocation178_spill] sm:$0xff] }
 0x6da   : > { %6927 = vmatpush.msrb.mxu0 %v20557_v42  ;;  %7046 = vmatpush.msrb.mxu1 %v20525_v63  ;;  %v20562_v42 = vld [vmem:[#allocation107_spill] sm:$0xff] }
 0x6db   : > { %v16261_v9 = vadd.f32 %v5398_v53, %v5290_v11  ;;  %6090 = vmatmul.f32.gmra.mxu2 %v15838_v3  ;;  %7286 = vmatpush.msra.mxu3 %v20558_v59  ;;  %v20563_v59 = vld [vmem:[#allocation233_spill] sm:$0xff] }
 0x6dc   : > { %6931 = vmatpush.msrb.mxu0 %v20559_v60  ;;  %7048 = vmatpush.msrb.mxu1 %v20528_v54 }
 0x6dd   : > { %6171 = vmatmul.f32.gmra.mxu3 %v15838_v3  ;;  %7133 = vmatpush.msra.mxu2 %v20560_v31 }
 0x6de   : > { %v5443_v19 = vpop.f32.mrf.mxu0  ;;  %v5528_v33 = vpop.f32.mrf.mxu1  ;;  %6935 = vmatpush.msrb.mxu0 %v20561_v48  ;;  %7050 = vmatpush.msrb.mxu1 %v20531_v5  ;;  %v20565_v48 = vld [vmem:[#allocation241_spill] sm:$0xff] }
 0x6df   : > { %v5444_v53 = vadd.f32 %v5443_v19, %v16131_v36  ;;  %v5609_v11 = vpop.f32.mrf.mxu2  ;;  %7292 = vmatpush.msra.mxu3 %v20562_v42  ;;  %7135 = vmatpush.msra.mxu2 %v20563_v59  ;;  %v20566_v36 = vld [vmem:[#allocation187_spill] sm:$0xff]  ;;  %v20568_v42 = vld [vmem:[#allocation245_spill] sm:$0xff] }
 0x6e0   : > { %v5774_v60 = vpop.f32.mrf.mxu3  ;;  %6939 = vmatpush.msrb.mxu0 %v20564_v20  ;;  %7052 = vmatpush.msrb.mxu1 %v20534_v40  ;;  %v20567_v20 = vld [vmem:[#allocation236_spill] sm:$0xff] }
 0x6e1   : > { %v5525_v3 = vadd.f32 %v5524_v28, %v5444_v53  ;;  %v16276_v26 = vadd.f32 %v5774_v60, %v5609_v11  ;;  %5873 = vmatmul.f32.gmra.mxu0 %v15849_v29  ;;  %5977 = vmatmul.f32.gmra.mxu1 %v15887_v47  ;;  %v20569_v29 = vld [vmem:[#allocation193_spill] sm:$0xff]  ;;  %v20570_v53 = vld [vmem:[#allocation239_spill] sm:$0xff] }
 0x6e2   : > { %7298 = vmatpush.msra.mxu3 %v20565_v48  ;;  %6943 = vmatpush.msrb.mxu0 %v20566_v36  ;;  %v20571_v36 = vld [vmem:[#allocation194_spill] sm:$0xff] }
 0x6e3   : > { %v6219_v19 = vmul.f32 4.464286, %v5525_v3  ;;  %6094 = vmatmul.f32.gmra.mxu2 %v15870_v62  ;;  %7054 = vmatpush.msrb.mxu1 %v20537_v39 }
 0x6e4   : > { %7137 = vmatpush.msra.mxu2 %v20567_v20  ;;  %7304 = vmatpush.msra.mxu3 %v20568_v42  ;;  %v20572_v42 = vld [vmem:[#allocation196_spill] sm:$0xff] }
 0x6e5   : > { %v16286_v28 = vadd.f32 -2.0357144, %v6219_v19  ;;  %6175 = vmatmul.f32.gmra.mxu3 %v15870_v62  ;;  %6947 = vmatpush.msrb.mxu0 %v20569_v29  ;;  %v20573_v62 = vld [vmem:[#allocation242_spill] sm:$0xff] }
 0x6e6   : > { %v5447_v47 = vpop.f32.mrf.mxu0  ;;  %v5532_v60 = vpop.f32.mrf.mxu1  ;;  %7056 = vmatpush.msrb.mxu1 %v20540_v10  ;;  %7139 = vmatpush.msra.mxu2 %v20570_v53 }
 0x6e7   : > { %12175 = vst [vmem:[%s13737_s19 + $0xe0] sm:$0xff] %v16286_v28  ;;  %v5448_v11 = vadd.f32 %v5447_v47, %v16149_v37  ;;  %v5617_v3 = vpop.f32.mrf.mxu2  ;;  %7310 = vmatpush.msra.mxu3 %v20571_v36  ;;  %6951 = vmatpush.msrb.mxu0 %v20572_v42  ;;  %v20575_v37 = vld [vmem:[#allocation118_spill] sm:$0xff]  ;;  %v20576_v42 = vld [vmem:[#allocation247_spill] sm:$0xff] }
 0x6e8   : > { %v5778_v19 = vpop.f32.mrf.mxu3  ;;  %7058 = vmatpush.msrb.mxu1 %v20542_v52  ;;  %7141 = vmatpush.msra.mxu2 %v20573_v62  ;;  %v20577_v36 = vld [vmem:[#allocation254_spill] sm:$0xff]  ;;  %v20584_v52 = vld [vmem:[#allocation273_spill] sm:$0xff] }
 0x6e9   : > { %v5529_v29 = vadd.f32 %v5528_v33, %v5448_v11  ;;  %v16299_v48 = vadd.f32 %v5778_v19, %v5617_v3  ;;  %5878 = vmatmul.f32.gmra.mxu0 %v15880_v32  ;;  %5983 = vmatmul.f32.gmra.mxu1 %v15909_v43  ;;  %v20578_v32 = vld [vmem:[#allocation204_spill] sm:$0xff]  ;;  %v20579_v3 = vld [vmem:[#allocation250_spill] sm:$0xff] }
 0x6ea   : > { %7316 = vmatpush.msra.mxu3 %v20574_v24  ;;  %6955 = vmatpush.msrb.mxu0 %v20575_v37  ;;  %v20580_v19 = vld [vmem:[#allocation256_spill] sm:$0xff] }
 0x6eb   : > { %v6221_v47 = vmul.f32 4.464286, %v5529_v29  ;;  %6098 = vmatmul.f32.gmra.mxu2 %v15895_v46  ;;  %7060 = vmatpush.msrb.mxu1 %v20543_v6  ;;  %v20581_v24 = vld [vmem:[#allocation208_spill] sm:$0xff] }
 0x6ec   : > { %7143 = vmatpush.msra.mxu2 %v20576_v42  ;;  %7322 = vmatpush.msra.mxu3 %v20577_v36  ;;  %v20582_v36 = vld [vmem:[#allocation211_spill] sm:$0xff] }
 0x6ed   : > { %v16309_v33 = vadd.f32 -2.0357144, %v6221_v47  ;;  %6179 = vmatmul.f32.gmra.mxu3 %v15895_v46  ;;  %6959 = vmatpush.msrb.mxu0 %v20578_v32  ;;  %v20583_v32 = vld [vmem:[#allocation114_spill] sm:$0xff] }
 0x6ee   : > { %v5451_v43 = vpop.f32.mrf.mxu0  ;;  %v5536_v11 = vpop.f32.mrf.mxu1  ;;  %7145 = vmatpush.msra.mxu2 %v20579_v3  ;;  %7328 = vmatpush.msra.mxu3 %v20580_v19 }
 0x6ef   : > { %12177 = vst [vmem:[%s13737_s19 + $0xf0] sm:$0xff] %v16309_v33  ;;  %v5452_v29 = vadd.f32 %v5451_v43, %v16167_v13  ;;  %v5625_v37 = vpop.f32.mrf.mxu2  ;;  %6963 = vmatpush.msrb.mxu0 %v20581_v24  ;;  %v20585_v13 = vld [vmem:[#allocation215_spill] sm:$0xff] }
 0x6f0   : > { %v5782_v47 = vpop.f32.mrf.mxu3  ;;  %7334 = vmatpush.msra.mxu3 %v20582_v36  ;;  %v20588_v36 = vld [vmem:[#allocation269_spill] sm:$0xff] }
 0x6f1   : > { %v5533_v46 = vadd.f32 %v5532_v60, %v5452_v29  ;;  %v16320_v6 = vadd.f32 %v5782_v47, %v5625_v37  ;;  %5883 = vmatmul.f32.gmra.mxu0 %v15903_v55  ;;  %5989 = vmatmul.f32.gmra.mxu1 %v15928_v61  ;;  %v20586_v37 = vld [vmem:[#allocation257_spill] sm:$0xff] }
 0x6f2   : > { %6967 = vmatpush.msrb.mxu0 %v20583_v32 }
 0x6f3   : > { %v6223_v19 = vmul.f32 4.464286, %v5533_v46  ;;  %6102 = vmatmul.f32.gmra.mxu2 %v20584_v52  ;;  %v20587_v46 = vld [vmem:[#allocation276_spill] sm:$0xff] }
 0x6f4   : > { %6971 = vmatpush.msrb.mxu0 %v20585_v13 }
 0x6f5   : > { %v16327_v43 = vadd.f32 -2.0357144, %v6223_v19  ;;  %6183 = vmatmul.f32.gmra.mxu3 %v20584_v52 }
 0x6f6   : > { %v5455_v24 = vpop.f32.mrf.mxu0  ;;  %v5540_v60 = vpop.f32.mrf.mxu1 }
 0x6f7   : > { %12179 = vst [vmem:[%s13737_s19 + $0x100] sm:$0xff] %v16327_v43  ;;  %v5456_v55 = vadd.f32 %v5455_v24, %v20586_v37  ;;  %v5633_v29 = vpop.f32.mrf.mxu2  ;;  %v16446_v39 = vand.u32 4294901760, %v16327_v43 }
 0x6f8   : > { %v5786_v61 = vpop.f32.mrf.mxu3 }
 0x6f9   : > { %v5537_v47 = vadd.f32 %v5536_v11, %v5456_v55  ;;  %v16333_v32 = vadd.f32 %v5786_v61, %v5633_v29  ;;  %5888 = vmatmul.f32.gmra.mxu0 %v20587_v46  ;;  %5995 = vmatmul.f32.gmra.mxu1 %v20588_v36  ;;  %v20589_v36 = vld [vmem:[#allocation281_spill] sm:$0xff]  ;;  %v20590_v61 = vld [vmem:[#allocation279_spill] sm:$0xff] }
 0x6fb   : > { %v6225_v19 = vmul.f32 4.464286, %v5537_v47  ;;  %6106 = vmatmul.f32.gmra.mxu2 %v15934_v18 }
 0x6fd   : > { %v16338_v52 = vadd.f32 -2.0357144, %v6225_v19  ;;  %6187 = vmatmul.f32.gmra.mxu3 %v15934_v18 }
 0x6fe   : > { %v5459_v13 = vpop.f32.mrf.mxu0  ;;  %v5544_v10 = vpop.f32.mrf.mxu1 }
 0x6ff   : > { %12181 = vst [vmem:[%s13737_s19 + $0x110] sm:$0xff] %v16338_v52  ;;  %v5460_v24 = vadd.f32 %v5459_v13, %v16185_v44  ;;  %v5641_v11 = vpop.f32.mrf.mxu2 }
 0x700   : > { %v5790_v37 = vpop.f32.mrf.mxu3 }
 0x701   : > { %v5541_v55 = vadd.f32 %v5540_v60, %v5460_v24  ;;  %v16344_v29 = vadd.f32 %v5790_v37, %v5641_v11  ;;  %5893 = vmatmul.f32.gmra.mxu0 %v20589_v36  ;;  %6001 = vmatmul.f32.gmra.mxu1 %v20590_v61  ;;  %v20591_v37 = vld [vmem:[#allocation274_spill] sm:$0xff] }
 0x703   : > { %v6227_v47 = vmul.f32 4.464286, %v5541_v55  ;;  %6110 = vmatmul.f32.gmra.mxu2 %v15953_v51  ;;  %v20592_v55 = vld [vmem:[#allocation144_spill] sm:$0xff] }
 0x705   : > { %v16349_v18 = vadd.f32 -2.0357144, %v6227_v47  ;;  %6191 = vmatmul.f32.gmra.mxu3 %v15953_v51 }
 0x706   : > { %v5463_v46 = vpop.f32.mrf.mxu0  ;;  %v5548_v19 = vpop.f32.mrf.mxu1 }
 0x707   : > { %12183 = vst [vmem:[%s13737_s19 + $0x120] sm:$0xff] %v16349_v18  ;;  %v5464_v44 = vadd.f32 %v5463_v46, %v16191_v30  ;;  %v5649_v13 = vpop.f32.mrf.mxu2 }
 0x708   : > { %v5794_v60 = vpop.f32.mrf.mxu3 }
 0x709   : > { %v5545_v24 = vadd.f32 %v5544_v10, %v5464_v44  ;;  %v16355_v11 = vadd.f32 %v5794_v60, %v5649_v13  ;;  %5898 = vmatmul.f32.gmra.mxu0 %v20591_v37  ;;  %6007 = vmatmul.f32.gmra.mxu1 %v20592_v55  ;;  %v20593_v60 = vld [vmem:[#allocation284_spill] sm:$0xff] }
 0x70b   : > { %v6229_v36 = vmul.f32 4.464286, %v5545_v24  ;;  %6114 = vmatmul.f32.gmra.mxu2 %v15972_v25  ;;  %v20594_v24 = vld [vmem:[#allocation270_spill] sm:$0xff] }
 0x70d   : > { %v16360_v51 = vadd.f32 -2.0357144, %v6229_v36  ;;  %6195 = vmatmul.f32.gmra.mxu3 %v15972_v25 }
 0x70e   : > { %v5467_v61 = vpop.f32.mrf.mxu0  ;;  %v5552_v47 = vpop.f32.mrf.mxu1 }
 0x70f   : > { %12185 = vst [vmem:[%s13737_s19 + $0x130] sm:$0xff] %v16360_v51  ;;  %v5468_v10 = vadd.f32 %v5467_v61, %v16197_v15  ;;  %v5657_v30 = vpop.f32.mrf.mxu2 }
 0x710   : > { %v5798_v46 = vpop.f32.mrf.mxu3 }
 0x711   : > { %v5549_v44 = vadd.f32 %v5548_v19, %v5468_v10  ;;  %v16366_v13 = vadd.f32 %v5798_v46, %v5657_v30  ;;  %5903 = vmatmul.f32.gmra.mxu0 %v20593_v60  ;;  %6013 = vmatmul.f32.gmra.mxu1 %v20594_v24  ;;  %v20595_v46 = vld [vmem:[#allocation265_spill] sm:$0xff] }
 0x713   : > { %v6231_v37 = vmul.f32 4.464286, %v5549_v44  ;;  %6118 = vmatmul.f32.gmra.mxu2 %v15991_v14  ;;  %v20596_v44 = vld [vmem:[#allocation282_spill] sm:$0xff] }
 0x715   : > { %v16371_v25 = vadd.f32 -2.0357144, %v6231_v37  ;;  %6199 = vmatmul.f32.gmra.mxu3 %v15991_v14 }
 0x716   : > { %v5471_v55 = vpop.f32.mrf.mxu0  ;;  %v5556_v36 = vpop.f32.mrf.mxu1 }
 0x717   : > { %12187 = vst [vmem:[%s13737_s19 + $0x140] sm:$0xff] %v16371_v25  ;;  %v5472_v15 = vadd.f32 %v5471_v55, %v16203_v2  ;;  %v5665_v19 = vpop.f32.mrf.mxu2 }
 0x718   : > { %v5802_v61 = vpop.f32.mrf.mxu3 }
 0x719   : > { %v5553_v10 = vadd.f32 %v5552_v47, %v5472_v15  ;;  %v16377_v30 = vadd.f32 %v5802_v61, %v5665_v19  ;;  %5908 = vmatmul.f32.gmra.mxu0 %v20595_v46  ;;  %6019 = vmatmul.f32.gmra.mxu1 %v20596_v44  ;;  %v20597_v61 = vld [vmem:[#allocation275_spill] sm:$0xff] }
 0x71b   : > { %v6233_v60 = vmul.f32 4.464286, %v5553_v10  ;;  %6122 = vmatmul.f32.gmra.mxu2 %v16010_v4  ;;  %v20598_v10 = vld [vmem:[#allocation261_spill] sm:$0xff] }
 0x71d   : > { %v16382_v14 = vadd.f32 -2.0357144, %v6233_v60  ;;  %6203 = vmatmul.f32.gmra.mxu3 %v16010_v4 }
 0x71e   : > { %v5475_v24 = vpop.f32.mrf.mxu0  ;;  %v5560_v37 = vpop.f32.mrf.mxu1 }
 0x71f   : > { %12189 = vst [vmem:[%s13737_s19 + $0x150] sm:$0xff] %v16382_v14  ;;  %v5476_v2 = vadd.f32 %v5475_v24, %v16209_v0  ;;  %v5673_v47 = vpop.f32.mrf.mxu2 }
 0x720   : > { %v5806_v55 = vpop.f32.mrf.mxu3 }
 0x721   : > { %v5557_v15 = vadd.f32 %v5556_v36, %v5476_v2  ;;  %v16388_v19 = vadd.f32 %v5806_v55, %v5673_v47  ;;  %5913 = vmatmul.f32.gmra.mxu0 %v20597_v61  ;;  %6025 = vmatmul.f32.gmra.mxu1 %v20598_v10  ;;  %v20599_v55 = vld [vmem:[#allocation219_spill] sm:$0xff] }
 0x723   : > { %v6235_v46 = vmul.f32 4.464286, %v5557_v15  ;;  %6126 = vmatmul.f32.gmra.mxu2 %v16029_v56  ;;  %v20600_v15 = vld [vmem:[#allocation271_spill] sm:$0xff] }
 0x725   : > { %v16393_v4 = vadd.f32 -2.0357144, %v6235_v46  ;;  %6207 = vmatmul.f32.gmra.mxu3 %v16029_v56 }
 0x726   : > { %v5479_v44 = vpop.f32.mrf.mxu0  ;;  %v5564_v60 = vpop.f32.mrf.mxu1 }
 0x727   : > { %12191 = vst [vmem:[%s13737_s19 + $0x160] sm:$0xff] %v16393_v4  ;;  %v5480_v0 = vadd.f32 %v5479_v44, %v16215_v27  ;;  %v5681_v36 = vpop.f32.mrf.mxu2  ;;  %v16411_v44 = vand.u32 4294901760, %v16286_v28 }
 0x728   : > { %v5810_v24 = vpop.f32.mrf.mxu3 }
 0x729   : > { %v5561_v2 = vadd.f32 %v5560_v37, %v5480_v0  ;;  %v16399_v47 = vadd.f32 %v5810_v24, %v5681_v36  ;;  %5918 = vmatmul.f32.gmra.mxu0 %v20599_v55  ;;  %6031 = vmatmul.f32.gmra.mxu1 %v20600_v15  ;;  %v20602_v55 = vld [vmem:[#allocation129_spill] sm:$0xff]  ;;  %v6407_v15 = vsub.f32 %v16286_v28, %v16411_v44  ;;  %v20603_v28 = vld [vmem:[#allocation280_spill] sm:$0xff] }
 0x72b   : > { %v6237_v61 = vmul.f32 4.464286, %v5561_v2  ;;  %6130 = vmatmul.f32.gmra.mxu2 %v16048_v58  ;;  %v20601_v2 = vld [vmem:[#allocation266_spill] sm:$0xff] }
 0x72d   : > { %v16404_v56 = vadd.f32 -2.0357144, %v6237_v61  ;;  %6211 = vmatmul.f32.gmra.mxu3 %v16048_v58 }
 0x72e   : > { %v5483_v10 = vpop.f32.mrf.mxu0  ;;  %v5568_v46 = vpop.f32.mrf.mxu1 }
 0x72f   : > { %12193 = vst [vmem:[%s13737_s19 + $0x170] sm:$0xff] %v16404_v56  ;;  %v5484_v27 = vadd.f32 %v5483_v10, %v16221_v1  ;;  %v5689_v37 = vpop.f32.mrf.mxu2 }
 0x730   : > { %v5814_v0 = vpop.f32.mrf.mxu3 }
 0x731   : > { %v5565_v36 = vadd.f32 %v5564_v60, %v5484_v27  ;;  %v16413_v24 = vadd.f32 %v5814_v0, %v5689_v37  ;;  %5923 = vmatmul.f32.gmra.mxu0 %v20601_v2  ;;  %6037 = vmatmul.f32.gmra.mxu1 %v20602_v55  ;;  %v6408_v37 = vand.u32 4294901760, %v6407_v15  ;;  %v16427_v0 = vand.u32 4294901760, %v16309_v33 }
 0x733   : > { %v6239_v58 = vmul.f32 4.464286, %v5565_v36  ;;  %6134 = vmatmul.f32.gmra.mxu2 %v16065_v23 }
 0x735   : > { %v16420_v61 = vadd.f32 -2.0357144, %v6239_v58  ;;  %6215 = vmatmul.f32.gmra.mxu3 %v16065_v23  ;;  %v6409_v58 = vsub.f32 %v6407_v15, %v6408_v37 }
 0x736   : > { %v5487_v1 = vpop.f32.mrf.mxu0  ;;  %v5572_v10 = vpop.f32.mrf.mxu1 }
 0x737   : > { %12195 = vst [vmem:[%s13737_s19 + $0x180] sm:$0xff] %v16420_v61  ;;  %v5488_v60 = vadd.f32 %v5487_v1, %v16228_v7  ;;  %v5697_v27 = vpop.f32.mrf.mxu2  ;;  %v6415_v7 = vsub.f32 %v16309_v33, %v16427_v0  ;;  %v20604_v1 = vld [vmem:[#allocation98_spill] sm:$0xff] }
 0x738   : > { %v5818_v36 = vpop.f32.mrf.mxu3 }
 0x739   : > { %v5569_v2 = vadd.f32 %v5568_v46, %v5488_v60  ;;  %v16429_v55 = vadd.f32 %v5818_v36, %v5697_v27  ;;  %5928 = vmatmul.f32.gmra.mxu0 %v20603_v28  ;;  %6616 = vmatmul.f32.vlgmr.msra.gmra.mxu1 %v16411_v44  ;;  %v20605_v36 = vld [vmem:[#allocation221_spill] sm:$0xff]  ;;  %v6410_v28 = vand.u32 4294901760, %v6409_v58  ;;  %v6416_v33 = vand.u32 4294901760, %v6415_v7 }
 0x73a   : > { %7508 = vmatpush.msra.mxu1 %v20545_v21 }
 0x73b   : > { %v6241_v23 = vmul.f32 4.464286, %v5569_v2  ;;  %6722 = vmatmul.f32.vlgmr.msrb.gmra.mxu2 %v6407_v15 }
 0x73c   : > { %7510 = vmatpush.msra.mxu1 %v20546_v17  ;;  %7623 = vmatpush.msrb.mxu2 %v20604_v1 }
 0x73d   : > { %v16438_v46 = vadd.f32 -2.0357144, %v6241_v23  ;;  %6826 = vmatmul.f32.vlgmr.msrb.gmra.mxu3 %v6408_v37  ;;  %v20606_v37 = vld [vmem:[#allocation105_spill] sm:$0xff] }
 0x73e   : > { %v5491_v60 = vpop.f32.mrf.mxu0  ;;  %v5576_v27 = vpop.f32.mrf.mxu1  ;;  %7512 = vmatpush.msra.mxu1 %v20548_v41  ;;  %7627 = vmatpush.msrb.mxu2 %v20605_v36  ;;  %v6423_v36 = vsub.f32 %v16327_v43, %v16446_v39 }
 0x73f   : > { %12197 = vst [vmem:[%s13737_s19 + $0x190] sm:$0xff] %v16438_v46  ;;  %v5492_v15 = vadd.f32 %v5491_v60, %v16243_v45  ;;  %v5705_v2 = vpop.f32.mrf.mxu2  ;;  %7730 = vmatpush.msrb.mxu3 %v20545_v21  ;;  %v20607_v45 = vld [vmem:[#allocation151_spill] sm:$0xff]  ;;  %v6417_v60 = vsub.f32 %v6415_v7, %v6416_v33 }
 0x740   : > { %v5822_v23 = vpop.f32.mrf.mxu3  ;;  %7514 = vmatpush.msra.mxu1 %v20552_v16  ;;  %7631 = vmatpush.msrb.mxu2 %v20606_v37  ;;  %v20608_v37 = vld [vmem:[#allocation230_spill] sm:$0xff] }
 0x741   : > { %v5573_v1 = vadd.f32 %v5572_v10, %v5492_v15  ;;  %v16451_v40 = vadd.f32 %v5822_v23, %v5705_v2  ;;  %6411 = vmatmul.f32.vlgmr.msra.gmra.mxu0 %v6410_v28  ;;  %6620 = vmatmul.f32.gmra.mxu1 %v16427_v0  ;;  %v20609_v15 = vld [vmem:[#allocation100_spill] sm:$0xff]  ;;  %v6418_v23 = vand.u32 4294901760, %v6417_v60 }
 0x742   : > { %7732 = vmatpush.msrb.mxu3 %v20546_v17  ;;  %7398 = vmatpush.msra.mxu0 %v20607_v45  ;;  %v16470_v45 = vand.u32 4294901760, %v16338_v52 }
 0x743   : > { %v6243_v58 = vmul.f32 4.464286, %v5573_v1  ;;  %6727 = vmatmul.f32.gmra.mxu2 %v6415_v7  ;;  %7516 = vmatpush.msra.mxu1 %v20555_v34  ;;  %v20610_v1 = vld [vmem:[#allocation232_spill] sm:$0xff] }
 0x744   : > { %7635 = vmatpush.msrb.mxu2 %v20608_v37  ;;  %7734 = vmatpush.msrb.mxu3 %v20548_v41  ;;  %v6424_v37 = vand.u32 4294901760, %v6423_v36 }
 0x745   : > { %v16461_v10 = vadd.f32 -2.0357144, %v6243_v58  ;;  %6832 = vmatmul.f32.gmra.mxu3 %v6416_v33  ;;  %7401 = vmatpush.msra.mxu0 %v20609_v15  ;;  %v20611_v33 = vld [vmem:[#allocation223_spill] sm:$0xff] }
 0x746   : > { %v5495_v2 = vpop.f32.mrf.mxu0  ;;  %v5960_v28 = vpop.f32.mrf.mxu1  ;;  %7518 = vmatpush.msra.mxu1 %v20560_v31  ;;  %7639 = vmatpush.msrb.mxu2 %v20610_v1  ;;  %v20612_v15 = vld [vmem:[#allocation235_spill] sm:$0xff] }
 0x747   : > { %12199 = vst [vmem:[%s13737_s19 + $0x1a0] sm:$0xff] %v16461_v10  ;;  %v5496_v43 = vadd.f32 %v5495_v2, %v16261_v9  ;;  %v5713_v7 = vpop.f32.mrf.mxu2  ;;  %7736 = vmatpush.msrb.mxu3 %v20552_v16  ;;  %7404 = vmatpush.msra.mxu0 %v20611_v33  ;;  %v20613_v9 = vld [vmem:[#allocation226_spill] sm:$0xff]  ;;  %v6425_v2 = vsub.f32 %v6423_v36, %v6424_v37 }
 0x748   : > { %v5826_v58 = vpop.f32.mrf.mxu3  ;;  %7520 = vmatpush.msra.mxu1 %v20563_v59  ;;  %7643 = vmatpush.msrb.mxu2 %v20612_v15  ;;  %v6431_v33 = vsub.f32 %v16338_v52, %v16470_v45  ;;  %v20614_v15 = vld [vmem:[#allocation238_spill] sm:$0xff] }
 0x749   : > { %v5577_v1 = vadd.f32 %v5576_v27, %v5496_v43  ;;  %v16476_v41 = vadd.f32 %v5826_v58, %v5713_v7  ;;  %6419 = vmatmul.f32.gmra.mxu0 %v6418_v23  ;;  %6624 = vmatmul.f32.gmra.mxu1 %v16446_v39  ;;  %v20615_v43 = vld [vmem:[#allocation229_spill] sm:$0xff]  ;;  %v6426_v58 = vand.u32 4294901760, %v6425_v2 }
 0x74a   : > { %7738 = vmatpush.msrb.mxu3 %v20555_v34  ;;  %7407 = vmatpush.msra.mxu0 %v20613_v9  ;;  %v16495_v9 = vand.u32 4294901760, %v16349_v18 }
 0x74b   : > { %v6245_v60 = vmul.f32 4.464286, %v5577_v1  ;;  %6732 = vmatmul.f32.gmra.mxu2 %v6423_v36  ;;  %7522 = vmatpush.msra.mxu1 %v20567_v20  ;;  %v20616_v1 = vld [vmem:[#allocation244_spill] sm:$0xff] }
 0x74c   : > { %7647 = vmatpush.msrb.mxu2 %v20614_v15  ;;  %7740 = vmatpush.msrb.mxu3 %v20560_v31  ;;  %v6432_v15 = vand.u32 4294901760, %v6431_v33 }
 0x74d   : > { %v16486_v27 = vadd.f32 -2.0357144, %v6245_v60  ;;  %6838 = vmatmul.f32.gmra.mxu3 %v6424_v37  ;;  %7410 = vmatpush.msra.mxu0 %v20615_v43  ;;  %v20617_v37 = vld [vmem:[#allocation234_spill] sm:$0xff] }
 0x74e   : > { %v5864_v7 = vpop.f32.mrf.mxu0  ;;  %v5966_v23 = vpop.f32.mrf.mxu1  ;;  %7524 = vmatpush.msra.mxu1 %v20570_v53  ;;  %7651 = vmatpush.msrb.mxu2 %v20616_v1  ;;  %v20618_v43 = vld [vmem:[#allocation246_spill] sm:$0xff] }
 0x74f   : > { %12201 = vst [vmem:[%s13737_s19 + $0x1b0] sm:$0xff] %v16486_v27  ;;  %v5865_v52 = vadd.f32 %v5864_v7, %v16276_v26  ;;  %v6083_v36 = vpop.f32.mrf.mxu2  ;;  %7742 = vmatpush.msrb.mxu3 %v20563_v59  ;;  %7413 = vmatpush.msra.mxu0 %v20617_v37  ;;  %v20619_v26 = vld [vmem:[#allocation237_spill] sm:$0xff]  ;;  %v6433_v7 = vsub.f32 %v6431_v33, %v6432_v15 }
 0x750   : > { %v6164_v60 = vpop.f32.mrf.mxu3  ;;  %7526 = vmatpush.msra.mxu1 %v20573_v62  ;;  %7655 = vmatpush.msrb.mxu2 %v20618_v43  ;;  %v6439_v59 = vsub.f32 %v16349_v18, %v16495_v9  ;;  %v20620_v37 = vld [vmem:[#allocation249_spill] sm:$0xff] }
 0x751   : > { %v5961_v1 = vadd.f32 %v5960_v28, %v5865_v52  ;;  %6427 = vmatmul.f32.gmra.mxu0 %v6426_v58  ;;  %6628 = vmatmul.f32.gmra.mxu1 %v16470_v45  ;;  %v20621_v52 = vld [vmem:[#allocation240_spill] sm:$0xff] }
 0x752   : > { %7744 = vmatpush.msrb.mxu3 %v20567_v20  ;;  %7416 = vmatpush.msra.mxu0 %v20619_v26  ;;  %v16511_v26 = vand.u32 4294901760, %v16360_v51 }
 0x753   : > { %v6084_v2 = vadd.f32 %v6083_v36, %v5961_v1  ;;  %6737 = vmatmul.f32.gmra.mxu2 %v6431_v33  ;;  %7528 = vmatpush.msra.mxu1 %v20576_v42  ;;  %v20622_v33 = vld [vmem:[#allocation252_spill] sm:$0xff] }
 0x754   : > { %7659 = vmatpush.msrb.mxu2 %v20620_v37  ;;  %7746 = vmatpush.msrb.mxu3 %v20570_v53  ;;  %v6434_v37 = vand.u32 4294901760, %v6433_v7  ;;  %v6440_v53 = vand.u32 4294901760, %v6439_v59 }
 0x755   : > { %v6165_v28 = vadd.f32 %v6164_v60, %v6084_v2  ;;  %6844 = vmatmul.f32.gmra.mxu3 %v6432_v15  ;;  %7419 = vmatpush.msra.mxu0 %v20621_v52  ;;  %v20623_v15 = vld [vmem:[#allocation243_spill] sm:$0xff] }
 0x756   : > { %v5869_v58 = vpop.f32.mrf.mxu0  ;;  %v5972_v43 = vpop.f32.mrf.mxu1  ;;  %7530 = vmatpush.msra.mxu1 %v20579_v3  ;;  %7663 = vmatpush.msrb.mxu2 %v20622_v33  ;;  %v20624_v2 = vld [vmem:[#allocation255_spill] sm:$0xff] }
 0x757   : > { %v6220_v18 = vmul.f32 4.464286, %v6165_v28  ;;  %v5870_v1 = vadd.f32 %v5869_v58, %v16299_v48  ;;  %v6087_v36 = vpop.f32.mrf.mxu2  ;;  %7748 = vmatpush.msrb.mxu3 %v20573_v62  ;;  %7422 = vmatpush.msra.mxu0 %v20623_v15  ;;  %v6447_v28 = vsub.f32 %v16360_v51, %v16511_v26  ;;  %v20625_v48 = vld [vmem:[#allocation248_spill] sm:$0xff]  ;;  %v6441_v58 = vsub.f32 %v6439_v59, %v6440_v53  ;;  %v20627_v51 = vld [vmem:[#allocation253_spill] sm:$0xff] }
 0x758   : > { %v6168_v60 = vpop.f32.mrf.mxu3  ;;  %7667 = vmatpush.msrb.mxu2 %v20624_v2  ;;  %v20626_v2 = vld [vmem:[#allocation251_spill] sm:$0xff] }
 0x759   : > { %v6248_v52 = vadd.f32 -2.0357144, %v6220_v18  ;;  %v5967_v20 = vadd.f32 %v5966_v23, %v5870_v1  ;;  %6435 = vmatmul.f32.gmra.mxu0 %v6434_v37  ;;  %6632 = vmatmul.f32.gmra.mxu1 %v16495_v9  ;;  %v6448_v1 = vand.u32 4294901760, %v6447_v28 }
 0x75a   : > { %7750 = vmatpush.msrb.mxu3 %v20576_v42  ;;  %7425 = vmatpush.msra.mxu0 %v20625_v48 }
 0x75b   : > { %12176 = vst.msk [vmem:[%s13737_s19 + $0xe8] sm:$0xff] %vm2393_vm1, %v6248_v52  ;;  %v6088_v7 = vadd.f32 %v6087_v36, %v5967_v20  ;;  %6742 = vmatmul.f32.gmra.mxu2 %v6439_v59  ;;  %v6442_v52 = vand.u32 4294901760, %v6441_v58  ;;  %v16531_v20 = vand.u32 4294901760, %v16371_v25 }
 0x75c   : > { %7752 = vmatpush.msrb.mxu3 %v20579_v3  ;;  %7428 = vmatpush.msra.mxu0 %v20626_v2 }
 0x75d   : > { %v6169_v23 = vadd.f32 %v6168_v60, %v6088_v7  ;;  %6850 = vmatmul.f32.gmra.mxu3 %v6440_v53  ;;  %v6449_v53 = vsub.f32 %v6447_v28, %v6448_v1  ;;  %v6455_v7 = vsub.f32 %v16371_v25, %v16531_v20 }
 0x75e   : > { %v5874_v37 = vpop.f32.mrf.mxu0  ;;  %v5978_v18 = vpop.f32.mrf.mxu1  ;;  %7431 = vmatpush.msra.mxu0 %v20627_v51 }
 0x75f   : > { %v6222_v15 = vmul.f32 4.464286, %v6169_v23  ;;  %v5875_v48 = vadd.f32 %v5874_v37, %v16320_v6  ;;  %v6091_v33 = vpop.f32.mrf.mxu2  ;;  %v6450_v37 = vand.u32 4294901760, %v6449_v53 }
 0x760   : > { %v6172_v59 = vpop.f32.mrf.mxu3 }
 0x761   : > { %v6250_v36 = vadd.f32 -2.0357144, %v6222_v15  ;;  %v5973_v3 = vadd.f32 %v5972_v43, %v5875_v48  ;;  %6443 = vmatmul.f32.gmra.mxu0 %v6442_v52  ;;  %6636 = vmatmul.f32.gmra.mxu1 %v16511_v26  ;;  %v6456_v48 = vand.u32 4294901760, %v6455_v7  ;;  %v16540_v52 = vand.u32 4294901760, %v16382_v14 }
 0x763   : > { %12178 = vst.msk [vmem:[%s13737_s19 + $0xf8] sm:$0xff] %vm2393_vm1, %v6250_v36  ;;  %v6092_v60 = vadd.f32 %v6091_v33, %v5973_v3  ;;  %6747 = vmatmul.f32.gmra.mxu2 %v6447_v28  ;;  %v6457_v28 = vsub.f32 %v6455_v7, %v6456_v48 }
 0x765   : > { %v6173_v6 = vadd.f32 %v6172_v59, %v6092_v60  ;;  %6856 = vmatmul.f32.gmra.mxu3 %v6448_v1  ;;  %v6463_v1 = vsub.f32 %v16382_v14, %v16540_v52  ;;  %v16548_v60 = vand.u32 4294901760, %v16393_v4 }
 0x766   : > { %v5879_v58 = vpop.f32.mrf.mxu0  ;;  %v5984_v23 = vpop.f32.mrf.mxu1 }
 0x767   : > { %v6224_v51 = vmul.f32 4.464286, %v6173_v6  ;;  %v5880_v43 = vadd.f32 %v5879_v58, %v16333_v32  ;;  %v6095_v15 = vpop.f32.mrf.mxu2  ;;  %v6458_v58 = vand.u32 4294901760, %v6457_v28  ;;  %v6471_v14 = vsub.f32 %v16393_v4, %v16548_v60 }
 0x768   : > { %v6176_v36 = vpop.f32.mrf.mxu3 }
 0x769   : > { %v6252_v3 = vadd.f32 -2.0357144, %v6224_v51  ;;  %v5979_v33 = vadd.f32 %v5978_v18, %v5880_v43  ;;  %6451 = vmatmul.f32.gmra.mxu0 %v6450_v37  ;;  %6640 = vmatmul.f32.gmra.mxu1 %v16531_v20  ;;  %v6464_v37 = vand.u32 4294901760, %v6463_v1 }
 0x76b   : > { %12180 = vst.msk [vmem:[%s13737_s19 + $0x108] sm:$0xff] %vm2393_vm1, %v6252_v3  ;;  %v6096_v25 = vadd.f32 %v6095_v15, %v5979_v33  ;;  %6752 = vmatmul.f32.gmra.mxu2 %v6455_v7 }
 0x76d   : > { %v6177_v32 = vadd.f32 %v6176_v36, %v6096_v25  ;;  %6862 = vmatmul.f32.gmra.mxu3 %v6456_v48  ;;  %v6465_v36 = vsub.f32 %v6463_v1, %v6464_v37  ;;  %v6472_v25 = vand.u32 4294901760, %v6471_v14 }
 0x76e   : > { %v5884_v59 = vpop.f32.mrf.mxu0  ;;  %v5990_v53 = vpop.f32.mrf.mxu1 }
 0x76f   : > { %v6226_v18 = vmul.f32 4.464286, %v6177_v32  ;;  %v5885_v51 = vadd.f32 %v5884_v59, %v16344_v29  ;;  %v6099_v6 = vpop.f32.mrf.mxu2  ;;  %v6466_v59 = vand.u32 4294901760, %v6465_v36 }
 0x770   : > { %v6180_v43 = vpop.f32.mrf.mxu3 }
 0x771   : > { %v6254_v15 = vadd.f32 -2.0357144, %v6226_v18  ;;  %v5985_v7 = vadd.f32 %v5984_v23, %v5885_v51  ;;  %6459 = vmatmul.f32.gmra.mxu0 %v6458_v58  ;;  %6644 = vmatmul.f32.gmra.mxu1 %v16540_v52  ;;  %v16558_v18 = vand.u32 4294901760, %v16404_v56 }
 0x773   : > { %12182 = vst.msk [vmem:[%s13737_s19 + $0x118] sm:$0xff] %vm2393_vm1, %v6254_v15  ;;  %v6100_v48 = vadd.f32 %v6099_v6, %v5985_v7  ;;  %6757 = vmatmul.f32.gmra.mxu2 %v6463_v1  ;;  %v6473_v1 = vsub.f32 %v6471_v14, %v6472_v25 }
 0x775   : > { %v6181_v3 = vadd.f32 %v6180_v43, %v6100_v48  ;;  %6868 = vmatmul.f32.gmra.mxu3 %v6464_v37  ;;  %v6479_v37 = vsub.f32 %v16404_v56, %v16558_v18  ;;  %v6474_v7 = vand.u32 4294901760, %v6473_v1 }
 0x776   : > { %v5889_v29 = vpop.f32.mrf.mxu0  ;;  %v5996_v33 = vpop.f32.mrf.mxu1 }
 0x777   : > { %v6228_v28 = vmul.f32 4.464286, %v6181_v3  ;;  %v5890_v23 = vadd.f32 %v5889_v29, %v16355_v11  ;;  %v6103_v32 = vpop.f32.mrf.mxu2  ;;  %v6480_v3 = vand.u32 4294901760, %v6479_v37  ;;  %v16567_v29 = vand.u32 4294901760, %v16420_v61 }
 0x778   : > { %v6184_v4 = vpop.f32.mrf.mxu3 }
 0x779   : > { %v6256_v51 = vadd.f32 -2.0357144, %v6228_v28  ;;  %v5991_v58 = vadd.f32 %v5990_v53, %v5890_v23  ;;  %6467 = vmatmul.f32.gmra.mxu0 %v6466_v59  ;;  %6648 = vmatmul.f32.gmra.mxu1 %v16548_v60 }
 0x77b   : > { %12184 = vst.msk [vmem:[%s13737_s19 + $0x128] sm:$0xff] %vm2393_vm1, %v6256_v51  ;;  %v6104_v6 = vadd.f32 %v6103_v32, %v5991_v58  ;;  %6762 = vmatmul.f32.gmra.mxu2 %v6471_v14  ;;  %v6487_v32 = vsub.f32 %v16420_v61, %v16567_v29  ;;  %v16575_v51 = vand.u32 4294901760, %v16438_v46 }
 0x77d   : > { %v6185_v11 = vadd.f32 %v6184_v4, %v6104_v6  ;;  %6874 = vmatmul.f32.gmra.mxu3 %v6472_v25  ;;  %v6481_v25 = vsub.f32 %v6479_v37, %v6480_v3  ;;  %v6495_v61 = vsub.f32 %v16438_v46, %v16575_v51 }
 0x77e   : > { %v5894_v43 = vpop.f32.mrf.mxu0  ;;  %v6002_v15 = vpop.f32.mrf.mxu1 }
 0x77f   : > { %v6230_v48 = vmul.f32 4.464286, %v6185_v11  ;;  %v5895_v53 = vadd.f32 %v5894_v43, %v16366_v13  ;;  %v6107_v36 = vpop.f32.mrf.mxu2  ;;  %v6482_v6 = vand.u32 4294901760, %v6481_v25  ;;  %v6488_v11 = vand.u32 4294901760, %v6487_v32 }
 0x780   : > { %v6188_v28 = vpop.f32.mrf.mxu3  ;;  %v16585_v25 = vand.u32 4294901760, %v16461_v10 }
 0x781   : > { %v6258_v23 = vadd.f32 -2.0357144, %v6230_v48  ;;  %v5997_v14 = vadd.f32 %v5996_v33, %v5895_v53  ;;  %6475 = vmatmul.f32.gmra.mxu0 %v6474_v7  ;;  %6652 = vmatmul.f32.gmra.mxu1 %v16558_v18  ;;  %v6489_v53 = vsub.f32 %v6487_v32, %v6488_v11 }
 0x783   : > { %12186 = vst.msk [vmem:[%s13737_s19 + $0x138] sm:$0xff] %vm2393_vm1, %v6258_v23  ;;  %v6108_v56 = vadd.f32 %v6107_v36, %v5997_v14  ;;  %6767 = vmatmul.f32.gmra.mxu2 %v6479_v37 }
 0x785   : > { %v6189_v13 = vadd.f32 %v6188_v28, %v6108_v56  ;;  %6880 = vmatmul.f32.gmra.mxu3 %v6480_v3  ;;  %v6496_v28 = vand.u32 4294901760, %v6495_v61  ;;  %v6490_v56 = vand.u32 4294901760, %v6489_v53 }
 0x786   : > { %v5899_v59 = vpop.f32.mrf.mxu0  ;;  %v6008_v4 = vpop.f32.mrf.mxu1 }
 0x787   : > { %v6232_v33 = vmul.f32 4.464286, %v6189_v13  ;;  %v5900_v58 = vadd.f32 %v5899_v59, %v16377_v30  ;;  %v6111_v1 = vpop.f32.mrf.mxu2 }
 0x788   : > { %v6192_v43 = vpop.f32.mrf.mxu3 }
 0x789   : > { %v6260_v7 = vadd.f32 -2.0357144, %v6232_v33  ;;  %v6003_v37 = vadd.f32 %v6002_v15, %v5900_v58  ;;  %6483 = vmatmul.f32.gmra.mxu0 %v6482_v6  ;;  %6656 = vmatmul.f32.gmra.mxu1 %v16567_v29  ;;  %v12204_v33 = vld [vmem:[%s13737_s19 + $0xe8] sm:$0xff] }
 0x78a   : > { %v6333_v6 = vsel %vm2393_vm1, %v12204_v33, 0 }
 0x78b   : > { %12188 = vst.msk [vmem:[%s13737_s19 + $0x148] sm:$0xff] %vm2393_vm1, %v6260_v7  ;;  %v6112_v48 = vadd.f32 %v6111_v1, %v6003_v37  ;;  %6772 = vmatmul.f32.gmra.mxu2 %v6487_v32  ;;  %v6497_v32 = vsub.f32 %v6495_v61, %v6496_v28 }
 0x78d   : > { %v6193_v36 = vadd.f32 %v6192_v43, %v6112_v48  ;;  %6886 = vmatmul.f32.gmra.mxu3 %v6488_v11 }
 0x78e   : > { %v5904_v30 = vpop.f32.mrf.mxu0  ;;  %v6014_v3 = vpop.f32.mrf.mxu1 }
 0x78f   : > { %v6234_v23 = vmul.f32 4.464286, %v6193_v36  ;;  %v5905_v15 = vadd.f32 %v5904_v30, %v16388_v19  ;;  %v6115_v14 = vpop.f32.mrf.mxu2  ;;  %v6503_v19 = vsub.f32 %v16461_v10, %v16585_v25  ;;  %v16596_v36 = vand.u32 4294901760, %v16486_v27 }
 0x790   : > { %v6196_v46 = vpop.f32.mrf.mxu3  ;;  %v16598_v30 = vand.u32 4294901760, %v6333_v6 }
 0x791   : > { %v6262_v13 = vadd.f32 -2.0357144, %v6234_v23  ;;  %v6009_v59 = vadd.f32 %v6008_v4, %v5905_v15  ;;  %6491 = vmatmul.f32.gmra.mxu0 %v6490_v56  ;;  %6660 = vmatmul.f32.gmra.mxu1 %v16575_v51  ;;  %v6498_v4 = vand.u32 4294901760, %v6497_v32  ;;  %v6504_v53 = vand.u32 4294901760, %v6503_v19 }
 0x792   : > { %v16607_v56 = vsub.f32 %v6333_v6, %v16598_v30 }
 0x793   : > { %12190 = vst.msk [vmem:[%s13737_s19 + $0x158] sm:$0xff] %vm2393_vm1, %v6262_v13  ;;  %v6116_v58 = vadd.f32 %v6115_v14, %v6009_v59  ;;  %6777 = vmatmul.f32.gmra.mxu2 %v6495_v61  ;;  %v6505_v15 = vsub.f32 %v6503_v19, %v6504_v53  ;;  %v12206_v14 = vld [vmem:[%s13737_s19 + $0xf8] sm:$0xff] }
 0x794   : > { %v6336_v59 = vsel %vm2393_vm1, %v12206_v14, 0 }
 0x795   : > { %v6197_v1 = vadd.f32 %v6196_v46, %v6116_v58  ;;  %6892 = vmatmul.f32.gmra.mxu3 %v6496_v28 }
 0x796   : > { %v5909_v11 = vpop.f32.mrf.mxu0  ;;  %v6020_v43 = vpop.f32.mrf.mxu1 }
 0x797   : > { %v6236_v7 = vmul.f32 4.464286, %v6197_v1  ;;  %v5910_v37 = vadd.f32 %v5909_v11, %v16399_v47  ;;  %v6119_v48 = vpop.f32.mrf.mxu2  ;;  %v6511_v47 = vsub.f32 %v16486_v27, %v16596_v36  ;;  %v19862_v27 = vand.u32 4294901760, %v16607_v56 }
 0x798   : > { %v6200_v61 = vpop.f32.mrf.mxu3 }
 0x799   : > { %v6264_v10 = vadd.f32 -2.0357144, %v6236_v7  ;;  %v6015_v28 = vadd.f32 %v6014_v3, %v5910_v37  ;;  %6499 = vmatmul.f32.gmra.mxu0 %v6498_v4  ;;  %6664 = vmatmul.f32.gmra.mxu1 %v16585_v25  ;;  %v6512_v1 = vand.u32 4294901760, %v6511_v47  ;;  %v16613_v7 = vand.u32 4294901760, %v6336_v59 }
 0x79b   : > { %12192 = vst.msk [vmem:[%s13737_s19 + $0x168] sm:$0xff] %vm2393_vm1, %v6264_v10  ;;  %v6120_v23 = vadd.f32 %v6119_v48, %v6015_v28  ;;  %6782 = vmatmul.f32.gmra.mxu2 %v6503_v19  ;;  %v6506_v19 = vand.u32 4294901760, %v6505_v15  ;;  %v6513_v48 = vsub.f32 %v6511_v47, %v6512_v1  ;;  %v16622_v10 = vsub.f32 %v6336_v59, %v16613_v7 }
 0x79d   : > { %v6201_v46 = vadd.f32 %v6200_v61, %v6120_v23  ;;  %6898 = vmatmul.f32.gmra.mxu3 %v6504_v53  ;;  %v12208_v53 = vld [vmem:[%s13737_s19 + $0x108] sm:$0xff]  ;;  %v19860_v59 = vand.u32 4294901760, %v16622_v10 }
 0x79e   : > { %v5914_v13 = vpop.f32.mrf.mxu0  ;;  %v6026_v3 = vpop.f32.mrf.mxu1  ;;  %v6339_v23 = vsel %vm2393_vm1, %v12208_v53, 0 }
 0x79f   : > { %v6238_v32 = vmul.f32 4.464286, %v6201_v46  ;;  %v5915_v33 = vadd.f32 %v5914_v13, %v16413_v24  ;;  %v6123_v58 = vpop.f32.mrf.mxu2  ;;  %v7149_v24 = vsub.f32 %v16607_v56, %v19862_v27  ;;  %v6514_v46 = vand.u32 4294901760, %v6513_v48 }
 0x7a0   : > { %v6204_v11 = vpop.f32.mrf.mxu3 }
 0x7a1   : > { %v6266_v4 = vadd.f32 -2.0357144, %v6238_v32  ;;  %v6021_v6 = vadd.f32 %v6020_v43, %v5915_v33  ;;  %6507 = vmatmul.f32.gmra.mxu0 %v6506_v19  ;;  %6668 = vmatmul.f32.gmra.mxu1 %v16596_v36  ;;  %v7150_v32 = vand.u32 4294901760, %v7149_v24  ;;  %v16628_v19 = vand.u32 4294901760, %v6339_v23 }
 0x7a3   : > { %12194 = vst.msk [vmem:[%s13737_s19 + $0x178] sm:$0xff] %vm2393_vm1, %v6266_v4  ;;  %v6124_v37 = vadd.f32 %v6123_v58, %v6021_v6  ;;  %6787 = vmatmul.f32.gmra.mxu2 %v6511_v47 }
 0x7a5   : > { %v6205_v61 = vadd.f32 %v6204_v11, %v6124_v37  ;;  %6904 = vmatmul.f32.gmra.mxu3 %v6512_v1  ;;  %v12210_v1 = vld [vmem:[%s13737_s19 + $0x118] sm:$0xff] }
 0x7a6   : > { %v5919_v43 = vpop.f32.mrf.mxu0  ;;  %v6032_v28 = vpop.f32.mrf.mxu1  ;;  %v6342_v6 = vsel %vm2393_vm1, %v12210_v1, 0 }
 0x7a7   : > { %v6240_v15 = vmul.f32 4.464286, %v6205_v61  ;;  %v5920_v14 = vadd.f32 %v5919_v43, %v16429_v55  ;;  %v6127_v47 = vpop.f32.mrf.mxu2  ;;  %v7157_v55 = vsub.f32 %v16622_v10, %v19860_v59 }
 0x7a8   : > { %v6208_v13 = vpop.f32.mrf.mxu3 }
 0x7a9   : > { %v6268_v33 = vadd.f32 -2.0357144, %v6240_v15  ;;  %v6027_v58 = vadd.f32 %v6026_v3, %v5920_v14  ;;  %6515 = vmatmul.f32.gmra.mxu0 %v6514_v46  ;;  %7062 = vmatmul.f32.vlgmr.msrb.gmra.mxu1 %v16411_v44  ;;  %v16638_v3 = vsub.f32 %v6339_v23, %v16628_v19  ;;  %v16642_v15 = vand.u32 4294901760, %v6342_v6 }
 0x7aa   : > { %v7158_v23 = vand.u32 4294901760, %v7157_v55 }
 0x7ab   : > { %12196 = vst.msk [vmem:[%s13737_s19 + $0x188] sm:$0xff] %vm2393_vm1, %v6268_v33  ;;  %v6128_v11 = vadd.f32 %v6127_v47, %v6027_v58  ;;  %7151 = vmatmul.f32.vlgmr.msra.gmra.mxu2 %v7150_v32  ;;  %v19859_v46 = vand.u32 4294901760, %v16638_v3  ;;  %v12212_v32 = vld [vmem:[%s13737_s19 + $0x128] sm:$0xff] }
 0x7ac   : > { %v6345_v1 = vsel %vm2393_vm1, %v12212_v32, 0 }
 0x7ad   : > { %v6209_v4 = vadd.f32 %v6208_v13, %v6128_v11  ;;  %7336 = vmatmul.f32.vlgmr.msra.gmra.mxu3 %v16598_v30 }
 0x7ae   : > { %v5924_v37 = vpop.f32.mrf.mxu0  ;;  %v6038_v48 = vpop.f32.mrf.mxu1 }
 0x7af   : > { %v6242_v53 = vmul.f32 4.464286, %v6209_v4  ;;  %v5925_v24 = vadd.f32 %v5924_v37, %v16451_v40  ;;  %v6131_v61 = vpop.f32.mrf.mxu2  ;;  %v16651_v40 = vsub.f32 %v6342_v6, %v16642_v15 }
 0x7b0   : > { %v6212_v43 = vpop.f32.mrf.mxu3 }
 0x7b1   : > { %v6270_v14 = vadd.f32 -2.0357144, %v6242_v53  ;;  %v6033_v47 = vadd.f32 %v6032_v28, %v5925_v24  ;;  %6973 = vmatmul.f32.vlgmr.msrb.gmra.mxu0 %v16411_v44  ;;  %7066 = vmatmul.f32.gmra.mxu1 %v16427_v0  ;;  %v7165_v44 = vsub.f32 %v16638_v3, %v19859_v46  ;;  %v19857_v6 = vand.u32 4294901760, %v16651_v40 }
 0x7b3   : > { %12198 = vst.msk [vmem:[%s13737_s19 + $0x198] sm:$0xff] %vm2393_vm1, %v6270_v14  ;;  %v6132_v13 = vadd.f32 %v6131_v61, %v6033_v47  ;;  %7159 = vmatmul.f32.gmra.mxu2 %v7158_v23  ;;  %v7166_v61 = vand.u32 4294901760, %v7165_v44  ;;  %v12214_v47 = vld [vmem:[%s13737_s19 + $0x138] sm:$0xff] }
 0x7b4   : > { %v6348_v32 = vsel %vm2393_vm1, %v12214_v47, 0 }
 0x7b5   : > { %v6213_v33 = vadd.f32 %v6212_v43, %v6132_v13  ;;  %7340 = vmatmul.f32.gmra.mxu3 %v16613_v7  ;;  %v16662_v43 = vand.u32 4294901760, %v6345_v1 }
 0x7b6   : > { %v5929_v28 = vpop.f32.mrf.mxu0  ;;  %v6617_v58 = vpop.f32.mrf.mxu1 }
 0x7b7   : > { %v6244_v11 = vmul.f32 4.464286, %v6213_v33  ;;  %v5930_v4 = vadd.f32 %v5929_v28, %v16476_v41  ;;  %v6135_v55 = vpop.f32.mrf.mxu2  ;;  %v7173_v41 = vsub.f32 %v16651_v40, %v19857_v6 }
 0x7b8   : > { %v6216_v37 = vpop.f32.mrf.mxu3 }
 0x7b9   : > { %v6272_v53 = vadd.f32 -2.0357144, %v6244_v11  ;;  %v6039_v24 = vadd.f32 %v6038_v48, %v5930_v4  ;;  %6977 = vmatmul.f32.gmra.mxu0 %v16427_v0  ;;  %7070 = vmatmul.f32.gmra.mxu1 %v16446_v39  ;;  %v16672_v0 = vsub.f32 %v6345_v1, %v16662_v43  ;;  %v7174_v4 = vand.u32 4294901760, %v7173_v41 }
 0x7ba   : > { %v16678_v1 = vand.u32 4294901760, %v6348_v32 }
 0x7bb   : > { %12200 = vst.msk [vmem:[%s13737_s19 + $0x1a8] sm:$0xff] %vm2393_vm1, %v6272_v53  ;;  %v6136_v14 = vadd.f32 %v6135_v55, %v6039_v24  ;;  %7167 = vmatmul.f32.gmra.mxu2 %v7166_v61  ;;  %v12216_v61 = vld [vmem:[%s13737_s19 + $0x148] sm:$0xff] }
 0x7bc   : > { %v6351_v41 = vsel %vm2393_vm1, %v12216_v61, 0 }
 0x7bd   : > { %v6217_v23 = vadd.f32 %v6216_v37, %v6136_v14  ;;  %7344 = vmatmul.f32.gmra.mxu3 %v16628_v19  ;;  %v19856_v37 = vand.u32 4294901760, %v16672_v0 }
 0x7be   : > { %v6412_v48 = vpop.f32.mrf.mxu0  ;;  %v6621_v13 = vpop.f32.mrf.mxu1 }
 0x7bf   : > { %v6246_v33 = vmul.f32 4.464286, %v6217_v23  ;;  %v6618_v44 = vadd.f32 %v6617_v58, %v6412_v48  ;;  %v6723_v28 = vpop.f32.mrf.mxu2  ;;  %v7181_v58 = vsub.f32 %v16672_v0, %v19856_v37 }
 0x7c0   : > { %v6827_v11 = vpop.f32.mrf.mxu3 }
 0x7c1   : > { %v6274_v55 = vadd.f32 -2.0357144, %v6246_v33  ;;  %v6724_v53 = vadd.f32 %v6723_v28, %v6618_v44  ;;  %6981 = vmatmul.f32.gmra.mxu0 %v16446_v39  ;;  %7074 = vmatmul.f32.gmra.mxu1 %v16470_v45  ;;  %v16690_v39 = vsub.f32 %v6348_v32, %v16678_v1  ;;  %v7182_v28 = vand.u32 4294901760, %v7181_v58  ;;  %v12218_v32 = vld [vmem:[%s13737_s19 + $0x158] sm:$0xff] }
 0x7c2   : > { %v6354_v58 = vsel %vm2393_vm1, %v12218_v32, 0 }
 0x7c3   : > { %12202 = vst.msk [vmem:[%s13737_s19 + $0x1b8] sm:$0xff] %vm2393_vm1, %v6274_v55  ;;  %v16682_v24 = vadd.f32 %v6827_v11, %v6724_v53  ;;  %7175 = vmatmul.f32.gmra.mxu2 %v7174_v4  ;;  %v19855_v11 = vand.u32 4294901760, %v16690_v39  ;;  %v16696_v4 = vand.u32 4294901760, %v6351_v41 }
 0x7c5   : > { %7348 = vmatmul.f32.gmra.mxu3 %v16642_v15 }
 0x7c6   : > { %v6420_v14 = vpop.f32.mrf.mxu0  ;;  %v6625_v47 = vpop.f32.mrf.mxu1 }
 0x7c7   : > { %v6622_v23 = vadd.f32 %v6621_v13, %v6420_v14  ;;  %v6728_v48 = vpop.f32.mrf.mxu2  ;;  %v7189_v13 = vsub.f32 %v16690_v39, %v19855_v11  ;;  %v16712_v11 = vand.u32 4294901760, %v6354_v58 }
 0x7c8   : > { %v6833_v33 = vpop.f32.mrf.mxu3 }
 0x7c9   : > { %v6729_v44 = vadd.f32 %v6728_v48, %v6622_v23  ;;  %6985 = vmatmul.f32.gmra.mxu0 %v16470_v45  ;;  %7078 = vmatmul.f32.gmra.mxu1 %v16495_v9  ;;  %v16706_v45 = vsub.f32 %v6351_v41, %v16696_v4  ;;  %v12220_v41 = vld [vmem:[%s13737_s19 + $0x168] sm:$0xff] }
 0x7cb   : > { %v16698_v55 = vadd.f32 %v6833_v33, %v6729_v44  ;;  %7183 = vmatmul.f32.gmra.mxu2 %v7182_v28  ;;  %v7190_v44 = vand.u32 4294901760, %v7189_v13  ;;  %v19858_v28 = vand.u32 4294901760, %v16706_v45 }
 0x7cd   : > { %7352 = vmatmul.f32.gmra.mxu3 %v16662_v43 }
 0x7ce   : > { %v6428_v53 = vpop.f32.mrf.mxu0  ;;  %v6629_v61 = vpop.f32.mrf.mxu1 }
 0x7cf   : > { %v6626_v14 = vadd.f32 %v6625_v47, %v6428_v53  ;;  %v6733_v23 = vpop.f32.mrf.mxu2  ;;  %v7197_v47 = vsub.f32 %v16706_v45, %v19858_v28  ;;  %v6357_v53 = vsel %vm2393_vm1, %v12220_v41, 0 }
 0x7d0   : > { %v6839_v48 = vpop.f32.mrf.mxu3  ;;  %v16728_v28 = vand.u32 4294901760, %v6357_v53 }
 0x7d1   : > { %v6734_v33 = vadd.f32 %v6733_v23, %v6626_v14  ;;  %6989 = vmatmul.f32.gmra.mxu0 %v16495_v9  ;;  %7082 = vmatmul.f32.gmra.mxu1 %v16511_v26  ;;  %v16722_v9 = vsub.f32 %v6354_v58, %v16712_v11  ;;  %v12222_v58 = vld [vmem:[%s13737_s19 + $0x178] sm:$0xff] }
 0x7d3   : > { %v16714_v37 = vadd.f32 %v6839_v48, %v6734_v33  ;;  %7191 = vmatmul.f32.gmra.mxu2 %v7190_v44  ;;  %v7198_v44 = vand.u32 4294901760, %v7197_v47  ;;  %v19861_v6 = vand.u32 4294901760, %v16722_v9 }
 0x7d5   : > { %7356 = vmatmul.f32.gmra.mxu3 %v16678_v1 }
 0x7d6   : > { %v6436_v32 = vpop.f32.mrf.mxu0  ;;  %v6633_v13 = vpop.f32.mrf.mxu1 }
 0x7d7   : > { %v6630_v14 = vadd.f32 %v6629_v61, %v6436_v32  ;;  %v6738_v23 = vpop.f32.mrf.mxu2  ;;  %v7205_v61 = vsub.f32 %v16722_v9, %v19861_v6  ;;  %v6360_v32 = vsel %vm2393_vm1, %v12222_v58, 0 }
 0x7d8   : > { %v6845_v48 = vpop.f32.mrf.mxu3  ;;  %v16744_v6 = vand.u32 4294901760, %v6360_v32 }
 0x7d9   : > { %v6739_v33 = vadd.f32 %v6738_v23, %v6630_v14  ;;  %6993 = vmatmul.f32.gmra.mxu0 %v16511_v26  ;;  %7086 = vmatmul.f32.gmra.mxu1 %v16531_v20  ;;  %v16738_v26 = vsub.f32 %v6357_v53, %v16728_v28  ;;  %v12224_v53 = vld [vmem:[%s13737_s19 + $0x188] sm:$0xff] }
 0x7db   : > { %v16730_v46 = vadd.f32 %v6845_v48, %v6739_v33  ;;  %7199 = vmatmul.f32.gmra.mxu2 %v7198_v44  ;;  %v7206_v44 = vand.u32 4294901760, %v7205_v61  ;;  %v19863_v59 = vand.u32 4294901760, %v16738_v26 }
 0x7dd   : > { %7360 = vmatmul.f32.gmra.mxu3 %v16696_v4 }
 0x7de   : > { %v6444_v41 = vpop.f32.mrf.mxu0  ;;  %v6637_v47 = vpop.f32.mrf.mxu1 }
 0x7df   : > { %v6634_v14 = vadd.f32 %v6633_v13, %v6444_v41  ;;  %v6743_v23 = vpop.f32.mrf.mxu2  ;;  %v7213_v13 = vsub.f32 %v16738_v26, %v19863_v59  ;;  %v6363_v41 = vsel %vm2393_vm1, %v12224_v53, 0 }
 0x7e0   : > { %v6851_v48 = vpop.f32.mrf.mxu3  ;;  %v16760_v59 = vand.u32 4294901760, %v6363_v41 }
 0x7e1   : > { %v6744_v33 = vadd.f32 %v6743_v23, %v6634_v14  ;;  %6997 = vmatmul.f32.gmra.mxu0 %v16531_v20  ;;  %7090 = vmatmul.f32.gmra.mxu1 %v16540_v52  ;;  %v16754_v20 = vsub.f32 %v6360_v32, %v16744_v6  ;;  %v12226_v32 = vld [vmem:[%s13737_s19 + $0x198] sm:$0xff] }
 0x7e3   : > { %v16746_v27 = vadd.f32 %v6851_v48, %v6744_v33  ;;  %7207 = vmatmul.f32.gmra.mxu2 %v7206_v44  ;;  %v7214_v44 = vand.u32 4294901760, %v7213_v13  ;;  %v19866_v2 = vand.u32 4294901760, %v16754_v20 }
 0x7e5   : > { %7364 = vmatmul.f32.gmra.mxu3 %v16712_v11 }
 0x7e6   : > { %v6452_v58 = vpop.f32.mrf.mxu0  ;;  %v6641_v61 = vpop.f32.mrf.mxu1 }
 0x7e7   : > { %v6638_v14 = vadd.f32 %v6637_v47, %v6452_v58  ;;  %v6748_v23 = vpop.f32.mrf.mxu2  ;;  %v7221_v47 = vsub.f32 %v16754_v20, %v19866_v2  ;;  %v6366_v58 = vsel %vm2393_vm1, %v12226_v32, 0 }
 0x7e8   : > { %v6857_v48 = vpop.f32.mrf.mxu3  ;;  %v16776_v2 = vand.u32 4294901760, %v6366_v58 }
 0x7e9   : > { %v6749_v33 = vadd.f32 %v6748_v23, %v6638_v14  ;;  %7001 = vmatmul.f32.gmra.mxu0 %v16540_v52  ;;  %7094 = vmatmul.f32.gmra.mxu1 %v16548_v60  ;;  %v16770_v52 = vsub.f32 %v6363_v41, %v16760_v59  ;;  %v12228_v41 = vld [vmem:[%s13737_s19 + $0x1a8] sm:$0xff] }
 0x7eb   : > { %v16762_v42 = vadd.f32 %v6857_v48, %v6749_v33  ;;  %7215 = vmatmul.f32.gmra.mxu2 %v7214_v44  ;;  %v7222_v44 = vand.u32 4294901760, %v7221_v47  ;;  %v19869_v62 = vand.u32 4294901760, %v16770_v52 }
 0x7ed   : > { %7368 = vmatmul.f32.gmra.mxu3 %v16728_v28 }
 0x7ee   : > { %v6460_v53 = vpop.f32.mrf.mxu0  ;;  %v6645_v13 = vpop.f32.mrf.mxu1 }
 0x7ef   : > { %v6642_v14 = vadd.f32 %v6641_v61, %v6460_v53  ;;  %v6753_v23 = vpop.f32.mrf.mxu2  ;;  %v7229_v61 = vsub.f32 %v16770_v52, %v19869_v62  ;;  %v6369_v53 = vsel %vm2393_vm1, %v12228_v41, 0 }
 0x7f0   : > { %v6863_v48 = vpop.f32.mrf.mxu3  ;;  %v16792_v62 = vand.u32 4294901760, %v6369_v53 }
 0x7f1   : > { %v6754_v33 = vadd.f32 %v6753_v23, %v6642_v14  ;;  %7005 = vmatmul.f32.gmra.mxu0 %v16548_v60  ;;  %7098 = vmatmul.f32.gmra.mxu1 %v16558_v18  ;;  %v16786_v60 = vsub.f32 %v6366_v58, %v16776_v2  ;;  %v12230_v58 = vld [vmem:[%s13737_s19 + $0x1b8] sm:$0xff] }
 0x7f2   : > { %v16802_v41 = vsub.f32 %v6369_v53, %v16792_v62 }
 0x7f3   : > { %v16778_v31 = vadd.f32 %v6863_v48, %v6754_v33  ;;  %7223 = vmatmul.f32.gmra.mxu2 %v7222_v44  ;;  %v7230_v44 = vand.u32 4294901760, %v7229_v61  ;;  %v19873_v34 = vand.u32 4294901760, %v16786_v60  ;;  %v6372_v61 = vsel %vm2393_vm1, %v12230_v58, 0 }
 0x7f4   : > { %v16808_v21 = vand.u32 4294901760, %v6372_v61 }
 0x7f5   : > { %7372 = vmatmul.f32.gmra.mxu3 %v16744_v6 }
 0x7f6   : > { %v6468_v32 = vpop.f32.mrf.mxu0  ;;  %v6649_v47 = vpop.f32.mrf.mxu1  ;;  %v16817_v53 = vsub.f32 %v6372_v61, %v16808_v21 }
 0x7f7   : > { %v6646_v14 = vadd.f32 %v6645_v13, %v6468_v32  ;;  %v6758_v23 = vpop.f32.mrf.mxu2  ;;  %v7237_v13 = vsub.f32 %v16786_v60, %v19873_v34 }
 0x7f8   : > { %v6869_v48 = vpop.f32.mrf.mxu3 }
 0x7f9   : > { %v6759_v33 = vadd.f32 %v6758_v23, %v6646_v14  ;;  %7009 = vmatmul.f32.gmra.mxu0 %v16558_v18  ;;  %7102 = vmatmul.f32.gmra.mxu1 %v16567_v29 }
 0x7fb   : > { %v16794_v16 = vadd.f32 %v6869_v48, %v6759_v33  ;;  %7231 = vmatmul.f32.gmra.mxu2 %v7230_v44  ;;  %v7238_v33 = vand.u32 4294901760, %v7237_v13  ;;  %v19874_v44 = vand.u32 4294901760, %v16802_v41 }
 0x7fd   : > { %7376 = vmatmul.f32.gmra.mxu3 %v16760_v59 }
 0x7fe   : > { %v6476_v18 = vpop.f32.mrf.mxu0  ;;  %v6653_v32 = vpop.f32.mrf.mxu1 }
 0x7ff   : > { %v6650_v14 = vadd.f32 %v6649_v47, %v6476_v18  ;;  %v6763_v23 = vpop.f32.mrf.mxu2  ;;  %v7245_v47 = vsub.f32 %v16802_v41, %v19874_v44 }
 0x800   : > { %v6875_v17 = vpop.f32.mrf.mxu3 }
 0x801   : > { %v6764_v48 = vadd.f32 %v6763_v23, %v6650_v14  ;;  %7013 = vmatmul.f32.gmra.mxu0 %v16567_v29  ;;  %7106 = vmatmul.f32.gmra.mxu1 %v16575_v51 }
 0x803   : > { %v16810_v34 = vadd.f32 %v6875_v17, %v6764_v48  ;;  %7239 = vmatmul.f32.gmra.mxu2 %v7238_v33  ;;  %v7246_v17 = vand.u32 4294901760, %v7245_v47  ;;  %v19876_v48 = vand.u32 4294901760, %v16817_v53 }
 0x805   : > { %7380 = vmatmul.f32.gmra.mxu3 %v16776_v2  ;;  %v7253_v61 = vsub.f32 %v16817_v53, %v19876_v48 }
 0x806   : > { %v6484_v29 = vpop.f32.mrf.mxu0  ;;  %v6657_v58 = vpop.f32.mrf.mxu1 }
 0x807   : > { %v6654_v18 = vadd.f32 %v6653_v32, %v6484_v29  ;;  %v6768_v13 = vpop.f32.mrf.mxu2  ;;  %v7254_v47 = vand.u32 4294901760, %v7253_v61 }
 0x808   : > { %v6881_v14 = vpop.f32.mrf.mxu3 }
 0x809   : > { %v6769_v23 = vadd.f32 %v6768_v13, %v6654_v18  ;;  %7017 = vmatmul.f32.gmra.mxu0 %v16575_v51  ;;  %7110 = vmatmul.f32.gmra.mxu1 %v16585_v25 }
 0x80b   : > { %v16822_v33 = vadd.f32 %v6881_v14, %v6769_v23  ;;  %7247 = vmatmul.f32.gmra.mxu2 %v7246_v17 }
 0x80d   : > { %7384 = vmatmul.f32.gmra.mxu3 %v16792_v62 }
 0x80e   : > { %v6492_v32 = vpop.f32.mrf.mxu0  ;;  %v6661_v29 = vpop.f32.mrf.mxu1 }
 0x80f   : > { %v6658_v44 = vadd.f32 %v6657_v58, %v6492_v32  ;;  %v6773_v18 = vpop.f32.mrf.mxu2 }
 0x810   : > { %v6887_v13 = vpop.f32.mrf.mxu3 }
 0x811   : > { %v6774_v51 = vadd.f32 %v6773_v18, %v6658_v44  ;;  %7021 = vmatmul.f32.gmra.mxu0 %v16585_v25  ;;  %7114 = vmatmul.f32.gmra.mxu1 %v16596_v36  ;;  %v20628_v44 = vand.u32 4294901760, %v16607_v56 }
 0x813   : > { %v16830_v14 = vadd.f32 %v6887_v13, %v6774_v51  ;;  %7255 = vmatmul.f32.gmra.mxu2 %v7254_v47 }
 0x815   : > { %7388 = vmatmul.f32.gmra.mxu3 %v16808_v21 }
 0x816   : > { %v6500_v23 = vpop.f32.mrf.mxu0  ;;  %v6665_v17 = vpop.f32.mrf.mxu1 }
 0x817   : > { %v6662_v5 = vadd.f32 %v6661_v29, %v6500_v23  ;;  %v6778_v48 = vpop.f32.mrf.mxu2  ;;  %v20630_v23 = vand.u32 4294901760, %v16638_v3 }
 0x818   : > { %v6893_v54 = vpop.f32.mrf.mxu3 }
 0x819   : > { %v6779_v63 = vadd.f32 %v6778_v48, %v6662_v5  ;;  %7025 = vmatmul.f32.gmra.mxu0 %v16596_v36  ;;  %7534 = vmatmul.f32.vlgmr.msra.gmra.mxu1 %v20628_v44  ;;  %v20629_v5 = vand.u32 4294901760, %v16622_v10 }
 0x81b   : > { %v16836_v25 = vadd.f32 %v6893_v54, %v6779_v63  ;;  %7669 = vmatmul.f32.vlgmr.msrb.gmra.mxu2 %v16598_v30 }
 0x81d   : > { %7754 = vmatmul.f32.vlgmr.msrb.gmra.mxu3 %v16598_v30 }
 0x81e   : > { %v6508_v58 = vpop.f32.mrf.mxu0  ;;  %v6669_v61 = vpop.f32.mrf.mxu1 }
 0x81f   : > { %v6666_v32 = vadd.f32 %v6665_v17, %v6508_v58  ;;  %v6783_v18 = vpop.f32.mrf.mxu2 }
 0x820   : > { %v6899_v13 = vpop.f32.mrf.mxu3 }
 0x821   : > { %v6784_v29 = vadd.f32 %v6783_v18, %v6666_v32  ;;  %7434 = vmatmul.f32.vlgmr.msra.gmra.mxu0 %v16607_v56  ;;  %7540 = vmatmul.f32.gmra.mxu1 %v20629_v5 }
 0x823   : > { %v16843_v36 = vadd.f32 %v6899_v13, %v6784_v29  ;;  %7673 = vmatmul.f32.gmra.mxu2 %v16613_v7 }
 0x825   : > { %7758 = vmatmul.f32.gmra.mxu3 %v16613_v7 }
 0x826   : > { %v6516_v54 = vpop.f32.mrf.mxu0  ;;  %v7063_v63 = vpop.f32.mrf.mxu1 }
 0x827   : > { %v6670_v30 = vadd.f32 %v6669_v61, %v6516_v54  ;;  %v6788_v48 = vpop.f32.mrf.mxu2 }
 0x828   : > { %v6905_v51 = vpop.f32.mrf.mxu3 }
 0x829   : > { %v6789_v47 = vadd.f32 %v6788_v48, %v6670_v30  ;;  %7439 = vmatmul.f32.gmra.mxu0 %v16622_v10  ;;  %7546 = vmatmul.f32.gmra.mxu1 %v20630_v23  ;;  %v20631_v10 = vand.u32 4294901760, %v16651_v40 }
 0x82b   : > { %v16850_v56 = vadd.f32 %v6905_v51, %v6789_v47  ;;  %7677 = vmatmul.f32.gmra.mxu2 %v16628_v19 }
 0x82d   : > { %7762 = vmatmul.f32.gmra.mxu3 %v16628_v19 }
 0x82e   : > { %v6974_v17 = vpop.f32.mrf.mxu0  ;;  %v7067_v44 = vpop.f32.mrf.mxu1 }
 0x82f   : > { %v6975_v7 = vadd.f32 %v6974_v17, %v16682_v24  ;;  %v7152_v58 = vpop.f32.mrf.mxu2 }
 0x830   : > { %v7337_v61 = vpop.f32.mrf.mxu3 }
 0x831   : > { %v7064_v32 = vadd.f32 %v7063_v63, %v6975_v7  ;;  %7444 = vmatmul.f32.gmra.mxu0 %v16638_v3  ;;  %7552 = vmatmul.f32.gmra.mxu1 %v20631_v10  ;;  %v20633_v3 = vand.u32 4294901760, %v16672_v0 }
 0x833   : > { %v7153_v18 = vadd.f32 %v7152_v58, %v7064_v32  ;;  %7681 = vmatmul.f32.gmra.mxu2 %v16642_v15 }
 0x835   : > { %v16859_v13 = vadd.f32 %v7337_v61, %v7153_v18  ;;  %7766 = vmatmul.f32.gmra.mxu3 %v16642_v15 }
 0x836   : > { %v6978_v19 = vpop.f32.mrf.mxu0  ;;  %v7071_v29 = vpop.f32.mrf.mxu1 }
 0x837   : > { %20632 = vst [vmem:[#allocation262_spill] sm:$0xff] %v16859_v13  ;;  %v6979_v5 = vadd.f32 %v6978_v19, %v16698_v55  ;;  %v7160_v24 = vpop.f32.mrf.mxu2 }
 0x838   : > { %v7341_v54 = vpop.f32.mrf.mxu3 }
 0x839   : > { %v7068_v30 = vadd.f32 %v7067_v44, %v6979_v5  ;;  %7449 = vmatmul.f32.gmra.mxu0 %v16651_v40  ;;  %7558 = vmatmul.f32.gmra.mxu1 %v20633_v3  ;;  %v20635_v40 = vand.u32 4294901760, %v16690_v39  ;;  %v20641_v3 = vand.u32 4294901760, %v16738_v26 }
 0x83b   : > { %v7161_v63 = vadd.f32 %v7160_v24, %v7068_v30  ;;  %7685 = vmatmul.f32.gmra.mxu2 %v16662_v43 }
 0x83d   : > { %v16867_v48 = vadd.f32 %v7341_v54, %v7161_v63  ;;  %7770 = vmatmul.f32.gmra.mxu3 %v16662_v43 }
 0x83e   : > { %v6982_v15 = vpop.f32.mrf.mxu0  ;;  %v7075_v51 = vpop.f32.mrf.mxu1 }
 0x83f   : > { %20634 = vst [vmem:[#allocation267_spill] sm:$0xff] %v16867_v48  ;;  %v6983_v47 = vadd.f32 %v6982_v15, %v16714_v37  ;;  %v7168_v55 = vpop.f32.mrf.mxu2 }
 0x840   : > { %v7345_v23 = vpop.f32.mrf.mxu3 }
 0x841   : > { %v7072_v17 = vadd.f32 %v7071_v29, %v6983_v47  ;;  %7454 = vmatmul.f32.gmra.mxu0 %v16672_v0  ;;  %7564 = vmatmul.f32.gmra.mxu1 %v20635_v40  ;;  %v20637_v0 = vand.u32 4294901760, %v16706_v45 }
 0x843   : > { %v7169_v44 = vadd.f32 %v7168_v55, %v7072_v17  ;;  %7689 = vmatmul.f32.gmra.mxu2 %v16678_v1 }
 0x845   : > { %v16875_v7 = vadd.f32 %v7345_v23, %v7169_v44  ;;  %7774 = vmatmul.f32.gmra.mxu3 %v16678_v1  ;;  %v20643_v23 = vand.u32 4294901760, %v16770_v52  ;;  %v20644_v44 = vand.u32 4294901760, %v16786_v60 }
 0x846   : > { %v6986_v43 = vpop.f32.mrf.mxu0  ;;  %v16878_v58 = vpop.f32.mrf.mxu1 }
 0x847   : > { %20636 = vst [vmem:[#allocation277_spill] sm:$0xff] %v16875_v7  ;;  %v6987_v37 = vadd.f32 %v6986_v43, %v16730_v46  ;;  %v7176_v61 = vpop.f32.mrf.mxu2 }
 0x848   : > { %v7349_v32 = vpop.f32.mrf.mxu3 }
 0x849   : > { %v7076_v10 = vadd.f32 %v7075_v51, %v6987_v37  ;;  %7459 = vmatmul.f32.gmra.mxu0 %v16690_v39  ;;  %7570 = vmatmul.f32.gmra.mxu1 %v20637_v0  ;;  %v20640_v39 = vand.u32 4294901760, %v16722_v9  ;;  %v20642_v51 = vand.u32 4294901760, %v16754_v20  ;;  %v20646_v0 = vand.u32 4294901760, %v16817_v53 }
 0x84b   : > { %v7177_v18 = vadd.f32 %v7176_v61, %v7076_v10  ;;  %7693 = vmatmul.f32.gmra.mxu2 %v16696_v4  ;;  %v20645_v61 = vand.u32 4294901760, %v16802_v41 }
 0x84d   : > { %v16885_v19 = vadd.f32 %v7349_v32, %v7177_v18  ;;  %7778 = vmatmul.f32.gmra.mxu3 %v16696_v4 }
 0x84e   : > { %v16888_v1 = vpop.f32.mrf.mxu0  ;;  %v16890_v29 = vpop.f32.mrf.mxu1 }
 0x84f   : > { %20638 = vst [vmem:[#allocation134_spill] sm:$0xff] %v16885_v19  ;;  %v16892_v46 = vpop.f32.mrf.mxu2 }
 0x850   : > { %v16894_v5 = vpop.f32.mrf.mxu3 }
 0x851   : > { %20639 = vst [vmem:[#allocation201_spill] sm:$0xff] %v16894_v5  ;;  %7464 = vmatmul.f32.gmra.mxu0 %v16706_v45  ;;  %7576 = vmatmul.f32.gmra.mxu1 %v20640_v39 }
 0x853   : > { %7697 = vmatmul.f32.gmra.mxu2 %v16712_v11 }
 0x855   : > { %7782 = vmatmul.f32.gmra.mxu3 %v16712_v11 }
 0x856   : > { %v16901_v24 = vpop.f32.mrf.mxu0  ;;  %v16903_v4 = vpop.f32.mrf.mxu1 }
 0x857   : > { %v16905_v54 = vpop.f32.mrf.mxu2 }
 0x858   : > { %v16907_v30 = vpop.f32.mrf.mxu3 }
 0x859   : > { %7469 = vmatmul.f32.gmra.mxu0 %v16722_v9  ;;  %7582 = vmatmul.f32.gmra.mxu1 %v20641_v3 }
 0x85b   : > { %7701 = vmatmul.f32.gmra.mxu2 %v16728_v28 }
 0x85d   : > { %7786 = vmatmul.f32.gmra.mxu3 %v16728_v28 }
 0x85e   : > { %v16914_v45 = vpop.f32.mrf.mxu0  ;;  %v16916_v11 = vpop.f32.mrf.mxu1 }
 0x85f   : > { %v16918_v63 = vpop.f32.mrf.mxu2 }
 0x860   : > { %v16920_v15 = vpop.f32.mrf.mxu3 }
 0x861   : > { %7474 = vmatmul.f32.gmra.mxu0 %v16738_v26  ;;  %7588 = vmatmul.f32.gmra.mxu1 %v20642_v51 }
 0x863   : > { %7705 = vmatmul.f32.gmra.mxu2 %v16744_v6 }
 0x865   : > { %7790 = vmatmul.f32.gmra.mxu3 %v16744_v6 }
 0x866   : > { %v16927_v9 = vpop.f32.mrf.mxu0  ;;  %v16929_v28 = vpop.f32.mrf.mxu1 }
 0x867   : > { %v16931_v47 = vpop.f32.mrf.mxu2 }
 0x868   : > { %v16933_v55 = vpop.f32.mrf.mxu3 }
 0x869   : > { %7479 = vmatmul.f32.gmra.mxu0 %v16754_v20  ;;  %7594 = vmatmul.f32.gmra.mxu1 %v20643_v23 }
 0x86b   : > { %7709 = vmatmul.f32.gmra.mxu2 %v16760_v59 }
 0x86d   : > { %7794 = vmatmul.f32.gmra.mxu3 %v16760_v59 }
 0x86e   : > { %v16940_v26 = vpop.f32.mrf.mxu0  ;;  %v16942_v6 = vpop.f32.mrf.mxu1 }
 0x86f   : > { %v16944_v17 = vpop.f32.mrf.mxu2 }
 0x870   : > { %v16946_v40 = vpop.f32.mrf.mxu3 }
 0x871   : > { %7484 = vmatmul.f32.gmra.mxu0 %v16770_v52  ;;  %7600 = vmatmul.f32.gmra.mxu1 %v20644_v44 }
 0x873   : > { %7713 = vmatmul.f32.gmra.mxu2 %v16776_v2 }
 0x875   : > { %7798 = vmatmul.f32.gmra.mxu3 %v16776_v2 }
 0x876   : > { %v16953_v20 = vpop.f32.mrf.mxu0  ;;  %v16955_v59 = vpop.f32.mrf.mxu1 }
 0x877   : > { %v16957_v43 = vpop.f32.mrf.mxu2 }
 0x878   : > { %v16959_v37 = vpop.f32.mrf.mxu3 }
 0x879   : > { %7489 = vmatmul.f32.gmra.mxu0 %v16786_v60  ;;  %7606 = vmatmul.f32.gmra.mxu1 %v20645_v61 }
 0x87b   : > { %7717 = vmatmul.f32.gmra.mxu2 %v16792_v62 }
 0x87d   : > { %7802 = vmatmul.f32.gmra.mxu3 %v16792_v62 }
 0x87e   : > { %v16966_v52 = vpop.f32.mrf.mxu0  ;;  %v16968_v2 = vpop.f32.mrf.mxu1 }
 0x87f   : > { %v16970_v32 = vpop.f32.mrf.mxu2 }
 0x880   : > { %v16972_v10 = vpop.f32.mrf.mxu3 }
 0x881   : > { %7494 = vmatmul.f32.gmra.mxu0 %v16802_v41  ;;  %7612 = vmatmul.f32.gmra.mxu1 %v20646_v0 }
 0x883   : > { %7721 = vmatmul.f32.gmra.mxu2 %v16808_v21 }
 0x885   : > { %7806 = vmatmul.f32.gmra.mxu3 %v16808_v21 }
 0x886   : > { %v7018_v60 = vpop.f32.mrf.mxu0  ;;  %v16979_v18 = vpop.f32.mrf.mxu1 }
 0x887   : > { %v16981_v62 = vpop.f32.mrf.mxu2 }
 0x888   : > { %v16983_v39 = vpop.f32.mrf.mxu3 }
 0x889   : > { %7499 = vmatmul.f32.gmra.mxu0 %v16817_v53 }
 0x88e   : > { %v7022_v3 = vpop.f32.mrf.mxu0  ;;  %v16986_v51 = vpop.f32.mrf.mxu1 }
 0x88f   : > { %v16988_v41 = vpop.f32.mrf.mxu2 }
 0x890   : > { %v16990_v23 = vpop.f32.mrf.mxu3 }
 0x896   : > { %v16992_v44 = vpop.f32.mrf.mxu0  ;;  %v16994_v61 = vpop.f32.mrf.mxu1 }
 0x897   : > { %20647 = vst [vmem:[#allocation258_spill] sm:$0xff] %v16994_v61  ;;  %v16996_v21 = vpop.f32.mrf.mxu2 }
 0x898   : > { %v16998_v0 = vpop.f32.mrf.mxu3 }
 0x899   : > { %20648 = vst [vmem:[#allocation263_spill] sm:$0xff] %v16998_v0  ;;  %v7023_v0 = vadd.f32 %v7022_v3, %v16843_v36 }
 0x89e   : > { %v17000_v35 = vpop.f32.mrf.mxu0  ;;  %v17002_v50 = vpop.f32.mrf.mxu1 }
 0x89f   : > { %20649 = vst [vmem:[#allocation272_spill] sm:$0xff] %v17000_v35  ;;  %v17004_v53 = vpop.f32.mrf.mxu2 }
 0x8a0   : > { %20650 = vst [vmem:[#allocation146_spill] sm:$0xff] %v17002_v50  ;;  %v17006_v49 = vpop.f32.mrf.mxu3 }
 0x8a1   : > { %20651 = vst [vmem:[#allocation259_spill] sm:$0xff] %v17004_v53 }
 0x8a2   : > { %20652 = vst [vmem:[#allocation268_spill] sm:$0xff] %v17006_v49 }
 0x8a6   : > { %v17008_v38 = vpop.f32.mrf.mxu0  ;;  %v17010_v12 = vpop.f32.mrf.mxu1 }
 0x8a7   : > { %20653 = vst [vmem:[#allocation147_spill] sm:$0xff] %v17008_v38  ;;  %v17012_v8 = vpop.f32.mrf.mxu2 }
 0x8a8   : > { %20654 = vst [vmem:[#allocation148_spill] sm:$0xff] %v17010_v12  ;;  %v17014_v57 = vpop.f32.mrf.mxu3 }
 0x8a9   : > { %20655 = vst [vmem:[#allocation264_spill] sm:$0xff] %v17012_v8 }
 0x8aa   : > { %20656 = vst [vmem:[#allocation184_spill] sm:$0xff] %v17014_v57 }
 0x8ae   : > { %v17016_v22 = vpop.f32.mrf.mxu0  ;;  %v17018_v61 = vpop.f32.mrf.mxu1 }
 0x8af   : > { %20657 = vst [vmem:[#allocation260_spill] sm:$0xff] %v17016_v22  ;;  %v17020_v13 = vpop.f32.mrf.mxu2 }
 0x8b0   : > { %20658 = vst [vmem:[#allocation167_spill] sm:$0xff] %v17018_v61  ;;  %v17022_v35 = vpop.f32.mrf.mxu3 }
 0x8b1   : > { %20659 = vst [vmem:[#allocation225_spill] sm:$0xff] %v17020_v13 }
 0x8b2   : > { %20660 = vst [vmem:[#allocation99_spill] sm:$0xff] %v17022_v35 }
 0x8b6   : > { %v17024_v50 = vpop.f32.mrf.mxu0  ;;  %v17026_v53 = vpop.f32.mrf.mxu1 }
 0x8b7   : > { %20661 = vst [vmem:[#allocation220_spill] sm:$0xff] %v17024_v50  ;;  %v17028_v49 = vpop.f32.mrf.mxu2 }
 0x8b8   : > { %20662 = vst [vmem:[#allocation273_spill] sm:$0xff] %v17026_v53  ;;  %v17030_v38 = vpop.f32.mrf.mxu3 }
 0x8b9   : > { %20663 = vst [vmem:[#allocation257_spill] sm:$0xff] %v17028_v49 }
 0x8ba   : > { %20664 = vst [vmem:[#allocation276_spill] sm:$0xff] %v17030_v38 }
 0x8be   : > { %v17032_v12 = vpop.f32.mrf.mxu0  ;;  %v17034_v8 = vpop.f32.mrf.mxu1 }
 0x8bf   : > { %20665 = vst [vmem:[#allocation269_spill] sm:$0xff] %v17032_v12  ;;  %v17036_v57 = vpop.f32.mrf.mxu2 }
 0x8c0   : > { %20666 = vst [vmem:[#allocation281_spill] sm:$0xff] %v17034_v8  ;;  %v17038_v48 = vpop.f32.mrf.mxu3 }
 0x8c1   : > { %20667 = vst [vmem:[#allocation279_spill] sm:$0xff] %v17036_v57 }
 0x8c2   : > { %20668 = vst [vmem:[#allocation274_spill] sm:$0xff] %v17038_v48 }
 0x8c6   : > { %v17040_v61 = vpop.f32.mrf.mxu0  ;;  %v17042_v13 = vpop.f32.mrf.mxu1 }
 0x8c7   : > { %20669 = vst [vmem:[#allocation144_spill] sm:$0xff] %v17040_v61  ;;  %v17044_v35 = vpop.f32.mrf.mxu2  ;;  %v7019_v61 = vadd.f32 %v7018_v60, %v16836_v25  ;;  %v7003_v25 = vadd.f32 %v16927_v9, %v16794_v16 }
 0x8c8   : > { %20670 = vst [vmem:[#allocation284_spill] sm:$0xff] %v17042_v13  ;;  %v17046_v22 = vpop.f32.mrf.mxu3 }
 0x8c9   : > { %20671 = vst [vmem:[#allocation270_spill] sm:$0xff] %v17044_v35  ;;  %v7092_v16 = vadd.f32 %v16916_v11, %v7003_v25 }
 0x8ca   : > { %20672 = vst [vmem:[#allocation265_spill] sm:$0xff] %v17046_v22 }
 0x8ce   : > { %v17048_v7 = vpop.f32.mrf.mxu0  ;;  %v17050_v49 = vpop.f32.mrf.mxu1 }
 0x8cf   : > { %20673 = vst [vmem:[#allocation282_spill] sm:$0xff] %v17050_v49  ;;  %v17052_v38 = vpop.f32.mrf.mxu2 }
 0x8d0   : > { %20674 = vst [vmem:[#allocation275_spill] sm:$0xff] %v17052_v38  ;;  %v17054_v53 = vpop.f32.mrf.mxu3 }
 0x8d1   : > { %20675 = vst [vmem:[#allocation261_spill] sm:$0xff] %v17054_v53 }
 0x8d6   : > { %v17056_v8 = vpop.f32.mrf.mxu0  ;;  %v17058_v57 = vpop.f32.mrf.mxu1 }
 0x8d7   : > { %20676 = vst [vmem:[#allocation219_spill] sm:$0xff] %v17058_v57  ;;  %v17060_v48 = vpop.f32.mrf.mxu2 }
 0x8d8   : > { %20677 = vst [vmem:[#allocation271_spill] sm:$0xff] %v17060_v48  ;;  %v17062_v50 = vpop.f32.mrf.mxu3  ;;  %v7015_v48 = vadd.f32 %v16966_v52, %v16830_v14 }
 0x8d9   : > { %20678 = vst [vmem:[#allocation266_spill] sm:$0xff] %v17062_v50 }
 0x8de   : > { %v7475_v19 = vpop.f32.mrf.mxu0  ;;  %v17066_v22 = vpop.f32.mrf.mxu1 }
 0x8df   : > { %v17064_v35 = vpop.f32.mrf.mxu2 }
 0x8e0   : > { %20679 = vst [vmem:[#allocation129_spill] sm:$0xff] %v17064_v35  ;;  %v17068_v13 = vpop.f32.mrf.mxu3  ;;  %v7011_v35 = vadd.f32 %v16953_v20, %v16822_v33  ;;  %v6999_v33 = vadd.f32 %v16914_v45, %v16778_v31  ;;  %v7027_v31 = vadd.f32 %v16992_v44, %v16850_v56  ;;  %v20684_v44 = vld [vmem:[#allocation263_spill] sm:$0xff] }
 0x8e1   : > { %20680 = vst [vmem:[#allocation280_spill] sm:$0xff] %v17068_v13  ;;  %v7108_v13 = vadd.f32 %v16968_v2, %v7019_v61 }
 0x8e2   : > { %v7100_v14 = vadd.f32 %v16942_v6, %v7011_v35  ;;  %v7116_v56 = vadd.f32 %v16986_v51, %v7027_v31 }
 0x8e3   : > { %v7241_v52 = vadd.f32 %v16981_v62, %v7108_v13 }
 0x8e4   : > { %v7225_v35 = vadd.f32 %v16957_v43, %v7100_v14  ;;  %v7257_v62 = vadd.f32 %v16996_v21, %v7116_v56 }
 0x8e5   : > { %v7382_v13 = vadd.f32 %v16983_v39, %v7241_v52 }
 0x8e6   : > { %v7480_v12 = vpop.f32.mrf.mxu0  ;;  %v7595_v53 = vpop.f32.mrf.mxu1  ;;  %v7390_v61 = vadd.f32 %v20684_v44, %v7257_v62  ;;  %v20703_v62 = vld [vmem:[#allocation260_spill] sm:$0xff] }
 0x8e7   : > { %v17070_v49 = vpop.f32.mrf.mxu2 }
 0x8e8   : > { %20681 = vst [vmem:[#allocation285_spill] sm:$0xff] %v17070_v49  ;;  %v17072_v38 = vpop.f32.mrf.mxu3  ;;  %v7104_v49 = vadd.f32 %v16955_v59, %v7015_v48  ;;  %v6995_v48 = vadd.f32 %v16901_v24, %v16762_v42  ;;  %v7374_v59 = vadd.f32 %v16959_v37, %v7225_v35 }
 0x8e9   : > { %20682 = vst [vmem:[#allocation286_spill] sm:$0xff] %v17072_v38  ;;  %v7007_v38 = vadd.f32 %v16940_v26, %v16810_v34 }
 0x8ea   : > { %v7233_v34 = vadd.f32 %v16970_v32, %v7104_v49  ;;  %v7088_v49 = vadd.f32 %v16903_v4, %v6999_v33  ;;  %v7084_v11 = vadd.f32 %v16890_v29, %v6995_v48  ;;  %v7481_v32 = vadd.f32 %v7480_v12, %v7374_v59 }
 0x8eb   : > { %v7096_v36 = vadd.f32 %v16929_v28, %v7007_v38  ;;  %v6991_v38 = vadd.f32 %v16888_v1, %v16746_v27  ;;  %v7209_v28 = vadd.f32 %v16931_v47, %v7092_v16  ;;  %v20692_v16 = vld [vmem:[#allocation129_spill] sm:$0xff] }
 0x8ec   : > { %v7378_v42 = vadd.f32 %v16972_v10, %v7233_v34  ;;  %v7201_v1 = vadd.f32 %v16918_v63, %v7088_v49  ;;  %v7193_v47 = vadd.f32 %v16905_v54, %v7084_v11  ;;  %v7590_v12 = vadd.f32 %v17066_v22, %v7481_v32  ;;  %v20695_v49 = vld [vmem:[#allocation220_spill] sm:$0xff] }
 0x8ed   : > { %v7217_v45 = vadd.f32 %v16944_v17, %v7096_v36  ;;  %v7080_v27 = vadd.f32 %v16878_v58, %v6991_v38  ;;  %v7366_v37 = vadd.f32 %v16933_v55, %v7209_v28  ;;  %v20694_v38 = vld [vmem:[#allocation134_spill] sm:$0xff]  ;;  %v20701_v32 = vld [vmem:[#allocation280_spill] sm:$0xff] }
 0x8ee   : > { %v7485_v5 = vpop.f32.mrf.mxu0  ;;  %v7601_v60 = vpop.f32.mrf.mxu1  ;;  %v7362_v63 = vadd.f32 %v16920_v15, %v7201_v1  ;;  %v7358_v54 = vadd.f32 %v16907_v30, %v7193_v47  ;;  %v20687_v15 = vld [vmem:[#allocation144_spill] sm:$0xff]  ;;  %v20690_v30 = vld [vmem:[#allocation269_spill] sm:$0xff] }
 0x8ef   : > { %v7710_v50 = vpop.f32.mrf.mxu2  ;;  %v7486_v43 = vadd.f32 %v7485_v5, %v7378_v42  ;;  %v7370_v2 = vadd.f32 %v16946_v40, %v7217_v45  ;;  %v7185_v58 = vadd.f32 %v16892_v46, %v7080_v27  ;;  %v7471_v40 = vadd.f32 %v17056_v8, %v7366_v37  ;;  %v20686_v46 = vld [vmem:[#allocation201_spill] sm:$0xff]  ;;  %v20688_v8 = vld [vmem:[#allocation282_spill] sm:$0xff] }
 0x8f0   : > { %v17077_v57 = vpop.f32.mrf.mxu3  ;;  %v7466_v55 = vadd.f32 %v17048_v7, %v7362_v63  ;;  %v20689_v22 = vld [vmem:[#allocation285_spill] sm:$0xff]  ;;  %v20691_v7 = vld [vmem:[#allocation284_spill] sm:$0xff]  ;;  %v7451_v45 = vadd.f32 %v20695_v49, %v20694_v38  ;;  %v20698_v59 = vld [vmem:[#allocation286_spill] sm:$0xff] }
 0x8f1   : > { %20683 = vst [vmem:[#allocation287_spill] sm:$0xff] %v17077_v57  ;;  %v7112_v57 = vadd.f32 %v16979_v18, %v7023_v0  ;;  %v7476_v39 = vadd.f32 %v7475_v19, %v7370_v2  ;;  %v7596_v5 = vadd.f32 %v7595_v53, %v7486_v43  ;;  %v20685_v19 = vld [vmem:[#allocation219_spill] sm:$0xff]  ;;  %v7354_v25 = vadd.f32 %v20686_v46, %v7185_v58  ;;  %v20696_v42 = vld [vmem:[#allocation281_spill] sm:$0xff]  ;;  %v20705_v58 = vld [vmem:[#allocation270_spill] sm:$0xff] }
 0x8f2   : > { %v7578_v52 = vadd.f32 %v20688_v8, %v7471_v40  ;;  %v7707_v33 = vadd.f32 %v20689_v22, %v7590_v12  ;;  %v20699_v27 = vld [vmem:[#allocation273_spill] sm:$0xff] }
 0x8f3   : > { %v7249_v6 = vadd.f32 %v16988_v41, %v7112_v57  ;;  %v7584_v21 = vadd.f32 %v20685_v19, %v7476_v39  ;;  %v7711_v0 = vadd.f32 %v7710_v50, %v7596_v5  ;;  %v7456_v34 = vadd.f32 %v20690_v30, %v7354_v25  ;;  %v20704_v5 = vld [vmem:[#allocation167_spill] sm:$0xff] }
 0x8f5   : > { %v7386_v57 = vadd.f32 %v16990_v23, %v7249_v6  ;;  %v7703_v35 = vadd.f32 %v20692_v16, %v7584_v21  ;;  %v7560_v1 = vadd.f32 %v20699_v27, %v7456_v34  ;;  %v20710_v21 = vld [vmem:[#allocation261_spill] sm:$0xff]  ;;  %v20716_v16 = vld [vmem:[#allocation146_spill] sm:$0xff] }
 0x8f6   : > { %v7490_v20 = vpop.f32.mrf.mxu0  ;;  %v7607_v4 = vpop.f32.mrf.mxu1 }
 0x8f7   : > { %v7714_v26 = vpop.f32.mrf.mxu2  ;;  %v7491_v24 = vadd.f32 %v7490_v20, %v7382_v13 }
 0x8f8   : > { %v7799_v9 = vpop.f32.mrf.mxu3  ;;  %v20693_v50 = vld [vmem:[#allocation287_spill] sm:$0xff] }
 0x8f9   : > { %v7602_v10 = vadd.f32 %v7601_v60, %v7491_v24  ;;  %v7461_v60 = vadd.f32 %v20687_v15, %v7358_v54  ;;  %v7796_v13 = vadd.f32 %v20693_v50, %v7711_v0  ;;  %v20707_v54 = vld [vmem:[#allocation267_spill] sm:$0xff]  ;;  %v20717_v50 = vld [vmem:[#allocation274_spill] sm:$0xff] }
 0x8fb   : > { %v7715_v41 = vadd.f32 %v7714_v26, %v7602_v10  ;;  %v7572_v26 = vadd.f32 %v20691_v7, %v7466_v55  ;;  %v7566_v24 = vadd.f32 %v20696_v42, %v7461_v60  ;;  %v7788_v10 = vadd.f32 %v20701_v32, %v7703_v35  ;;  %v20708_v55 = vld [vmem:[#allocation147_spill] sm:$0xff]  ;;  %v20711_v60 = vld [vmem:[#allocation262_spill] sm:$0xff] }
 0x8fc   : > { %v7441_v44 = vadd.f32 %v20708_v55, %v20707_v54 }
 0x8fd   : > { %v7800_v20 = vadd.f32 %v7799_v9, %v7715_v41  ;;  %v20697_v9 = vld [vmem:[#allocation271_spill] sm:$0xff]  ;;  %v7691_v63 = vadd.f32 %v20705_v58, %v7566_v24  ;;  %v20718_v24 = vld [vmem:[#allocation258_spill] sm:$0xff] }
 0x8fe   : > { %v7495_v17 = vpop.f32.mrf.mxu0  ;;  %v7613_v48 = vpop.f32.mrf.mxu1  ;;  %v7699_v28 = vadd.f32 %v20697_v9, %v7578_v52  ;;  %v20713_v52 = vld [vmem:[#allocation148_spill] sm:$0xff]  ;;  %v7542_v35 = vadd.f32 %v20716_v16, %v7441_v44  ;;  %v20719_v9 = vld [vmem:[#allocation225_spill] sm:$0xff]  ;;  %v20723_v58 = vld [vmem:[#allocation99_spill] sm:$0xff] }
 0x8ff   : > { %v7496_v29 = vadd.f32 %v7495_v17, %v7386_v57  ;;  %v7718_v18 = vpop.f32.mrf.mxu2  ;;  %v7792_v57 = vadd.f32 %v20698_v59, %v7707_v33  ;;  %v17142_v56 = vand.u32 4294901760, %v7800_v20  ;;  %v20714_v33 = vld [vmem:[#allocation257_spill] sm:$0xff]  ;;  %v20720_v59 = vld [vmem:[#allocation276_spill] sm:$0xff] }
 0x900   : > { %v7803_v51 = vpop.f32.mrf.mxu3 }
 0x901   : > { %v7608_v3 = vadd.f32 %v7607_v4, %v7496_v29  ;;  %v20700_v4 = vld [vmem:[#allocation275_spill] sm:$0xff]  ;;  %v17147_v29 = vand.u32 4294901760, %v7796_v13  ;;  %v17157_v12 = vand.u32 4294901760, %v7792_v57  ;;  %v17160_v41 = vsub.f32 %v7800_v20, %v17142_v56 }
 0x902   : > { %v7695_v17 = vadd.f32 %v20700_v4, %v7572_v26 }
 0x903   : > { %v7719_v23 = vadd.f32 %v7718_v18, %v7608_v3  ;;  %v20702_v18 = vld [vmem:[#allocation277_spill] sm:$0xff]  ;;  %v7554_v3 = vadd.f32 %v20704_v5, %v7451_v45  ;;  %v17171_v46 = vsub.f32 %v7796_v13, %v17147_v29  ;;  %v17187_v7 = vsub.f32 %v7792_v57, %v17157_v12  ;;  %v20722_v5 = vld [vmem:[#allocation259_spill] sm:$0xff] }
 0x904   : > { %v7446_v39 = vadd.f32 %v20703_v62, %v20702_v18  ;;  %v7780_v0 = vadd.f32 %v20710_v21, %v7695_v17 }
 0x905   : > { %v7804_v53 = vadd.f32 %v7803_v51, %v7719_v23  ;;  %v20706_v51 = vld [vmem:[#allocation266_spill] sm:$0xff]  ;;  %v7683_v20 = vadd.f32 %v20714_v33, %v7554_v3  ;;  %v7871_v42 = vand.u32 4294901760, %v17171_v46  ;;  %v7877_v17 = vand.u32 4294901760, %v17187_v7 }
 0x906   : > { %v7500_v14 = vpop.f32.mrf.mxu0  ;;  %v7784_v40 = vadd.f32 %v20706_v51, %v7699_v28  ;;  %v7548_v22 = vadd.f32 %v20713_v52, %v7446_v39 }
 0x907   : > { %v7501_v36 = vadd.f32 %v7500_v14, %v7390_v61  ;;  %v17135_v6 = vand.u32 4294901760, %v7804_v53  ;;  %v7722_v11 = vpop.f32.mrf.mxu2  ;;  %v20709_v61 = vld [vmem:[#allocation279_spill] sm:$0xff]  ;;  %v20712_v14 = vld [vmem:[#allocation272_spill] sm:$0xff]  ;;  %v7768_v57 = vadd.f32 %v20720_v59, %v7683_v20  ;;  %v7872_v62 = vsub.f32 %v17171_v46, %v7871_v42 }
 0x908   : > { %v7807_v2 = vpop.f32.mrf.mxu3  ;;  %v7687_v19 = vadd.f32 %v20709_v61, %v7560_v1  ;;  %v7436_v8 = vadd.f32 %v20712_v14, %v20711_v60  ;;  %v17184_v34 = vand.u32 4294901760, %v7784_v40  ;;  %v7679_v28 = vadd.f32 %v20719_v9, %v7548_v22  ;;  %v20724_v61 = vld [vmem:[#allocation184_spill] sm:$0xff] }
 0x909   : > { %v7614_v31 = vadd.f32 %v7613_v48, %v7501_v36  ;;  %v17150_v47 = vsub.f32 %v7804_v53, %v17135_v6  ;;  %v17168_v53 = vand.u32 4294901760, %v7788_v10  ;;  %v20715_v36 = vld [vmem:[#allocation265_spill] sm:$0xff]  ;;  %v7865_v48 = vand.u32 4294901760, %v17160_v41 }
 0x90a   : > { %v7776_v30 = vadd.f32 %v20715_v36, %v7691_v63  ;;  %v7772_v13 = vadd.f32 %v20717_v50, %v7687_v19  ;;  %v17217_v27 = vsub.f32 %v7784_v40, %v17184_v34  ;;  %v7764_v63 = vadd.f32 %v20723_v58, %v7679_v28 }
 0x90b   : > { %v7723_v43 = vadd.f32 %v7722_v11, %v7614_v31  ;;  %v7859_v15 = vand.u32 4294901760, %v17150_v47  ;;  %v17195_v31 = vand.u32 4294901760, %v7780_v0  ;;  %v17199_v38 = vsub.f32 %v7788_v10, %v17168_v53 }
 0x90c   : > { %v7536_v11 = vadd.f32 %v20718_v24, %v7436_v8  ;;  %v7866_v4 = vsub.f32 %v17160_v41, %v7865_v48  ;;  %v17226_v10 = vand.u32 4294901760, %v7772_v13  ;;  %v17239_v51 = vand.u32 4294901760, %v7768_v57  ;;  %v20725_v8 = vld [vmem:[#allocation268_spill] sm:$0xff] }
 0x90d   : > { %v7808_v37 = vadd.f32 %v7807_v2, %v7723_v43  ;;  %v7860_v45 = vsub.f32 %v17150_v47, %v7859_v15  ;;  %v17213_v43 = vand.u32 4294901760, %v7776_v30  ;;  %v20721_v2 = vld [vmem:[#allocation264_spill] sm:$0xff]  ;;  %v7883_v39 = vand.u32 4294901760, %v17199_v38 }
 0x90e   : > { %v7675_v32 = vadd.f32 %v20721_v2, %v7542_v35  ;;  %v7671_v3 = vadd.f32 %v20722_v5, %v7536_v11  ;;  %v7867_v54 = vand.u32 4294901760, %v7866_v4  ;;  %v7878_v55 = vsub.f32 %v17187_v7, %v7877_v17  ;;  %v12239_v5 = vld [vmem:[%s19917_s0 + $0xb8] sm:$0xff] }
 0x90f   : > { %v17162_v23 = vand.u32 4294901760, %v7808_v37  ;;  %v7861_v18 = vand.u32 4294901760, %v7860_v45  ;;  %v17244_v40 = vsub.f32 %v7776_v30, %v17213_v43  ;;  %v7889_v44 = vand.u32 4294901760, %v17217_v27 }
 0x910   : > { %v7760_v19 = vadd.f32 %v20724_v61, %v7675_v32  ;;  %v17255_v21 = vsub.f32 %v7772_v13, %v17226_v10  ;;  %v7884_v60 = vsub.f32 %v17199_v38, %v7883_v39  ;;  %v7756_v52 = vadd.f32 %v20725_v8, %v7671_v3  ;;  %v12238_v61 = vld [vmem:[%s19917_s0 + $0xb0] sm:$0xff] }
 0x911   : > { %v17174_v25 = vsub.f32 %v7808_v37, %v17162_v23  ;;  %7813 = vmatpush.msra.mxu2 %v17162_v23  ;;  %7993 = vmatpush.msrb.mxu1 %v17162_v23  ;;  %v17230_v37 = vsub.f32 %v7780_v0, %v17195_v31  ;;  %v7873_v0 = vand.u32 4294901760, %v7872_v62  ;;  %v17263_v22 = vand.u32 4294901760, %v7764_v63 }
 0x912   : > { %v17268_v33 = vsub.f32 %v7768_v57, %v17239_v51  ;;  %v7879_v20 = vand.u32 4294901760, %v7878_v55  ;;  %v7890_v36 = vsub.f32 %v17217_v27, %v7889_v44  ;;  %v7901_v30 = vand.u32 4294901760, %v17244_v40 }
 0x913   : > { %v7853_v26 = vand.u32 4294901760, %v17174_v25  ;;  %7815 = vmatpush.msra.mxu2 %v17135_v6  ;;  %7944 = vmatpush.msrb.mxu0 %v17174_v25  ;;  %v7895_v14 = vand.u32 4294901760, %v17230_v37  ;;  %v17275_v16 = vand.u32 4294901760, %v7760_v19  ;;  %v7885_v35 = vand.u32 4294901760, %v7884_v60  ;;  %v20726_v60 = vld [vmem:[#allocation218_spill] sm:$0xff] }
 0x914   : > { %7995 = vmatpush.msrb.mxu1 %v17135_v6  ;;  %v7907_v13 = vand.u32 4294901760, %v17255_v21  ;;  %v17287_v45 = vsub.f32 %v7764_v63, %v17263_v22  ;;  %v7891_v24 = vand.u32 4294901760, %v7890_v36  ;;  %v7902_v11 = vsub.f32 %v17244_v40, %v7901_v30 }
 0x915   : > { %7817 = vmatpush.msra.mxu2 %v17142_v56  ;;  %7947 = vmatpush.msrb.mxu0 %v17150_v47  ;;  %v7854_v49 = vsub.f32 %v17174_v25, %v7853_v26  ;;  %v7896_v50 = vsub.f32 %v17230_v37, %v7895_v14  ;;  %v7913_v9 = vand.u32 4294901760, %v17268_v33  ;;  %v17297_v28 = vsub.f32 %v7760_v19, %v17275_v16  ;;  %v12235_v47 = vld [vmem:[%s19917_s0 + $0x98] sm:$0xff] }
 0x916   : > { %7997 = vmatpush.msrb.mxu1 %v17142_v56  ;;  %v7908_v57 = vsub.f32 %v17255_v21, %v7907_v13  ;;  %v7919_v4 = vand.u32 4294901760, %v17287_v45  ;;  %v7903_v2 = vand.u32 4294901760, %v7902_v11  ;;  %v17334_v55 = vand.u32 4294901760, %v12239_v5 }
 0x917   : > { %7819 = vmatpush.msra.mxu2 %v17147_v29  ;;  %7950 = vmatpush.msrb.mxu0 %v17160_v41  ;;  %v7855_v1 = vand.u32 4294901760, %v7854_v49  ;;  %v17284_v49 = vand.u32 4294901760, %v7756_v52  ;;  %v7897_v59 = vand.u32 4294901760, %v7896_v50  ;;  %v7914_v32 = vsub.f32 %v17268_v33, %v7913_v9  ;;  %v20729_v41 = vld [vmem:[#allocation278_spill] sm:$0xff] }
 0x918   : > { %7999 = vmatpush.msrb.mxu1 %v17147_v29  ;;  %v7909_v62 = vand.u32 4294901760, %v7908_v57  ;;  %v7920_v3 = vsub.f32 %v17287_v45, %v7919_v4  ;;  %v17355_v36 = vand.u32 4294901760, %v12238_v61  ;;  %v17389_v50 = vand.u32 4294901760, %v12235_v47  ;;  %v20733_v57 = vld [vmem:[#allocation75_spill] sm:$0xff] }
 0x919   : > { %7821 = vmatpush.msra.mxu2 %v17157_v12  ;;  %7856 = vmatpush.msra.mxu3 %v7855_v1  ;;  %v17306_v1 = vsub.f32 %v7756_v52, %v17284_v49  ;;  %v7915_v63 = vand.u32 4294901760, %v7914_v32  ;;  %v20727_v52 = vld [vmem:[#allocation283_spill] sm:$0xff] }
 0x91a   : > { %7953 = vmatpush.msrb.mxu0 %v17171_v46  ;;  %8001 = vmatpush.msrb.mxu1 %v17157_v12  ;;  %v7921_v19 = vand.u32 4294901760, %v7920_v3  ;;  %v20735_v32 = vld [vmem:[#allocation79_spill] sm:$0xff]  ;;  %v20737_v3 = vld [vmem:[#allocation68_spill] sm:$0xff] }
 0x91b   : > { %7823 = vmatpush.msra.mxu2 %v17168_v53  ;;  %7862 = vmatpush.msra.mxu3 %v7861_v18  ;;  %v7925_v18 = vand.u32 4294901760, %v17297_v28  ;;  %v7931_v58 = vand.u32 4294901760, %v17306_v1 }
 0x91c   : > { %7956 = vmatpush.msrb.mxu0 %v17187_v7  ;;  %8003 = vmatpush.msrb.mxu1 %v17168_v53  ;;  %v17413_v7 = vsub.f32 %v12235_v47, %v17389_v50  ;;  %v20746_v47 = vld [vmem:[#allocation17_spill] sm:$0xff] }
 0x91d   : > { %7825 = vmatpush.msra.mxu2 %v17184_v34  ;;  %7868 = vmatpush.msra.mxu3 %v7867_v54  ;;  %v7926_v54 = vsub.f32 %v17297_v28, %v7925_v18 }
 0x91e   : > { %7959 = vmatpush.msrb.mxu0 %v17199_v38  ;;  %8005 = vmatpush.msrb.mxu1 %v17184_v34 }
 0x91f   : > { %7827 = vmatpush.msra.mxu2 %v17195_v31  ;;  %7874 = vmatpush.msra.mxu3 %v7873_v0  ;;  %v7932_v0 = vsub.f32 %v17306_v1, %v7931_v58  ;;  %v7927_v8 = vand.u32 4294901760, %v7926_v54  ;;  %v20739_v54 = vld [vmem:[#allocation71_spill] sm:$0xff] }
 0x920   : > { %7962 = vmatpush.msrb.mxu0 %v17217_v27  ;;  %8007 = vmatpush.msrb.mxu1 %v17195_v31 }
 0x921   : > { %7829 = vmatpush.msra.mxu2 %v17213_v43  ;;  %7880 = vmatpush.msra.mxu3 %v7879_v20  ;;  %v17353_v20 = vsub.f32 %v12239_v5, %v17334_v55  ;;  %v7933_v25 = vand.u32 4294901760, %v7932_v0  ;;  %v20736_v5 = vld [vmem:[#allocation83_spill] sm:$0xff]  ;;  %v20741_v0 = vld [vmem:[#allocation74_spill] sm:$0xff] }
 0x922   : > { %7965 = vmatpush.msrb.mxu0 %v17230_v37  ;;  %8009 = vmatpush.msrb.mxu1 %v17213_v43 }
 0x923   : > { %7831 = vmatpush.msra.mxu2 %v17226_v10  ;;  %7886 = vmatpush.msra.mxu3 %v7885_v35 }
 0x924   : > { %7968 = vmatpush.msrb.mxu0 %v17244_v40  ;;  %8011 = vmatpush.msrb.mxu1 %v17226_v10 }
 0x925   : > { %7833 = vmatpush.msra.mxu2 %v17239_v51  ;;  %7892 = vmatpush.msra.mxu3 %v7891_v24  ;;  %v20731_v24 = vld [vmem:[#allocation66_spill] sm:$0xff] }
 0x926   : > { %7971 = vmatpush.msrb.mxu0 %v17255_v21  ;;  %8013 = vmatpush.msrb.mxu1 %v17239_v51  ;;  %v8307_v21 = vand.u32 4294901760, %v17413_v7 }
 0x927   : > { %7835 = vmatpush.msra.mxu2 %v17263_v22  ;;  %7898 = vmatpush.msra.mxu3 %v7897_v59 }
 0x928   : > { %7974 = vmatpush.msrb.mxu0 %v17268_v33  ;;  %8015 = vmatpush.msrb.mxu1 %v17263_v22 }
 0x929   : > { %7837 = vmatpush.msra.mxu2 %v17275_v16  ;;  %7904 = vmatpush.msra.mxu3 %v7903_v2  ;;  %v20734_v2 = vld [vmem:[#allocation14_spill] sm:$0xff] }
 0x92a   : > { %7977 = vmatpush.msrb.mxu0 %v17287_v45  ;;  %8017 = vmatpush.msrb.mxu1 %v17275_v16 }
 0x92b   : > { %7839 = vmatpush.msra.mxu2 %v17284_v49  ;;  %7910 = vmatpush.msra.mxu3 %v7909_v62 }
 0x92c   : > { %7980 = vmatpush.msrb.mxu0 %v17297_v28  ;;  %8019 = vmatpush.msrb.mxu1 %v17284_v49 }
 0x92d   : > { %7916 = vmatpush.msra.mxu3 %v7915_v63  ;;  %7845 = vmatmul.f32.vlgmr.msra.gmra.mxu2 %v20726_v60  ;;  %v20738_v63 = vld [vmem:[#allocation15_spill] sm:$0xff]  ;;  %v20876_v60 = vld [vmem:[#allocation158_spill] sm:$0xff] }
 0x92e   : > { %8093 = vmatpush.msra.mxu1 %v17162_v23  ;;  %7983 = vmatpush.msrb.mxu0 %v17306_v1  ;;  %v12237_v23 = vld [vmem:[%s19917_s0 + $0xa8] sm:$0xff] }
 0x92f   : > { %7922 = vmatpush.msra.mxu3 %v7921_v19  ;;  %7986 = vmatmul.f32.vlgmr.msrb.gmra.mxu0 %v20727_v52  ;;  %v20740_v19 = vld [vmem:[#allocation90_spill] sm:$0xff]  ;;  %v20873_v52 = vld [vmem:[#allocation155_spill] sm:$0xff] }
 0x930   : > { %8032 = vmatpush.msra.mxu0 %v7853_v26  ;;  %8095 = vmatpush.msra.mxu1 %v17135_v6  ;;  %v12236_v6 = vld [vmem:[%s19917_s0 + $0xa0] sm:$0xff]  ;;  %v17364_v26 = vand.u32 4294901760, %v12237_v23 }
 0x931   : > { %7928 = vmatpush.msra.mxu3 %v7927_v8  ;;  %8396 = vmatpush.msrb.mxu2 %v17353_v20  ;;  %v17376_v35 = vand.u32 4294901760, %v12236_v6  ;;  %v20743_v8 = vld [vmem:[#allocation93_spill] sm:$0xff] }
 0x932   : > { %8036 = vmatpush.msra.mxu0 %v7859_v15  ;;  %8097 = vmatpush.msra.mxu1 %v17142_v56  ;;  %v20728_v56 = vld [vmem:[#allocation145_spill] sm:$0xff]  ;;  %v17374_v15 = vsub.f32 %v12238_v61, %v17355_v36 }
 0x933   : > { %7934 = vmatpush.msra.mxu3 %v7933_v25  ;;  %8023 = vmatmul.f32.vlgmr.msrb.gmra.mxu1 %v20728_v56  ;;  %v17400_v46 = vsub.f32 %v12236_v6, %v17376_v35  ;;  %v20744_v6 = vld [vmem:[#allocation10_spill] sm:$0xff] }
 0x934   : > { %8040 = vmatpush.msra.mxu0 %v7865_v48  ;;  %8099 = vmatpush.msra.mxu1 %v17147_v29  ;;  %v12234_v29 = vld [vmem:[%s19917_s0 + $0x90] sm:$0xff]  ;;  %v17387_v48 = vsub.f32 %v12237_v23, %v17364_v26  ;;  %v8289_v27 = vand.u32 4294901760, %v17374_v15 }
 0x935   : > { %7936 = vmatmul.f32.vlgmr.msra.gmra.mxu3 %v20729_v41  ;;  %8399 = vmatpush.msrb.mxu2 %v17374_v15  ;;  %v8301_v40 = vand.u32 4294901760, %v17400_v46  ;;  %v20742_v23 = vld [vmem:[#allocation18_spill] sm:$0xff] }
 0x936   : > { %8044 = vmatpush.msra.mxu0 %v7871_v42  ;;  %8101 = vmatpush.msra.mxu1 %v17157_v12  ;;  %v12233_v12 = vld [vmem:[%s19917_s0 + $0x88] sm:$0xff]  ;;  %v17402_v42 = vand.u32 4294901760, %v12234_v29  ;;  %v20745_v25 = vld [vmem:[#allocation94_spill] sm:$0xff] }
 0x937   : > { %8498 = vmatpush.msrb.mxu3 %v17334_v55  ;;  %8402 = vmatpush.msrb.mxu2 %v17387_v48 }
 0x938   : > { %8048 = vmatpush.msra.mxu0 %v7877_v17  ;;  %8103 = vmatpush.msra.mxu1 %v17168_v53  ;;  %v12232_v53 = vld [vmem:[%s19917_s0 + $0x80] sm:$0xff]  ;;  %v17415_v17 = vand.u32 4294901760, %v12233_v12  ;;  %v17424_v38 = vsub.f32 %v12234_v29, %v17402_v42 }
 0x939   : > { %8500 = vmatpush.msrb.mxu3 %v17355_v36  ;;  %8405 = vmatpush.msrb.mxu2 %v17400_v46  ;;  %v20747_v29 = vld [vmem:[#allocation20_spill] sm:$0xff] }
 0x93a   : > { %8052 = vmatpush.msra.mxu0 %v7883_v39  ;;  %8105 = vmatpush.msra.mxu1 %v17184_v34  ;;  %v8283_v34 = vand.u32 4294901760, %v17353_v20  ;;  %v17426_v39 = vand.u32 4294901760, %v12232_v53 }
 0x93b   : > { %8502 = vmatpush.msrb.mxu3 %v17364_v26  ;;  %8408 = vmatpush.msrb.mxu2 %v17413_v7 }
 0x93c   : > { %8056 = vmatpush.msra.mxu0 %v7889_v44  ;;  %8107 = vmatpush.msra.mxu1 %v17195_v31  ;;  %v17435_v31 = vsub.f32 %v12233_v12, %v17415_v17  ;;  %v8284_v37 = vsub.f32 %v17353_v20, %v8283_v34  ;;  %v17447_v44 = vsub.f32 %v12232_v53, %v17426_v39  ;;  %v20748_v12 = vld [vmem:[#allocation96_spill] sm:$0xff]  ;;  %v20749_v53 = vld [vmem:[#allocation78_spill] sm:$0xff] }
 0x93d   : > { %8504 = vmatpush.msrb.mxu3 %v17376_v35  ;;  %8411 = vmatpush.msrb.mxu2 %v17424_v38  ;;  %v20752_v20 = vld [vmem:[#allocation12_spill] sm:$0xff] }
 0x93e   : > { %8060 = vmatpush.msra.mxu0 %v7895_v14  ;;  %8109 = vmatpush.msra.mxu1 %v17213_v43  ;;  %v8295_v43 = vand.u32 4294901760, %v17387_v48  ;;  %v8285_v14 = vand.u32 4294901760, %v8284_v37  ;;  %v8319_v11 = vand.u32 4294901760, %v17435_v31  ;;  %v8325_v59 = vand.u32 4294901760, %v17447_v44  ;;  %v20750_v37 = vld [vmem:[#allocation22_spill] sm:$0xff] }
 0x93f   : > { %8506 = vmatpush.msrb.mxu3 %v17389_v50  ;;  %8414 = vmatpush.msrb.mxu2 %v17435_v31 }
 0x940   : > { %8064 = vmatpush.msra.mxu0 %v7901_v30  ;;  %8111 = vmatpush.msra.mxu1 %v17226_v10  ;;  %v8290_v10 = vsub.f32 %v17374_v15, %v8289_v27  ;;  %v20730_v30 = vld [vmem:[#allocation11_spill] sm:$0xff]  ;;  %v8326_v62 = vsub.f32 %v17447_v44, %v8325_v59 }
 0x941   : > { %8508 = vmatpush.msrb.mxu3 %v17402_v42  ;;  %8417 = vmatpush.msrb.mxu2 %v17447_v44  ;;  %v20754_v15 = vld [vmem:[#allocation19_spill] sm:$0xff] }
 0x942   : > { %8068 = vmatpush.msra.mxu0 %v7907_v13  ;;  %8113 = vmatpush.msra.mxu1 %v17239_v51  ;;  %v8296_v51 = vsub.f32 %v17387_v48, %v8295_v43  ;;  %v8291_v33 = vand.u32 4294901760, %v8290_v10  ;;  %v8313_v13 = vand.u32 4294901760, %v17424_v38  ;;  %v8327_v61 = vand.u32 4294901760, %v8326_v62  ;;  %v20756_v48 = vld [vmem:[#allocation85_spill] sm:$0xff]  ;;  %v20769_v44 = vld [vmem:[#allocation27_spill] sm:$0xff]  ;;  %v20770_v10 = vld [vmem:[#allocation32_spill] sm:$0xff] }
 0x943   : > { %8510 = vmatpush.msrb.mxu3 %v17415_v17  ;;  %8420 = vmatmul.f32.vlgmr.msrb.gmra.mxu2 %v20730_v30  ;;  %v20775_v30 = vld [vmem:[#allocation88_spill] sm:$0xff] }
 0x944   : > { %8072 = vmatpush.msra.mxu0 %v7913_v9  ;;  %8115 = vmatpush.msra.mxu1 %v17263_v22  ;;  %v8302_v22 = vsub.f32 %v17400_v46, %v8301_v40  ;;  %v8297_v45 = vand.u32 4294901760, %v8296_v51  ;;  %v20732_v9 = vld [vmem:[#allocation13_spill] sm:$0xff]  ;;  %v20773_v51 = vld [vmem:[#allocation84_spill] sm:$0xff] }
 0x945   : > { %8512 = vmatpush.msrb.mxu3 %v17426_v39  ;;  %8827 = vmatpush.msra.mxu2 %v20731_v24  ;;  %v20759_v46 = vld [vmem:[#allocation89_spill] sm:$0xff]  ;;  %v20793_v62 = vld [vmem:[#allocation44_spill] sm:$0xff] }
 0x946   : > { %8076 = vmatpush.msra.mxu0 %v7919_v4  ;;  %8117 = vmatpush.msra.mxu1 %v17275_v16  ;;  %v8308_v16 = vsub.f32 %v17413_v7, %v8307_v21  ;;  %v8303_v28 = vand.u32 4294901760, %v8302_v22  ;;  %v8320_v4 = vsub.f32 %v17435_v31, %v8319_v11  ;;  %v20761_v7 = vld [vmem:[#allocation28_spill] sm:$0xff]  ;;  %v20767_v31 = vld [vmem:[#allocation21_spill] sm:$0xff] }
 0x947   : > { %8516 = vmatmul.f32.vlgmr.msrb.gmra.mxu3 %v20732_v9  ;;  %8829 = vmatpush.msra.mxu2 %v20737_v3  ;;  %v20777_v22 = vld [vmem:[#allocation76_spill] sm:$0xff]  ;;  %v20783_v9 = vld [vmem:[#allocation38_spill] sm:$0xff] }
 0x948   : > { %8080 = vmatpush.msra.mxu0 %v7925_v18  ;;  %8119 = vmatpush.msra.mxu1 %v17284_v49  ;;  %v8314_v49 = vsub.f32 %v17424_v38, %v8313_v13  ;;  %v8309_v1 = vand.u32 4294901760, %v8308_v16  ;;  %v20764_v38 = vld [vmem:[#allocation70_spill] sm:$0xff]  ;;  %v20781_v16 = vld [vmem:[#allocation81_spill] sm:$0xff] }
 0x949   : > { %8121 = vmatmul.f32.vlgmr.msra.gmra.mxu1 %v20729_v41  ;;  %8968 = vmatpush.msra.mxu3 %v20733_v57  ;;  %v20787_v57 = vld [vmem:[#allocation35_spill] sm:$0xff] }
 0x94a   : > { %8286 = vmatpush.msrb.mxu1 %v8285_v14  ;;  %8084 = vmatpush.msra.mxu0 %v7931_v58  ;;  %v8315_v18 = vand.u32 4294901760, %v8314_v49  ;;  %v8321_v58 = vand.u32 4294901760, %v8320_v4  ;;  %v20772_v14 = vld [vmem:[#allocation72_spill] sm:$0xff]  ;;  %v20785_v49 = vld [vmem:[#allocation29_spill] sm:$0xff]  ;;  %v20789_v4 = vld [vmem:[#allocation95_spill] sm:$0xff] }
 0x94b   : > { %8086 = vmatmul.f32.vlgmr.msra.gmra.mxu0 %v20729_v41  ;;  %8425 = vmatmul.f32.gmra.mxu2 %v20734_v2  ;;  %v20790_v2 = vld [vmem:[#allocation42_spill] sm:$0xff]  ;;  %v20875_v41 = vld [vmem:[#allocation173_spill] sm:$0xff] }
 0x94c   : > { %8145 = vmatpush.msrb.mxu0 %v17334_v55  ;;  %8292 = vmatpush.msrb.mxu1 %v8291_v33  ;;  %v20776_v33 = vld [vmem:[#allocation25_spill] sm:$0xff] }
 0x94d   : > { %8974 = vmatpush.msra.mxu3 %v20735_v32  ;;  %8831 = vmatpush.msra.mxu2 %v20739_v54  ;;  %v20791_v32 = vld [vmem:[#allocation33_spill] sm:$0xff] }
 0x94e   : > { %8147 = vmatpush.msrb.mxu0 %v17355_v36  ;;  %8298 = vmatpush.msrb.mxu1 %v8297_v45  ;;  %v20780_v45 = vld [vmem:[#allocation36_spill] sm:$0xff] }
 0x94f   : > { %8980 = vmatpush.msra.mxu3 %v20736_v5  ;;  %8833 = vmatpush.msra.mxu2 %v20741_v0  ;;  %v20794_v5 = vld [vmem:[#allocation46_spill] sm:$0xff] }
 0x950   : > { %8149 = vmatpush.msrb.mxu0 %v17364_v26  ;;  %8304 = vmatpush.msrb.mxu1 %v8303_v28  ;;  %v20784_v28 = vld [vmem:[#allocation87_spill] sm:$0xff] }
 0x951   : > { %8522 = vmatmul.f32.gmra.mxu3 %v20738_v63  ;;  %8835 = vmatpush.msra.mxu2 %v20749_v53  ;;  %v20797_v63 = vld [vmem:[#allocation48_spill] sm:$0xff] }
 0x952   : > { %8151 = vmatpush.msrb.mxu0 %v17376_v35  ;;  %8310 = vmatpush.msrb.mxu1 %v8309_v1  ;;  %v20788_v1 = vld [vmem:[#allocation40_spill] sm:$0xff] }
 0x953   : > { %8986 = vmatpush.msra.mxu3 %v20740_v19  ;;  %8430 = vmatmul.f32.gmra.mxu2 %v20742_v23  ;;  %v20800_v19 = vld [vmem:[#allocation47_spill] sm:$0xff]  ;;  %v20802_v23 = vld [vmem:[#allocation54_spill] sm:$0xff] }
 0x954   : > { %8153 = vmatpush.msrb.mxu0 %v17389_v50  ;;  %8316 = vmatpush.msrb.mxu1 %v8315_v18  ;;  %v20792_v18 = vld [vmem:[#allocation39_spill] sm:$0xff] }
 0x955   : > { %8992 = vmatpush.msra.mxu3 %v20743_v8  ;;  %v20803_v8 = vld [vmem:[#allocation45_spill] sm:$0xff] }
 0x956   : > { %8155 = vmatpush.msrb.mxu0 %v17402_v42  ;;  %8322 = vmatpush.msrb.mxu1 %v8321_v58  ;;  %v20796_v58 = vld [vmem:[#allocation43_spill] sm:$0xff] }
 0x957   : > { %8998 = vmatpush.msra.mxu3 %v20745_v25  ;;  %v20804_v25 = vld [vmem:[#allocation51_spill] sm:$0xff] }
 0x958   : > { %8157 = vmatpush.msrb.mxu0 %v17415_v17  ;;  %8328 = vmatpush.msrb.mxu1 %v8327_v61  ;;  %v20799_v61 = vld [vmem:[#allocation41_spill] sm:$0xff] }
 0x959   : > { %8330 = vmatmul.f32.vlgmr.msrb.gmra.mxu1 %v20744_v6  ;;  %8528 = vmatmul.f32.gmra.mxu3 %v20747_v29  ;;  %v20806_v29 = vld [vmem:[#allocation58_spill] sm:$0xff] }
 0x95a   : > { %8159 = vmatpush.msrb.mxu0 %v17426_v39  ;;  %8704 = vmatpush.msra.mxu1 %v17334_v55  ;;  %v20751_v55 = vld [vmem:[#allocation97_spill] sm:$0xff] }
 0x95b   : > { %8165 = vmatmul.f32.vlgmr.msrb.gmra.mxu0 %v20746_v47  ;;  %9004 = vmatpush.msra.mxu3 %v20748_v12  ;;  %v20805_v47 = vld [vmem:[#allocation56_spill] sm:$0xff]  ;;  %v20807_v12 = vld [vmem:[#allocation49_spill] sm:$0xff] }
 0x95c   : > { %8609 = vmatpush.msra.mxu0 %v8283_v34  ;;  %8706 = vmatpush.msra.mxu1 %v17355_v36  ;;  %v20753_v36 = vld [vmem:[#allocation80_spill] sm:$0xff]  ;;  %v20763_v34 = vld [vmem:[#allocation69_spill] sm:$0xff] }
 0x95d   : > { %8435 = vmatmul.f32.gmra.mxu2 %v20750_v37  ;;  %9010 = vmatpush.msra.mxu3 %v20751_v55  ;;  %v20809_v37 = vld [vmem:[#allocation60_spill] sm:$0xff]  ;;  %v20810_v55 = vld [vmem:[#allocation62_spill] sm:$0xff] }
 0x95e   : > { %8613 = vmatpush.msra.mxu0 %v8289_v27  ;;  %8708 = vmatpush.msra.mxu1 %v17364_v26  ;;  %v20755_v26 = vld [vmem:[#allocation24_spill] sm:$0xff]  ;;  %v20766_v27 = vld [vmem:[#allocation73_spill] sm:$0xff] }
 0x95f   : > { %8837 = vmatpush.msra.mxu2 %v20753_v36  ;;  %9386 = vmatpush.msrb.mxu3 %v20731_v24 }
 0x960   : > { %8617 = vmatpush.msra.mxu0 %v8295_v43  ;;  %8710 = vmatpush.msra.mxu1 %v17376_v35  ;;  %v20757_v35 = vld [vmem:[#allocation26_spill] sm:$0xff]  ;;  %v20768_v43 = vld [vmem:[#allocation77_spill] sm:$0xff] }
 0x961   : > { %8334 = vmatmul.f32.gmra.mxu1 %v20752_v20  ;;  %8534 = vmatmul.f32.gmra.mxu3 %v20755_v26  ;;  %v20813_v26 = vld [vmem:[#allocation64_spill] sm:$0xff] }
 0x962   : > { %8621 = vmatpush.msra.mxu0 %v8301_v40  ;;  %8712 = vmatpush.msra.mxu1 %v17389_v50  ;;  %v20758_v50 = vld [vmem:[#allocation16_spill] sm:$0xff]  ;;  %v20771_v40 = vld [vmem:[#allocation82_spill] sm:$0xff] }
 0x963   : > { %8173 = vmatmul.f32.gmra.mxu0 %v20754_v15  ;;  %8839 = vmatpush.msra.mxu2 %v20756_v48  ;;  %v20812_v15 = vld [vmem:[#allocation59_spill] sm:$0xff] }
 0x964   : > { %8625 = vmatpush.msra.mxu0 %v8307_v21  ;;  %8714 = vmatpush.msra.mxu1 %v17402_v42  ;;  %v20760_v42 = vld [vmem:[#allocation23_spill] sm:$0xff]  ;;  %v20774_v21 = vld [vmem:[#allocation34_spill] sm:$0xff] }
 0x965   : > { %8440 = vmatmul.f32.gmra.mxu2 %v20757_v35  ;;  %9388 = vmatpush.msrb.mxu3 %v20737_v3  ;;  %v20815_v35 = vld [vmem:[#allocation63_spill] sm:$0xff] }
 0x966   : > { %8629 = vmatpush.msra.mxu0 %v8313_v13  ;;  %8716 = vmatpush.msra.mxu1 %v17415_v17  ;;  %v20762_v17 = vld [vmem:[#allocation67_spill] sm:$0xff]  ;;  %v20778_v13 = vld [vmem:[#allocation92_spill] sm:$0xff] }
 0x967   : > { %8841 = vmatpush.msra.mxu2 %v20759_v46  ;;  %9390 = vmatpush.msrb.mxu3 %v20739_v54 }
 0x968   : > { %8633 = vmatpush.msra.mxu0 %v8319_v11  ;;  %8718 = vmatpush.msra.mxu1 %v17426_v39  ;;  %v20765_v39 = vld [vmem:[#allocation30_spill] sm:$0xff] }
 0x969   : > { %8338 = vmatmul.f32.gmra.mxu1 %v20758_v50  ;;  %8540 = vmatmul.f32.gmra.mxu3 %v20761_v7  ;;  %v20782_v11 = vld [vmem:[#allocation86_spill] sm:$0xff] }
 0x96a   : > { %8637 = vmatpush.msra.mxu0 %v8325_v59  ;;  %9180 = vmatpush.msrb.mxu1 %v20731_v24  ;;  %v20779_v24 = vld [vmem:[#allocation31_spill] sm:$0xff] }
 0x96b   : > { %8181 = vmatmul.f32.gmra.mxu0 %v20760_v42  ;;  %9291 = vmatpush.msrb.mxu2 %v20763_v34  ;;  %v20786_v59 = vld [vmem:[#allocation91_spill] sm:$0xff] }
 0x96c   : > { %9078 = vmatpush.msrb.mxu0 %v20762_v17  ;;  %9182 = vmatpush.msrb.mxu1 %v20737_v3  ;;  %v20795_v3 = vld [vmem:[#allocation37_spill] sm:$0xff] }
 0x96d   : > { %8445 = vmatmul.f32.gmra.mxu2 %v20765_v39  ;;  %9392 = vmatpush.msrb.mxu3 %v20741_v0  ;;  %v20817_v39 = vld [vmem:[#allocation65_spill] sm:$0xff] }
 0x96e   : > { %9081 = vmatpush.msrb.mxu0 %v20764_v38  ;;  %9184 = vmatpush.msrb.mxu1 %v20739_v54  ;;  %v20798_v54 = vld [vmem:[#allocation50_spill] sm:$0xff]  ;;  %v20816_v38 = vld [vmem:[#allocation61_spill] sm:$0xff] }
 0x96f   : > { %9394 = vmatpush.msrb.mxu3 %v20749_v53  ;;  %9295 = vmatpush.msrb.mxu2 %v20772_v14 }
 0x970   : > { %9084 = vmatpush.msrb.mxu0 %v20766_v27  ;;  %9186 = vmatpush.msrb.mxu1 %v20741_v0  ;;  %v20801_v0 = vld [vmem:[#allocation52_spill] sm:$0xff] }
 0x971   : > { %8342 = vmatmul.f32.gmra.mxu1 %v20767_v31  ;;  %8546 = vmatmul.f32.gmra.mxu3 %v20770_v10 }
 0x972   : > { %9087 = vmatpush.msrb.mxu0 %v20768_v43  ;;  %9188 = vmatpush.msrb.mxu1 %v20749_v53  ;;  %v20808_v53 = vld [vmem:[#allocation55_spill] sm:$0xff] }
 0x973   : > { %8189 = vmatmul.f32.gmra.mxu0 %v20769_v44  ;;  %9396 = vmatpush.msrb.mxu3 %v20753_v36 }
 0x974   : > { %9090 = vmatpush.msrb.mxu0 %v20771_v40  ;;  %9190 = vmatpush.msrb.mxu1 %v20753_v36  ;;  %v20811_v36 = vld [vmem:[#allocation53_spill] sm:$0xff]  ;;  %v20818_v40 = vld [vmem:[#allocation119_spill] sm:$0xff] }
 0x975   : > { %8450 = vmatmul.f32.gmra.mxu2 %v20774_v21  ;;  %9398 = vmatpush.msrb.mxu3 %v20756_v48  ;;  %v20820_v21 = vld [vmem:[#allocation123_spill] sm:$0xff] }
 0x976   : > { %9093 = vmatpush.msrb.mxu0 %v20773_v51  ;;  %9192 = vmatpush.msrb.mxu1 %v20756_v48  ;;  %v20814_v48 = vld [vmem:[#allocation57_spill] sm:$0xff]  ;;  %v20819_v51 = vld [vmem:[#allocation108_spill] sm:$0xff] }
 0x977   : > { %9299 = vmatpush.msrb.mxu2 %v20777_v22  ;;  %9400 = vmatpush.msrb.mxu3 %v20759_v46  ;;  %v20821_v22 = vld [vmem:[#allocation109_spill] sm:$0xff] }
 0x978   : > { %9096 = vmatpush.msrb.mxu0 %v20775_v30  ;;  %9194 = vmatpush.msrb.mxu1 %v20759_v46 }
 0x979   : > { %8346 = vmatmul.f32.gmra.mxu1 %v20776_v33  ;;  %8552 = vmatmul.f32.gmra.mxu3 %v20780_v45  ;;  %v20824_v45 = vld [vmem:[#allocation135_spill] sm:$0xff] }
 0x97a   : > { %9099 = vmatpush.msrb.mxu0 %v20778_v13  ;;  %9303 = vmatpush.msrb.mxu2 %v20781_v16  ;;  %v20822_v13 = vld [vmem:[#allocation126_spill] sm:$0xff]  ;;  %v20825_v16 = vld [vmem:[#allocation116_spill] sm:$0xff] }
 0x97b   : > { %8197 = vmatmul.f32.gmra.mxu0 %v20779_v24  ;;  %v20823_v24 = vld [vmem:[#allocation112_spill] sm:$0xff] }
 0x97c   : > { %9307 = vmatpush.msrb.mxu2 %v20782_v11  ;;  %v20827_v11 = vld [vmem:[#allocation121_spill] sm:$0xff] }
 0x97d   : > { %8455 = vmatmul.f32.gmra.mxu2 %v20783_v9  ;;  %v20828_v9 = vld [vmem:[#allocation140_spill] sm:$0xff] }
 0x97e   : > { %9311 = vmatpush.msrb.mxu2 %v20784_v28 }
 0x980   : > { %9315 = vmatpush.msrb.mxu2 %v20786_v59  ;;  %v20829_v59 = vld [vmem:[#allocation125_spill] sm:$0xff] }
 0x981   : > { %8350 = vmatmul.f32.gmra.mxu1 %v20785_v49  ;;  %8558 = vmatmul.f32.gmra.mxu3 %v20788_v1 }
 0x982   : > { %9319 = vmatpush.msrb.mxu2 %v20789_v4  ;;  %v20831_v4 = vld [vmem:[#allocation128_spill] sm:$0xff] }
 0x983   : > { %8205 = vmatmul.f32.gmra.mxu0 %v20787_v57  ;;  %v20830_v57 = vld [vmem:[#allocation142_spill] sm:$0xff] }
 0x985   : > { %8460 = vmatmul.f32.gmra.mxu2 %v20790_v2  ;;  %v20832_v2 = vld [vmem:[#allocation143_spill] sm:$0xff] }
 0x989   : > { %8354 = vmatmul.f32.gmra.mxu1 %v20791_v32  ;;  %8564 = vmatmul.f32.gmra.mxu3 %v20793_v62 }
 0x98b   : > { %8213 = vmatmul.f32.gmra.mxu0 %v20792_v18  ;;  %v20833_v18 = vld [vmem:[#allocation132_spill] sm:$0xff] }
 0x98d   : > { %8465 = vmatmul.f32.gmra.mxu2 %v20794_v5 }
 0x991   : > { %8358 = vmatmul.f32.gmra.mxu1 %v20795_v3  ;;  %8570 = vmatmul.f32.gmra.mxu3 %v20797_v63 }
 0x993   : > { %8221 = vmatmul.f32.gmra.mxu0 %v20796_v58 }
 0x995   : > { %8470 = vmatmul.f32.gmra.mxu2 %v20798_v54 }
 0x999   : > { %8362 = vmatmul.f32.gmra.mxu1 %v20799_v61  ;;  %8576 = vmatmul.f32.gmra.mxu3 %v20801_v0 }
 0x99b   : > { %8229 = vmatmul.f32.gmra.mxu0 %v20800_v19 }
 0x99d   : > { %8475 = vmatmul.f32.gmra.mxu2 %v20802_v23 }
 0x9a1   : > { %8366 = vmatmul.f32.gmra.mxu1 %v20803_v8  ;;  %8582 = vmatmul.f32.gmra.mxu3 %v20805_v47 }
 0x9a3   : > { %8237 = vmatmul.f32.gmra.mxu0 %v20804_v25 }
 0x9a5   : > { %8480 = vmatmul.f32.gmra.mxu2 %v20806_v29 }
 0x9a9   : > { %8370 = vmatmul.f32.gmra.mxu1 %v20807_v12  ;;  %8588 = vmatmul.f32.gmra.mxu3 %v20809_v37 }
 0x9ab   : > { %8245 = vmatmul.f32.gmra.mxu0 %v20808_v53 }
 0x9ac   : > { %v7987_v17 = vpop.f32.mrf.mxu0 }
 0x9ad   : > { %8485 = vmatmul.f32.gmra.mxu2 %v20810_v55 }
 0x9b0   : > { %v7846_v46 = vpop.f32.mrf.mxu2  ;;  %v8024_v34 = vpop.f32.mrf.mxu1 }
 0x9b1   : > { %8374 = vmatmul.f32.gmra.mxu1 %v20811_v36  ;;  %8594 = vmatmul.f32.gmra.mxu3 %v20813_v26 }
 0x9b3   : > { %8253 = vmatmul.f32.gmra.mxu0 %v20812_v15 }
 0x9b8   : > { %v7937_v42 = vpop.f32.mrf.mxu3 }
 0x9b9   : > { %8378 = vmatmul.f32.gmra.mxu1 %v20814_v48  ;;  %v7938_v7 = vadd.f32 %v7937_v42, %v7846_v46 }
 0x9bb   : > { %8261 = vmatmul.f32.gmra.mxu0 %v20815_v35  ;;  %v7988_v27 = vadd.f32 %v7987_v17, %v7938_v7 }
 0x9bd   : > { %v8025_v43 = vadd.f32 %v8024_v34, %v7988_v27 }
 0x9c1   : > { %8382 = vmatmul.f32.gmra.mxu1 %v20816_v38 }
 0x9c3   : > { %8269 = vmatmul.f32.gmra.mxu0 %v20817_v39 }
 0x9c6   : > { %v8122_v10 = vpop.f32.mrf.mxu1 }
 0x9c8   : > { %v8087_v44 = vpop.f32.mrf.mxu0 }
 0x9c9   : > { %8720 = vmatmul.f32.vlgmr.msra.gmra.mxu1 %v20744_v6  ;;  %v8088_v14 = vadd.f32 %v8087_v44, %v8025_v43 }
 0x9ca   : > { %9608 = vmatpush.msra.mxu1 %v20818_v40  ;;  %v8517_v37 = vpop.f32.mrf.mxu3 }
 0x9cb   : > { %8639 = vmatmul.f32.vlgmr.msra.gmra.mxu0 %v20744_v6  ;;  %v8123_v30 = vadd.f32 %v8122_v10, %v8088_v14  ;;  %v20826_v6 = vld [vmem:[#allocation139_spill] sm:$0xff] }
 0x9cc   : > { %9467 = vmatpush.msra.mxu0 %v20819_v51  ;;  %9614 = vmatpush.msra.mxu1 %v20820_v21 }
 0x9cd   : > { %12231 = vst.msk [vmem:[%s15701_s15 + $0x8] sm:$0xff] %vm4246_vm3, %v8123_v30 }
 0x9ce   : > { %9469 = vmatpush.msra.mxu0 %v20821_v22  ;;  %9620 = vmatpush.msra.mxu1 %v20822_v13 }
 0x9d0   : > { %9471 = vmatpush.msra.mxu0 %v20823_v24  ;;  %9626 = vmatpush.msra.mxu1 %v20824_v45 }
 0x9d1   : > { %8724 = vmatmul.f32.gmra.mxu1 %v20752_v20 }
 0x9d2   : > { %9473 = vmatpush.msra.mxu0 %v20825_v16  ;;  %9632 = vmatpush.msra.mxu1 %v20826_v6 }
 0x9d3   : > { %8643 = vmatmul.f32.gmra.mxu0 %v20752_v20 }
 0x9d4   : > { %9475 = vmatpush.msra.mxu0 %v20827_v11  ;;  %9638 = vmatpush.msra.mxu1 %v20828_v9 }
 0x9d6   : > { %v8331_v28 = vpop.f32.mrf.mxu1  ;;  %9477 = vmatpush.msra.mxu0 %v20829_v59  ;;  %9644 = vmatpush.msra.mxu1 %v20830_v57 }
 0x9d8   : > { %v8166_v1 = vpop.f32.mrf.mxu0  ;;  %9479 = vmatpush.msra.mxu0 %v20831_v4  ;;  %9650 = vmatpush.msra.mxu1 %v20832_v2 }
 0x9d9   : > { %8728 = vmatmul.f32.gmra.mxu1 %v20758_v50  ;;  %v8332_v17 = vadd.f32 %v8331_v28, %v8166_v1 }
 0x9da   : > { %9481 = vmatpush.msra.mxu0 %v20833_v18 }
 0x9db   : > { %8647 = vmatmul.f32.gmra.mxu0 %v20758_v50 }
 0x9de   : > { %v8335_v20 = vpop.f32.mrf.mxu1 }
 0x9e0   : > { %v8174_v62 = vpop.f32.mrf.mxu0 }
 0x9e1   : > { %8732 = vmatmul.f32.gmra.mxu1 %v20767_v31  ;;  %v8336_v44 = vadd.f32 %v8335_v20, %v8174_v62 }
 0x9e3   : > { %8651 = vmatmul.f32.gmra.mxu0 %v20767_v31 }
 0x9e6   : > { %v17657_v5 = vpop.f32.mrf.mxu1 }
 0x9e8   : > { %v17659_v58 = vpop.f32.mrf.mxu0 }
 0x9e9   : > { %8736 = vmatmul.f32.gmra.mxu1 %v20776_v33  ;;  %v8340_v28 = vadd.f32 %v17657_v5, %v17659_v58  ;;  %v20834_v5 = vld [vmem:[#allocation111_spill] sm:$0xff] }
 0x9eb   : > { %8655 = vmatmul.f32.gmra.mxu0 %v20776_v33 }
 0x9ee   : > { %v17663_v63 = vpop.f32.mrf.mxu1 }
 0x9f0   : > { %v17665_v54 = vpop.f32.mrf.mxu0 }
 0x9f1   : > { %8740 = vmatmul.f32.gmra.mxu1 %v20785_v49 }
 0x9f3   : > { %8659 = vmatmul.f32.gmra.mxu0 %v20785_v49 }
 0x9f6   : > { %v17669_v50 = vpop.f32.mrf.mxu1 }
 0x9f8   : > { %v17671_v19 = vpop.f32.mrf.mxu0 }
 0x9f9   : > { %8744 = vmatmul.f32.gmra.mxu1 %v20791_v32 }
 0x9fb   : > { %8663 = vmatmul.f32.gmra.mxu0 %v20791_v32 }
 0x9fe   : > { %v17675_v31 = vpop.f32.mrf.mxu1 }
 0xa00   : > { %v17677_v0 = vpop.f32.mrf.mxu0 }
 0xa01   : > { %8748 = vmatmul.f32.gmra.mxu1 %v20795_v3 }
 0xa03   : > { %8667 = vmatmul.f32.gmra.mxu0 %v20795_v3 }
 0xa06   : > { %v17681_v33 = vpop.f32.mrf.mxu1 }
 0xa08   : > { %v17683_v23 = vpop.f32.mrf.mxu0 }
 0xa09   : > { %8752 = vmatmul.f32.gmra.mxu1 %v20799_v61 }
 0xa0b   : > { %8671 = vmatmul.f32.gmra.mxu0 %v20799_v61  ;;  %v8421_v61 = vpop.f32.mrf.mxu2 }
 0xa0c   : > { %v8422_v34 = vadd.f32 %v8421_v61, %v8332_v17 }
 0xa0e   : > { %v17687_v49 = vpop.f32.mrf.mxu1  ;;  %v8518_v43 = vadd.f32 %v8517_v37, %v8422_v34 }
 0xa10   : > { %v17689_v25 = vpop.f32.mrf.mxu0 }
 0xa11   : > { %8756 = vmatmul.f32.gmra.mxu1 %v20803_v8 }
 0xa13   : > { %8675 = vmatmul.f32.gmra.mxu0 %v20803_v8 }
 0xa16   : > { %v17693_v32 = vpop.f32.mrf.mxu1 }
 0xa18   : > { %v17695_v47 = vpop.f32.mrf.mxu0 }
 0xa19   : > { %8760 = vmatmul.f32.gmra.mxu1 %v20807_v12 }
 0xa1b   : > { %8679 = vmatmul.f32.gmra.mxu0 %v20807_v12  ;;  %v8426_v12 = vpop.f32.mrf.mxu2 }
 0xa1c   : > { %v8427_v14 = vadd.f32 %v8426_v12, %v8336_v44  ;;  %v20836_v44 = vld [vmem:[#allocation120_spill] sm:$0xff] }
 0xa1e   : > { %v17699_v3 = vpop.f32.mrf.mxu1 }
 0xa20   : > { %v17701_v29 = vpop.f32.mrf.mxu0 }
 0xa21   : > { %8764 = vmatmul.f32.gmra.mxu1 %v20811_v36 }
 0xa23   : > { %8683 = vmatmul.f32.gmra.mxu0 %v20811_v36  ;;  %v8523_v36 = vpop.f32.mrf.mxu3  ;;  %v8431_v46 = vpop.f32.mrf.mxu2 }
 0xa24   : > { %v8524_v9 = vadd.f32 %v8523_v36, %v8427_v14  ;;  %v8432_v61 = vadd.f32 %v8431_v46, %v8340_v28  ;;  %v20835_v36 = vld [vmem:[#allocation115_spill] sm:$0xff] }
 0xa26   : > { %v17705_v53 = vpop.f32.mrf.mxu1 }
 0xa28   : > { %v17707_v8 = vpop.f32.mrf.mxu0 }
 0xa29   : > { %8768 = vmatmul.f32.gmra.mxu1 %v20814_v48 }
 0xa2b   : > { %8687 = vmatmul.f32.gmra.mxu0 %v20814_v48  ;;  %v8529_v42 = vpop.f32.mrf.mxu3  ;;  %v8436_v39 = vpop.f32.mrf.mxu2 }
 0xa2e   : > { %v17711_v55 = vpop.f32.mrf.mxu1 }
 0xa30   : > { %v17713_v15 = vpop.f32.mrf.mxu0 }
 0xa31   : > { %8772 = vmatmul.f32.gmra.mxu1 %v20816_v38 }
 0xa33   : > { %8691 = vmatmul.f32.gmra.mxu0 %v20816_v38  ;;  %v17725_v10 = vpop.f32.mrf.mxu3  ;;  %v17728_v13 = vpop.f32.mrf.mxu2 }
 0xa36   : > { %v17717_v26 = vpop.f32.mrf.mxu1 }
 0xa38   : > { %v17719_v35 = vpop.f32.mrf.mxu0 }
 0xa3b   : > { %v17739_v20 = vpop.f32.mrf.mxu3 }
 0xa3e   : > { %v17721_v7 = vpop.f32.mrf.mxu1 }
 0xa40   : > { %v17723_v48 = vpop.f32.mrf.mxu0 }
 0xa46   : > { %v8721_v27 = vpop.f32.mrf.mxu1 }
 0xa48   : > { %v8640_v38 = vpop.f32.mrf.mxu0 }
 0xa49   : > { %v8641_v40 = vadd.f32 %v8640_v38, %v8518_v43  ;;  %v8344_v43 = vadd.f32 %v17663_v63, %v17665_v54  ;;  %v17762_v38 = vpop.f32.mrf.mxu2 }
 0xa4b   : > { %v8722_v21 = vadd.f32 %v8721_v27, %v8641_v40  ;;  %v8530_v27 = vadd.f32 %v8529_v42, %v8432_v61  ;;  %v8437_v54 = vadd.f32 %v8436_v39, %v8344_v43  ;;  %v20841_v61 = vld [vmem:[#allocation117_spill] sm:$0xff] }
 0xa4c   : > { %v20844_v43 = vld [vmem:[#allocation137_spill] sm:$0xff] }
 0xa4d   : > { %v8777_v30 = vsel %vm331_vm0, %v8722_v21, 0 }
 0xa4e   : > { %v17730_v45 = vand.u32 4294901760, %v8777_v30  ;;  %v8725_v6 = vpop.f32.mrf.mxu1 }
 0xa50   : > { %v17735_v57 = vsub.f32 %v8777_v30, %v17730_v45  ;;  %v8644_v1 = vpop.f32.mrf.mxu0  ;;  %9012 = vmatmul.f32.vlgmr.msra.gmra.mxu3 %v17730_v45  ;;  %v20838_v30 = vld [vmem:[#allocation124_spill] sm:$0xff] }
 0xa51   : > { %v8645_v2 = vadd.f32 %v8644_v1, %v8524_v9  ;;  %9820 = vmatpush.msra.mxu3 %v20819_v51  ;;  %v20839_v9 = vld [vmem:[#allocation113_spill] sm:$0xff]  ;;  %v20840_v1 = vld [vmem:[#allocation131_spill] sm:$0xff] }
 0xa52   : > { %9102 = vmatmul.f32.vlgmr.msrb.gmra.mxu0 %v17735_v57  ;;  %v17743_v62 = vand.u32 4294901760, %v17735_v57 }
 0xa53   : > { %v8726_v37 = vadd.f32 %v8725_v6, %v8645_v2  ;;  %9822 = vmatpush.msra.mxu3 %v20821_v22  ;;  %9931 = vmatpush.msrb.mxu0 %v20834_v5  ;;  %v17778_v6 = vpop.f32.mrf.mxu3  ;;  %v8348_v5 = vadd.f32 %v17669_v50, %v17671_v19 }
 0xa54   : > { %9198 = vmatmul.f32.vlgmr.msrb.gmra.mxu1 %v17743_v62  ;;  %v8845_v58 = vsub.f32 %v17735_v57, %v17743_v62 }
 0xa55   : > { %v8780_v12 = vsel %vm331_vm0, %v8726_v37, 0  ;;  %9824 = vmatpush.msra.mxu3 %v20823_v24  ;;  %9935 = vmatpush.msrb.mxu0 %v20835_v36  ;;  %v8536_v37 = vadd.f32 %v17725_v10, %v8437_v54  ;;  %v8451_v10 = vpop.f32.mrf.mxu2  ;;  %v8442_v19 = vadd.f32 %v17728_v13, %v8348_v5 }
 0xa56   : > { %v17753_v17 = vand.u32 4294901760, %v8780_v12  ;;  %v17755_v34 = vand.u32 4294901760, %v8845_v58  ;;  %v8729_v46 = vpop.f32.mrf.mxu1  ;;  %10026 = vmatpush.msrb.mxu1 %v20819_v51  ;;  %v20837_v51 = vld [vmem:[#allocation110_spill] sm:$0xff]  ;;  %v20842_v58 = vld [vmem:[#allocation136_spill] sm:$0xff] }
 0xa57   : > { %9826 = vmatpush.msra.mxu3 %v20825_v16  ;;  %9939 = vmatpush.msrb.mxu0 %v20836_v44  ;;  %v20845_v44 = vld [vmem:[#allocation127_spill] sm:$0xff] }
 0xa58   : > { %v17765_v40 = vsub.f32 %v8780_v12, %v17753_v17  ;;  %v8648_v14 = vpop.f32.mrf.mxu0  ;;  %8847 = vmatmul.f32.vlgmr.msra.gmra.mxu2 %v17755_v34  ;;  %9016 = vmatmul.f32.gmra.mxu3 %v17753_v17 }
 0xa59   : > { %v8649_v21 = vadd.f32 %v8648_v14, %v8530_v27  ;;  %9718 = vmatpush.msra.mxu2 %v20837_v51  ;;  %10028 = vmatpush.msrb.mxu1 %v20821_v22 }
 0xa5a   : > { %9107 = vmatmul.f32.gmra.mxu0 %v17765_v40  ;;  %v17773_v63 = vand.u32 4294901760, %v17765_v40  ;;  %9828 = vmatpush.msra.mxu3 %v20827_v11 }
 0xa5b   : > { %v8730_v42 = vadd.f32 %v8729_v46, %v8649_v21  ;;  %9943 = vmatpush.msrb.mxu0 %v20838_v30  ;;  %10030 = vmatpush.msrb.mxu1 %v20823_v24  ;;  %v20843_v46 = vld [vmem:[#allocation122_spill] sm:$0xff]  ;;  %v20846_v21 = vld [vmem:[#allocation141_spill] sm:$0xff]  ;;  %v8553_v51 = vpop.f32.mrf.mxu3  ;;  %v8542_v30 = vadd.f32 %v17739_v20, %v8442_v19 }
 0xa5c   : > { %9204 = vmatmul.f32.gmra.mxu1 %v17773_v63  ;;  %v8853_v22 = vsub.f32 %v17765_v40, %v17773_v63  ;;  %9721 = vmatpush.msra.mxu2 %v20839_v9 }
 0xa5d   : > { %v8783_v28 = vsel %vm331_vm0, %v8730_v42, 0  ;;  %9830 = vmatpush.msra.mxu3 %v20829_v59  ;;  %9947 = vmatpush.msrb.mxu0 %v20840_v1  ;;  %v20848_v1 = vld [vmem:[#allocation133_spill] sm:$0xff] }
 0xa5e   : > { %v17787_v39 = vand.u32 4294901760, %v8783_v28  ;;  %v17789_v2 = vand.u32 4294901760, %v8853_v22  ;;  %v8733_v24 = vpop.f32.mrf.mxu1  ;;  %10032 = vmatpush.msrb.mxu1 %v20825_v16  ;;  %9724 = vmatpush.msra.mxu2 %v20841_v61  ;;  %v8352_v22 = vadd.f32 %v17675_v31, %v17677_v0 }
 0xa5f   : > { %9832 = vmatpush.msra.mxu3 %v20831_v4  ;;  %9951 = vmatpush.msrb.mxu0 %v20842_v58 }
 0xa60   : > { %v17799_v12 = vsub.f32 %v8783_v28, %v17787_v39  ;;  %v8652_v36 = vpop.f32.mrf.mxu0  ;;  %8855 = vmatmul.f32.gmra.mxu2 %v17789_v2  ;;  %9020 = vmatmul.f32.gmra.mxu3 %v17787_v39  ;;  %v8447_v31 = vadd.f32 %v17762_v38, %v8352_v22  ;;  %v8356_v38 = vadd.f32 %v17681_v33, %v17683_v23 }
 0xa61   : > { %v8653_v16 = vadd.f32 %v8652_v36, %v8536_v37  ;;  %10034 = vmatpush.msrb.mxu1 %v20827_v11  ;;  %9727 = vmatpush.msra.mxu2 %v20843_v46  ;;  %v8360_v22 = vadd.f32 %v17687_v49, %v17689_v25 }
 0xa62   : > { %9112 = vmatmul.f32.gmra.mxu0 %v17799_v12  ;;  %v17807_v50 = vand.u32 4294901760, %v17799_v12  ;;  %9834 = vmatpush.msra.mxu3 %v20833_v18 }
 0xa63   : > { %v8734_v27 = vadd.f32 %v8733_v24, %v8653_v16  ;;  %9955 = vmatpush.msrb.mxu0 %v20844_v43  ;;  %10036 = vmatpush.msrb.mxu1 %v20829_v59  ;;  %v20847_v59 = vld [vmem:[#allocation130_spill] sm:$0xff]  ;;  %v8456_v24 = vpop.f32.mrf.mxu2  ;;  %v8548_v16 = vadd.f32 %v17778_v6, %v8447_v31  ;;  %v8559_v46 = vpop.f32.mrf.mxu3 }
 0xa64   : > { %9210 = vmatmul.f32.gmra.mxu1 %v17807_v50  ;;  %v8861_v11 = vsub.f32 %v17799_v12, %v17807_v50  ;;  %9730 = vmatpush.msra.mxu2 %v20845_v44  ;;  %v8452_v44 = vadd.f32 %v8451_v10, %v8356_v38 }
 0xa65   : > { %v8786_v14 = vsel %vm331_vm0, %v8734_v27, 0  ;;  %9959 = vmatpush.msrb.mxu0 %v20846_v21  ;;  %10038 = vmatpush.msrb.mxu1 %v20831_v4 }
 0xa66   : > { %v17820_v13 = vand.u32 4294901760, %v8786_v14  ;;  %v17822_v54 = vand.u32 4294901760, %v8861_v11  ;;  %v8737_v42 = vpop.f32.mrf.mxu1  ;;  %9733 = vmatpush.msra.mxu2 %v20847_v59 }
 0xa67   : > { %10040 = vmatpush.msrb.mxu1 %v20833_v18  ;;  %v20849_v18 = vld [vmem:[#allocation138_spill] sm:$0xff] }
 0xa68   : > { %v17830_v9 = vsub.f32 %v8786_v14, %v17820_v13  ;;  %v8656_v28 = vpop.f32.mrf.mxu0  ;;  %8863 = vmatmul.f32.gmra.mxu2 %v17822_v54  ;;  %9024 = vmatmul.f32.gmra.mxu3 %v17820_v13 }
 0xa69   : > { %v8657_v4 = vadd.f32 %v8656_v28, %v8542_v30  ;;  %9736 = vmatpush.msra.mxu2 %v20848_v1  ;;  %v8554_v30 = vadd.f32 %v8553_v51, %v8452_v44 }
 0xa6a   : > { %9117 = vmatmul.f32.gmra.mxu0 %v17830_v9  ;;  %v17837_v20 = vand.u32 4294901760, %v17830_v9 }
 0xa6b   : > { %v8738_v0 = vadd.f32 %v8737_v42, %v8657_v4  ;;  %9739 = vmatpush.msra.mxu2 %v20849_v18  ;;  %v8461_v14 = vpop.f32.mrf.mxu2  ;;  %v8565_v1 = vpop.f32.mrf.mxu3 }
 0xa6c   : > { %9216 = vmatmul.f32.gmra.mxu1 %v17837_v20  ;;  %v8869_v61 = vsub.f32 %v17830_v9, %v17837_v20 }
 0xa6d   : > { %v8789_v37 = vsel %vm331_vm0, %v8738_v0, 0  ;;  %v8457_v0 = vadd.f32 %v8456_v24, %v8360_v22 }
 0xa6e   : > { %v17845_v5 = vand.u32 4294901760, %v8789_v37  ;;  %v17847_v58 = vand.u32 4294901760, %v8869_v61  ;;  %v8741_v36 = vpop.f32.mrf.mxu1 }
 0xa70   : > { %v17853_v19 = vsub.f32 %v8789_v37, %v17845_v5  ;;  %v8660_v27 = vpop.f32.mrf.mxu0  ;;  %8871 = vmatmul.f32.gmra.mxu2 %v17847_v58  ;;  %9028 = vmatmul.f32.gmra.mxu3 %v17845_v5 }
 0xa71   : > { %v8661_v43 = vadd.f32 %v8660_v27, %v8548_v16  ;;  %v8364_v16 = vadd.f32 %v17693_v32, %v17695_v47 }
 0xa72   : > { %9122 = vmatmul.f32.gmra.mxu0 %v17853_v19  ;;  %v17859_v11 = vand.u32 4294901760, %v17853_v19 }
 0xa73   : > { %v8742_v6 = vadd.f32 %v8741_v36, %v8661_v43  ;;  %v8560_v36 = vadd.f32 %v8559_v46, %v8457_v0  ;;  %v8466_v38 = vpop.f32.mrf.mxu2 }
 0xa74   : > { %9222 = vmatmul.f32.gmra.mxu1 %v17859_v11  ;;  %v8877_v33 = vsub.f32 %v17853_v19, %v17859_v11 }
 0xa75   : > { %v8792_v23 = vsel %vm331_vm0, %v8742_v6, 0  ;;  %v8462_v6 = vadd.f32 %v8461_v14, %v8364_v16 }
 0xa76   : > { %v17865_v21 = vand.u32 4294901760, %v8792_v23  ;;  %v17867_v42 = vand.u32 4294901760, %v8877_v33  ;;  %v8745_v59 = vpop.f32.mrf.mxu1  ;;  %v8571_v33 = vpop.f32.mrf.mxu3 }
 0xa77   : > { %v8566_v22 = vadd.f32 %v8565_v1, %v8462_v6  ;;  %v8372_v6 = vadd.f32 %v17705_v53, %v17707_v8 }
 0xa78   : > { %20850 = vst [vmem:[#allocation263_spill] sm:$0xff] %v17865_v21  ;;  %v17872_v10 = vsub.f32 %v8792_v23, %v17865_v21  ;;  %v8664_v28 = vpop.f32.mrf.mxu0  ;;  %8879 = vmatmul.f32.gmra.mxu2 %v17867_v42  ;;  %9032 = vmatmul.f32.gmra.mxu3 %v17865_v21 }
 0xa79   : > { %v8665_v4 = vadd.f32 %v8664_v28, %v8554_v30  ;;  %v8368_v28 = vadd.f32 %v17699_v3, %v17701_v29 }
 0xa7a   : > { %20851 = vst [vmem:[#allocation219_spill] sm:$0xff] %v17872_v10  ;;  %9127 = vmatmul.f32.gmra.mxu0 %v17872_v10  ;;  %v17878_v31 = vand.u32 4294901760, %v17872_v10 }
 0xa7b   : > { %v8746_v51 = vadd.f32 %v8745_v59, %v8665_v4 }
 0xa7c   : > { %20852 = vst [vmem:[#allocation201_spill] sm:$0xff] %v17878_v31  ;;  %9228 = vmatmul.f32.gmra.mxu1 %v17878_v31  ;;  %v8885_v49 = vsub.f32 %v17872_v10, %v17878_v31 }
 0xa7d   : > { %v8795_v25 = vsel %vm331_vm0, %v8746_v51, 0  ;;  %v8471_v51 = vpop.f32.mrf.mxu2 }
 0xa7e   : > { %v17884_v18 = vand.u32 4294901760, %v8795_v25  ;;  %v17886_v61 = vand.u32 4294901760, %v8885_v49  ;;  %v8749_v37 = vpop.f32.mrf.mxu1 }
 0xa80   : > { %v17891_v24 = vsub.f32 %v8795_v25, %v17884_v18  ;;  %v8668_v27 = vpop.f32.mrf.mxu0  ;;  %8887 = vmatmul.f32.gmra.mxu2 %v17886_v61  ;;  %9036 = vmatmul.f32.gmra.mxu3 %v17884_v18  ;;  %v8467_v25 = vadd.f32 %v8466_v38, %v8368_v28 }
 0xa81   : > { %v8669_v43 = vadd.f32 %v8668_v27, %v8560_v36 }
 0xa82   : > { %20853 = vst [vmem:[#allocation144_spill] sm:$0xff] %v17891_v24  ;;  %9132 = vmatmul.f32.gmra.mxu0 %v17891_v24  ;;  %v17897_v44 = vand.u32 4294901760, %v17891_v24 }
 0xa83   : > { %v8750_v46 = vadd.f32 %v8749_v37, %v8669_v43  ;;  %v8577_v37 = vpop.f32.mrf.mxu3  ;;  %v8572_v43 = vadd.f32 %v8571_v33, %v8467_v25 }
 0xa84   : > { %20854 = vst [vmem:[#allocation282_spill] sm:$0xff] %v17897_v44  ;;  %9234 = vmatmul.f32.gmra.mxu1 %v17897_v44  ;;  %v8893_v32 = vsub.f32 %v17891_v24, %v17897_v44  ;;  %v20910_v24 = vld [vmem:[#allocation198_spill] sm:$0xff] }
 0xa85   : > { %v8798_v47 = vsel %vm331_vm0, %v8750_v46, 0  ;;  %v8476_v33 = vpop.f32.mrf.mxu2 }
 0xa86   : > { %v17903_v23 = vand.u32 4294901760, %v8798_v47  ;;  %v17905_v59 = vand.u32 4294901760, %v8893_v32  ;;  %v8753_v30 = vpop.f32.mrf.mxu1 }
 0xa88   : > { %v17910_v14 = vsub.f32 %v8798_v47, %v17903_v23  ;;  %v8672_v4 = vpop.f32.mrf.mxu0  ;;  %8895 = vmatmul.f32.gmra.mxu2 %v17905_v59  ;;  %9040 = vmatmul.f32.gmra.mxu3 %v17903_v23 }
 0xa89   : > { %v8673_v0 = vadd.f32 %v8672_v4, %v8566_v22 }
 0xa8a   : > { %20855 = vst [vmem:[#allocation285_spill] sm:$0xff] %v17910_v14  ;;  %9137 = vmatmul.f32.gmra.mxu0 %v17910_v14  ;;  %v17916_v49 = vand.u32 4294901760, %v17910_v14 }
 0xa8b   : > { %v8754_v1 = vadd.f32 %v8753_v30, %v8673_v0  ;;  %v8472_v30 = vadd.f32 %v8471_v51, %v8372_v6 }
 0xa8c   : > { %20856 = vst [vmem:[#allocation269_spill] sm:$0xff] %v17916_v49  ;;  %9240 = vmatmul.f32.gmra.mxu1 %v17916_v49  ;;  %v8901_v3 = vsub.f32 %v17910_v14, %v17916_v49 }
 0xa8d   : > { %v8801_v29 = vsel %vm331_vm0, %v8754_v1, 0  ;;  %v8578_v25 = vadd.f32 %v8577_v37, %v8472_v30  ;;  %v8376_v1 = vadd.f32 %v17711_v55, %v17713_v15 }
 0xa8e   : > { %v17922_v36 = vand.u32 4294901760, %v8801_v29  ;;  %v17924_v16 = vand.u32 4294901760, %v8901_v3  ;;  %v8757_v27 = vpop.f32.mrf.mxu1  ;;  %v8583_v3 = vpop.f32.mrf.mxu3 }
 0xa8f   : > { %v8477_v6 = vadd.f32 %v8476_v33, %v8376_v1 }
 0xa90   : > { %v17929_v38 = vsub.f32 %v8801_v29, %v17922_v36  ;;  %v8676_v46 = vpop.f32.mrf.mxu0  ;;  %8903 = vmatmul.f32.gmra.mxu2 %v17924_v16  ;;  %9044 = vmatmul.f32.gmra.mxu3 %v17922_v36 }
 0xa91   : > { %v8677_v32 = vadd.f32 %v8676_v46, %v8572_v43  ;;  %v8481_v46 = vpop.f32.mrf.mxu2 }
 0xa92   : > { %20857 = vst [vmem:[#allocation284_spill] sm:$0xff] %v17929_v38  ;;  %9142 = vmatmul.f32.gmra.mxu0 %v17929_v38  ;;  %v17935_v47 = vand.u32 4294901760, %v17929_v38 }
 0xa93   : > { %v8758_v22 = vadd.f32 %v8757_v27, %v8677_v32 }
 0xa94   : > { %20858 = vst [vmem:[#allocation129_spill] sm:$0xff] %v17935_v47  ;;  %9246 = vmatmul.f32.gmra.mxu1 %v17935_v47  ;;  %v8909_v53 = vsub.f32 %v17929_v38, %v17935_v47  ;;  %v20901_v47 = vld [vmem:[#allocation185_spill] sm:$0xff] }
 0xa95   : > { %v8804_v8 = vsel %vm331_vm0, %v8758_v22, 0 }
 0xa96   : > { %v17941_v28 = vand.u32 4294901760, %v8804_v8  ;;  %v17943_v4 = vand.u32 4294901760, %v8909_v53  ;;  %v8761_v0 = vpop.f32.mrf.mxu1  ;;  %v8584_v53 = vadd.f32 %v8583_v3, %v8477_v6  ;;  %v8589_v1 = vpop.f32.mrf.mxu3 }
 0xa98   : > { %v17948_v51 = vsub.f32 %v8804_v8, %v17941_v28  ;;  %v8680_v29 = vpop.f32.mrf.mxu0  ;;  %8911 = vmatmul.f32.gmra.mxu2 %v17943_v4  ;;  %9048 = vmatmul.f32.gmra.mxu3 %v17941_v28  ;;  %v8380_v8 = vadd.f32 %v17717_v26, %v17719_v35 }
 0xa99   : > { %v8681_v27 = vadd.f32 %v8680_v29, %v8578_v25 }
 0xa9a   : > { %20859 = vst [vmem:[#allocation287_spill] sm:$0xff] %v17948_v51  ;;  %9147 = vmatmul.f32.gmra.mxu0 %v17948_v51  ;;  %v17954_v43 = vand.u32 4294901760, %v17948_v51 }
 0xa9b   : > { %v8762_v37 = vadd.f32 %v8761_v0, %v8681_v27  ;;  %v8482_v27 = vadd.f32 %v8481_v46, %v8380_v8 }
 0xa9c   : > { %20860 = vst [vmem:[#allocation134_spill] sm:$0xff] %v17954_v43  ;;  %9252 = vmatmul.f32.gmra.mxu1 %v17954_v43  ;;  %v8917_v55 = vsub.f32 %v17948_v51, %v17954_v43  ;;  %v20899_v51 = vld [vmem:[#allocation207_spill] sm:$0xff] }
 0xa9d   : > { %v8807_v15 = vsel %vm331_vm0, %v8762_v37, 0  ;;  %v20900_v43 = vld [vmem:[#allocation191_spill] sm:$0xff] }
 0xa9e   : > { %v17960_v32 = vand.u32 4294901760, %v8807_v15  ;;  %v17962_v30 = vand.u32 4294901760, %v8917_v55  ;;  %v8765_v22 = vpop.f32.mrf.mxu1 }
 0xaa0   : > { %v17967_v33 = vsub.f32 %v8807_v15, %v17960_v32  ;;  %v8684_v0 = vpop.f32.mrf.mxu0  ;;  %8919 = vmatmul.f32.gmra.mxu2 %v17962_v30  ;;  %9052 = vmatmul.f32.gmra.mxu3 %v17960_v32  ;;  %v8590_v15 = vadd.f32 %v8589_v1, %v8482_v27  ;;  %v8595_v27 = vpop.f32.mrf.mxu3 }
 0xaa1   : > { %v8685_v25 = vadd.f32 %v8684_v0, %v8584_v53  ;;  %v8384_v53 = vadd.f32 %v17721_v7, %v17723_v48  ;;  %v8486_v0 = vpop.f32.mrf.mxu2 }
 0xaa2   : > { %20861 = vst [vmem:[#allocation220_spill] sm:$0xff] %v17967_v33  ;;  %9152 = vmatmul.f32.gmra.mxu0 %v17967_v33  ;;  %v17973_v29 = vand.u32 4294901760, %v17967_v33 }
 0xaa3   : > { %v8766_v3 = vadd.f32 %v8765_v22, %v8685_v25 }
 0xaa4   : > { %20862 = vst [vmem:[#allocation281_spill] sm:$0xff] %v17973_v29  ;;  %9258 = vmatmul.f32.gmra.mxu1 %v17973_v29  ;;  %v8925_v26 = vsub.f32 %v17967_v33, %v17973_v29  ;;  %v20897_v29 = vld [vmem:[#allocation189_spill] sm:$0xff] }
 0xaa5   : > { %v8810_v35 = vsel %vm331_vm0, %v8766_v3, 0  ;;  %v8487_v3 = vadd.f32 %v8486_v0, %v8384_v53 }
 0xaa6   : > { %v17979_v6 = vand.u32 4294901760, %v8810_v35  ;;  %v17981_v37 = vand.u32 4294901760, %v8925_v26  ;;  %v8769_v55 = vpop.f32.mrf.mxu1 }
 0xaa8   : > { %v17986_v46 = vsub.f32 %v8810_v35, %v17979_v6  ;;  %v8688_v22 = vpop.f32.mrf.mxu0  ;;  %8927 = vmatmul.f32.gmra.mxu2 %v17981_v37  ;;  %9056 = vmatmul.f32.gmra.mxu3 %v17979_v6 }
 0xaa9   : > { %v8689_v8 = vadd.f32 %v8688_v22, %v8590_v15  ;;  %v8596_v15 = vadd.f32 %v8595_v27, %v8487_v3 }
 0xaaa   : > { %20863 = vst [vmem:[#allocation271_spill] sm:$0xff] %v17986_v46  ;;  %9157 = vmatmul.f32.gmra.mxu0 %v17986_v46  ;;  %v17992_v25 = vand.u32 4294901760, %v17986_v46 }
 0xaab   : > { %v8770_v1 = vadd.f32 %v8769_v55, %v8689_v8 }
 0xaac   : > { %20864 = vst [vmem:[#allocation286_spill] sm:$0xff] %v17992_v25  ;;  %9264 = vmatmul.f32.gmra.mxu1 %v17992_v25  ;;  %v8933_v7 = vsub.f32 %v17986_v46, %v17992_v25  ;;  %v20893_v46 = vld [vmem:[#allocation202_spill] sm:$0xff]  ;;  %v20895_v25 = vld [vmem:[#allocation176_spill] sm:$0xff] }
 0xaad   : > { %v8813_v48 = vsel %vm331_vm0, %v8770_v1, 0 }
 0xaae   : > { %v17998_v26 = vand.u32 4294901760, %v8813_v48  ;;  %v18000_v35 = vand.u32 4294901760, %v8933_v7  ;;  %v8773_v55 = vpop.f32.mrf.mxu1 }
 0xab0   : > { %v18003_v22 = vsub.f32 %v8813_v48, %v17998_v26  ;;  %v8692_v56 = vpop.f32.mrf.mxu0  ;;  %8935 = vmatmul.f32.gmra.mxu2 %v18000_v35  ;;  %9060 = vmatmul.f32.gmra.mxu3 %v17998_v26 }
 0xab1   : > { %v8693_v53 = vadd.f32 %v8692_v56, %v8596_v15 }
 0xab2   : > { %20865 = vst [vmem:[#allocation273_spill] sm:$0xff] %v18003_v22  ;;  %9162 = vmatmul.f32.gmra.mxu0 %v18003_v22  ;;  %v18009_v0 = vand.u32 4294901760, %v18003_v22 }
 0xab3   : > { %v8774_v8 = vadd.f32 %v8773_v55, %v8693_v53  ;;  %v20869_v53 = vld [vmem:[#allocation161_spill] sm:$0xff] }
 0xab4   : > { %20866 = vst [vmem:[#allocation275_spill] sm:$0xff] %v18009_v0  ;;  %9270 = vmatmul.f32.gmra.mxu1 %v18009_v0  ;;  %v8941_v3 = vsub.f32 %v18003_v22, %v18009_v0  ;;  %v20889_v22 = vld [vmem:[#allocation166_spill] sm:$0xff]  ;;  %v20892_v0 = vld [vmem:[#allocation171_spill] sm:$0xff] }
 0xab5   : > { %v8816_v1 = vsel %vm331_vm0, %v8774_v8, 0  ;;  %v20870_v8 = vld [vmem:[#allocation164_spill] sm:$0xff] }
 0xab6   : > { %v18015_v27 = vand.u32 4294901760, %v8816_v1  ;;  %v18017_v7 = vand.u32 4294901760, %v8941_v3  ;;  %v20871_v3 = vld [vmem:[#allocation103_spill] sm:$0xff] }
 0xab8   : > { %v18020_v48 = vsub.f32 %v8816_v1, %v18015_v27  ;;  %8943 = vmatmul.f32.gmra.mxu2 %v18017_v7  ;;  %9064 = vmatmul.f32.gmra.mxu3 %v18015_v27  ;;  %v20872_v1 = vld [vmem:[#allocation169_spill] sm:$0xff] }
 0xaba   : > { %20867 = vst [vmem:[#allocation280_spill] sm:$0xff] %v18020_v48  ;;  %9167 = vmatmul.f32.gmra.mxu0 %v18020_v48  ;;  %v18026_v56 = vand.u32 4294901760, %v18020_v48 }
 0xabc   : > { %20868 = vst [vmem:[#allocation277_spill] sm:$0xff] %v18026_v56  ;;  %9276 = vmatmul.f32.gmra.mxu1 %v18026_v56  ;;  %v8949_v15 = vsub.f32 %v18020_v48, %v18026_v56  ;;  %v20886_v48 = vld [vmem:[#allocation102_spill] sm:$0xff]  ;;  %v20888_v56 = vld [vmem:[#allocation175_spill] sm:$0xff] }
 0xabe   : > { %v18031_v55 = vand.u32 4294901760, %v8949_v15  ;;  %v20874_v15 = vld [vmem:[#allocation152_spill] sm:$0xff] }
 0xac0   : > { %8951 = vmatmul.f32.gmra.mxu2 %v18031_v55  ;;  %9402 = vmatmul.f32.vlgmr.msrb.gmra.mxu3 %v17730_v45 }
 0xac1   : > { %10403 = vmatpush.msrb.mxu3 %v20869_v53  ;;  %v20878_v53 = vld [vmem:[#allocation104_spill] sm:$0xff] }
 0xac2   : > { %9487 = vmatmul.f32.vlgmr.msra.gmra.mxu0 %v17755_v34  ;;  %v20877_v34 = vld [vmem:[#allocation153_spill] sm:$0xff] }
 0xac3   : > { %10409 = vmatpush.msrb.mxu3 %v20870_v8  ;;  %10553 = vmatpush.msra.mxu0 %v20871_v3  ;;  %v20879_v8 = vld [vmem:[#allocation163_spill] sm:$0xff] }
 0xac4   : > { %9652 = vmatmul.f32.vlgmr.msra.gmra.mxu1 %v17730_v45  ;;  %v20883_v3 = vld [vmem:[#allocation159_spill] sm:$0xff] }
 0xac5   : > { %10415 = vmatpush.msrb.mxu3 %v20872_v1  ;;  %10556 = vmatpush.msra.mxu0 %v20873_v52  ;;  %v20880_v52 = vld [vmem:[#allocation156_spill] sm:$0xff] }
 0xac6   : > { %10671 = vmatpush.msra.mxu1 %v20874_v15 }
 0xac7   : > { %10421 = vmatpush.msrb.mxu3 %v20875_v41  ;;  %10559 = vmatpush.msra.mxu0 %v20876_v60  ;;  %v20881_v60 = vld [vmem:[#allocation181_spill] sm:$0xff]  ;;  %v20882_v41 = vld [vmem:[#allocation168_spill] sm:$0xff] }
 0xac8   : > { %9321 = vmatmul.f32.vlgmr.msrb.gmra.mxu2 %v17730_v45  ;;  %9406 = vmatmul.f32.gmra.mxu3 %v17753_v17 }
 0xac9   : > { %10673 = vmatpush.msra.mxu1 %v20877_v34  ;;  %10254 = vmatpush.msrb.mxu2 %v20874_v15 }
 0xaca   : > { %9495 = vmatmul.f32.gmra.mxu0 %v17789_v2  ;;  %10427 = vmatpush.msrb.mxu3 %v20878_v53  ;;  %v20884_v2 = vld [vmem:[#allocation186_spill] sm:$0xff] }
 0xacb   : > { %10562 = vmatpush.msra.mxu0 %v20879_v8  ;;  %10675 = vmatpush.msra.mxu1 %v20880_v52  ;;  %v20885_v53 = vld [vmem:[#allocation170_spill] sm:$0xff] }
 0xacc   : > { %9656 = vmatmul.f32.gmra.mxu1 %v17753_v17  ;;  %10256 = vmatpush.msrb.mxu2 %v20877_v34 }
 0xacd   : > { %10433 = vmatpush.msrb.mxu3 %v20881_v60  ;;  %10565 = vmatpush.msra.mxu0 %v20882_v41  ;;  %v20887_v60 = vld [vmem:[#allocation190_spill] sm:$0xff] }
 0xace   : > { %10677 = vmatpush.msra.mxu1 %v20883_v3  ;;  %10258 = vmatpush.msrb.mxu2 %v20880_v52 }
 0xacf   : > { %v9103_v1 = vpop.f32.mrf.mxu0  ;;  %10439 = vmatpush.msrb.mxu3 %v20884_v2  ;;  %10568 = vmatpush.msra.mxu0 %v20885_v53  ;;  %v20890_v2 = vld [vmem:[#allocation195_spill] sm:$0xff] }
 0xad0   : > { %9325 = vmatmul.f32.gmra.mxu2 %v17753_v17  ;;  %9410 = vmatmul.f32.gmra.mxu3 %v17787_v39  ;;  %v20891_v53 = vld [vmem:[#allocation179_spill] sm:$0xff] }
 0xad1   : > { %v9199_v8 = vpop.f32.mrf.mxu1  ;;  %10679 = vmatpush.msra.mxu1 %v20886_v48  ;;  %10260 = vmatpush.msrb.mxu2 %v20883_v3 }
 0xad2   : > { %9503 = vmatmul.f32.gmra.mxu0 %v17822_v54  ;;  %10445 = vmatpush.msrb.mxu3 %v20887_v60  ;;  %v20894_v60 = vld [vmem:[#allocation183_spill] sm:$0xff] }
 0xad3   : > { %v9013_v41 = vpop.f32.mrf.mxu3  ;;  %10571 = vmatpush.msra.mxu0 %v20888_v56  ;;  %10681 = vmatpush.msra.mxu1 %v20889_v22 }
 0xad4   : > { %9660 = vmatmul.f32.gmra.mxu1 %v17787_v39  ;;  %10262 = vmatpush.msrb.mxu2 %v20886_v48 }
 0xad5   : > { %10451 = vmatpush.msrb.mxu3 %v20890_v2  ;;  %10574 = vmatpush.msra.mxu0 %v20891_v53  ;;  %v20896_v2 = vld [vmem:[#allocation203_spill] sm:$0xff] }
 0xad6   : > { %10683 = vmatpush.msra.mxu1 %v20892_v0  ;;  %10264 = vmatpush.msrb.mxu2 %v20889_v22 }
 0xad7   : > { %v9108_v54 = vpop.f32.mrf.mxu0  ;;  %10457 = vmatpush.msrb.mxu3 %v20893_v46  ;;  %10577 = vmatpush.msra.mxu0 %v20894_v60  ;;  %v20898_v46 = vld [vmem:[#allocation180_spill] sm:$0xff] }
 0xad8   : > { %9329 = vmatmul.f32.gmra.mxu2 %v17787_v39  ;;  %9414 = vmatmul.f32.gmra.mxu3 %v17820_v13 }
 0xad9   : > { %v9205_v56 = vpop.f32.mrf.mxu1  ;;  %10685 = vmatpush.msra.mxu1 %v20895_v25  ;;  %10266 = vmatpush.msrb.mxu2 %v20892_v0 }
 0xada   : > { %9511 = vmatmul.f32.gmra.mxu0 %v17847_v58  ;;  %10463 = vmatpush.msrb.mxu3 %v20896_v2  ;;  %v20902_v2 = vld [vmem:[#allocation212_spill] sm:$0xff] }
 0xadb   : > { %v8848_v53 = vpop.f32.mrf.mxu2  ;;  %v9017_v33 = vpop.f32.mrf.mxu3  ;;  %10580 = vmatpush.msra.mxu0 %v20897_v29  ;;  %10687 = vmatpush.msra.mxu1 %v20898_v46  ;;  %v20903_v29 = vld [vmem:[#allocation197_spill] sm:$0xff] }
 0xadc   : > { %v9014_v60 = vadd.f32 %v9013_v41, %v8848_v53  ;;  %9664 = vmatmul.f32.gmra.mxu1 %v17820_v13  ;;  %10268 = vmatpush.msrb.mxu2 %v20895_v25 }
 0xadd   : > { %10469 = vmatpush.msrb.mxu3 %v20899_v51  ;;  %10583 = vmatpush.msra.mxu0 %v20900_v43  ;;  %v20904_v51 = vld [vmem:[#allocation188_spill] sm:$0xff]  ;;  %v20905_v43 = vld [vmem:[#allocation214_spill] sm:$0xff] }
 0xade   : > { %v9104_v38 = vadd.f32 %v9103_v1, %v9014_v60  ;;  %10689 = vmatpush.msra.mxu1 %v20901_v47  ;;  %10270 = vmatpush.msrb.mxu2 %v20898_v46 }
 0xadf   : > { %v9113_v58 = vpop.f32.mrf.mxu0  ;;  %10475 = vmatpush.msrb.mxu3 %v20902_v2  ;;  %10586 = vmatpush.msra.mxu0 %v20903_v29  ;;  %v20906_v2 = vld [vmem:[#allocation199_spill] sm:$0xff]  ;;  %v20907_v29 = vld [vmem:[#allocation192_spill] sm:$0xff] }
 0xae0   : > { %9333 = vmatmul.f32.gmra.mxu2 %v17820_v13  ;;  %9418 = vmatmul.f32.gmra.mxu3 %v17845_v5  ;;  %v18095_v41 = vadd.f32 %v9199_v8, %v9104_v38  ;;  %v20908_v38 = vld [vmem:[#allocation216_spill] sm:$0xff]  ;;  %v20909_v8 = vld [vmem:[#allocation205_spill] sm:$0xff] }
 0xae1   : > { %v9211_v53 = vpop.f32.mrf.mxu1  ;;  %10691 = vmatpush.msra.mxu1 %v20904_v51  ;;  %10272 = vmatpush.msrb.mxu2 %v20901_v47 }
 0xae2   : > { %9519 = vmatmul.f32.gmra.mxu0 %v17867_v42  ;;  %10481 = vmatpush.msrb.mxu3 %v20905_v43  ;;  %v20911_v43 = vld [vmem:[#allocation217_spill] sm:$0xff] }
 0xae3   : > { %v8856_v1 = vpop.f32.mrf.mxu2  ;;  %v9021_v60 = vpop.f32.mrf.mxu3  ;;  %10589 = vmatpush.msra.mxu0 %v20906_v2  ;;  %10693 = vmatpush.msra.mxu1 %v20907_v29  ;;  %v20912_v2 = vld [vmem:[#allocation210_spill] sm:$0xff] }
 0xae4   : > { %v9018_v14 = vadd.f32 %v9017_v33, %v8856_v1  ;;  %9668 = vmatmul.f32.gmra.mxu1 %v17845_v5  ;;  %10274 = vmatpush.msrb.mxu2 %v20904_v51 }
 0xae5   : > { %10487 = vmatpush.msrb.mxu3 %v20908_v38  ;;  %10592 = vmatpush.msra.mxu0 %v20909_v8  ;;  %v20913_v38 = vld [vmem:[#allocation200_spill] sm:$0xff]  ;;  %v20914_v8 = vld [vmem:[#allocation213_spill] sm:$0xff] }
 0xae6   : > { %v9109_v49 = vadd.f32 %v9108_v54, %v9018_v14  ;;  %10695 = vmatpush.msra.mxu1 %v20910_v24  ;;  %10276 = vmatpush.msrb.mxu2 %v20907_v29 }
 0xae7   : > { %v9118_v42 = vpop.f32.mrf.mxu0  ;;  %10493 = vmatpush.msrb.mxu3 %v20911_v43  ;;  %10595 = vmatpush.msra.mxu0 %v20912_v2  ;;  %v20915_v43 = vld [vmem:[#allocation206_spill] sm:$0xff] }
 0xae8   : > { %9337 = vmatmul.f32.gmra.mxu2 %v17845_v5  ;;  %9422 = vmatmul.f32.gmra.mxu3 %v17865_v21  ;;  %v18113_v33 = vadd.f32 %v9205_v56, %v9109_v49  ;;  %v20916_v49 = vld [vmem:[#allocation209_spill] sm:$0xff] }
 0xae9   : > { %v9217_v1 = vpop.f32.mrf.mxu1  ;;  %10697 = vmatpush.msra.mxu1 %v20913_v38  ;;  %10278 = vmatpush.msrb.mxu2 %v20910_v24 }
 0xaea   : > { %9527 = vmatmul.f32.gmra.mxu0 %v17886_v61 }
 0xaeb   : > { %v8864_v14 = vpop.f32.mrf.mxu2  ;;  %v9025_v54 = vpop.f32.mrf.mxu3  ;;  %10598 = vmatpush.msra.mxu0 %v20914_v8  ;;  %10699 = vmatpush.msra.mxu1 %v20915_v43 }
 0xaec   : > { %v9022_v2 = vadd.f32 %v9021_v60, %v8864_v14  ;;  %9672 = vmatmul.f32.gmra.mxu1 %v17865_v21  ;;  %10280 = vmatpush.msrb.mxu2 %v20913_v38 }
 0xaed   : > { %10701 = vmatpush.msra.mxu1 %v20916_v49 }
 0xaee   : > { %v9114_v56 = vadd.f32 %v9113_v58, %v9022_v2  ;;  %10282 = vmatpush.msrb.mxu2 %v20915_v43 }
 0xaef   : > { %v9123_v44 = vpop.f32.mrf.mxu0 }
 0xaf0   : > { %9341 = vmatmul.f32.gmra.mxu2 %v17865_v21  ;;  %9426 = vmatmul.f32.gmra.mxu3 %v17884_v18  ;;  %v18126_v61 = vadd.f32 %v9211_v53, %v9114_v56 }
 0xaf1   : > { %v9223_v8 = vpop.f32.mrf.mxu1  ;;  %10284 = vmatpush.msrb.mxu2 %v20916_v49 }
 0xaf2   : > { %20917 = vst [vmem:[#allocation260_spill] sm:$0xff] %v18126_v61  ;;  %9535 = vmatmul.f32.gmra.mxu0 %v17905_v59 }
 0xaf3   : > { %v8872_v60 = vpop.f32.mrf.mxu2  ;;  %v9029_v14 = vpop.f32.mrf.mxu3 }
 0xaf4   : > { %v9026_v10 = vadd.f32 %v9025_v54, %v8872_v60  ;;  %9676 = vmatmul.f32.gmra.mxu1 %v17884_v18 }
 0xaf6   : > { %v9119_v58 = vadd.f32 %v9118_v42, %v9026_v10 }
 0xaf7   : > { %v9128_v2 = vpop.f32.mrf.mxu0 }
 0xaf8   : > { %9345 = vmatmul.f32.gmra.mxu2 %v17884_v18  ;;  %9430 = vmatmul.f32.gmra.mxu3 %v17903_v23  ;;  %v18133_v21 = vadd.f32 %v9217_v1, %v9119_v58 }
 0xaf9   : > { %v9229_v53 = vpop.f32.mrf.mxu1 }
 0xafa   : > { %9543 = vmatmul.f32.gmra.mxu0 %v17924_v16 }
 0xafb   : > { %v8880_v56 = vpop.f32.mrf.mxu2  ;;  %v9033_v61 = vpop.f32.mrf.mxu3 }
 0xafc   : > { %v9030_v31 = vadd.f32 %v9029_v14, %v8880_v56  ;;  %9680 = vmatmul.f32.gmra.mxu1 %v17903_v23 }
 0xafe   : > { %v9124_v59 = vadd.f32 %v9123_v44, %v9030_v31 }
 0xaff   : > { %v9133_v54 = vpop.f32.mrf.mxu0 }
 0xb00   : > { %9349 = vmatmul.f32.gmra.mxu2 %v17903_v23  ;;  %9434 = vmatmul.f32.gmra.mxu3 %v17922_v36  ;;  %v18139_v10 = vadd.f32 %v9223_v8, %v9124_v59 }
 0xb01   : > { %v9235_v42 = vpop.f32.mrf.mxu1 }
 0xb02   : > { %9551 = vmatmul.f32.gmra.mxu0 %v17943_v4 }
 0xb03   : > { %v8888_v1 = vpop.f32.mrf.mxu2  ;;  %v9037_v60 = vpop.f32.mrf.mxu3 }
 0xb04   : > { %v9034_v58 = vadd.f32 %v9033_v61, %v8888_v1  ;;  %9684 = vmatmul.f32.gmra.mxu1 %v17922_v36 }
 0xb06   : > { %v9129_v16 = vadd.f32 %v9128_v2, %v9034_v58 }
 0xb07   : > { %v9138_v14 = vpop.f32.mrf.mxu0 }
 0xb08   : > { %9353 = vmatmul.f32.gmra.mxu2 %v17922_v36  ;;  %9438 = vmatmul.f32.gmra.mxu3 %v17941_v28  ;;  %v18145_v31 = vadd.f32 %v9229_v53, %v9129_v16 }
 0xb09   : > { %v9241_v44 = vpop.f32.mrf.mxu1 }
 0xb0a   : > { %9559 = vmatmul.f32.gmra.mxu0 %v17962_v30 }
 0xb0b   : > { %v8896_v8 = vpop.f32.mrf.mxu2  ;;  %v9041_v56 = vpop.f32.mrf.mxu3 }
 0xb0c   : > { %v9038_v59 = vadd.f32 %v9037_v60, %v8896_v8  ;;  %9688 = vmatmul.f32.gmra.mxu1 %v17941_v28 }
 0xb0e   : > { %v9134_v4 = vadd.f32 %v9133_v54, %v9038_v59 }
 0xb0f   : > { %v9143_v61 = vpop.f32.mrf.mxu0 }
 0xb10   : > { %9357 = vmatmul.f32.gmra.mxu2 %v17941_v28  ;;  %9442 = vmatmul.f32.gmra.mxu3 %v17960_v32  ;;  %v18151_v2 = vadd.f32 %v9235_v42, %v9134_v4 }
 0xb11   : > { %v9247_v1 = vpop.f32.mrf.mxu1 }
 0xb12   : > { %9567 = vmatmul.f32.gmra.mxu0 %v17981_v37 }
 0xb13   : > { %v8904_v53 = vpop.f32.mrf.mxu2  ;;  %v9045_v58 = vpop.f32.mrf.mxu3 }
 0xb14   : > { %v9042_v16 = vadd.f32 %v9041_v56, %v8904_v53  ;;  %9692 = vmatmul.f32.gmra.mxu1 %v17960_v32 }
 0xb16   : > { %v9139_v30 = vadd.f32 %v9138_v14, %v9042_v16 }
 0xb17   : > { %v9148_v60 = vpop.f32.mrf.mxu0 }
 0xb18   : > { %9361 = vmatmul.f32.gmra.mxu2 %v17960_v32  ;;  %9446 = vmatmul.f32.gmra.mxu3 %v17979_v6  ;;  %v18157_v54 = vadd.f32 %v9241_v44, %v9139_v30 }
 0xb19   : > { %v9253_v8 = vpop.f32.mrf.mxu1 }
 0xb1a   : > { %9575 = vmatmul.f32.gmra.mxu0 %v18000_v35 }
 0xb1b   : > { %v8912_v42 = vpop.f32.mrf.mxu2  ;;  %v9049_v59 = vpop.f32.mrf.mxu3 }
 0xb1c   : > { %v9046_v4 = vadd.f32 %v9045_v58, %v8912_v42  ;;  %9696 = vmatmul.f32.gmra.mxu1 %v17979_v6 }
 0xb1e   : > { %v9144_v37 = vadd.f32 %v9143_v61, %v9046_v4 }
 0xb1f   : > { %v9153_v56 = vpop.f32.mrf.mxu0 }
 0xb20   : > { %9365 = vmatmul.f32.gmra.mxu2 %v17979_v6  ;;  %9450 = vmatmul.f32.gmra.mxu3 %v17998_v26  ;;  %v18163_v14 = vadd.f32 %v9247_v1, %v9144_v37 }
 0xb21   : > { %v9259_v53 = vpop.f32.mrf.mxu1 }
 0xb22   : > { %9583 = vmatmul.f32.gmra.mxu0 %v18017_v7 }
 0xb23   : > { %v8920_v44 = vpop.f32.mrf.mxu2  ;;  %v9053_v16 = vpop.f32.mrf.mxu3 }
 0xb24   : > { %v9050_v30 = vadd.f32 %v9049_v59, %v8920_v44  ;;  %9700 = vmatmul.f32.gmra.mxu1 %v17998_v26 }
 0xb26   : > { %v9149_v35 = vadd.f32 %v9148_v60, %v9050_v30 }
 0xb27   : > { %v9158_v58 = vpop.f32.mrf.mxu0 }
 0xb28   : > { %9369 = vmatmul.f32.gmra.mxu2 %v17998_v26  ;;  %9454 = vmatmul.f32.gmra.mxu3 %v18015_v27  ;;  %v18169_v61 = vadd.f32 %v9253_v8, %v9149_v35 }
 0xb29   : > { %v9265_v42 = vpop.f32.mrf.mxu1 }
 0xb2a   : > { %9591 = vmatmul.f32.gmra.mxu0 %v18031_v55 }
 0xb2b   : > { %v8928_v1 = vpop.f32.mrf.mxu2  ;;  %v9057_v4 = vpop.f32.mrf.mxu3 }
 0xb2c   : > { %v9054_v37 = vadd.f32 %v9053_v16, %v8928_v1  ;;  %9704 = vmatmul.f32.gmra.mxu1 %v18015_v27  ;;  %v20918_v16 = vld [vmem:[#allocation149_spill] sm:$0xff] }
 0xb2e   : > { %v9154_v7 = vadd.f32 %v9153_v56, %v9054_v37  ;;  %v20919_v56 = vld [vmem:[#allocation150_spill] sm:$0xff]  ;;  %v20927_v37 = vld [vmem:[#allocation231_spill] sm:$0xff] }
 0xb2f   : > { %v9163_v59 = vpop.f32.mrf.mxu0 }
 0xb30   : > { %9373 = vmatmul.f32.gmra.mxu2 %v18015_v27  ;;  %9838 = vmatmul.f32.vlgmr.msra.gmra.mxu3 %v17743_v62  ;;  %v18175_v60 = vadd.f32 %v9259_v53, %v9154_v7  ;;  %v20920_v53 = vld [vmem:[#allocation160_spill] sm:$0xff] }
 0xb31   : > { %v9271_v44 = vpop.f32.mrf.mxu1  ;;  %10909 = vmatpush.msra.mxu3 %v20874_v15  ;;  %v20921_v15 = vld [vmem:[#allocation101_spill] sm:$0xff]  ;;  %v20928_v7 = vld [vmem:[#allocation224_spill] sm:$0xff] }
 0xb32   : > { %9961 = vmatmul.f32.vlgmr.msrb.gmra.mxu0 %v17730_v45 }
 0xb33   : > { %v8936_v8 = vpop.f32.mrf.mxu2  ;;  %v9061_v55 = vpop.f32.mrf.mxu3  ;;  %10911 = vmatpush.msra.mxu3 %v20877_v34  ;;  %11002 = vmatpush.msrb.mxu0 %v20918_v16 }
 0xb34   : > { %v9058_v30 = vadd.f32 %v9057_v4, %v8936_v8  ;;  %10042 = vmatmul.f32.vlgmr.msrb.gmra.mxu1 %v17730_v45  ;;  %v20922_v45 = vld [vmem:[#allocation154_spill] sm:$0xff] }
 0xb35   : > { %10913 = vmatpush.msra.mxu3 %v20880_v52  ;;  %11004 = vmatpush.msrb.mxu0 %v20919_v56  ;;  %v20923_v52 = vld [vmem:[#allocation227_spill] sm:$0xff] }
 0xb36   : > { %v9159_v62 = vadd.f32 %v9158_v58, %v9058_v30  ;;  %11147 = vmatpush.msrb.mxu1 %v20920_v53  ;;  %v20929_v30 = vld [vmem:[#allocation165_spill] sm:$0xff]  ;;  %v20932_v53 = vld [vmem:[#allocation174_spill] sm:$0xff] }
 0xb37   : > { %v9168_v35 = vpop.f32.mrf.mxu0  ;;  %10915 = vmatpush.msra.mxu3 %v20883_v3  ;;  %11006 = vmatpush.msrb.mxu0 %v20921_v15  ;;  %v20924_v3 = vld [vmem:[#allocation157_spill] sm:$0xff] }
 0xb38   : > { %9742 = vmatmul.f32.vlgmr.msra.gmra.mxu2 %v17735_v57  ;;  %9844 = vmatmul.f32.gmra.mxu3 %v17773_v63  ;;  %v18189_v34 = vadd.f32 %v9265_v42, %v9159_v62  ;;  %v20925_v63 = vld [vmem:[#allocation222_spill] sm:$0xff] }
 0xb39   : > { %v9277_v1 = vpop.f32.mrf.mxu1  ;;  %10790 = vmatpush.msra.mxu2 %v20922_v45  ;;  %10917 = vmatpush.msra.mxu3 %v20886_v48  ;;  %v20926_v42 = vld [vmem:[#allocation162_spill] sm:$0xff]  ;;  %v20936_v45 = vld [vmem:[#allocation233_spill] sm:$0xff] }
 0xb3a   : > { %9965 = vmatmul.f32.gmra.mxu0 %v17753_v17  ;;  %11153 = vmatpush.msrb.mxu1 %v20923_v52 }
 0xb3b   : > { %v8944_v58 = vpop.f32.mrf.mxu2  ;;  %v9065_v4 = vpop.f32.mrf.mxu3  ;;  %10794 = vmatpush.msra.mxu2 %v20924_v3  ;;  %10919 = vmatpush.msra.mxu3 %v20889_v22 }
 0xb3c   : > { %v9062_v57 = vadd.f32 %v9061_v55, %v8944_v58  ;;  %10046 = vmatmul.f32.gmra.mxu1 %v17753_v17  ;;  %11008 = vmatpush.msrb.mxu0 %v20925_v63  ;;  %v20937_v58 = vld [vmem:[#allocation182_spill] sm:$0xff] }
 0xb3d   : > { %10798 = vmatpush.msra.mxu2 %v20926_v42  ;;  %10921 = vmatpush.msra.mxu3 %v20892_v0  ;;  %v20930_v0 = vld [vmem:[#allocation172_spill] sm:$0xff] }
 0xb3e   : > { %v9164_v48 = vadd.f32 %v9163_v59, %v9062_v57  ;;  %11159 = vmatpush.msrb.mxu1 %v20927_v37  ;;  %11010 = vmatpush.msrb.mxu0 %v20928_v7  ;;  %v20931_v59 = vld [vmem:[#allocation177_spill] sm:$0xff]  ;;  %v20940_v57 = vld [vmem:[#allocation236_spill] sm:$0xff] }
 0xb3f   : > { %v18203_v8 = vpop.f32.mrf.mxu0  ;;  %10802 = vmatpush.msra.mxu2 %v20929_v30  ;;  %10923 = vmatpush.msra.mxu3 %v20895_v25  ;;  %v20934_v25 = vld [vmem:[#allocation178_spill] sm:$0xff] }
 0xb40   : > { %9747 = vmatmul.f32.gmra.mxu2 %v17765_v40  ;;  %9850 = vmatmul.f32.gmra.mxu3 %v17807_v50  ;;  %v18209_v17 = vadd.f32 %v9271_v44, %v9164_v48  ;;  %v20933_v50 = vld [vmem:[#allocation228_spill] sm:$0xff]  ;;  %v20935_v44 = vld [vmem:[#allocation107_spill] sm:$0xff]  ;;  %v20944_v48 = vld [vmem:[#allocation194_spill] sm:$0xff] }
 0xb41   : > { %v18211_v22 = vpop.f32.mrf.mxu1  ;;  %10806 = vmatpush.msra.mxu2 %v20930_v0  ;;  %10925 = vmatpush.msra.mxu3 %v20898_v46  ;;  %v20946_v30 = vld [vmem:[#allocation242_spill] sm:$0xff] }
 0xb42   : > { %9969 = vmatmul.f32.gmra.mxu0 %v17787_v39  ;;  %11165 = vmatpush.msrb.mxu1 %v20931_v59  ;;  %v20948_v0 = vld [vmem:[#allocation118_spill] sm:$0xff] }
 0xb43   : > { %v8952_v55 = vpop.f32.mrf.mxu2  ;;  %v9403_v62 = vpop.f32.mrf.mxu3  ;;  %10810 = vmatpush.msra.mxu2 %v20932_v53  ;;  %10927 = vmatpush.msra.mxu3 %v20901_v47  ;;  %v20950_v53 = vld [vmem:[#allocation254_spill] sm:$0xff] }
 0xb44   : > { %v9066_v40 = vadd.f32 %v9065_v4, %v8952_v55  ;;  %10050 = vmatmul.f32.gmra.mxu1 %v17787_v39  ;;  %11012 = vmatpush.msrb.mxu0 %v20933_v50 }
 0xb45   : > { %10814 = vmatpush.msra.mxu2 %v20934_v25  ;;  %10929 = vmatpush.msra.mxu3 %v20904_v51  ;;  %v20938_v51 = vld [vmem:[#allocation241_spill] sm:$0xff]  ;;  %v20953_v25 = vld [vmem:[#allocation256_spill] sm:$0xff] }
 0xb46   : > { %v9169_v46 = vadd.f32 %v9168_v35, %v9066_v40  ;;  %11171 = vmatpush.msrb.mxu1 %v20935_v44  ;;  %11014 = vmatpush.msrb.mxu0 %v20936_v45  ;;  %v20939_v35 = vld [vmem:[#allocation187_spill] sm:$0xff]  ;;  %v20952_v40 = vld [vmem:[#allocation250_spill] sm:$0xff] }
 0xb47   : > { %v18225_v52 = vpop.f32.mrf.mxu0  ;;  %10818 = vmatpush.msra.mxu2 %v20937_v58  ;;  %10931 = vmatpush.msra.mxu3 %v20907_v29  ;;  %v20941_v29 = vld [vmem:[#allocation245_spill] sm:$0xff]  ;;  %v20955_v58 = vld [vmem:[#allocation211_spill] sm:$0xff] }
 0xb48   : > { %9752 = vmatmul.f32.gmra.mxu2 %v17799_v12  ;;  %9856 = vmatmul.f32.gmra.mxu3 %v17837_v20  ;;  %v18231_v39 = vadd.f32 %v9277_v1, %v9169_v46  ;;  %v20942_v20 = vld [vmem:[#allocation193_spill] sm:$0xff]  ;;  %v20943_v1 = vld [vmem:[#allocation239_spill] sm:$0xff]  ;;  %v20954_v46 = vld [vmem:[#allocation208_spill] sm:$0xff] }
 0xb49   : > { %v18233_v47 = vpop.f32.mrf.mxu1  ;;  %11177 = vmatpush.msrb.mxu1 %v20938_v51  ;;  %10822 = vmatpush.msra.mxu2 %v20939_v35  ;;  %v20957_v35 = vld [vmem:[#allocation114_spill] sm:$0xff] }
 0xb4a   : > { %9973 = vmatmul.f32.gmra.mxu0 %v17820_v13  ;;  %10933 = vmatpush.msra.mxu3 %v20910_v24  ;;  %v20945_v24 = vld [vmem:[#allocation196_spill] sm:$0xff] }
 0xb4b   : > { %v9322_v4 = vpop.f32.mrf.mxu2  ;;  %v9407_v3 = vpop.f32.mrf.mxu3  ;;  %11016 = vmatpush.msrb.mxu0 %v20940_v57  ;;  %11183 = vmatpush.msrb.mxu1 %v20941_v29  ;;  %v20958_v29 = vld [vmem:[#allocation263_spill] sm:$0xff] }
 0xb4c   : > { %v9323_v12 = vadd.f32 %v9322_v4, %v18095_v41  ;;  %10054 = vmatmul.f32.gmra.mxu1 %v17820_v13  ;;  %10826 = vmatpush.msra.mxu2 %v20942_v20  ;;  %v20959_v20 = vld [vmem:[#allocation215_spill] sm:$0xff] }
 0xb4d   : > { %10935 = vmatpush.msra.mxu3 %v20913_v38  ;;  %11018 = vmatpush.msrb.mxu0 %v20943_v1  ;;  %v20947_v38 = vld [vmem:[#allocation106_spill] sm:$0xff] }
 0xb4e   : > { %v9404_v42 = vadd.f32 %v9403_v62, %v9323_v12  ;;  %11189 = vmatpush.msrb.mxu1 %v20944_v48  ;;  %10830 = vmatpush.msra.mxu2 %v20945_v24  ;;  %v20949_v62 = vld [vmem:[#allocation247_spill] sm:$0xff] }
 0xb4f   : > { %v18248_v37 = vpop.f32.mrf.mxu0  ;;  %10937 = vmatpush.msra.mxu3 %v20915_v43  ;;  %11020 = vmatpush.msrb.mxu0 %v20946_v30 }
 0xb50   : > { %v10098_v41 = vmul.f32 4.4444447, %v9404_v42  ;;  %9757 = vmatmul.f32.gmra.mxu2 %v17830_v9  ;;  %9862 = vmatmul.f32.gmra.mxu3 %v17859_v11  ;;  %v20951_v11 = vld [vmem:[#allocation204_spill] sm:$0xff] }
 0xb51   : > { %v18254_v13 = vpop.f32.mrf.mxu1  ;;  %11195 = vmatpush.msrb.mxu1 %v20947_v38  ;;  %10834 = vmatpush.msra.mxu2 %v20948_v0  ;;  %v20960_v42 = vld [vmem:[#allocation260_spill] sm:$0xff]  ;;  %v20961_v38 = vld [vmem:[#allocation219_spill] sm:$0xff]  ;;  %v20962_v0 = vld [vmem:[#allocation282_spill] sm:$0xff] }
 0xb52   : > { %v18258_v59 = vadd.f32 -1.8044444, %v10098_v41  ;;  %9977 = vmatmul.f32.gmra.mxu0 %v17845_v5  ;;  %10939 = vmatpush.msra.mxu3 %v20916_v49 }
 0xb53   : > { %v9326_v43 = vpop.f32.mrf.mxu2  ;;  %v9411_v55 = vpop.f32.mrf.mxu3  ;;  %11022 = vmatpush.msrb.mxu0 %v20949_v62  ;;  %11201 = vmatpush.msrb.mxu1 %v20950_v53 }
 0xb54   : > { %12240 = vst [vmem:[%s13737_s19 + $0x1c0] sm:$0xff] %v18258_v59  ;;  %v9327_v9 = vadd.f32 %v9326_v43, %v18113_v33  ;;  %10058 = vmatmul.f32.gmra.mxu1 %v17845_v5  ;;  %10838 = vmatpush.msra.mxu2 %v20951_v11  ;;  %v20956_v33 = vld [vmem:[#allocation201_spill] sm:$0xff] }
 0xb55   : > { %11024 = vmatpush.msrb.mxu0 %v20952_v40  ;;  %11207 = vmatpush.msrb.mxu1 %v20953_v25 }
 0xb56   : > { %v9408_v49 = vadd.f32 %v9407_v3, %v9327_v9  ;;  %10842 = vmatpush.msra.mxu2 %v20954_v46 }
 0xb57   : > { %v18272_v44 = vpop.f32.mrf.mxu0  ;;  %11213 = vmatpush.msrb.mxu1 %v20955_v58  ;;  %v20963_v58 = vld [vmem:[#allocation144_spill] sm:$0xff] }
 0xb58   : > { %v10100_v51 = vmul.f32 4.4444447, %v9408_v49  ;;  %9762 = vmatmul.f32.gmra.mxu2 %v17853_v19  ;;  %9868 = vmatmul.f32.gmra.mxu3 %v20956_v33 }
 0xb59   : > { %v18277_v5 = vpop.f32.mrf.mxu1  ;;  %10846 = vmatpush.msra.mxu2 %v20957_v35 }
 0xb5a   : > { %v18280_v4 = vadd.f32 -1.8044444, %v10100_v51  ;;  %9981 = vmatmul.f32.gmra.mxu0 %v20958_v29  ;;  %v20964_v51 = vld [vmem:[#allocation269_spill] sm:$0xff] }
 0xb5b   : > { %v9330_v3 = vpop.f32.mrf.mxu2  ;;  %v9415_v12 = vpop.f32.mrf.mxu3  ;;  %10850 = vmatpush.msra.mxu2 %v20959_v20 }
 0xb5c   : > { %12242 = vst [vmem:[%s13737_s19 + $0x1d0] sm:$0xff] %v18280_v4  ;;  %v9331_v48 = vadd.f32 %v9330_v3, %v20960_v42  ;;  %10062 = vmatmul.f32.gmra.mxu1 %v20958_v29  ;;  %v20965_v42 = vld [vmem:[#allocation285_spill] sm:$0xff] }
 0xb5e   : > { %v9412_v19 = vadd.f32 %v9411_v55, %v9331_v48  ;;  %v20966_v48 = vld [vmem:[#allocation129_spill] sm:$0xff] }
 0xb5f   : > { %v18288_v24 = vpop.f32.mrf.mxu0 }
 0xb60   : > { %v10102_v41 = vmul.f32 4.4444447, %v9412_v19  ;;  %9767 = vmatmul.f32.gmra.mxu2 %v20961_v38  ;;  %9874 = vmatmul.f32.gmra.mxu3 %v20962_v0 }
 0xb61   : > { %v18292_v43 = vpop.f32.mrf.mxu1 }
 0xb62   : > { %v18294_v53 = vadd.f32 -1.8044444, %v10102_v41  ;;  %9985 = vmatmul.f32.gmra.mxu0 %v17884_v18 }
 0xb63   : > { %v9334_v9 = vpop.f32.mrf.mxu2  ;;  %v9419_v11 = vpop.f32.mrf.mxu3 }
 0xb64   : > { %12244 = vst [vmem:[%s13737_s19 + $0x1e0] sm:$0xff] %v18294_v53  ;;  %v9335_v55 = vadd.f32 %v9334_v9, %v18133_v21  ;;  %10066 = vmatmul.f32.gmra.mxu1 %v17884_v18 }
 0xb66   : > { %v9416_v25 = vadd.f32 %v9415_v12, %v9335_v55  ;;  %v20967_v55 = vld [vmem:[#allocation284_spill] sm:$0xff] }
 0xb67   : > { %v18301_v49 = vpop.f32.mrf.mxu0 }
 0xb68   : > { %v10104_v46 = vmul.f32 4.4444447, %v9416_v25  ;;  %9772 = vmatmul.f32.gmra.mxu2 %v20963_v58  ;;  %9880 = vmatmul.f32.gmra.mxu3 %v20964_v51  ;;  %v20968_v25 = vld [vmem:[#allocation134_spill] sm:$0xff] }
 0xb69   : > { %v18305_v33 = vpop.f32.mrf.mxu1 }
 0xb6a   : > { %v18307_v35 = vadd.f32 -1.8044444, %v10104_v46  ;;  %9989 = vmatmul.f32.gmra.mxu0 %v17903_v23 }
 0xb6b   : > { %v9338_v29 = vpop.f32.mrf.mxu2  ;;  %v9423_v3 = vpop.f32.mrf.mxu3 }
 0xb6c   : > { %12246 = vst [vmem:[%s13737_s19 + $0x1f0] sm:$0xff] %v18307_v35  ;;  %v9339_v21 = vadd.f32 %v9338_v29, %v18139_v10  ;;  %10070 = vmatmul.f32.gmra.mxu1 %v17903_v23 }
 0xb6e   : > { %v9420_v18 = vadd.f32 %v9419_v11, %v9339_v21 }
 0xb6f   : > { %v18314_v12 = vpop.f32.mrf.mxu0 }
 0xb70   : > { %v10106_v20 = vmul.f32 4.4444447, %v9420_v18  ;;  %9777 = vmatmul.f32.gmra.mxu2 %v20965_v42  ;;  %9886 = vmatmul.f32.gmra.mxu3 %v20966_v48  ;;  %v20969_v18 = vld [vmem:[#allocation287_spill] sm:$0xff] }
 0xb71   : > { %v18318_v19 = vpop.f32.mrf.mxu1 }
 0xb72   : > { %v18320_v41 = vadd.f32 -1.8044444, %v10106_v20  ;;  %9993 = vmatmul.f32.gmra.mxu0 %v17922_v36  ;;  %v20970_v20 = vld [vmem:[#allocation281_spill] sm:$0xff] }
 0xb73   : > { %v9342_v38 = vpop.f32.mrf.mxu2  ;;  %v9427_v0 = vpop.f32.mrf.mxu3 }
 0xb74   : > { %12248 = vst [vmem:[%s13737_s19 + $0x200] sm:$0xff] %v18320_v41  ;;  %v9343_v23 = vadd.f32 %v9342_v38, %v18145_v31  ;;  %10074 = vmatmul.f32.gmra.mxu1 %v17922_v36 }
 0xb76   : > { %v9424_v10 = vadd.f32 %v9423_v3, %v9343_v23 }
 0xb77   : > { %v18327_v9 = vpop.f32.mrf.mxu0 }
 0xb78   : > { %v10108_v11 = vmul.f32 4.4444447, %v9424_v10  ;;  %9782 = vmatmul.f32.gmra.mxu2 %v20967_v55  ;;  %9892 = vmatmul.f32.gmra.mxu3 %v20968_v25  ;;  %v20972_v55 = vld [vmem:[#allocation286_spill] sm:$0xff] }
 0xb79   : > { %v18331_v46 = vpop.f32.mrf.mxu1 }
 0xb7a   : > { %v18333_v58 = vadd.f32 -1.8044444, %v10108_v11  ;;  %9997 = vmatmul.f32.gmra.mxu0 %v17941_v28  ;;  %v20971_v11 = vld [vmem:[#allocation220_spill] sm:$0xff] }
 0xb7b   : > { %v9346_v51 = vpop.f32.mrf.mxu2  ;;  %v9431_v29 = vpop.f32.mrf.mxu3 }
 0xb7c   : > { %12250 = vst [vmem:[%s13737_s19 + $0x210] sm:$0xff] %v18333_v58  ;;  %v9347_v36 = vadd.f32 %v9346_v51, %v18151_v2  ;;  %10078 = vmatmul.f32.gmra.mxu1 %v17941_v28 }
 0xb7e   : > { %v9428_v31 = vadd.f32 %v9427_v0, %v9347_v36 }
 0xb7f   : > { %v18340_v3 = vpop.f32.mrf.mxu0 }
 0xb80   : > { %v10110_v21 = vmul.f32 4.4444447, %v9428_v31  ;;  %9787 = vmatmul.f32.gmra.mxu2 %v20969_v18  ;;  %9898 = vmatmul.f32.gmra.mxu3 %v20970_v20  ;;  %v20973_v18 = vld [vmem:[#allocation271_spill] sm:$0xff] }
 0xb81   : > { %v18344_v42 = vpop.f32.mrf.mxu1  ;;  %v20974_v20 = vld [vmem:[#allocation275_spill] sm:$0xff] }
 0xb82   : > { %v18346_v48 = vadd.f32 -1.8044444, %v10110_v21  ;;  %10001 = vmatmul.f32.gmra.mxu0 %v17960_v32 }
 0xb83   : > { %v9350_v38 = vpop.f32.mrf.mxu2  ;;  %v9435_v23 = vpop.f32.mrf.mxu3 }
 0xb84   : > { %12252 = vst [vmem:[%s13737_s19 + $0x220] sm:$0xff] %v18346_v48  ;;  %v9351_v28 = vadd.f32 %v9350_v38, %v18157_v54  ;;  %10082 = vmatmul.f32.gmra.mxu1 %v17960_v32 }
 0xb86   : > { %v9432_v2 = vadd.f32 %v9431_v29, %v9351_v28 }
 0xb87   : > { %v18353_v0 = vpop.f32.mrf.mxu0 }
 0xb88   : > { %v10112_v10 = vmul.f32 4.4444447, %v9432_v2  ;;  %9792 = vmatmul.f32.gmra.mxu2 %v20971_v11  ;;  %9904 = vmatmul.f32.gmra.mxu3 %v20972_v55 }
 0xb89   : > { %v18357_v25 = vpop.f32.mrf.mxu1 }
 0xb8a   : > { %v18359_v51 = vadd.f32 -1.8044444, %v10112_v10  ;;  %10005 = vmatmul.f32.gmra.mxu0 %v17979_v6 }
 0xb8b   : > { %v9354_v36 = vpop.f32.mrf.mxu2  ;;  %v9439_v31 = vpop.f32.mrf.mxu3 }
 0xb8c   : > { %12254 = vst [vmem:[%s13737_s19 + $0x230] sm:$0xff] %v18359_v51  ;;  %v9355_v32 = vadd.f32 %v9354_v36, %v18163_v14  ;;  %10086 = vmatmul.f32.gmra.mxu1 %v17979_v6  ;;  %v20975_v36 = vld [vmem:[#allocation273_spill] sm:$0xff] }
 0xb8e   : > { %v9436_v54 = vadd.f32 %v9435_v23, %v9355_v32  ;;  %v18380_v23 = vand.u32 4294901760, %v18258_v59  ;;  %v20976_v32 = vld [vmem:[#allocation277_spill] sm:$0xff] }
 0xb8f   : > { %v18366_v29 = vpop.f32.mrf.mxu0 }
 0xb90   : > { %v10114_v21 = vmul.f32 4.4444447, %v9436_v54  ;;  %9797 = vmatmul.f32.gmra.mxu2 %v20973_v18  ;;  %9910 = vmatmul.f32.gmra.mxu3 %v20974_v20 }
 0xb91   : > { %v18370_v38 = vpop.f32.mrf.mxu1 }
 0xb92   : > { %v18372_v28 = vadd.f32 -1.8044444, %v10114_v21  ;;  %10009 = vmatmul.f32.gmra.mxu0 %v17998_v26 }
 0xb93   : > { %v9358_v2 = vpop.f32.mrf.mxu2  ;;  %v9443_v10 = vpop.f32.mrf.mxu3 }
 0xb94   : > { %12256 = vst [vmem:[%s13737_s19 + $0x240] sm:$0xff] %v18372_v28  ;;  %v9359_v6 = vadd.f32 %v9358_v2, %v18169_v61  ;;  %10090 = vmatmul.f32.gmra.mxu1 %v17998_v26  ;;  %v10286_v26 = vsub.f32 %v18258_v59, %v18380_v23 }
 0xb96   : > { %v9440_v14 = vadd.f32 %v9439_v31, %v9359_v6  ;;  %v10287_v2 = vand.u32 4294901760, %v10286_v26  ;;  %v18398_v6 = vand.u32 4294901760, %v18280_v4 }
 0xb97   : > { %v18382_v11 = vpop.f32.mrf.mxu0 }
 0xb98   : > { %v10116_v55 = vmul.f32 4.4444447, %v9440_v14  ;;  %9802 = vmatmul.f32.gmra.mxu2 %v20975_v36  ;;  %9916 = vmatmul.f32.gmra.mxu3 %v20976_v32  ;;  %v20978_v36 = vld [vmem:[#allocation280_spill] sm:$0xff] }
 0xb99   : > { %v18386_v54 = vpop.f32.mrf.mxu1 }
 0xb9a   : > { %v18388_v21 = vadd.f32 -1.8044444, %v10116_v55  ;;  %10013 = vmatmul.f32.gmra.mxu0 %v18015_v27 }
 0xb9b   : > { %v9362_v61 = vpop.f32.mrf.mxu2  ;;  %v9447_v31 = vpop.f32.mrf.mxu3 }
 0xb9c   : > { %12258 = vst [vmem:[%s13737_s19 + $0x250] sm:$0xff] %v18388_v21  ;;  %v9363_v18 = vadd.f32 %v9362_v61, %v18175_v60  ;;  %10094 = vmatmul.f32.gmra.mxu1 %v18015_v27  ;;  %v10288_v27 = vsub.f32 %v10286_v26, %v10287_v2 }
 0xb9e   : > { %v9444_v20 = vadd.f32 %v9443_v10, %v9363_v18  ;;  %v10294_v10 = vsub.f32 %v18280_v4, %v18398_v6  ;;  %v20980_v18 = vld [vmem:[#allocation98_spill] sm:$0xff]  ;;  %v18419_v4 = vand.u32 4294901760, %v18294_v53 }
 0xb9f   : > { %v18400_v14 = vpop.f32.mrf.mxu0 }
 0xba0   : > { %20977 = vst [vmem:[#allocation167_spill] sm:$0xff] %v18400_v14  ;;  %v10118_v55 = vmul.f32 4.4444447, %v9444_v20  ;;  %9807 = vmatmul.f32.gmra.mxu2 %v20978_v36  ;;  %10495 = vmatmul.f32.vlgmr.msrb.gmra.mxu3 %v18380_v23 }
 0xba1   : > { %v18404_v59 = vpop.f32.mrf.mxu1  ;;  %11387 = vmatpush.msrb.mxu3 %v20918_v16 }
 0xba2   : > { %20979 = vst [vmem:[#allocation270_spill] sm:$0xff] %v18404_v59  ;;  %v18407_v60 = vadd.f32 -1.8044444, %v10118_v55  ;;  %10601 = vmatmul.f32.vlgmr.msra.gmra.mxu0 %v10286_v26  ;;  %v20981_v55 = vld [vmem:[#allocation221_spill] sm:$0xff]  ;;  %v10289_v26 = vand.u32 4294901760, %v10288_v27  ;;  %v10295_v59 = vand.u32 4294901760, %v10294_v10 }
 0xba3   : > { %v9366_v32 = vpop.f32.mrf.mxu2  ;;  %v9451_v61 = vpop.f32.mrf.mxu3  ;;  %11389 = vmatpush.msrb.mxu3 %v20919_v56  ;;  %11502 = vmatpush.msra.mxu0 %v20980_v18  ;;  %v20982_v18 = vld [vmem:[#allocation105_spill] sm:$0xff] }
 0xba4   : > { %12260 = vst [vmem:[%s13737_s19 + $0x260] sm:$0xff] %v18407_v60  ;;  %v9367_v20 = vadd.f32 %v9366_v32, %v18189_v34  ;;  %10705 = vmatmul.f32.vlgmr.msra.gmra.mxu1 %v10287_v2  ;;  %v10302_v32 = vsub.f32 %v18294_v53, %v18419_v4 }
 0xba5   : > { %11391 = vmatpush.msrb.mxu3 %v20921_v15  ;;  %11506 = vmatpush.msra.mxu0 %v20981_v55 }
 0xba6   : > { %v9448_v36 = vadd.f32 %v9447_v31, %v9367_v20  ;;  %11609 = vmatpush.msra.mxu1 %v20918_v16  ;;  %v20983_v31 = vld [vmem:[#allocation151_spill] sm:$0xff]  ;;  %v10296_v16 = vsub.f32 %v10294_v10, %v10295_v59 }
 0xba7   : > { %v18422_v14 = vpop.f32.mrf.mxu0  ;;  %11393 = vmatpush.msrb.mxu3 %v20925_v63  ;;  %11510 = vmatpush.msra.mxu0 %v20982_v18 }
 0xba8   : > { %v10120_v34 = vmul.f32 4.4444447, %v9448_v36  ;;  %10290 = vmatmul.f32.vlgmr.msrb.gmra.mxu2 %v10289_v26  ;;  %10499 = vmatmul.f32.gmra.mxu3 %v18398_v6  ;;  %v20984_v36 = vld [vmem:[#allocation230_spill] sm:$0xff]  ;;  %v10297_v18 = vand.u32 4294901760, %v10296_v16 }
 0xba9   : > { %v18427_v2 = vpop.f32.mrf.mxu1  ;;  %11277 = vmatpush.msrb.mxu2 %v20983_v31  ;;  %11611 = vmatpush.msra.mxu1 %v20919_v56  ;;  %v20985_v56 = vld [vmem:[#allocation100_spill] sm:$0xff]  ;;  %v18445_v31 = vand.u32 4294901760, %v18307_v35  ;;  %v20989_v16 = vld [vmem:[#allocation226_spill] sm:$0xff] }
 0xbaa   : > { %v18431_v27 = vadd.f32 -1.8044444, %v10120_v34  ;;  %10606 = vmatmul.f32.gmra.mxu0 %v10294_v10  ;;  %11395 = vmatpush.msrb.mxu3 %v20928_v7  ;;  %v20986_v10 = vld [vmem:[#allocation232_spill] sm:$0xff]  ;;  %v10303_v34 = vand.u32 4294901760, %v10302_v32 }
 0xbab   : > { %v9370_v20 = vpop.f32.mrf.mxu2  ;;  %v9455_v55 = vpop.f32.mrf.mxu3  ;;  %11514 = vmatpush.msra.mxu0 %v20984_v36  ;;  %11613 = vmatpush.msra.mxu1 %v20921_v15  ;;  %v20987_v15 = vld [vmem:[#allocation223_spill] sm:$0xff] }
 0xbac   : > { %12262 = vst [vmem:[%s13737_s19 + $0x270] sm:$0xff] %v18431_v27  ;;  %v9371_v26 = vadd.f32 %v9370_v20, %v18209_v17  ;;  %10711 = vmatmul.f32.gmra.mxu1 %v10295_v59  ;;  %11280 = vmatpush.msrb.mxu2 %v20985_v56  ;;  %v20988_v17 = vld [vmem:[#allocation235_spill] sm:$0xff]  ;;  %v10304_v20 = vsub.f32 %v10302_v32, %v10303_v34 }
 0xbad   : > { %11397 = vmatpush.msrb.mxu3 %v20933_v50  ;;  %11518 = vmatpush.msra.mxu0 %v20986_v10 }
 0xbae   : > { %v9452_v53 = vadd.f32 %v9451_v61, %v9371_v26  ;;  %11615 = vmatpush.msra.mxu1 %v20925_v63  ;;  %11283 = vmatpush.msrb.mxu2 %v20987_v15  ;;  %v10310_v26 = vsub.f32 %v18307_v35, %v18445_v31  ;;  %v10305_v15 = vand.u32 4294901760, %v10304_v20  ;;  %v20995_v20 = vld [vmem:[#allocation237_spill] sm:$0xff] }
 0xbaf   : > { %v18449_v36 = vpop.f32.mrf.mxu0  ;;  %11399 = vmatpush.msrb.mxu3 %v20936_v45  ;;  %11522 = vmatpush.msra.mxu0 %v20988_v17 }
 0xbb0   : > { %v10122_v59 = vmul.f32 4.4444447, %v9452_v53  ;;  %10298 = vmatmul.f32.gmra.mxu2 %v10297_v18  ;;  %10503 = vmatmul.f32.gmra.mxu3 %v18419_v4  ;;  %v20990_v53 = vld [vmem:[#allocation238_spill] sm:$0xff]  ;;  %v20991_v18 = vld [vmem:[#allocation229_spill] sm:$0xff]  ;;  %v10311_v17 = vand.u32 4294901760, %v10310_v26 }
 0xbb1   : > { %v18454_v61 = vpop.f32.mrf.mxu1  ;;  %11617 = vmatpush.msra.mxu1 %v20928_v7  ;;  %11286 = vmatpush.msrb.mxu2 %v20989_v16 }
 0xbb2   : > { %v18458_v63 = vadd.f32 -1.8044444, %v10122_v59  ;;  %10611 = vmatmul.f32.gmra.mxu0 %v10302_v32  ;;  %11401 = vmatpush.msrb.mxu3 %v20940_v57  ;;  %v20992_v32 = vld [vmem:[#allocation244_spill] sm:$0xff]  ;;  %v18472_v59 = vand.u32 4294901760, %v18320_v41 }
 0xbb3   : > { %v9374_v56 = vpop.f32.mrf.mxu2  ;;  %v9839_v10 = vpop.f32.mrf.mxu3  ;;  %11526 = vmatpush.msra.mxu0 %v20990_v53  ;;  %11619 = vmatpush.msra.mxu1 %v20933_v50  ;;  %v20993_v50 = vld [vmem:[#allocation234_spill] sm:$0xff]  ;;  %v10312_v53 = vsub.f32 %v10310_v26, %v10311_v17 }
 0xbb4   : > { %12264 = vst [vmem:[%s13737_s19 + $0x280] sm:$0xff] %v18458_v63  ;;  %v9375_v7 = vadd.f32 %v9374_v56, %v18231_v39  ;;  %10717 = vmatmul.f32.gmra.mxu1 %v10303_v34  ;;  %11289 = vmatpush.msrb.mxu2 %v20991_v18  ;;  %v20994_v39 = vld [vmem:[#allocation246_spill] sm:$0xff] }
 0xbb5   : > { %11403 = vmatpush.msrb.mxu3 %v20943_v1  ;;  %11530 = vmatpush.msra.mxu0 %v20992_v32 }
 0xbb6   : > { %v9456_v35 = vadd.f32 %v9455_v55, %v9375_v7  ;;  %11621 = vmatpush.msra.mxu1 %v20936_v45  ;;  %11292 = vmatpush.msrb.mxu2 %v20993_v50  ;;  %v9654_v45 = vadd.f32 %v18211_v22, %v18203_v8  ;;  %v10318_v7 = vsub.f32 %v18320_v41, %v18472_v59  ;;  %v20997_v8 = vld [vmem:[#allocation240_spill] sm:$0xff]  ;;  %v18494_v22 = vand.u32 4294901760, %v18333_v58 }
 0xbb7   : > { %v9966_v16 = vpop.f32.mrf.mxu0  ;;  %11405 = vmatpush.msrb.mxu3 %v20946_v30  ;;  %11534 = vmatpush.msra.mxu0 %v20994_v39  ;;  %v20998_v41 = vld [vmem:[#allocation252_spill] sm:$0xff]  ;;  %v20999_v39 = vld [vmem:[#allocation243_spill] sm:$0xff] }
 0xbb8   : > { %v10124_v34 = vmul.f32 4.4444447, %v9456_v35  ;;  %10306 = vmatmul.f32.gmra.mxu2 %v10305_v15  ;;  %10507 = vmatmul.f32.gmra.mxu3 %v18445_v31  ;;  %v20996_v35 = vld [vmem:[#allocation249_spill] sm:$0xff]  ;;  %v10313_v15 = vand.u32 4294901760, %v10312_v53  ;;  %v10319_v50 = vand.u32 4294901760, %v10318_v7 }
 0xbb9   : > { %v10047_v55 = vpop.f32.mrf.mxu1  ;;  %11623 = vmatpush.msra.mxu1 %v20940_v57  ;;  %11295 = vmatpush.msrb.mxu2 %v20995_v20 }
 0xbba   : > { %v18483_v56 = vadd.f32 -1.8044444, %v10124_v34  ;;  %10616 = vmatmul.f32.gmra.mxu0 %v10310_v26  ;;  %11407 = vmatpush.msrb.mxu3 %v20949_v62  ;;  %v21000_v34 = vld [vmem:[#allocation255_spill] sm:$0xff] }
 0xbbb   : > { %v9743_v18 = vpop.f32.mrf.mxu2  ;;  %v9845_v32 = vpop.f32.mrf.mxu3  ;;  %11538 = vmatpush.msra.mxu0 %v20996_v35  ;;  %11625 = vmatpush.msra.mxu1 %v20943_v1 }
 0xbbc   : > { %12266 = vst [vmem:[%s13737_s19 + $0x290] sm:$0xff] %v18483_v56  ;;  %v9744_v57 = vadd.f32 %v9743_v18, %v9654_v45  ;;  %10723 = vmatmul.f32.gmra.mxu1 %v10311_v17  ;;  %11298 = vmatpush.msrb.mxu2 %v20997_v8  ;;  %v10326_v45 = vsub.f32 %v18333_v58, %v18494_v22 }
 0xbbd   : > { %11409 = vmatpush.msrb.mxu3 %v20952_v40  ;;  %11542 = vmatpush.msra.mxu0 %v20998_v41  ;;  %v10320_v18 = vsub.f32 %v10318_v7, %v10319_v50  ;;  %v21003_v41 = vld [vmem:[#allocation253_spill] sm:$0xff] }
 0xbbe   : > { %v9840_v26 = vadd.f32 %v9839_v10, %v9744_v57  ;;  %11627 = vmatpush.msra.mxu1 %v20946_v30  ;;  %11301 = vmatpush.msrb.mxu2 %v20999_v39  ;;  %v21001_v10 = vld [vmem:[#allocation248_spill] sm:$0xff]  ;;  %v9658_v30 = vadd.f32 %v18233_v47, %v18225_v52  ;;  %v21002_v57 = vld [vmem:[#allocation251_spill] sm:$0xff]  ;;  %v18514_v47 = vand.u32 4294901760, %v18346_v48 }
 0xbbf   : > { %v9970_v1 = vpop.f32.mrf.mxu0  ;;  %11546 = vmatpush.msra.mxu0 %v21000_v34  ;;  %v10321_v52 = vand.u32 4294901760, %v10320_v18 }
 0xbc0   : > { %v9963_v17 = vadd.f32 %v18449_v36, %v9840_v26  ;;  %10314 = vmatmul.f32.gmra.mxu2 %v10313_v15  ;;  %10511 = vmatmul.f32.gmra.mxu3 %v18472_v59 }
 0xbc1   : > { %v10051_v20 = vpop.f32.mrf.mxu1  ;;  %11629 = vmatpush.msra.mxu1 %v20949_v62  ;;  %11304 = vmatpush.msrb.mxu2 %v21001_v10  ;;  %v10327_v62 = vand.u32 4294901760, %v10326_v45 }
 0xbc2   : > { %v10044_v53 = vadd.f32 %v18454_v61, %v9963_v17  ;;  %10621 = vmatmul.f32.gmra.mxu0 %v10318_v7 }
 0xbc3   : > { %v9748_v36 = vpop.f32.mrf.mxu2  ;;  %v9851_v35 = vpop.f32.mrf.mxu3  ;;  %11631 = vmatpush.msra.mxu1 %v20952_v40  ;;  %11307 = vmatpush.msrb.mxu2 %v21002_v57  ;;  %v10328_v39 = vsub.f32 %v10326_v45, %v10327_v62 }
 0xbc4   : > { %v10099_v8 = vmul.f32 4.4444447, %v10044_v53  ;;  %v9749_v58 = vadd.f32 %v9748_v36, %v9658_v30  ;;  %10729 = vmatmul.f32.gmra.mxu1 %v10319_v50  ;;  %v9662_v50 = vadd.f32 %v18254_v13, %v18248_v37 }
 0xbc5   : > { %11310 = vmatpush.msrb.mxu2 %v21003_v41 }
 0xbc6   : > { %v10127_v26 = vadd.f32 -1.8044444, %v10099_v8  ;;  %v9846_v15 = vadd.f32 %v9845_v32, %v9749_v58  ;;  %v10334_v32 = vsub.f32 %v18346_v48, %v18514_v47  ;;  %v18524_v8 = vand.u32 4294901760, %v18359_v51 }
 0xbc7   : > { %v9974_v61 = vpop.f32.mrf.mxu0  ;;  %v9666_v48 = vadd.f32 %v18277_v5, %v18272_v44 }
 0xbc8   : > { %12241 = vst.msk [vmem:[%s13737_s19 + $0x1c8] sm:$0xff] %vm2393_vm1, %v10127_v26  ;;  %v9967_v7 = vadd.f32 %v9966_v16, %v9846_v15  ;;  %10322 = vmatmul.f32.gmra.mxu2 %v10321_v52  ;;  %10515 = vmatmul.f32.gmra.mxu3 %v18494_v22  ;;  %v10329_v16 = vand.u32 4294901760, %v10328_v39  ;;  %v10335_v57 = vand.u32 4294901760, %v10334_v32 }
 0xbc9   : > { %v10055_v40 = vpop.f32.mrf.mxu1 }
 0xbca   : > { %v10048_v34 = vadd.f32 %v10047_v55, %v9967_v7  ;;  %10626 = vmatmul.f32.gmra.mxu0 %v10326_v45  ;;  %v10336_v45 = vsub.f32 %v10334_v32, %v10335_v57 }
 0xbcb   : > { %v9753_v17 = vpop.f32.mrf.mxu2  ;;  %v9857_v10 = vpop.f32.mrf.mxu3 }
 0xbcc   : > { %v10101_v30 = vmul.f32 4.4444447, %v10048_v34  ;;  %v9754_v53 = vadd.f32 %v9753_v17, %v9662_v50  ;;  %10735 = vmatmul.f32.gmra.mxu1 %v10327_v62  ;;  %v10337_v39 = vand.u32 4294901760, %v10336_v45  ;;  %v9670_v34 = vadd.f32 %v18292_v43, %v18288_v24 }
 0xbce   : > { %v10129_v18 = vadd.f32 -1.8044444, %v10101_v30  ;;  %v9852_v36 = vadd.f32 %v9851_v35, %v9754_v53  ;;  %v10342_v35 = vsub.f32 %v18359_v51, %v18524_v8 }
 0xbcf   : > { %v9978_v58 = vpop.f32.mrf.mxu0 }
 0xbd0   : > { %12243 = vst.msk [vmem:[%s13737_s19 + $0x1d8] sm:$0xff] %vm2393_vm1, %v10129_v18  ;;  %v9971_v37 = vadd.f32 %v9970_v1, %v9852_v36  ;;  %10330 = vmatmul.f32.gmra.mxu2 %v10329_v16  ;;  %10519 = vmatmul.f32.gmra.mxu3 %v18514_v47  ;;  %v18534_v1 = vand.u32 4294901760, %v18372_v28  ;;  %v10343_v50 = vand.u32 4294901760, %v10342_v35 }
 0xbd1   : > { %v10059_v13 = vpop.f32.mrf.mxu1 }
 0xbd2   : > { %v10052_v55 = vadd.f32 %v10051_v20, %v9971_v37  ;;  %10631 = vmatmul.f32.gmra.mxu0 %v10334_v32  ;;  %v10350_v20 = vsub.f32 %v18372_v28, %v18534_v1  ;;  %v10344_v17 = vsub.f32 %v10342_v35, %v10343_v50  ;;  %v18544_v37 = vand.u32 4294901760, %v18388_v21 }
 0xbd3   : > { %v9758_v62 = vpop.f32.mrf.mxu2  ;;  %v9863_v41 = vpop.f32.mrf.mxu3 }
 0xbd4   : > { %v10103_v26 = vmul.f32 4.4444447, %v10052_v55  ;;  %v9759_v15 = vadd.f32 %v9758_v62, %v9666_v48  ;;  %10741 = vmatmul.f32.gmra.mxu1 %v10335_v57  ;;  %v10345_v57 = vand.u32 4294901760, %v10344_v17  ;;  %v10358_v45 = vsub.f32 %v18388_v21, %v18544_v37 }
 0xbd5   : > { %v9678_v21 = vadd.f32 %v18318_v19, %v18314_v12 }
 0xbd6   : > { %v10131_v52 = vadd.f32 -1.8044444, %v10103_v26  ;;  %v9858_v7 = vadd.f32 %v9857_v10, %v9759_v15 }
 0xbd7   : > { %v9982_v44 = vpop.f32.mrf.mxu0 }
 0xbd8   : > { %12245 = vst.msk [vmem:[%s13737_s19 + $0x1e8] sm:$0xff] %vm2393_vm1, %v10131_v52  ;;  %v9975_v5 = vadd.f32 %v9974_v61, %v9858_v7  ;;  %10338 = vmatmul.f32.gmra.mxu2 %v10337_v39  ;;  %10523 = vmatmul.f32.gmra.mxu3 %v18524_v8  ;;  %v10351_v61 = vand.u32 4294901760, %v10350_v20  ;;  %v10359_v7 = vand.u32 4294901760, %v10358_v45  ;;  %v18554_v39 = vand.u32 4294901760, %v18407_v60 }
 0xbd9   : > { %v10063_v51 = vpop.f32.mrf.mxu1 }
 0xbda   : > { %v10056_v32 = vadd.f32 %v10055_v40, %v9975_v5  ;;  %10636 = vmatmul.f32.gmra.mxu0 %v10342_v35  ;;  %v10352_v43 = vsub.f32 %v10350_v20, %v10351_v61  ;;  %v9674_v40 = vadd.f32 %v18305_v33, %v18301_v49  ;;  %v10360_v5 = vsub.f32 %v10358_v45, %v10359_v7 }
 0xbdb   : > { %v9763_v10 = vpop.f32.mrf.mxu2  ;;  %v9869_v30 = vpop.f32.mrf.mxu3 }
 0xbdc   : > { %v10105_v53 = vmul.f32 4.4444447, %v10056_v32  ;;  %v9764_v16 = vadd.f32 %v9763_v10, %v9670_v34  ;;  %10747 = vmatmul.f32.gmra.mxu1 %v10343_v50 }
 0xbde   : > { %v10133_v18 = vadd.f32 -1.8044444, %v10105_v53  ;;  %v9864_v36 = vadd.f32 %v9863_v41, %v9764_v16  ;;  %v10361_v16 = vand.u32 4294901760, %v10360_v5 }
 0xbdf   : > { %v9986_v28 = vpop.f32.mrf.mxu0 }
 0xbe0   : > { %12247 = vst.msk [vmem:[%s13737_s19 + $0x1f8] sm:$0xff] %vm2393_vm1, %v10133_v18  ;;  %v9979_v48 = vadd.f32 %v9978_v58, %v9864_v36  ;;  %10346 = vmatmul.f32.gmra.mxu2 %v10345_v57  ;;  %10527 = vmatmul.f32.gmra.mxu3 %v18534_v1  ;;  %v10353_v58 = vand.u32 4294901760, %v10352_v43  ;;  %v9682_v18 = vadd.f32 %v18331_v46, %v18327_v9 }
 0xbe1   : > { %v10067_v24 = vpop.f32.mrf.mxu1 }
 0xbe2   : > { %v10060_v55 = vadd.f32 %v10059_v13, %v9979_v48  ;;  %10641 = vmatmul.f32.gmra.mxu0 %v10350_v20  ;;  %v10366_v20 = vsub.f32 %v18407_v60, %v18554_v39 }
 0xbe3   : > { %v9768_v35 = vpop.f32.mrf.mxu2  ;;  %v9875_v62 = vpop.f32.mrf.mxu3 }
 0xbe4   : > { %v10107_v41 = vmul.f32 4.4444447, %v10060_v55  ;;  %v9769_v26 = vadd.f32 %v9768_v35, %v9674_v40  ;;  %10753 = vmatmul.f32.gmra.mxu1 %v10351_v61  ;;  %v10367_v61 = vand.u32 4294901760, %v10366_v20 }
 0xbe6   : > { %v10135_v15 = vadd.f32 -1.8044444, %v10107_v41  ;;  %v9870_v52 = vadd.f32 %v9869_v30, %v9769_v26  ;;  %v10368_v57 = vsub.f32 %v10366_v20, %v10367_v61  ;;  %v18574_v41 = vand.u32 4294901760, %v18458_v63 }
 0xbe7   : > { %v9990_v50 = vpop.f32.mrf.mxu0  ;;  %v9686_v26 = vadd.f32 %v18344_v42, %v18340_v3  ;;  %v18586_v3 = vand.u32 4294901760, %v18483_v56 }
 0xbe8   : > { %12249 = vst.msk [vmem:[%s13737_s19 + $0x208] sm:$0xff] %vm2393_vm1, %v10135_v15  ;;  %v9983_v49 = vadd.f32 %v9982_v44, %v9870_v52  ;;  %10354 = vmatmul.f32.gmra.mxu2 %v10353_v58  ;;  %10531 = vmatmul.f32.gmra.mxu3 %v18544_v37  ;;  %v18564_v44 = vand.u32 4294901760, %v18431_v27  ;;  %v10382_v15 = vsub.f32 %v18458_v63, %v18574_v41  ;;  %v12269_v52 = vld [vmem:[%s13737_s19 + $0x1c8] sm:$0xff] }
 0xbe9   : > { %v10071_v33 = vpop.f32.mrf.mxu1  ;;  %v10212_v5 = vsel %vm2393_vm1, %v12269_v52, 0 }
 0xbea   : > { %v10064_v13 = vadd.f32 %v10063_v51, %v9983_v49  ;;  %10646 = vmatmul.f32.gmra.mxu0 %v10358_v45  ;;  %v10374_v51 = vsub.f32 %v18431_v27, %v18564_v44 }
 0xbeb   : > { %v9773_v34 = vpop.f32.mrf.mxu2  ;;  %v9881_v32 = vpop.f32.mrf.mxu3 }
 0xbec   : > { %v10109_v17 = vmul.f32 4.4444447, %v10064_v13  ;;  %v9774_v10 = vadd.f32 %v9773_v34, %v9678_v21  ;;  %10759 = vmatmul.f32.gmra.mxu1 %v10359_v7 }
 0xbee   : > { %v10137_v30 = vadd.f32 -1.8044444, %v10109_v17  ;;  %v9876_v53 = vadd.f32 %v9875_v62, %v9774_v10  ;;  %v10369_v62 = vand.u32 4294901760, %v10368_v57  ;;  %v9690_v10 = vadd.f32 %v18357_v25, %v18353_v0 }
 0xbef   : > { %v9994_v12 = vpop.f32.mrf.mxu0 }
 0xbf0   : > { %12251 = vst.msk [vmem:[%s13737_s19 + $0x218] sm:$0xff] %vm2393_vm1, %v10137_v30  ;;  %v9987_v19 = vadd.f32 %v9986_v28, %v9876_v53  ;;  %10362 = vmatmul.f32.gmra.mxu2 %v10361_v16  ;;  %10535 = vmatmul.f32.gmra.mxu3 %v18554_v39  ;;  %v10375_v28 = vand.u32 4294901760, %v10374_v51  ;;  %v10390_v16 = vsub.f32 %v18483_v56, %v18586_v3 }
 0xbf1   : > { %v10075_v60 = vpop.f32.mrf.mxu1 }
 0xbf2   : > { %v10068_v36 = vadd.f32 %v10067_v24, %v9987_v19  ;;  %10651 = vmatmul.f32.gmra.mxu0 %v10366_v20  ;;  %v10376_v24 = vsub.f32 %v10374_v51, %v10375_v28 }
 0xbf3   : > { %v9778_v48 = vpop.f32.mrf.mxu2  ;;  %v9887_v43 = vpop.f32.mrf.mxu3 }
 0xbf4   : > { %v10111_v40 = vmul.f32 4.4444447, %v10068_v36  ;;  %v9779_v55 = vadd.f32 %v9778_v48, %v9682_v18  ;;  %10765 = vmatmul.f32.gmra.mxu1 %v10367_v61  ;;  %v12271_v61 = vld [vmem:[%s13737_s19 + $0x1d8] sm:$0xff] }
 0xbf5   : > { %v10215_v57 = vsel %vm2393_vm1, %v12271_v61, 0 }
 0xbf6   : > { %v10139_v45 = vadd.f32 -1.8044444, %v10111_v40  ;;  %v9882_v35 = vadd.f32 %v9881_v32, %v9779_v55  ;;  %v10383_v32 = vand.u32 4294901760, %v10382_v15  ;;  %v18606_v55 = vand.u32 4294901760, %v10215_v57 }
 0xbf7   : > { %v9998_v27 = vpop.f32.mrf.mxu0 }
 0xbf8   : > { %12253 = vst.msk [vmem:[%s13737_s19 + $0x228] sm:$0xff] %vm2393_vm1, %v10139_v45  ;;  %v9991_v9 = vadd.f32 %v9990_v50, %v9882_v35  ;;  %10370 = vmatmul.f32.gmra.mxu2 %v10369_v62  ;;  %10539 = vmatmul.f32.gmra.mxu3 %v18564_v44  ;;  %v10377_v50 = vand.u32 4294901760, %v10376_v24  ;;  %v10384_v53 = vsub.f32 %v10382_v15, %v10383_v32 }
 0xbf9   : > { %v10079_v46 = vpop.f32.mrf.mxu1  ;;  %v9694_v45 = vadd.f32 %v18370_v38, %v18366_v29  ;;  %v18615_v52 = vsub.f32 %v10215_v57, %v18606_v55 }
 0xbfa   : > { %v10072_v58 = vadd.f32 %v10071_v33, %v9991_v9  ;;  %10656 = vmatmul.f32.gmra.mxu0 %v10374_v51  ;;  %v18591_v33 = vand.u32 4294901760, %v10212_v5  ;;  %v10385_v25 = vand.u32 4294901760, %v10384_v53  ;;  %v12273_v9 = vld [vmem:[%s13737_s19 + $0x1e8] sm:$0xff] }
 0xbfb   : > { %v9783_v7 = vpop.f32.mrf.mxu2  ;;  %v9893_v49 = vpop.f32.mrf.mxu3 }
 0xbfc   : > { %v10113_v21 = vmul.f32 4.4444447, %v10072_v58  ;;  %v9784_v13 = vadd.f32 %v9783_v7, %v9686_v26  ;;  %10771 = vmatmul.f32.gmra.mxu1 %v10375_v28  ;;  %v18599_v36 = vsub.f32 %v10212_v5, %v18591_v33  ;;  %v10218_v7 = vsel %vm2393_vm1, %v12273_v9, 0 }
 0xbfd   : > { %v18622_v5 = vand.u32 4294901760, %v10218_v7 }
 0xbfe   : > { %v10141_v20 = vadd.f32 -1.8044444, %v10113_v21  ;;  %v9888_v34 = vadd.f32 %v9887_v43, %v9784_v13  ;;  %v11027_v40 = vand.u32 4294901760, %v18599_v36 }
 0xbff   : > { %v10002_v42 = vpop.f32.mrf.mxu0  ;;  %v18632_v61 = vsub.f32 %v10218_v7, %v18622_v5 }
 0xc00   : > { %12255 = vst.msk [vmem:[%s13737_s19 + $0x238] sm:$0xff] %vm2393_vm1, %v10141_v20  ;;  %v9995_v63 = vadd.f32 %v9994_v12, %v9888_v34  ;;  %10378 = vmatmul.f32.gmra.mxu2 %v10377_v50  ;;  %10543 = vmatmul.f32.gmra.mxu3 %v18574_v41  ;;  %v11035_v50 = vand.u32 4294901760, %v18615_v52  ;;  %v9698_v34 = vadd.f32 %v18386_v54, %v18382_v11 }
 0xc01   : > { %v10083_v17 = vpop.f32.mrf.mxu1 }
 0xc02   : > { %v10076_v30 = vadd.f32 %v10075_v60, %v9995_v63  ;;  %10661 = vmatmul.f32.gmra.mxu0 %v10382_v15  ;;  %v10391_v60 = vand.u32 4294901760, %v10390_v16  ;;  %v11028_v15 = vsub.f32 %v18599_v36, %v11027_v40  ;;  %v12275_v63 = vld [vmem:[%s13737_s19 + $0x1f8] sm:$0xff] }
 0xc03   : > { %v9788_v19 = vpop.f32.mrf.mxu2  ;;  %v9899_v51 = vpop.f32.mrf.mxu3 }
 0xc04   : > { %v10115_v12 = vmul.f32 4.4444447, %v10076_v30  ;;  %v9789_v18 = vadd.f32 %v9788_v19, %v9690_v10  ;;  %10777 = vmatmul.f32.gmra.mxu1 %v10383_v32  ;;  %v10392_v62 = vsub.f32 %v10390_v16, %v10391_v60  ;;  %v11029_v13 = vand.u32 4294901760, %v11028_v15 }
 0xc05   : > { %v10221_v19 = vsel %vm2393_vm1, %v12275_v63, 0 }
 0xc06   : > { %v10143_v48 = vadd.f32 -1.8044444, %v10115_v12  ;;  %v9894_v0 = vadd.f32 %v9893_v49, %v9789_v18  ;;  %v11043_v18 = vand.u32 4294901760, %v18632_v61  ;;  %v18640_v57 = vand.u32 4294901760, %v10221_v19 }
 0xc07   : > { %v10006_v43 = vpop.f32.mrf.mxu0 }
 0xc08   : > { %12257 = vst.msk [vmem:[%s13737_s19 + $0x248] sm:$0xff] %vm2393_vm1, %v10143_v48  ;;  %v9999_v56 = vadd.f32 %v9998_v27, %v9894_v0  ;;  %10386 = vmatmul.f32.gmra.mxu2 %v10385_v25  ;;  %10547 = vmatmul.f32.gmra.mxu3 %v18586_v3  ;;  %v21004_v0 = vld [vmem:[#allocation167_spill] sm:$0xff]  ;;  %v21005_v25 = vld [vmem:[#allocation270_spill] sm:$0xff] }
 0xc09   : > { %v10087_v28 = vpop.f32.mrf.mxu1 }
 0xc0a   : > { %v10080_v35 = vadd.f32 %v10079_v46, %v9999_v56  ;;  %10666 = vmatmul.f32.gmra.mxu0 %v10390_v16  ;;  %v10393_v46 = vand.u32 4294901760, %v10392_v62  ;;  %v11036_v16 = vsub.f32 %v18615_v52, %v11035_v50 }
 0xc0b   : > { %v9793_v24 = vpop.f32.mrf.mxu2  ;;  %v9905_v26 = vpop.f32.mrf.mxu3 }
 0xc0c   : > { %v10117_v58 = vmul.f32 4.4444447, %v10080_v35  ;;  %v9794_v27 = vadd.f32 %v9793_v24, %v9694_v45  ;;  %10783 = vmatmul.f32.gmra.mxu1 %v10391_v60  ;;  %v11037_v12 = vand.u32 4294901760, %v11036_v16  ;;  %v9702_v60 = vadd.f32 %v21005_v25, %v21004_v0  ;;  %v12277_v45 = vld [vmem:[%s13737_s19 + $0x208] sm:$0xff] }
 0xc0d   : > { %v18650_v24 = vsub.f32 %v10221_v19, %v18640_v57 }
 0xc0e   : > { %v10145_v29 = vadd.f32 -1.8044444, %v10117_v58  ;;  %v9900_v38 = vadd.f32 %v9899_v51, %v9794_v27 }
 0xc0f   : > { %v10010_v49 = vpop.f32.mrf.mxu0 }
 0xc10   : > { %12259 = vst.msk [vmem:[%s13737_s19 + $0x258] sm:$0xff] %vm2393_vm1, %v10145_v29  ;;  %v10003_v21 = vadd.f32 %v10002_v42, %v9900_v38  ;;  %10394 = vmatmul.f32.gmra.mxu2 %v10393_v46  ;;  %10941 = vmatmul.f32.vlgmr.msra.gmra.mxu3 %v18380_v23  ;;  %v11051_v29 = vand.u32 4294901760, %v18650_v24 }
 0xc11   : > { %v10091_v20 = vpop.f32.mrf.mxu1 }
 0xc12   : > { %v10084_v32 = vadd.f32 %v10083_v17, %v10003_v21  ;;  %11030 = vmatmul.f32.vlgmr.msrb.gmra.mxu0 %v11029_v13  ;;  %v9706_v21 = vadd.f32 %v18427_v2, %v18422_v14 }
 0xc13   : > { %v9798_v10 = vpop.f32.mrf.mxu2  ;;  %v9911_v30 = vpop.f32.mrf.mxu3 }
 0xc14   : > { %v10119_v53 = vmul.f32 4.4444447, %v10084_v32  ;;  %v9799_v42 = vadd.f32 %v9798_v10, %v9698_v34  ;;  %11215 = vmatmul.f32.vlgmr.msrb.gmra.mxu1 %v18591_v33  ;;  %v12279_v34 = vld [vmem:[%s13737_s19 + $0x218] sm:$0xff] }
 0xc16   : > { %v10147_v11 = vadd.f32 -1.8044444, %v10119_v53  ;;  %v9906_v54 = vadd.f32 %v9905_v26, %v9799_v42  ;;  %v10224_v26 = vsel %vm2393_vm1, %v12277_v45, 0  ;;  %v10227_v53 = vsel %vm2393_vm1, %v12279_v34, 0 }
 0xc17   : > { %v10014_v17 = vpop.f32.mrf.mxu0  ;;  %v18658_v38 = vand.u32 4294901760, %v10224_v26 }
 0xc18   : > { %12261 = vst.msk [vmem:[%s13737_s19 + $0x268] sm:$0xff] %vm2393_vm1, %v10147_v11  ;;  %v10007_v51 = vadd.f32 %v10006_v43, %v9906_v54  ;;  %10852 = vmatmul.f32.vlgmr.msra.gmra.mxu2 %v18380_v23  ;;  %10945 = vmatmul.f32.gmra.mxu3 %v18398_v6  ;;  %v11044_v23 = vsub.f32 %v18632_v61, %v11043_v18  ;;  %v18676_v11 = vand.u32 4294901760, %v10227_v53 }
 0xc19   : > { %v10095_v48 = vpop.f32.mrf.mxu1 }
 0xc1a   : > { %v10088_v56 = vadd.f32 %v10087_v28, %v10007_v51  ;;  %11038 = vmatmul.f32.gmra.mxu0 %v11037_v12  ;;  %v11045_v7 = vand.u32 4294901760, %v11044_v23  ;;  %v12281_v12 = vld [vmem:[%s13737_s19 + $0x228] sm:$0xff] }
 0xc1b   : > { %v9803_v35 = vpop.f32.mrf.mxu2  ;;  %v9917_v62 = vpop.f32.mrf.mxu3  ;;  %v10230_v45 = vsel %vm2393_vm1, %v12281_v12, 0 }
 0xc1c   : > { %v10121_v43 = vmul.f32 4.4444447, %v10088_v56  ;;  %v9804_v9 = vadd.f32 %v9803_v35, %v9702_v60  ;;  %11219 = vmatmul.f32.gmra.mxu1 %v18606_v55  ;;  %v18692_v23 = vand.u32 4294901760, %v10230_v45 }
 0xc1e   : > { %v10149_v58 = vadd.f32 -1.8044444, %v10121_v43  ;;  %v9912_v28 = vadd.f32 %v9911_v30, %v9804_v9  ;;  %v18668_v30 = vsub.f32 %v10224_v26, %v18658_v38 }
 0xc1f   : > { %v10602_v27 = vpop.f32.mrf.mxu0 }
 0xc20   : > { %12263 = vst.msk [vmem:[%s13737_s19 + $0x278] sm:$0xff] %vm2393_vm1, %v10149_v58  ;;  %v10011_v15 = vadd.f32 %v10010_v49, %v9912_v28  ;;  %10856 = vmatmul.f32.gmra.mxu2 %v18398_v6  ;;  %10949 = vmatmul.f32.gmra.mxu3 %v18419_v4  ;;  %v11052_v6 = vsub.f32 %v18650_v24, %v11051_v29  ;;  %v11059_v19 = vand.u32 4294901760, %v18668_v30  ;;  %v12283_v28 = vld [vmem:[%s13737_s19 + $0x238] sm:$0xff] }
 0xc21   : > { %v10706_v46 = vpop.f32.mrf.mxu1 }
 0xc22   : > { %v10092_v13 = vadd.f32 %v10091_v20, %v10011_v15  ;;  %11046 = vmatmul.f32.gmra.mxu0 %v11045_v7  ;;  %v11053_v16 = vand.u32 4294901760, %v11052_v6 }
 0xc23   : > { %v9808_v32 = vpop.f32.mrf.mxu2  ;;  %v10496_v63 = vpop.f32.mrf.mxu3 }
 0xc24   : > { %v10123_v49 = vmul.f32 4.4444447, %v10092_v13  ;;  %v9809_v10 = vadd.f32 %v9808_v32, %v9706_v21  ;;  %11223 = vmatmul.f32.gmra.mxu1 %v18622_v5  ;;  %v18702_v21 = vsub.f32 %v10230_v45, %v18692_v23  ;;  %v10233_v13 = vsel %vm2393_vm1, %v12283_v28, 0 }
 0xc26   : > { %v10151_v14 = vadd.f32 -1.8044444, %v10123_v49  ;;  %v9918_v2 = vadd.f32 %v9917_v62, %v9809_v10  ;;  %v18708_v49 = vand.u32 4294901760, %v10233_v13 }
 0xc27   : > { %v10607_v20 = vpop.f32.mrf.mxu0 }
 0xc28   : > { %12265 = vst.msk [vmem:[%s13737_s19 + $0x288] sm:$0xff] %vm2393_vm1, %v10151_v14  ;;  %v10015_v42 = vadd.f32 %v10014_v17, %v9918_v2  ;;  %10860 = vmatmul.f32.gmra.mxu2 %v18419_v4  ;;  %10953 = vmatmul.f32.gmra.mxu3 %v18445_v31  ;;  %v11060_v4 = vsub.f32 %v18668_v30, %v11059_v19 }
 0xc29   : > { %v10712_v54 = vpop.f32.mrf.mxu1  ;;  %v18684_v17 = vsub.f32 %v10227_v53, %v18676_v11  ;;  %v12285_v53 = vld [vmem:[%s13737_s19 + $0x248] sm:$0xff] }
 0xc2a   : > { %v10096_v51 = vadd.f32 %v10095_v48, %v10015_v42  ;;  %11054 = vmatmul.f32.gmra.mxu0 %v11053_v16  ;;  %v11061_v43 = vand.u32 4294901760, %v11060_v4  ;;  %v10236_v16 = vsel %vm2393_vm1, %v12285_v53, 0  ;;  %v12287_v4 = vld [vmem:[%s13737_s19 + $0x258] sm:$0xff] }
 0xc2b   : > { %v10291_v0 = vpop.f32.mrf.mxu2  ;;  %v10500_v25 = vpop.f32.mrf.mxu3  ;;  %v11067_v9 = vand.u32 4294901760, %v18684_v17 }
 0xc2c   : > { %v10125_v60 = vmul.f32 4.4444447, %v10096_v51  ;;  %v10497_v56 = vadd.f32 %v10496_v63, %v10291_v0  ;;  %11227 = vmatmul.f32.gmra.mxu1 %v18640_v57  ;;  %v11075_v63 = vand.u32 4294901760, %v18702_v21 }
 0xc2e   : > { %v10153_v35 = vadd.f32 -1.8044444, %v10125_v60  ;;  %v10603_v48 = vadd.f32 %v10602_v27, %v10497_v56 }
 0xc2f   : > { %v10612_v62 = vpop.f32.mrf.mxu0 }
 0xc30   : > { %12267 = vst.msk [vmem:[%s13737_s19 + $0x298] sm:$0xff] %vm2393_vm1, %v10153_v35  ;;  %10864 = vmatmul.f32.gmra.mxu2 %v18445_v31  ;;  %10957 = vmatmul.f32.gmra.mxu3 %v18472_v59  ;;  %v18694_v26 = vadd.f32 %v10706_v46, %v10603_v48  ;;  %v11068_v31 = vsub.f32 %v18684_v17, %v11067_v9 }
 0xc31   : > { %v10718_v58 = vpop.f32.mrf.mxu1 }
 0xc32   : > { %11062 = vmatmul.f32.gmra.mxu0 %v11061_v43  ;;  %v11069_v32 = vand.u32 4294901760, %v11068_v31  ;;  %v10239_v43 = vsel %vm2393_vm1, %v12287_v4, 0 }
 0xc33   : > { %v10299_v15 = vpop.f32.mrf.mxu2  ;;  %v10504_v7 = vpop.f32.mrf.mxu3 }
 0xc34   : > { %v10501_v27 = vadd.f32 %v10500_v25, %v10299_v15  ;;  %11231 = vmatmul.f32.gmra.mxu1 %v18658_v38  ;;  %v18724_v25 = vand.u32 4294901760, %v10236_v16 }
 0xc36   : > { %v10608_v46 = vadd.f32 %v10607_v20, %v10501_v27  ;;  %v18718_v20 = vsub.f32 %v10233_v13, %v18708_v49  ;;  %v18740_v27 = vand.u32 4294901760, %v10239_v43 }
 0xc37   : > { %v10617_v34 = vpop.f32.mrf.mxu0 }
 0xc38   : > { %10868 = vmatmul.f32.gmra.mxu2 %v18472_v59  ;;  %10961 = vmatmul.f32.gmra.mxu3 %v18494_v22  ;;  %v18710_v10 = vadd.f32 %v10712_v54, %v10608_v46  ;;  %v11076_v59 = vsub.f32 %v18702_v21, %v11075_v63  ;;  %v19912_v0 = vand.u32 4294901760, %v18718_v20  ;;  %v12289_v46 = vld [vmem:[%s13737_s19 + $0x268] sm:$0xff] }
 0xc39   : > { %v10724_v6 = vpop.f32.mrf.mxu1 }
 0xc3a   : > { %11070 = vmatmul.f32.gmra.mxu0 %v11069_v32  ;;  %v11077_v12 = vand.u32 4294901760, %v11076_v59 }
 0xc3b   : > { %v10307_v14 = vpop.f32.mrf.mxu2  ;;  %v10508_v2 = vpop.f32.mrf.mxu3 }
 0xc3c   : > { %v10505_v42 = vadd.f32 %v10504_v7, %v10307_v14  ;;  %11235 = vmatmul.f32.gmra.mxu1 %v18676_v11 }
 0xc3e   : > { %v10613_v54 = vadd.f32 %v10612_v62, %v10505_v42  ;;  %v18734_v62 = vsub.f32 %v10236_v16, %v18724_v25 }
 0xc3f   : > { %v10622_v51 = vpop.f32.mrf.mxu0 }
 0xc40   : > { %10872 = vmatmul.f32.gmra.mxu2 %v18494_v22  ;;  %10965 = vmatmul.f32.gmra.mxu3 %v18514_v47  ;;  %v18726_v60 = vadd.f32 %v10718_v58, %v10613_v54  ;;  %v11084_v22 = vsub.f32 %v18718_v20, %v19912_v0  ;;  %v19911_v7 = vand.u32 4294901760, %v18734_v62 }
 0xc41   : > { %v10730_v56 = vpop.f32.mrf.mxu1 }
 0xc42   : > { %11078 = vmatmul.f32.gmra.mxu0 %v11077_v12  ;;  %v11085_v15 = vand.u32 4294901760, %v11084_v22 }
 0xc43   : > { %v10315_v45 = vpop.f32.mrf.mxu2  ;;  %v10512_v35 = vpop.f32.mrf.mxu3 }
 0xc44   : > { %v10509_v48 = vadd.f32 %v10508_v2, %v10315_v45  ;;  %11239 = vmatmul.f32.gmra.mxu1 %v18692_v23  ;;  %v10242_v2 = vsel %vm2393_vm1, %v12289_v46, 0  ;;  %v12291_v45 = vld [vmem:[%s13737_s19 + $0x278] sm:$0xff] }
 0xc45   : > { %v18756_v54 = vand.u32 4294901760, %v10242_v2 }
 0xc46   : > { %v10618_v58 = vadd.f32 %v10617_v34, %v10509_v48  ;;  %v18750_v34 = vsub.f32 %v10239_v43, %v18740_v27  ;;  %v10245_v43 = vsel %vm2393_vm1, %v12291_v45, 0 }
 0xc47   : > { %v10627_v28 = vpop.f32.mrf.mxu0 }
 0xc48   : > { %10876 = vmatmul.f32.gmra.mxu2 %v18514_v47  ;;  %10969 = vmatmul.f32.gmra.mxu3 %v18524_v8  ;;  %v18742_v31 = vadd.f32 %v10724_v6, %v10618_v58  ;;  %v11092_v47 = vsub.f32 %v18734_v62, %v19911_v7  ;;  %v19909_v16 = vand.u32 4294901760, %v18750_v34 }
 0xc49   : > { %v10736_v13 = vpop.f32.mrf.mxu1 }
 0xc4a   : > { %11086 = vmatmul.f32.gmra.mxu0 %v11085_v15  ;;  %v11093_v59 = vand.u32 4294901760, %v11092_v47  ;;  %v12293_v47 = vld [vmem:[%s13737_s19 + $0x288] sm:$0xff] }
 0xc4b   : > { %v10323_v32 = vpop.f32.mrf.mxu2  ;;  %v10516_v53 = vpop.f32.mrf.mxu3  ;;  %v10248_v45 = vsel %vm2393_vm1, %v12293_v47, 0 }
 0xc4c   : > { %v10513_v14 = vadd.f32 %v10512_v35, %v10323_v32  ;;  %11243 = vmatmul.f32.gmra.mxu1 %v18708_v49  ;;  %v18772_v32 = vand.u32 4294901760, %v10245_v43 }
 0xc4e   : > { %v10623_v6 = vadd.f32 %v10622_v51, %v10513_v14  ;;  %v18766_v51 = vsub.f32 %v10242_v2, %v18756_v54 }
 0xc4f   : > { %v10632_v42 = vpop.f32.mrf.mxu0 }
 0xc50   : > { %10880 = vmatmul.f32.gmra.mxu2 %v18524_v8  ;;  %10973 = vmatmul.f32.gmra.mxu3 %v18534_v1  ;;  %v18758_v12 = vadd.f32 %v10730_v56, %v10623_v6  ;;  %v11100_v8 = vsub.f32 %v18750_v34, %v19909_v16  ;;  %v19908_v46 = vand.u32 4294901760, %v18766_v51 }
 0xc51   : > { %v10742_v4 = vpop.f32.mrf.mxu1 }
 0xc52   : > { %11094 = vmatmul.f32.gmra.mxu0 %v11093_v59  ;;  %v11101_v15 = vand.u32 4294901760, %v11100_v8  ;;  %v18788_v8 = vand.u32 4294901760, %v10248_v45 }
 0xc53   : > { %v10331_v35 = vpop.f32.mrf.mxu2  ;;  %v10520_v48 = vpop.f32.mrf.mxu3 }
 0xc54   : > { %v10517_v22 = vadd.f32 %v10516_v53, %v10331_v35  ;;  %11247 = vmatmul.f32.gmra.mxu1 %v18724_v25 }
 0xc56   : > { %v10628_v56 = vadd.f32 %v10627_v28, %v10517_v22  ;;  %v18782_v28 = vsub.f32 %v10245_v43, %v18772_v32 }
 0xc57   : > { %v10637_v58 = vpop.f32.mrf.mxu0 }
 0xc58   : > { %10884 = vmatmul.f32.gmra.mxu2 %v18534_v1  ;;  %10977 = vmatmul.f32.gmra.mxu3 %v18544_v37  ;;  %v18774_v53 = vadd.f32 %v10736_v13, %v10628_v56  ;;  %v11108_v1 = vsub.f32 %v18766_v51, %v19908_v46 }
 0xc59   : > { %v10748_v14 = vpop.f32.mrf.mxu1 }
 0xc5a   : > { %11102 = vmatmul.f32.gmra.mxu0 %v11101_v15  ;;  %v11109_v22 = vand.u32 4294901760, %v11108_v1 }
 0xc5b   : > { %v10339_v2 = vpop.f32.mrf.mxu2  ;;  %v10524_v6 = vpop.f32.mrf.mxu3 }
 0xc5c   : > { %v10521_v59 = vadd.f32 %v10520_v48, %v10339_v2  ;;  %11251 = vmatmul.f32.gmra.mxu1 %v18740_v27  ;;  %v19910_v48 = vand.u32 4294901760, %v18782_v28  ;;  %v12295_v2 = vld [vmem:[%s13737_s19 + $0x298] sm:$0xff] }
 0xc5d   : > { %v10251_v47 = vsel %vm2393_vm1, %v12295_v2, 0 }
 0xc5e   : > { %v10633_v13 = vadd.f32 %v10632_v42, %v10521_v59  ;;  %v18798_v42 = vsub.f32 %v10248_v45, %v18788_v8 }
 0xc5f   : > { %v10642_v35 = vpop.f32.mrf.mxu0 }
 0xc60   : > { %10888 = vmatmul.f32.gmra.mxu2 %v18544_v37  ;;  %10981 = vmatmul.f32.gmra.mxu3 %v18554_v39  ;;  %v18790_v56 = vadd.f32 %v10742_v4, %v10633_v13  ;;  %v11116_v37 = vsub.f32 %v18782_v28, %v19910_v48  ;;  %v18804_v13 = vand.u32 4294901760, %v10251_v47 }
 0xc61   : > { %v10754_v15 = vpop.f32.mrf.mxu1 }
 0xc62   : > { %11110 = vmatmul.f32.gmra.mxu0 %v11109_v22  ;;  %v11117_v1 = vand.u32 4294901760, %v11116_v37 }
 0xc63   : > { %v10347_v43 = vpop.f32.mrf.mxu2  ;;  %v10528_v46 = vpop.f32.mrf.mxu3 }
 0xc64   : > { %v10525_v16 = vadd.f32 %v10524_v6, %v10347_v43  ;;  %11255 = vmatmul.f32.gmra.mxu1 %v18756_v54  ;;  %v19913_v6 = vand.u32 4294901760, %v18798_v42 }
 0xc66   : > { %v10638_v59 = vadd.f32 %v10637_v58, %v10525_v16  ;;  %v18813_v16 = vsub.f32 %v10251_v47, %v18804_v13 }
 0xc67   : > { %v10647_v4 = vpop.f32.mrf.mxu0 }
 0xc68   : > { %10892 = vmatmul.f32.gmra.mxu2 %v18554_v39  ;;  %10985 = vmatmul.f32.gmra.mxu3 %v18564_v44  ;;  %v18806_v22 = vadd.f32 %v10748_v14, %v10638_v59  ;;  %v11124_v39 = vsub.f32 %v18798_v42, %v19913_v6  ;;  %v11131_v37 = vand.u32 4294901760, %v18813_v16 }
 0xc69   : > { %v10760_v43 = vpop.f32.mrf.mxu1 }
 0xc6a   : > { %11118 = vmatmul.f32.gmra.mxu0 %v11117_v1  ;;  %v11125_v14 = vand.u32 4294901760, %v11124_v39 }
 0xc6b   : > { %v10355_v48 = vpop.f32.mrf.mxu2  ;;  %v10532_v45 = vpop.f32.mrf.mxu3 }
 0xc6c   : > { %v10529_v7 = vadd.f32 %v10528_v46, %v10355_v48  ;;  %11259 = vmatmul.f32.gmra.mxu1 %v18772_v32 }
 0xc6e   : > { %v10643_v58 = vadd.f32 %v10642_v35, %v10529_v7  ;;  %v11132_v7 = vsub.f32 %v18813_v16, %v11131_v37 }
 0xc6f   : > { %v10652_v2 = vpop.f32.mrf.mxu0 }
 0xc70   : > { %10896 = vmatmul.f32.gmra.mxu2 %v18564_v44  ;;  %10989 = vmatmul.f32.gmra.mxu3 %v18574_v41  ;;  %v18818_v59 = vadd.f32 %v10754_v15, %v10643_v58  ;;  %v11133_v47 = vand.u32 4294901760, %v11132_v7 }
 0xc71   : > { %v10766_v46 = vpop.f32.mrf.mxu1 }
 0xc72   : > { %11126 = vmatmul.f32.gmra.mxu0 %v11125_v14 }
 0xc73   : > { %v10363_v48 = vpop.f32.mrf.mxu2  ;;  %v10536_v1 = vpop.f32.mrf.mxu3 }
 0xc74   : > { %v10533_v0 = vadd.f32 %v10532_v45, %v10363_v48  ;;  %11263 = vmatmul.f32.gmra.mxu1 %v18788_v8 }
 0xc76   : > { %v10648_v35 = vadd.f32 %v10647_v4, %v10533_v0 }
 0xc77   : > { %v10657_v44 = vpop.f32.mrf.mxu0 }
 0xc78   : > { %10900 = vmatmul.f32.gmra.mxu2 %v18574_v41  ;;  %10993 = vmatmul.f32.gmra.mxu3 %v18586_v3  ;;  %v18826_v15 = vadd.f32 %v10760_v43, %v10648_v35 }
 0xc79   : > { %v10772_v39 = vpop.f32.mrf.mxu1 }
 0xc7a   : > { %11134 = vmatmul.f32.gmra.mxu0 %v11133_v47 }
 0xc7b   : > { %v10371_v58 = vpop.f32.mrf.mxu2  ;;  %v10540_v14 = vpop.f32.mrf.mxu3 }
 0xc7c   : > { %v10537_v45 = vadd.f32 %v10536_v1, %v10371_v58  ;;  %11267 = vmatmul.f32.gmra.mxu1 %v18804_v13 }
 0xc7e   : > { %v10653_v48 = vadd.f32 %v10652_v2, %v10537_v45 }
 0xc7f   : > { %v10662_v6 = vpop.f32.mrf.mxu0 }
 0xc80   : > { %10904 = vmatmul.f32.gmra.mxu2 %v18586_v3  ;;  %11413 = vmatmul.f32.vlgmr.msrb.gmra.mxu3 %v11027_v40  ;;  %v18832_v41 = vadd.f32 %v10766_v46, %v10653_v48 }
 0xc81   : > { %v10778_v0 = vpop.f32.mrf.mxu1 }
 0xc82   : > { %11548 = vmatmul.f32.vlgmr.msra.gmra.mxu0 %v18591_v33 }
 0xc83   : > { %v10379_v4 = vpop.f32.mrf.mxu2  ;;  %v10544_v43 = vpop.f32.mrf.mxu3 }
 0xc84   : > { %v10541_v7 = vadd.f32 %v10540_v14, %v10379_v4  ;;  %11633 = vmatmul.f32.vlgmr.msra.gmra.mxu1 %v18591_v33 }
 0xc86   : > { %v10658_v1 = vadd.f32 %v10657_v44, %v10541_v7 }
 0xc87   : > { %v10667_v35 = vpop.f32.mrf.mxu0 }
 0xc88   : > { %11313 = vmatmul.f32.vlgmr.msrb.gmra.mxu2 %v18599_v36  ;;  %11419 = vmatmul.f32.gmra.mxu3 %v11035_v50  ;;  %v18839_v3 = vadd.f32 %v10772_v39, %v10658_v1 }
 0xc89   : > { %v10784_v40 = vpop.f32.mrf.mxu1 }
 0xc8a   : > { %11552 = vmatmul.f32.gmra.mxu0 %v18606_v55 }
 0xc8b   : > { %v10387_v2 = vpop.f32.mrf.mxu2  ;;  %v10548_v46 = vpop.f32.mrf.mxu3 }
 0xc8c   : > { %v10545_v47 = vadd.f32 %v10544_v43, %v10387_v2  ;;  %11637 = vmatmul.f32.gmra.mxu1 %v18606_v55 }
 0xc8e   : > { %v10663_v58 = vadd.f32 %v10662_v6, %v10545_v47 }
 0xc8f   : > { %v11031_v14 = vpop.f32.mrf.mxu0 }
 0xc90   : > { %11318 = vmatmul.f32.gmra.mxu2 %v18615_v52  ;;  %11425 = vmatmul.f32.gmra.mxu3 %v11043_v18  ;;  %v18846_v33 = vadd.f32 %v10778_v0, %v10663_v58 }
 0xc91   : > { %v11216_v36 = vpop.f32.mrf.mxu1 }
 0xc92   : > { %11556 = vmatmul.f32.gmra.mxu0 %v18622_v5 }
 0xc93   : > { %v10395_v50 = vpop.f32.mrf.mxu2  ;;  %v10942_v44 = vpop.f32.mrf.mxu3 }
 0xc94   : > { %v10549_v39 = vadd.f32 %v10548_v46, %v10395_v50  ;;  %11641 = vmatmul.f32.gmra.mxu1 %v18622_v5 }
 0xc96   : > { %v10668_v45 = vadd.f32 %v10667_v35, %v10549_v39 }
 0xc97   : > { %v11039_v48 = vpop.f32.mrf.mxu0 }
 0xc98   : > { %11323 = vmatmul.f32.gmra.mxu2 %v18632_v61  ;;  %11431 = vmatmul.f32.gmra.mxu3 %v11051_v29  ;;  %v18853_v55 = vadd.f32 %v10784_v40, %v10668_v45 }
 0xc99   : > { %v11220_v52 = vpop.f32.mrf.mxu1 }
 0xc9a   : > { %11560 = vmatmul.f32.gmra.mxu0 %v18640_v57 }
 0xc9b   : > { %v10853_v18 = vpop.f32.mrf.mxu2  ;;  %v10946_v6 = vpop.f32.mrf.mxu3 }
 0xc9c   : > { %v10854_v0 = vadd.f32 %v10853_v18, %v18694_v26  ;;  %11645 = vmatmul.f32.gmra.mxu1 %v18640_v57 }
 0xc9e   : > { %v10943_v4 = vadd.f32 %v10942_v44, %v10854_v0 }
 0xc9f   : > { %v11047_v5 = vpop.f32.mrf.mxu0 }
 0xca0   : > { %11328 = vmatmul.f32.gmra.mxu2 %v18650_v24  ;;  %11437 = vmatmul.f32.gmra.mxu3 %v11059_v19  ;;  %v11032_v61 = vadd.f32 %v11031_v14, %v10943_v4 }
 0xca1   : > { %v11224_v29 = vpop.f32.mrf.mxu1 }
 0xca2   : > { %11564 = vmatmul.f32.gmra.mxu0 %v18658_v38  ;;  %v18862_v43 = vadd.f32 %v11216_v36, %v11032_v61 }
 0xca3   : > { %v10857_v7 = vpop.f32.mrf.mxu2  ;;  %v10950_v1 = vpop.f32.mrf.mxu3 }
 0xca4   : > { %v10858_v35 = vadd.f32 %v10857_v7, %v18710_v10  ;;  %11649 = vmatmul.f32.gmra.mxu1 %v18658_v38 }
 0xca6   : > { %v10947_v57 = vadd.f32 %v10946_v6, %v10858_v35 }
 0xca7   : > { %v11055_v26 = vpop.f32.mrf.mxu0 }
 0xca8   : > { %11333 = vmatmul.f32.gmra.mxu2 %v18668_v30  ;;  %11443 = vmatmul.f32.gmra.mxu3 %v11067_v9  ;;  %v11040_v24 = vadd.f32 %v11039_v48, %v10947_v57 }
 0xca9   : > { %v11228_v19 = vpop.f32.mrf.mxu1 }
 0xcaa   : > { %11568 = vmatmul.f32.gmra.mxu0 %v18676_v11  ;;  %v18870_v40 = vadd.f32 %v11220_v52, %v11040_v24 }
 0xcab   : > { %v10861_v2 = vpop.f32.mrf.mxu2  ;;  %v10954_v46 = vpop.f32.mrf.mxu3 }
 0xcac   : > { %v10862_v47 = vadd.f32 %v10861_v2, %v18726_v60  ;;  %11653 = vmatmul.f32.gmra.mxu1 %v18676_v11 }
 0xcae   : > { %v10951_v38 = vadd.f32 %v10950_v1, %v10862_v47 }
 0xcaf   : > { %v11063_v10 = vpop.f32.mrf.mxu0 }
 0xcb0   : > { %11338 = vmatmul.f32.gmra.mxu2 %v18684_v17  ;;  %11449 = vmatmul.f32.gmra.mxu3 %v11075_v63  ;;  %v11048_v30 = vadd.f32 %v11047_v5, %v10951_v38  ;;  %v21006_v17 = vand.u32 4294901760, %v18718_v20 }
 0xcb1   : > { %v11232_v9 = vpop.f32.mrf.mxu1 }
 0xcb2   : > { %11572 = vmatmul.f32.gmra.mxu0 %v18692_v23  ;;  %v18878_v58 = vadd.f32 %v11224_v29, %v11048_v30 }
 0xcb3   : > { %v10865_v14 = vpop.f32.mrf.mxu2  ;;  %v10958_v36 = vpop.f32.mrf.mxu3 }
 0xcb4   : > { %v10866_v50 = vadd.f32 %v10865_v14, %v18742_v31  ;;  %11657 = vmatmul.f32.gmra.mxu1 %v18692_v23 }
 0xcb6   : > { %v10955_v11 = vadd.f32 %v10954_v46, %v10866_v50 }
 0xcb7   : > { %v11071_v60 = vpop.f32.mrf.mxu0 }
 0xcb8   : > { %11343 = vmatmul.f32.gmra.mxu2 %v18702_v21  ;;  %11455 = vmatmul.f32.gmra.mxu3 %v21006_v17  ;;  %v11056_v63 = vadd.f32 %v11055_v26, %v10955_v11  ;;  %v21007_v21 = vand.u32 4294901760, %v18734_v62 }
 0xcb9   : > { %v11236_v44 = vpop.f32.mrf.mxu1 }
 0xcba   : > { %11576 = vmatmul.f32.gmra.mxu0 %v18708_v49  ;;  %v18886_v39 = vadd.f32 %v11228_v19, %v11056_v63 }
 0xcbb   : > { %v10869_v45 = vpop.f32.mrf.mxu2  ;;  %v10962_v48 = vpop.f32.mrf.mxu3 }
 0xcbc   : > { %v10870_v52 = vadd.f32 %v10869_v45, %v18758_v12  ;;  %11661 = vmatmul.f32.gmra.mxu1 %v18708_v49 }
 0xcbe   : > { %v10959_v23 = vadd.f32 %v10958_v36, %v10870_v52 }
 0xcbf   : > { %v11079_v31 = vpop.f32.mrf.mxu0 }
 0xcc0   : > { %11348 = vmatmul.f32.gmra.mxu2 %v18718_v20  ;;  %11461 = vmatmul.f32.gmra.mxu3 %v21007_v21  ;;  %v11064_v18 = vadd.f32 %v11063_v10, %v10959_v23  ;;  %v21008_v20 = vand.u32 4294901760, %v18750_v34 }
 0xcc1   : > { %v11240_v6 = vpop.f32.mrf.mxu1 }
 0xcc2   : > { %11580 = vmatmul.f32.gmra.mxu0 %v18724_v25  ;;  %v18894_v0 = vadd.f32 %v11232_v9, %v11064_v18 }
 0xcc3   : > { %v10873_v4 = vpop.f32.mrf.mxu2  ;;  %v10966_v5 = vpop.f32.mrf.mxu3 }
 0xcc4   : > { %v10874_v61 = vadd.f32 %v10873_v4, %v18774_v53  ;;  %11665 = vmatmul.f32.gmra.mxu1 %v18724_v25 }
 0xcc6   : > { %v10963_v49 = vadd.f32 %v10962_v48, %v10874_v61 }
 0xcc7   : > { %v11087_v12 = vpop.f32.mrf.mxu0 }
 0xcc8   : > { %11353 = vmatmul.f32.gmra.mxu2 %v18734_v62  ;;  %11467 = vmatmul.f32.gmra.mxu3 %v21008_v20  ;;  %v11072_v29 = vadd.f32 %v11071_v60, %v10963_v49  ;;  %v21009_v62 = vand.u32 4294901760, %v18766_v51 }
 0xcc9   : > { %v11244_v7 = vpop.f32.mrf.mxu1 }
 0xcca   : > { %11584 = vmatmul.f32.gmra.mxu0 %v18740_v27  ;;  %v18902_v1 = vadd.f32 %v11236_v44, %v11072_v29 }
 0xccb   : > { %v10877_v35 = vpop.f32.mrf.mxu2  ;;  %v10970_v57 = vpop.f32.mrf.mxu3 }
 0xccc   : > { %v10878_v26 = vadd.f32 %v10877_v35, %v18790_v56  ;;  %11669 = vmatmul.f32.gmra.mxu1 %v18740_v27 }
 0xcce   : > { %v10967_v25 = vadd.f32 %v10966_v5, %v10878_v26 }
 0xccf   : > { %v11095_v53 = vpop.f32.mrf.mxu0 }
 0xcd0   : > { %11358 = vmatmul.f32.gmra.mxu2 %v18750_v34  ;;  %11473 = vmatmul.f32.gmra.mxu3 %v21009_v62  ;;  %v11080_v24 = vadd.f32 %v11079_v31, %v10967_v25  ;;  %v21010_v34 = vand.u32 4294901760, %v18782_v28 }
 0xcd1   : > { %v11248_v19 = vpop.f32.mrf.mxu1 }
 0xcd2   : > { %11588 = vmatmul.f32.gmra.mxu0 %v18756_v54  ;;  %v18910_v2 = vadd.f32 %v11240_v6, %v11080_v24 }
 0xcd3   : > { %v10881_v46 = vpop.f32.mrf.mxu2  ;;  %v10974_v47 = vpop.f32.mrf.mxu3 }
 0xcd4   : > { %v10882_v38 = vadd.f32 %v10881_v46, %v18806_v22  ;;  %11673 = vmatmul.f32.gmra.mxu1 %v18756_v54 }
 0xcd6   : > { %v10971_v27 = vadd.f32 %v10970_v57, %v10882_v38 }
 0xcd7   : > { %v11103_v56 = vpop.f32.mrf.mxu0 }
 0xcd8   : > { %11363 = vmatmul.f32.gmra.mxu2 %v18766_v51  ;;  %11479 = vmatmul.f32.gmra.mxu3 %v21010_v34  ;;  %v11088_v10 = vadd.f32 %v11087_v12, %v10971_v27  ;;  %v21011_v51 = vand.u32 4294901760, %v18798_v42 }
 0xcd9   : > { %v11252_v30 = vpop.f32.mrf.mxu1 }
 0xcda   : > { %11592 = vmatmul.f32.gmra.mxu0 %v18772_v32  ;;  %v18918_v9 = vadd.f32 %v11244_v7, %v11088_v10 }
 0xcdb   : > { %v10885_v14 = vpop.f32.mrf.mxu2  ;;  %v10978_v36 = vpop.f32.mrf.mxu3 }
 0xcdc   : > { %v10886_v50 = vadd.f32 %v10885_v14, %v18818_v59  ;;  %11677 = vmatmul.f32.gmra.mxu1 %v18772_v32 }
 0xcde   : > { %v10975_v54 = vadd.f32 %v10974_v47, %v10886_v50 }
 0xcdf   : > { %v11111_v22 = vpop.f32.mrf.mxu0 }
 0xce0   : > { %11368 = vmatmul.f32.gmra.mxu2 %v18782_v28  ;;  %11485 = vmatmul.f32.gmra.mxu3 %v21011_v51  ;;  %v11096_v11 = vadd.f32 %v11095_v53, %v10975_v54 }
 0xce1   : > { %v11256_v60 = vpop.f32.mrf.mxu1 }
 0xce2   : > { %11596 = vmatmul.f32.gmra.mxu0 %v18788_v8  ;;  %v18926_v17 = vadd.f32 %v11248_v19, %v11096_v11 }
 0xce3   : > { %v10889_v63 = vpop.f32.mrf.mxu2  ;;  %v10982_v44 = vpop.f32.mrf.mxu3 }
 0xce4   : > { %v10890_v45 = vadd.f32 %v10889_v63, %v18826_v15  ;;  %11681 = vmatmul.f32.gmra.mxu1 %v18788_v8 }
 0xce6   : > { %v10979_v32 = vadd.f32 %v10978_v36, %v10890_v45 }
 0xce7   : > { %v11119_v59 = vpop.f32.mrf.mxu0 }
 0xce8   : > { %11373 = vmatmul.f32.gmra.mxu2 %v18798_v42  ;;  %11491 = vmatmul.f32.gmra.mxu3 %v11131_v37  ;;  %v11104_v28 = vadd.f32 %v11103_v56, %v10979_v32 }
 0xce9   : > { %v11260_v48 = vpop.f32.mrf.mxu1 }
 0xcea   : > { %11600 = vmatmul.f32.gmra.mxu0 %v18804_v13  ;;  %v18934_v52 = vadd.f32 %v11252_v30, %v11104_v28 }
 0xceb   : > { %v10893_v23 = vpop.f32.mrf.mxu2  ;;  %v10986_v31 = vpop.f32.mrf.mxu3 }
 0xcec   : > { %v10894_v21 = vadd.f32 %v10893_v23, %v18832_v41  ;;  %11685 = vmatmul.f32.gmra.mxu1 %v18804_v13 }
 0xcee   : > { %v10983_v8 = vadd.f32 %v10982_v44, %v10894_v21 }
 0xcef   : > { %v11127_v15 = vpop.f32.mrf.mxu0 }
 0xcf0   : > { %11378 = vmatmul.f32.gmra.mxu2 %v18813_v16  ;;  %v11112_v42 = vadd.f32 %v11111_v22, %v10983_v8 }
 0xcf1   : > { %v11264_v18 = vpop.f32.mrf.mxu1 }
 0xcf2   : > { %v18939_v6 = vadd.f32 %v11256_v60, %v11112_v42 }
 0xcf3   : > { %v10897_v37 = vpop.f32.mrf.mxu2  ;;  %v10990_v4 = vpop.f32.mrf.mxu3 }
 0xcf4   : > { %v10898_v5 = vadd.f32 %v10897_v37, %v18839_v3 }
 0xcf6   : > { %v10987_v61 = vadd.f32 %v10986_v31, %v10898_v5 }
 0xcf7   : > { %v11135_v49 = vpop.f32.mrf.mxu0 }
 0xcf8   : > { %v11120_v12 = vadd.f32 %v11119_v59, %v10987_v61 }
 0xcf9   : > { %v11268_v20 = vpop.f32.mrf.mxu1 }
 0xcfa   : > { %v18942_v29 = vadd.f32 %v11260_v48, %v11120_v12 }
 0xcfb   : > { %v10901_v41 = vpop.f32.mrf.mxu2  ;;  %v10994_v13 = vpop.f32.mrf.mxu3 }
 0xcfc   : > { %v10902_v7 = vadd.f32 %v10901_v41, %v18846_v33 }
 0xcfe   : > { %v10991_v35 = vadd.f32 %v10990_v4, %v10902_v7 }
 0xcff   : > { %v11549_v16 = vpop.f32.mrf.mxu0 }
 0xd00   : > { %v11128_v57 = vadd.f32 %v11127_v15, %v10991_v35 }
 0xd01   : > { %v11634_v26 = vpop.f32.mrf.mxu1 }
 0xd02   : > { %v18945_v25 = vadd.f32 %v11264_v18, %v11128_v57 }
 0xd03   : > { %v10905_v53 = vpop.f32.mrf.mxu2  ;;  %v11414_v62 = vpop.f32.mrf.mxu3 }
 0xd04   : > { %v10906_v3 = vadd.f32 %v10905_v53, %v18853_v55 }
 0xd06   : > { %v10995_v24 = vadd.f32 %v10994_v13, %v10906_v3 }
 0xd07   : > { %v11553_v19 = vpop.f32.mrf.mxu0 }
 0xd08   : > { %v11136_v46 = vadd.f32 %v11135_v49, %v10995_v24 }
 0xd09   : > { %v11638_v47 = vpop.f32.mrf.mxu1 }
 0xd0a   : > { %v18948_v38 = vadd.f32 %v11268_v20, %v11136_v46 }
 0xd0b   : > { %v11314_v27 = vpop.f32.mrf.mxu2  ;;  %v11420_v56 = vpop.f32.mrf.mxu3 }
 0xd0c   : > { %v11315_v33 = vadd.f32 %v11314_v27, %v18862_v43 }
 0xd0e   : > { %v11415_v34 = vadd.f32 %v11414_v62, %v11315_v33 }
 0xd0f   : > { %v11557_v10 = vpop.f32.mrf.mxu0 }
 0xd10   : > { %v11550_v30 = vadd.f32 %v11549_v16, %v11415_v34 }
 0xd11   : > { %v11642_v14 = vpop.f32.mrf.mxu1 }
 0xd12   : > { %v18951_v36 = vadd.f32 %v11634_v26, %v11550_v30 }
 0xd13   : > { %v11319_v50 = vpop.f32.mrf.mxu2  ;;  %v11426_v54 = vpop.f32.mrf.mxu3 }
 0xd14   : > { %v11320_v55 = vadd.f32 %v11319_v50, %v18870_v40 }
 0xd16   : > { %v11421_v22 = vadd.f32 %v11420_v56, %v11320_v55 }
 0xd17   : > { %v11561_v51 = vpop.f32.mrf.mxu0 }
 0xd18   : > { %v11554_v11 = vadd.f32 %v11553_v19, %v11421_v22 }
 0xd19   : > { %v11646_v60 = vpop.f32.mrf.mxu1 }
 0xd1a   : > { %v18954_v63 = vadd.f32 %v11638_v47, %v11554_v11 }
 0xd1b   : > { %v11324_v44 = vpop.f32.mrf.mxu2  ;;  %v11432_v45 = vpop.f32.mrf.mxu3 }
 0xd1c   : > { %v11325_v43 = vadd.f32 %v11324_v44, %v18878_v58 }
 0xd1e   : > { %v11427_v32 = vadd.f32 %v11426_v54, %v11325_v43 }
 0xd1f   : > { %v11565_v59 = vpop.f32.mrf.mxu0 }
 0xd20   : > { %v11558_v28 = vadd.f32 %v11557_v10, %v11427_v32 }
 0xd21   : > { %v11650_v48 = vpop.f32.mrf.mxu1 }
 0xd22   : > { %v18957_v23 = vadd.f32 %v11642_v14, %v11558_v28 }
 0xd23   : > { %v11329_v31 = vpop.f32.mrf.mxu2  ;;  %v11438_v21 = vpop.f32.mrf.mxu3 }
 0xd24   : > { %v11330_v40 = vadd.f32 %v11329_v31, %v18886_v39 }
 0xd26   : > { %v11433_v8 = vadd.f32 %v11432_v45, %v11330_v40 }
 0xd27   : > { %v11569_v15 = vpop.f32.mrf.mxu0 }
 0xd28   : > { %v11562_v42 = vadd.f32 %v11561_v51, %v11433_v8 }
 0xd29   : > { %v11654_v18 = vpop.f32.mrf.mxu1 }
 0xd2a   : > { %v18960_v37 = vadd.f32 %v11646_v60, %v11562_v42 }
 0xd2b   : > { %v11334_v4 = vpop.f32.mrf.mxu2  ;;  %v11444_v5 = vpop.f32.mrf.mxu3 }
 0xd2c   : > { %v11335_v58 = vadd.f32 %v11334_v4, %v18894_v0 }
 0xd2e   : > { %v11439_v61 = vadd.f32 %v11438_v21, %v11335_v58 }
 0xd2f   : > { %v11573_v12 = vpop.f32.mrf.mxu0 }
 0xd30   : > { %v11566_v49 = vadd.f32 %v11565_v59, %v11439_v61 }
 0xd31   : > { %v11658_v41 = vpop.f32.mrf.mxu1 }
 0xd32   : > { %v18963_v20 = vadd.f32 %v11650_v48, %v11566_v49 }
 0xd33   : > { %v11339_v13 = vpop.f32.mrf.mxu2  ;;  %v11450_v7 = vpop.f32.mrf.mxu3 }
 0xd34   : > { %v11340_v39 = vadd.f32 %v11339_v13, %v18902_v1 }
 0xd36   : > { %v11445_v35 = vadd.f32 %v11444_v5, %v11340_v39 }
 0xd37   : > { %v11577_v26 = vpop.f32.mrf.mxu0 }
 0xd38   : > { %v11570_v16 = vadd.f32 %v11569_v15, %v11445_v35 }
 0xd39   : > { %v11662_v0 = vpop.f32.mrf.mxu1 }
 0xd3a   : > { %v18966_v57 = vadd.f32 %v11654_v18, %v11570_v16 }
 0xd3b   : > { %v11344_v53 = vpop.f32.mrf.mxu2  ;;  %v11456_v62 = vpop.f32.mrf.mxu3 }
 0xd3c   : > { %v11345_v3 = vadd.f32 %v11344_v53, %v18910_v2 }
 0xd3e   : > { %v11451_v24 = vadd.f32 %v11450_v7, %v11345_v3 }
 0xd3f   : > { %v11581_v56 = vpop.f32.mrf.mxu0 }
 0xd40   : > { %v11574_v19 = vadd.f32 %v11573_v12, %v11451_v24 }
 0xd41   : > { %v11666_v33 = vpop.f32.mrf.mxu1 }
 0xd42   : > { %v18969_v46 = vadd.f32 %v11658_v41, %v11574_v19 }
 0xd43   : > { %v11349_v47 = vpop.f32.mrf.mxu2  ;;  %v11462_v27 = vpop.f32.mrf.mxu3 }
 0xd44   : > { %v11350_v42 = vadd.f32 %v11349_v47, %v18918_v9 }
 0xd46   : > { %v11457_v49 = vadd.f32 %v11456_v62, %v11350_v42 }
 0xd47   : > { %v11585_v10 = vpop.f32.mrf.mxu0 }
 0xd48   : > { %v11578_v9 = vadd.f32 %v11577_v26, %v11457_v49 }
 0xd49   : > { %v11670_v30 = vpop.f32.mrf.mxu1 }
 0xd4b   : > { %v11354_v34 = vpop.f32.mrf.mxu2  ;;  %v11468_v1 = vpop.f32.mrf.mxu3 }
 0xd4c   : > { %v11355_v21 = vadd.f32 %v11354_v34, %v18926_v17 }
 0xd4e   : > { %v11463_v5 = vadd.f32 %v11462_v27, %v11355_v21 }
 0xd4f   : > { %v11589_v54 = vpop.f32.mrf.mxu0 }
 0xd50   : > { %v11582_v13 = vadd.f32 %v11581_v56, %v11463_v5 }
 0xd51   : > { %v11674_v55 = vpop.f32.mrf.mxu1 }
 0xd52   : > { %v11667_v19 = vadd.f32 %v11666_v33, %v11582_v13 }
 0xd53   : > { %v11359_v14 = vpop.f32.mrf.mxu2  ;;  %v11474_v50 = vpop.f32.mrf.mxu3 }
 0xd54   : > { %v11360_v59 = vadd.f32 %v11359_v14, %v18934_v52  ;;  %v18998_v33 = vand.u32 4294901760, %v11667_v19 }
 0xd56   : > { %v11469_v18 = vadd.f32 %v11468_v1, %v11360_v59  ;;  %v19038_v59 = vand.u32 4294901760, %v18963_v20 }
 0xd57   : > { %v11593_v2 = vpop.f32.mrf.mxu0 }
 0xd58   : > { %v11586_v52 = vadd.f32 %v11585_v10, %v11469_v18 }
 0xd59   : > { %v11678_v60 = vpop.f32.mrf.mxu1 }
 0xd5a   : > { %v11671_v16 = vadd.f32 %v11670_v30, %v11586_v52 }
 0xd5b   : > { %v11364_v22 = vpop.f32.mrf.mxu2  ;;  %v11480_v51 = vpop.f32.mrf.mxu3 }
 0xd5c   : > { %v11365_v45 = vadd.f32 %v11364_v22, %v18939_v6  ;;  %v18989_v34 = vand.u32 4294901760, %v11671_v16 }
 0xd5e   : > { %v11475_v40 = vadd.f32 %v11474_v50, %v11365_v45 }
 0xd5f   : > { %v11597_v31 = vpop.f32.mrf.mxu0 }
 0xd60   : > { %v11590_v6 = vadd.f32 %v11589_v54, %v11475_v40  ;;  %v19010_v54 = vsub.f32 %v11671_v16, %v18989_v34  ;;  %v19050_v40 = vand.u32 4294901760, %v18960_v37 }
 0xd61   : > { %v11682_v15 = vpop.f32.mrf.mxu1 }
 0xd62   : > { %v11675_v17 = vadd.f32 %v11674_v55, %v11590_v6  ;;  %v19013_v55 = vand.u32 4294901760, %v18969_v46  ;;  %v19071_v6 = vsub.f32 %v18963_v20, %v19038_v59  ;;  %v19083_v52 = vsub.f32 %v18960_v37, %v19050_v40 }
 0xd63   : > { %v11369_v11 = vpop.f32.mrf.mxu2  ;;  %v11486_v43 = vpop.f32.mrf.mxu3  ;;  %v19086_v20 = vand.u32 4294901760, %v18951_v36 }
 0xd64   : > { %v11370_v44 = vadd.f32 %v11369_v11, %v18942_v29  ;;  %v18982_v62 = vand.u32 4294901760, %v11675_v17  ;;  %v19024_v11 = vsub.f32 %v11667_v19, %v18998_v33  ;;  %v19047_v21 = vsub.f32 %v18969_v46, %v19013_v55 }
 0xd65   : > { %v19062_v46 = vand.u32 4294901760, %v18957_v23 }
 0xd66   : > { %v11481_v28 = vadd.f32 %v11480_v51, %v11370_v44  ;;  %v19002_v30 = vsub.f32 %v11675_v17, %v18982_v62  ;;  %v11774_v5 = vand.u32 4294901760, %v19047_v21 }
 0xd67   : > { %v11601_v35 = vpop.f32.mrf.mxu0  ;;  %v19095_v13 = vsub.f32 %v18957_v23, %v19062_v46 }
 0xd68   : > { %v11594_v4 = vadd.f32 %v11593_v2, %v11481_v28  ;;  %v11750_v2 = vand.u32 4294901760, %v19002_v30 }
 0xd69   : > { %v11686_v24 = vpop.f32.mrf.mxu1  ;;  %v11798_v16 = vand.u32 4294901760, %v19095_v13 }
 0xd6a   : > { %v11679_v12 = vadd.f32 %v11678_v60, %v11594_v4  ;;  %v19027_v60 = vand.u32 4294901760, %v18966_v57 }
 0xd6b   : > { %v11374_v32 = vpop.f32.mrf.mxu2  ;;  %v11492_v41 = vpop.f32.mrf.mxu3 }
 0xd6c   : > { %v11375_v48 = vadd.f32 %v11374_v32, %v18945_v25  ;;  %v18980_v3 = vand.u32 4294901760, %v11679_v12  ;;  %v19059_v18 = vsub.f32 %v18966_v57, %v19027_v60  ;;  %v19074_v57 = vand.u32 4294901760, %v18954_v63 }
 0xd6e   : > { %v11487_v8 = vadd.f32 %v11486_v43, %v11375_v48  ;;  %v18992_v1 = vsub.f32 %v11679_v12, %v18980_v3  ;;  %v11756_v43 = vand.u32 4294901760, %v19010_v54  ;;  %v11751_v48 = vsub.f32 %v19002_v30, %v11750_v2 }
 0xd6f   : > { %v11780_v49 = vand.u32 4294901760, %v19059_v18 }
 0xd70   : > { %v11598_v29 = vadd.f32 %v11597_v31, %v11487_v8  ;;  %v11744_v50 = vand.u32 4294901760, %v18992_v1  ;;  %v11762_v31 = vand.u32 4294901760, %v19024_v11  ;;  %v11752_v4 = vand.u32 4294901760, %v11751_v48 }
 0xd71   : > { %v11781_v17 = vsub.f32 %v19059_v18, %v11780_v49 }
 0xd72   : > { %v11683_v58 = vadd.f32 %v11682_v15, %v11598_v29  ;;  %v11745_v45 = vsub.f32 %v18992_v1, %v11744_v50  ;;  %v11757_v15 = vsub.f32 %v19010_v54, %v11756_v43  ;;  %v11763_v29 = vsub.f32 %v19024_v11, %v11762_v31 }
 0xd73   : > { %v11379_v61 = vpop.f32.mrf.mxu2 }
 0xd74   : > { %v11380_v25 = vadd.f32 %v11379_v61, %v18948_v38  ;;  %v18978_v39 = vand.u32 4294901760, %v11683_v58  ;;  %v11663_v38 = vadd.f32 %v11662_v0, %v11578_v9  ;;  %v11746_v8 = vand.u32 4294901760, %v11745_v45 }
 0xd75   : > { %v11764_v12 = vand.u32 4294901760, %v11763_v29 }
 0xd76   : > { %v11493_v7 = vadd.f32 %v11492_v41, %v11380_v25  ;;  %v18985_v27 = vsub.f32 %v11683_v58, %v18978_v39  ;;  %v19006_v14 = vand.u32 4294901760, %v11663_v38  ;;  %v11758_v58 = vand.u32 4294901760, %v11757_v15  ;;  %v21013_v15 = vld [vmem:[#allocation278_spill] sm:$0xff] }
 0xd77   : > { %v11775_v25 = vsub.f32 %v19047_v21, %v11774_v5  ;;  %v11786_v41 = vand.u32 4294901760, %v19071_v6 }
 0xd78   : > { %v11602_v53 = vadd.f32 %v11601_v35, %v11493_v7  ;;  %v11738_v10 = vand.u32 4294901760, %v18985_v27  ;;  %v19035_v32 = vsub.f32 %v11663_v38, %v19006_v14  ;;  %v11792_v7 = vand.u32 4294901760, %v19083_v52 }
 0xd79   : > { %v19104_v35 = vsub.f32 %v18954_v63, %v19074_v57  ;;  %v11776_v9 = vand.u32 4294901760, %v11775_v25  ;;  %v11787_v23 = vsub.f32 %v19071_v6, %v11786_v41  ;;  %v11799_v38 = vsub.f32 %v19095_v13, %v11798_v16 }
 0xd7a   : > { %v11687_v47 = vadd.f32 %v11686_v24, %v11602_v53  ;;  %v11739_v51 = vsub.f32 %v18985_v27, %v11738_v10  ;;  %v11768_v42 = vand.u32 4294901760, %v19035_v32  ;;  %v19113_v53 = vsub.f32 %v18951_v36, %v19086_v20 }
 0xd7b   : > { %v11782_v24 = vand.u32 4294901760, %v11781_v17  ;;  %v11793_v63 = vsub.f32 %v19083_v52, %v11792_v7  ;;  %v11804_v19 = vand.u32 4294901760, %v19104_v35 }
 0xd7c   : > { %v18987_v56 = vand.u32 4294901760, %v11687_v47  ;;  %v11740_v28 = vand.u32 4294901760, %v11739_v51  ;;  %v11769_v61 = vsub.f32 %v19035_v32, %v11768_v42  ;;  %v11810_v36 = vand.u32 4294901760, %v19113_v53 }
 0xd7d   : > { %v11805_v51 = vsub.f32 %v19104_v35, %v11804_v19 }
 0xd7e   : > { %11692 = vmatpush.msra.mxu2 %v18987_v56  ;;  %v18996_v26 = vsub.f32 %v11687_v47, %v18987_v56  ;;  %v11770_v37 = vand.u32 4294901760, %v11769_v61  ;;  %v11788_v47 = vand.u32 4294901760, %v11787_v23  ;;  %v11811_v45 = vsub.f32 %v19113_v53, %v11810_v36 }
 0xd7f   : > { %v11806_v48 = vand.u32 4294901760, %v11805_v51 }
 0xd80   : > { %11694 = vmatpush.msra.mxu2 %v18978_v39  ;;  %v11732_v0 = vand.u32 4294901760, %v18996_v26 }
 0xd82   : > { %11696 = vmatpush.msra.mxu2 %v18980_v3  ;;  %v11733_v22 = vsub.f32 %v18996_v26, %v11732_v0 }
 0xd84   : > { %11698 = vmatpush.msra.mxu2 %v18982_v62  ;;  %v11734_v44 = vand.u32 4294901760, %v11733_v22  ;;  %v11794_v22 = vand.u32 4294901760, %v11793_v63 }
 0xd86   : > { %11700 = vmatpush.msra.mxu2 %v18989_v34  ;;  %11735 = vmatpush.msra.mxu3 %v11734_v44  ;;  %v11800_v44 = vand.u32 4294901760, %v11799_v38 }
 0xd88   : > { %11702 = vmatpush.msra.mxu2 %v18998_v33  ;;  %11741 = vmatpush.msra.mxu3 %v11740_v28  ;;  %v21012_v28 = vld [vmem:[#allocation218_spill] sm:$0xff] }
 0xd8a   : > { %11704 = vmatpush.msra.mxu2 %v19006_v14  ;;  %11747 = vmatpush.msra.mxu3 %v11746_v8  ;;  %v11812_v8 = vand.u32 4294901760, %v11811_v45 }
 0xd8c   : > { %11706 = vmatpush.msra.mxu2 %v19013_v55  ;;  %11753 = vmatpush.msra.mxu3 %v11752_v4  ;;  %v21014_v4 = vld [vmem:[#allocation283_spill] sm:$0xff] }
 0xd8e   : > { %11708 = vmatpush.msra.mxu2 %v19027_v60  ;;  %11759 = vmatpush.msra.mxu3 %v11758_v58 }
 0xd90   : > { %11710 = vmatpush.msra.mxu2 %v19038_v59  ;;  %11765 = vmatpush.msra.mxu3 %v11764_v12 }
 0xd92   : > { %11712 = vmatpush.msra.mxu2 %v19050_v40  ;;  %11771 = vmatpush.msra.mxu3 %v11770_v37 }
 0xd94   : > { %11714 = vmatpush.msra.mxu2 %v19062_v46  ;;  %11777 = vmatpush.msra.mxu3 %v11776_v9 }
 0xd96   : > { %11716 = vmatpush.msra.mxu2 %v19074_v57  ;;  %11783 = vmatpush.msra.mxu3 %v11782_v24 }
 0xd98   : > { %11718 = vmatpush.msra.mxu2 %v19086_v20  ;;  %11789 = vmatpush.msra.mxu3 %v11788_v47 }
 0xd99   : > { %11724 = vmatmul.f32.vlgmr.msra.gmra.mxu2 %v21012_v28 }
 0xd9a   : > { %11823 = vmatpush.msrb.mxu2 %v18996_v26  ;;  %11795 = vmatpush.msra.mxu3 %v11794_v22  ;;  %v21015_v26 = vld [vmem:[#allocation145_spill] sm:$0xff] }
 0xd9c   : > { %11826 = vmatpush.msrb.mxu2 %v18985_v27  ;;  %11801 = vmatpush.msra.mxu3 %v11800_v44 }
 0xd9e   : > { %11829 = vmatpush.msrb.mxu2 %v18992_v1  ;;  %11807 = vmatpush.msra.mxu3 %v11806_v48 }
 0xda0   : > { %11832 = vmatpush.msrb.mxu2 %v19002_v30  ;;  %11813 = vmatpush.msra.mxu3 %v11812_v8 }
 0xda1   : > { %11815 = vmatmul.f32.vlgmr.msra.gmra.mxu3 %v21013_v15 }
 0xda2   : > { %11835 = vmatpush.msrb.mxu2 %v19010_v54  ;;  %11872 = vmatpush.msrb.mxu3 %v18987_v56 }
 0xda4   : > { %11838 = vmatpush.msrb.mxu2 %v19024_v11  ;;  %11874 = vmatpush.msrb.mxu3 %v18978_v39 }
 0xda6   : > { %11841 = vmatpush.msrb.mxu2 %v19035_v32  ;;  %11876 = vmatpush.msrb.mxu3 %v18980_v3 }
 0xda8   : > { %11844 = vmatpush.msrb.mxu2 %v19047_v21  ;;  %11878 = vmatpush.msrb.mxu3 %v18982_v62 }
 0xdaa   : > { %11847 = vmatpush.msrb.mxu2 %v19059_v18  ;;  %11880 = vmatpush.msrb.mxu3 %v18989_v34 }
 0xdac   : > { %11850 = vmatpush.msrb.mxu2 %v19071_v6  ;;  %11882 = vmatpush.msrb.mxu3 %v18998_v33 }
 0xdae   : > { %11853 = vmatpush.msrb.mxu2 %v19083_v52  ;;  %11884 = vmatpush.msrb.mxu3 %v19006_v14 }
 0xdb0   : > { %11856 = vmatpush.msrb.mxu2 %v19095_v13  ;;  %11886 = vmatpush.msrb.mxu3 %v19013_v55 }
 0xdb2   : > { %11859 = vmatpush.msrb.mxu2 %v19104_v35  ;;  %11888 = vmatpush.msrb.mxu3 %v19027_v60 }
 0xdb4   : > { %11862 = vmatpush.msrb.mxu2 %v19113_v53  ;;  %11890 = vmatpush.msrb.mxu3 %v19038_v59 }
 0xdb5   : > { %11865 = vmatmul.f32.vlgmr.msrb.gmra.mxu2 %v21014_v4 }
 0xdb6   : > { %11911 = vmatpush.msra.mxu2 %v11732_v0  ;;  %11892 = vmatpush.msrb.mxu3 %v19050_v40 }
 0xdb8   : > { %11915 = vmatpush.msra.mxu2 %v11738_v10  ;;  %11894 = vmatpush.msrb.mxu3 %v19062_v46 }
 0xdba   : > { %11919 = vmatpush.msra.mxu2 %v11744_v50  ;;  %11896 = vmatpush.msrb.mxu3 %v19074_v57 }
 0xdbc   : > { %11923 = vmatpush.msra.mxu2 %v11750_v2  ;;  %11898 = vmatpush.msrb.mxu3 %v19086_v20 }
 0xdbd   : > { %11902 = vmatmul.f32.vlgmr.msrb.gmra.mxu3 %v21015_v26 }
 0xdbe   : > { %11927 = vmatpush.msra.mxu2 %v11756_v43  ;;  %11972 = vmatpush.msra.mxu3 %v18987_v56 }
 0xdc0   : > { %11931 = vmatpush.msra.mxu2 %v11762_v31  ;;  %11974 = vmatpush.msra.mxu3 %v18978_v39 }
 0xdc2   : > { %11935 = vmatpush.msra.mxu2 %v11768_v42  ;;  %11976 = vmatpush.msra.mxu3 %v18980_v3 }
 0xdc4   : > { %11939 = vmatpush.msra.mxu2 %v11774_v5  ;;  %11978 = vmatpush.msra.mxu3 %v18982_v62 }
 0xdc6   : > { %11943 = vmatpush.msra.mxu2 %v11780_v49  ;;  %11980 = vmatpush.msra.mxu3 %v18989_v34 }
 0xdc8   : > { %11947 = vmatpush.msra.mxu2 %v11786_v41  ;;  %11982 = vmatpush.msra.mxu3 %v18998_v33 }
 0xdca   : > { %11951 = vmatpush.msra.mxu2 %v11792_v7  ;;  %11984 = vmatpush.msra.mxu3 %v19006_v14 }
 0xdcc   : > { %11955 = vmatpush.msra.mxu2 %v11798_v16  ;;  %11986 = vmatpush.msra.mxu3 %v19013_v55 }
 0xdce   : > { %11959 = vmatpush.msra.mxu2 %v11804_v19  ;;  %11988 = vmatpush.msra.mxu3 %v19027_v60 }
 0xdd0   : > { %11963 = vmatpush.msra.mxu2 %v11810_v36  ;;  %11990 = vmatpush.msra.mxu3 %v19038_v59 }
 0xdd1   : > { %11965 = vmatmul.f32.vlgmr.msra.gmra.mxu2 %v21013_v15 }
 0xdd2   : > { %11992 = vmatpush.msra.mxu3 %v19050_v40 }
 0xdd4   : > { %11994 = vmatpush.msra.mxu3 %v19062_v46 }
 0xdd6   : > { %11996 = vmatpush.msra.mxu3 %v19074_v57 }
 0xdd8   : > { %11998 = vmatpush.msra.mxu3 %v19086_v20 }
 0xdd9   : > { %12000 = vmatmul.f32.vlgmr.msra.gmra.mxu3 %v21013_v15 }
 0xe1c   : > { %v11725_v39 = vpop.f32.mrf.mxu2 }
 0xe24   : > { %v11816_v3 = vpop.f32.mrf.mxu3 }
 0xe25   : > { %v11817_v27 = vadd.f32 %v11816_v3, %v11725_v39 }
 0xe38   : > { %v11866_v62 = vpop.f32.mrf.mxu2 }
 0xe39   : > { %v11867_v34 = vadd.f32 %v11866_v62, %v11817_v27 }
 0xe40   : > { %v11903_v56 = vpop.f32.mrf.mxu3 }
 0xe41   : > { %v11904_v33 = vadd.f32 %v11903_v56, %v11867_v34 }
 0xe54   : > { %v11966_v1 = vpop.f32.mrf.mxu2 }
 0xe55   : > { %v11967_v10 = vadd.f32 %v11966_v1, %v11904_v33 }
 0xe5c   : > { %v12001_v30 = vpop.f32.mrf.mxu3 }
 0xe5d   : > { %v12002_v0 = vadd.f32 %v12001_v30, %v11967_v10 }
 0xe5f   : > { %12296 = vst.msk [vmem:[%s15701_s15 + $0x10] sm:$0xff] %vm4246_vm3, %v12002_v0 }
 0xe60   : > { %s12304_s9 = smul.u32 224, %s12501_s25  ;;  %s12035_s10 = sshll.u32 %s13737_s19, 4  ;;  %s12036_s10 = int_to_ptr.vmem [resolvable:$true] %s12035_s10 }
 0xe61   : > { %s12435_s14 = smov 3584   ;;  %s12436_s18 = smov 7168  }
 0xe62   : > { %s12024_s13 = scalar_lea.hbm %s19270_s5, %s12304_s9  ;;  %12307 = sst [smem:[#allocation7]] (%p12518_p5), %s12435_s14 }
 0xe63   : > { %s12037_s16 = sshll.u32 %s12024_s13, 4  ;;  %12308 = sst [smem:[#allocation7 + $0x1]] (%p12518_p5), %s12436_s18  ;;  %s12038_s16 = int_to_ptr.hbm [resolvable:$true] %s12037_s16 }
 0xe64   : > { %s12437_s20 = smov 14   ;;  %s12438_s26 = smov 256  }
 0xe65   : > { %12309 = sst [smem:[#allocation7 + $0x2]] (%p12518_p5), %s12437_s20  ;;  %s12439_s19 = smov 16  }
 0xe66   : > { %12310 = sst [smem:[#allocation7 + $0x3]] (%p12518_p5), %s12438_s26  ;;  %s12440_s9 = smov [#allocation6]  }
 0xe67   : > { %12311 = sst [smem:[#allocation7 + $0x4]] (%p12518_p5), %s12438_s26  ;;  %s12441_s11 = smov 0  }
 0xe68   : > { %12312 = sst [smem:[#allocation7 + $0x5]] (%p12518_p5), %s12439_s19  ;;  %s12299_s12 = sshll.u32 %s12501_s25, 3 }
 0xe69   : > { %12313 = dma.general (%p12518_p5), %s12036_s10, 10752, %s12038_s16, %s12007_s28, %s12440_s9, [#allocation7], %s12441_s11, 0  }
 0xe6a   : > { %s12064_s13 = sshll.u32 %s15701_s15, 4  ;;  %s12063_s20 = scalar_lea.hbm %s19271_s6, %s12299_s12  ;;  %s12065_s13 = int_to_ptr.vmem [resolvable:$true] %s12064_s13 }
 0xe6b   : > { %s12066_s29 = sshll.u32 %s12063_s20, 4  ;;  %s12387_s16 = scalar_lea.hbm %s19271_s6, 48  ;;  %s12067_s29 = int_to_ptr.hbm [resolvable:$true] %s12066_s29 }
 0xe6c   : > { %s12381_s26 = sshra.s32 %s12067_s29, 4  ;;  %s12382_s26 = int_to_ptr.hbm [resolvable:$true] %s12381_s26 }
 0xe6d   : > { %s12383_s0 = scalar_lea.hbm %s12382_s26, 24  ;;  %p12388_p0 = scmp.lt.s32.totalorder %s12382_s26, %s19271_s6 }
 0xe6e   : > { %p12384_p11 = scmp.ne.s32.totalorder %s12382_s26, %s12383_s0  ;;  %p12389_p1 = scmp.lt.s32.totalorder %s12387_s16, %s12383_s0 }
 0xe70   : > { %p12385_p12 = pnand %p12384_p11, %p12518_p5  ;;  %p12390_p2 = por %p12389_p1, %p12388_p0 }
 0xe72   : > { %p12386_p13 = pneg %p12385_p12 }
 0xe74   : > { %p12391_p3 = pnand %p12390_p2, %p12386_p13 }
 0xe76   : > { %12394 = shalt.err (!%p12391_p3)
}
 0xe77   : > { %s12442_s19 = smov 128   ;;  %s12443_s9 = smov 256  }
 0xe78   : > { %s12444_s11 = smov 8   ;;  %s21016_s12 = scalar_lea.sflag [#allocation5], %s13685_s17 }
 0xe79   : > { %12314 = dma.vmem_to_hbm [thread:$0]  (%p12518_p5), %s12065_s13, 384, %s12067_s29, %s21016_s12, %s12442_s19, %s12443_s9, %s12444_s11  }
 0xe7a PF: > { %p12324_p4 = scmp.ge.s32.totalorder %s12433_s24, 2  ;;  %s12081_s14 = sand.u32 1, %s12421_s21  }
 0xe7b   : > { %s12082_s0 = scalar_lea.sflag [#allocation3], %s12081_s14 }
 0xe7c   : > { %p12318_p7 = pnand %p12324_p4, %p12522_p6 }
 0xe7e   : > { %p12319_p8 = pneg %p12318_p7 }
 0xe80   : > { %12412 = dma.done.wait (%p12319_p8), %s12082_s0, 10752  }
 0xe81   : > { %12414 = vsyncadd (%p12319_p8), %s12082_s0, 4294956544  ;;  %s12092_s18 = scalar_lea.sflag [#allocation5], %s12081_s14 }
 0xe82   : > { %12416 = dma.done.wait (%p12319_p8), %s12092_s18, 384  }
 0xe83   : > { %12418 = vsyncadd (%p12319_p8), %s12092_s18, 4294966912  ;;  %p20_p5 = scmp.ge.s32.totalorder %s12505_s27, 4   ;;  %s21017_s21 = smov %s12425_s22 }
 0xe84   : > { %s21018_s22 = smov %s12429_s23  ;;  %s21019_s23 = smov %s12516_s30 }
 0xe85   : > { %s21020_s24 = smov %s12505_s27  ;;  %22 = sbr.rel (!%p20_p5) target bundleno = 7 (0x7), region = 103 }
 0xe8a   :  { %12098 = vsyncpa [#allocation3], 1 }
 0xe8b   :  { %12100 = vsyncpa [#allocation3 + $0x1], 1 }
 0xe8c   :  { %12101 = vsyncpa [#allocation5], 1 }
 0xe8d   :  { %12103 = vsyncpa [#allocation5 + $0x1], 1 }

</bundles_post_ra>
